<compile_context>
chip_gen: v7x
topology: tpu7x:2x2x1
jax: 0.10.0
libtpu: 0.0.40
codegen_flags: <defaults>
</compile_context>

<pallas_src>
import jax
import jax.numpy as jnp
from jax.experimental import pallas as pl
from jax.experimental.pallas import tpu as pltpu


def lattice_rnn_kernel(
    # ---- inputs (all resident in VMEM for the whole invocation) ----------
    x_ref,        # (L, B, 1)    per-cell scalar inputs (chain order)
    h_ext_ref,    # (B, H)       external hidden state (left neighbor of cell 0)
    c_ext_ref,    # (B, H)       external cell state
    hc_prev_ref,  # (2L, B, H)   [chain_h_prev (L) ; chain_c_prev (L)]
    w_left_ref,   # (2L, H, H)   [w_hp rows 0:H ; w_cp rows 0:H]   (left-state part)
    w_prev_ref,   # (2L, H, H)   [w_hp rows H:2H ; w_cp rows H:2H] (prev-state part)
    b_prev_ref,   # (2L, 1, H)   [b_hp ; b_cp]
    w_ih_ref,     # (L, 1, 4H)   LSTMCell weight_ih (input_size == 1), order (i,f,g,o)
    b_gates_ref,  # (L, 1, 4H)   b_ih + b_hh (pre-summed)
    w_hh_ref,     # (L, H, 4H)   LSTMCell weight_hh
    w_out_ref,    # (H, O)       fc_out Linear weight
    b_out_ref,    # (1, O)
    bn_g_ref,     # (1, O)       BatchNorm gamma
    bn_b_ref,     # (1, O)       BatchNorm beta
    # ---- outputs ----------------------------------------------------------
    chain_h_ref,  # (L, B, H)    updated chain_states[i].h
    chain_c_ref,  # (L, B, H)    updated chain_states[i].c
    out_ref,      # (B, O)       final network output
    # ---- VMEM scratch ------------------------------------------------------
    prev_sc,      # (2L, B, H) f32  precomputed prev-state contributions
    gbias_sc,     # (L, B, 4H) f32  precomputed x*W_ih + (b_ih+b_hh)
):
    L, B, _ = x_ref.shape
    H = h_ext_ref.shape[1]

    # ------ Phase 1: chain-INDEPENDENT precompute (off the critical path) --
    # prev-state contributions: 2L independent (B,H)@(H,H) dots; the LLO
    # scheduler pipelines these MXU pushes back-to-back before the chain.
    for j in range(2 * L):
        prev_sc[j] = (
            jnp.dot(hc_prev_ref[j], w_prev_ref[j],
                    preferred_element_type=jnp.float32)
            + b_prev_ref[j]
        )
    # gate bias: x_i * W_ih + (b_ih + b_hh), pure VPU work, hoisted.
    for i in range(L):
        gbias_sc[i] = x_ref[i] * w_ih_ref[i] + b_gates_ref[i]

    # ------ Phase 2: the serial chain (true dependency on h_left/c_left) ---
    h_left = h_ext_ref[...]                      # (B, H)
    c_left = c_ext_ref[...]                      # (B, H)
    for i in range(L):  # static unroll; L is small, live state is tiny
        # hidden_processor / cell_processor: split-K form, no concats.
        ph = jnp.maximum(
            jnp.dot(h_left, w_left_ref[i],
                    preferred_element_type=jnp.float32) + prev_sc[i],
            0.0,
        )                                        # processed_h  (B, H)
        pc = jnp.maximum(
            jnp.dot(c_left, w_left_ref[L + i],
                    preferred_element_type=jnp.float32) + prev_sc[L + i],
            0.0,
        )                                        # processed_c  (B, H)

        # LSTMCell: gates = x@W_ih + b_ih + h0@W_hh + b_hh  (h0 = processed_h)
        gates = gbias_sc[i] + jnp.dot(
            ph, w_hh_ref[i], preferred_element_type=jnp.float32)       # (B, 4H)
        i_g = jax.nn.sigmoid(gates[:, 0 * H:1 * H])
        f_g = jax.nn.sigmoid(gates[:, 1 * H:2 * H])
        g_g = jnp.tanh(gates[:, 2 * H:3 * H])
        o_g = jax.nn.sigmoid(gates[:, 3 * H:4 * H])

        c_left = f_g * pc + i_g * g_g
        h_left = o_g * jnp.tanh(c_left)

        chain_h_ref[i] = h_left
        chain_c_ref[i] = c_left

    # ------ Phase 3: readout — fc_out (Linear+ReLU) -> BatchNorm1d -> sigmoid
    out_lin = jnp.maximum(
        jnp.dot(h_left, w_out_ref[...], preferred_element_type=jnp.float32)
        + b_out_ref[...],
        0.0,
    )                                            # (B, O)
    mean = jnp.mean(out_lin, axis=0, keepdims=True)
    var = jnp.mean((out_lin - mean) ** 2, axis=0, keepdims=True)
    norm = (out_lin - mean) * jax.lax.rsqrt(var + 1e-5)
    out_ref[...] = jax.nn.sigmoid(norm * bn_g_ref[...] + bn_b_ref[...])


@jax.jit
def lattice_rnn_forward(x, h_ext, c_ext, chain_h_prev, chain_c_prev, params):
    """x: [B, L, 1]; h_ext/c_ext: [B, H]; chain_*_prev: [L, B, H]."""
    B, L, _ = x.shape
    H = h_ext.shape[1]
    O = params["w_out"].shape[1]

    # --- pack once in the wrapper (tiny XLA ops) ---------------------------
    x_lb1 = jnp.transpose(x.astype(jnp.float32), (1, 0, 2))              # (L,B,1)
    hc_prev = jnp.concatenate([chain_h_prev, chain_c_prev], axis=0)      # (2L,B,H)
    w_left = jnp.concatenate(
        [params["w_hp"][:, :H, :], params["w_cp"][:, :H, :]], axis=0)    # (2L,H,H)
    w_prev = jnp.concatenate(
        [params["w_hp"][:, H:, :], params["w_cp"][:, H:, :]], axis=0)    # (2L,H,H)
    b_prev = jnp.concatenate([params["b_hp"], params["b_cp"]], axis=0)   # (2L,1,H)
    b_gates = params["b_ih"] + params["b_hh"]                            # (L,1,4H)

    vmem = pl.BlockSpec(memory_space=pltpu.MemorySpace.VMEM)

    chain_h, chain_c, out = pl.pallas_call(
        lattice_rnn_kernel,
        out_shape=(
            jax.ShapeDtypeStruct((L, B, H), jnp.float32),
            jax.ShapeDtypeStruct((L, B, H), jnp.float32),
            jax.ShapeDtypeStruct((B, O), jnp.float32),
        ),
        in_specs=[vmem] * 14,
        out_specs=(vmem, vmem, vmem),
        scratch_shapes=[
            pltpu.VMEM((2 * L, B, H), jnp.float32),      # prev contributions
            pltpu.VMEM((L, B, 4 * H), jnp.float32),      # gate bias
        ],
    )(
        x_lb1, h_ext, c_ext, hc_prev, w_left, w_prev, b_prev,
        params["w_ih"], b_gates, params["w_hh"],
        params["w_out"], params["b_out"], params["bn_g"], params["bn_b"],
    )

    final_h = chain_h[-1]
    final_c = chain_c[-1]
    return out, final_h, final_c, (chain_h, chain_c)


def init_params(key, L, H, O, input_size=1):
    """Deterministic PyTorch-style uniform(-1/sqrt(fan_in), 1/sqrt(fan_in)) init."""
    ks = jax.random.split(key, 10)

    def u(k, shape, fan_in):
        bound = 1.0 / jnp.sqrt(jnp.float32(fan_in))
        return jax.random.uniform(k, shape, jnp.float32, -bound, bound)

    return dict(
        w_hp=u(ks[0], (L, 2 * H, H), 2 * H),
        b_hp=u(ks[1], (L, 1, H), 2 * H),
        w_cp=u(ks[2], (L, 2 * H, H), 2 * H),
        b_cp=u(ks[3], (L, 1, H), 2 * H),
        w_ih=u(ks[4], (L, 1, 4 * H), input_size),
        b_ih=u(ks[5], (L, 1, 4 * H), H),
        w_hh=u(ks[6], (L, H, 4 * H), H),
        b_hh=u(ks[7], (L, 1, 4 * H), H),
        w_out=u(ks[8], (H, O), H),
        b_out=u(ks[9], (1, O), H),
        bn_g=jnp.ones((1, O), jnp.float32),
        bn_b=jnp.zeros((1, O), jnp.float32),
    )


def reference_forward(x, h_ext, c_ext, chain_h_prev, chain_c_prev, p):
    """Pure-JAX reference mirroring the PyTorch forward."""
    B, L, _ = x.shape
    H = h_ext.shape[1]
    h, c = h_ext, c_ext
    new_h, new_c = [], []
    for i in range(L):
        h_prev, c_prev = chain_h_prev[i], chain_c_prev[i]
        ph = jax.nn.relu(jnp.concatenate([h, h_prev], 1) @ p["w_hp"][i] + p["b_hp"][i])
        pc = jax.nn.relu(jnp.concatenate([c, c_prev], 1) @ p["w_cp"][i] + p["b_cp"][i])
        x_i = x[:, i, :]
        gates = x_i @ p["w_ih"][i] + p["b_ih"][i] + ph @ p["w_hh"][i] + p["b_hh"][i]
        ig = jax.nn.sigmoid(gates[:, :H])
        fg = jax.nn.sigmoid(gates[:, H:2 * H])
        gg = jnp.tanh(gates[:, 2 * H:3 * H])
        og = jax.nn.sigmoid(gates[:, 3 * H:])
        c = fg * pc + ig * gg
        h = og * jnp.tanh(c)
        new_h.append(h)
        new_c.append(c)
    out_lin = jax.nn.relu(h @ p["w_out"] + p["b_out"])
    mean = out_lin.mean(0, keepdims=True)
    var = ((out_lin - mean) ** 2).mean(0, keepdims=True)
    out = jax.nn.sigmoid((out_lin - mean) / jnp.sqrt(var + 1e-5) * p["bn_g"] + p["bn_b"])
    return out, h, c, (jnp.stack(new_h), jnp.stack(new_c))


if __name__ == "__main__":
    B, L, H, O = 8, 8, 128, 8          # batch, chain length, hidden, output
    assert B % 8 == 0, "keep the batch sublane-aligned for the in-kernel BatchNorm"
    key = jax.random.PRNGKey(0)
    k_p, k_x, k_h, k_c, k_ch, k_cc = jax.random.split(key, 6)

    params = init_params(k_p, L, H, O)
    x = jax.random.normal(k_x, (B, L, 1), jnp.float32)       # PyTorch [B, length, 1]
    h_ext = jax.random.normal(k_h, (B, H), jnp.float32)
    c_ext = jax.random.normal(k_c, (B, H), jnp.float32)
    chain_h_prev = jax.random.normal(k_ch, (L, B, H), jnp.float32)
    chain_c_prev = jax.random.normal(k_cc, (L, B, H), jnp.float32)

    out, final_h, final_c, (chain_h, chain_c) = lattice_rnn_forward(
        x, h_ext, c_ext, chain_h_prev, chain_c_prev, params)
    jax.block_until_ready((out, final_h, final_c, chain_h, chain_c))

    # sanity check against the pure-JAX reference (tight tolerance: all-f32 path)
    ro, rh, rc, (rch, rcc) = reference_forward(
        x, h_ext, c_ext, chain_h_prev, chain_c_prev, params)
    assert jnp.allclose(out, ro, atol=1e-4, rtol=1e-4), "output mismatch"
    assert jnp.allclose(final_h, rh, atol=1e-4, rtol=1e-4), "final_h mismatch"
    assert jnp.allclose(final_c, rc, atol=1e-4, rtol=1e-4), "final_c mismatch"
    assert jnp.allclose(chain_h, rch, atol=1e-4, rtol=1e-4), "chain_h mismatch"
    assert jnp.allclose(chain_c, rcc, atol=1e-4, rtol=1e-4), "chain_c mismatch"

    print("KERNEL_OK")
</pallas_src>

<mosaic_0001>
module attributes {stable_mosaic.version = 11 : i64} {
  func.func @lattice_rnn_kernel(%arg0: memref<8x8x1xf32, #tpu.memory_space<vmem>>, %arg1: memref<8x128xf32, #tpu.memory_space<vmem>>, %arg2: memref<8x128xf32, #tpu.memory_space<vmem>>, %arg3: memref<16x8x128xf32, #tpu.memory_space<vmem>>, %arg4: memref<16x128x128xf32, #tpu.memory_space<vmem>>, %arg5: memref<16x128x128xf32, #tpu.memory_space<vmem>>, %arg6: memref<16x1x128xf32, #tpu.memory_space<vmem>>, %arg7: memref<8x1x512xf32, #tpu.memory_space<vmem>>, %arg8: memref<8x1x512xf32, #tpu.memory_space<vmem>>, %arg9: memref<8x128x512xf32, #tpu.memory_space<vmem>>, %arg10: memref<128x8xf32, #tpu.memory_space<vmem>>, %arg11: memref<1x8xf32, #tpu.memory_space<vmem>>, %arg12: memref<1x8xf32, #tpu.memory_space<vmem>>, %arg13: memref<1x8xf32, #tpu.memory_space<vmem>>, %arg14: memref<8x8x128xf32, #tpu.memory_space<vmem>>, %arg15: memref<8x8x128xf32, #tpu.memory_space<vmem>>, %arg16: memref<8x8xf32, #tpu.memory_space<vmem>>, %arg17: memref<16x8x128xf32, #tpu.memory_space<vmem>>, %arg18: memref<8x8x512xf32, #tpu.memory_space<vmem>>) attributes {dimension_semantics = [], scalar_prefetch = 0 : i64, scratch_operands = 2 : i64, tpu.core_type = #tpu.core_type<tc>} {
    %c0 = arith.constant 0 : index
    %c0_0 = arith.constant 0 : index
    %c0_1 = arith.constant 0 : index
    %0 = vector.load %arg3[%c0, %c0_0, %c0_1] : memref<16x8x128xf32, #tpu.memory_space<vmem>>, vector<1x8x128xf32>
    %1 = vector.shape_cast %0 : vector<1x8x128xf32> to vector<8x128xf32>
    %c0_2 = arith.constant 0 : index
    %c0_3 = arith.constant 0 : index
    %c0_4 = arith.constant 0 : index
    %2 = vector.load %arg5[%c0_2, %c0_3, %c0_4] : memref<16x128x128xf32, #tpu.memory_space<vmem>>, vector<1x128x128xf32>
    %3 = vector.shape_cast %2 : vector<1x128x128xf32> to vector<128x128xf32>
    %cst = arith.constant dense<0.000000e+00> : vector<8x128xf32>
    %4 = tpu.matmul %1, %3, %cst {dimension_numbers = #tpu.dot_dimension_numbers<[1], [0], [0], [1], [0, 0, 1, 1], [], []>} : vector<8x128xf32>, vector<128x128xf32>, vector<8x128xf32> -> vector<8x128xf32>
    %c0_5 = arith.constant 0 : index
    %c0_6 = arith.constant 0 : index
    %c0_7 = arith.constant 0 : index
    %5 = vector.load %arg6[%c0_5, %c0_6, %c0_7] : memref<16x1x128xf32, #tpu.memory_space<vmem>>, vector<1x1x128xf32>
    %6 = vector.shape_cast %5 : vector<1x1x128xf32> to vector<1x128xf32>
    %7 = vector.broadcast %6 : vector<1x128xf32> to vector<8x128xf32>
    %8 = arith.addf %4, %7 : vector<8x128xf32>
    %c0_8 = arith.constant 0 : index
    %c0_9 = arith.constant 0 : index
    %c0_10 = arith.constant 0 : index
    %9 = vector.load %arg17[%c0_8, %c0_9, %c0_10] : memref<16x8x128xf32, #tpu.memory_space<vmem>>, vector<1x8x128xf32>
    %10 = vector.shape_cast %9 : vector<1x8x128xf32> to vector<8x128xf32>
    %11 = vector.shape_cast %8 : vector<8x128xf32> to vector<1x8x128xf32>
    tpu.vector_store %arg17[%c0_8, %c0_9, %c0_10], %11 {strides = array<i32>} : memref<16x8x128xf32, #tpu.memory_space<vmem>>, vector<1x8x128xf32>,
    %c1 = arith.constant 1 : index
    %c0_11 = arith.constant 0 : index
    %c0_12 = arith.constant 0 : index
    %12 = vector.load %arg3[%c1, %c0_11, %c0_12] : memref<16x8x128xf32, #tpu.memory_space<vmem>>, vector<1x8x128xf32>
    %13 = vector.shape_cast %12 : vector<1x8x128xf32> to vector<8x128xf32>
    %c1_13 = arith.constant 1 : index
    %c0_14 = arith.constant 0 : index
    %c0_15 = arith.constant 0 : index
    %14 = vector.load %arg5[%c1_13, %c0_14, %c0_15] : memref<16x128x128xf32, #tpu.memory_space<vmem>>, vector<1x128x128xf32>
    %15 = vector.shape_cast %14 : vector<1x128x128xf32> to vector<128x128xf32>
    %cst_16 = arith.constant dense<0.000000e+00> : vector<8x128xf32>
    %16 = tpu.matmul %13, %15, %cst_16 {dimension_numbers = #tpu.dot_dimension_numbers<[1], [0], [0], [1], [0, 0, 1, 1], [], []>} : vector<8x128xf32>, vector<128x128xf32>, vector<8x128xf32> -> vector<8x128xf32>
    %c1_17 = arith.constant 1 : index
    %c0_18 = arith.constant 0 : index
    %c0_19 = arith.constant 0 : index
    %17 = vector.load %arg6[%c1_17, %c0_18, %c0_19] : memref<16x1x128xf32, #tpu.memory_space<vmem>>, vector<1x1x128xf32>
    %18 = vector.shape_cast %17 : vector<1x1x128xf32> to vector<1x128xf32>
    %19 = vector.broadcast %18 : vector<1x128xf32> to vector<8x128xf32>
    %20 = arith.addf %16, %19 : vector<8x128xf32>
    %c1_20 = arith.constant 1 : index
    %c0_21 = arith.constant 0 : index
    %c0_22 = arith.constant 0 : index
    %21 = vector.load %arg17[%c1_20, %c0_21, %c0_22] : memref<16x8x128xf32, #tpu.memory_space<vmem>>, vector<1x8x128xf32>
    %22 = vector.shape_cast %21 : vector<1x8x128xf32> to vector<8x128xf32>
    %23 = vector.shape_cast %20 : vector<8x128xf32> to vector<1x8x128xf32>
    tpu.vector_store %arg17[%c1_20, %c0_21, %c0_22], %23 {strides = array<i32>} : memref<16x8x128xf32, #tpu.memory_space<vmem>>, vector<1x8x128xf32>,
    %c2 = arith.constant 2 : index
    %c0_23 = arith.constant 0 : index
    %c0_24 = arith.constant 0 : index
    %24 = vector.load %arg3[%c2, %c0_23, %c0_24] : memref<16x8x128xf32, #tpu.memory_space<vmem>>, vector<1x8x128xf32>
    %25 = vector.shape_cast %24 : vector<1x8x128xf32> to vector<8x128xf32>
    %c2_25 = arith.constant 2 : index
    %c0_26 = arith.constant 0 : index
    %c0_27 = arith.constant 0 : index
    %26 = vector.load %arg5[%c2_25, %c0_26, %c0_27] : memref<16x128x128xf32, #tpu.memory_space<vmem>>, vector<1x128x128xf32>
    %27 = vector.shape_cast %26 : vector<1x128x128xf32> to vector<128x128xf32>
    %cst_28 = arith.constant dense<0.000000e+00> : vector<8x128xf32>
    %28 = tpu.matmul %25, %27, %cst_28 {dimension_numbers = #tpu.dot_dimension_numbers<[1], [0], [0], [1], [0, 0, 1, 1], [], []>} : vector<8x128xf32>, vector<128x128xf32>, vector<8x128xf32> -> vector<8x128xf32>
    %c2_29 = arith.constant 2 : index
    %c0_30 = arith.constant 0 : index
    %c0_31 = arith.constant 0 : index
    %29 = vector.load %arg6[%c2_29, %c0_30, %c0_31] : memref<16x1x128xf32, #tpu.memory_space<vmem>>, vector<1x1x128xf32>
    %30 = vector.shape_cast %29 : vector<1x1x128xf32> to vector<1x128xf32>
    %31 = vector.broadcast %30 : vector<1x128xf32> to vector<8x128xf32>
    %32 = arith.addf %28, %31 : vector<8x128xf32>
    %c2_32 = arith.constant 2 : index
    %c0_33 = arith.constant 0 : index
    %c0_34 = arith.constant 0 : index
    %33 = vector.load %arg17[%c2_32, %c0_33, %c0_34] : memref<16x8x128xf32, #tpu.memory_space<vmem>>, vector<1x8x128xf32>
    %34 = vector.shape_cast %33 : vector<1x8x128xf32> to vector<8x128xf32>
    %35 = vector.shape_cast %32 : vector<8x128xf32> to vector<1x8x128xf32>
    tpu.vector_store %arg17[%c2_32, %c0_33, %c0_34], %35 {strides = array<i32>} : memref<16x8x128xf32, #tpu.memory_space<vmem>>, vector<1x8x128xf32>,
    %c3 = arith.constant 3 : index
    %c0_35 = arith.constant 0 : index
    %c0_36 = arith.constant 0 : index
    %36 = vector.load %arg3[%c3, %c0_35, %c0_36] : memref<16x8x128xf32, #tpu.memory_space<vmem>>, vector<1x8x128xf32>
    %37 = vector.shape_cast %36 : vector<1x8x128xf32> to vector<8x128xf32>
    %c3_37 = arith.constant 3 : index
    %c0_38 = arith.constant 0 : index
    %c0_39 = arith.constant 0 : index
    %38 = vector.load %arg5[%c3_37, %c0_38, %c0_39] : memref<16x128x128xf32, #tpu.memory_space<vmem>>, vector<1x128x128xf32>
    %39 = vector.shape_cast %38 : vector<1x128x128xf32> to vector<128x128xf32>
    %cst_40 = arith.constant dense<0.000000e+00> : vector<8x128xf32>
    %40 = tpu.matmul %37, %39, %cst_40 {dimension_numbers = #tpu.dot_dimension_numbers<[1], [0], [0], [1], [0, 0, 1, 1], [], []>} : vector<8x128xf32>, vector<128x128xf32>, vector<8x128xf32> -> vector<8x128xf32>
    %c3_41 = arith.constant 3 : index
    %c0_42 = arith.constant 0 : index
    %c0_43 = arith.constant 0 : index
    %41 = vector.load %arg6[%c3_41, %c0_42, %c0_43] : memref<16x1x128xf32, #tpu.memory_space<vmem>>, vector<1x1x128xf32>
    %42 = vector.shape_cast %41 : vector<1x1x128xf32> to vector<1x128xf32>
    %43 = vector.broadcast %42 : vector<1x128xf32> to vector<8x128xf32>
    %44 = arith.addf %40, %43 : vector<8x128xf32>
    %c3_44 = arith.constant 3 : index
    %c0_45 = arith.constant 0 : index
    %c0_46 = arith.constant 0 : index
    %45 = vector.load %arg17[%c3_44, %c0_45, %c0_46] : memref<16x8x128xf32, #tpu.memory_space<vmem>>, vector<1x8x128xf32>
    %46 = vector.shape_cast %45 : vector<1x8x128xf32> to vector<8x128xf32>
    %47 = vector.shape_cast %44 : vector<8x128xf32> to vector<1x8x128xf32>
    tpu.vector_store %arg17[%c3_44, %c0_45, %c0_46], %47 {strides = array<i32>} : memref<16x8x128xf32, #tpu.memory_space<vmem>>, vector<1x8x128xf32>,
    %c4 = arith.constant 4 : index
    %c0_47 = arith.constant 0 : index
    %c0_48 = arith.constant 0 : index
    %48 = vector.load %arg3[%c4, %c0_47, %c0_48] : memref<16x8x128xf32, #tpu.memory_space<vmem>>, vector<1x8x128xf32>
    %49 = vector.shape_cast %48 : vector<1x8x128xf32> to vector<8x128xf32>
    %c4_49 = arith.constant 4 : index
    %c0_50 = arith.constant 0 : index
    %c0_51 = arith.constant 0 : index
    %50 = vector.load %arg5[%c4_49, %c0_50, %c0_51] : memref<16x128x128xf32, #tpu.memory_space<vmem>>, vector<1x128x128xf32>
    %51 = vector.shape_cast %50 : vector<1x128x128xf32> to vector<128x128xf32>
    %cst_52 = arith.constant dense<0.000000e+00> : vector<8x128xf32>
    %52 = tpu.matmul %49, %51, %cst_52 {dimension_numbers = #tpu.dot_dimension_numbers<[1], [0], [0], [1], [0, 0, 1, 1], [], []>} : vector<8x128xf32>, vector<128x128xf32>, vector<8x128xf32> -> vector<8x128xf32>
    %c4_53 = arith.constant 4 : index
    %c0_54 = arith.constant 0 : index
    %c0_55 = arith.constant 0 : index
    %53 = vector.load %arg6[%c4_53, %c0_54, %c0_55] : memref<16x1x128xf32, #tpu.memory_space<vmem>>, vector<1x1x128xf32>
    %54 = vector.shape_cast %53 : vector<1x1x128xf32> to vector<1x128xf32>
    %55 = vector.broadcast %54 : vector<1x128xf32> to vector<8x128xf32>
    %56 = arith.addf %52, %55 : vector<8x128xf32>
    %c4_56 = arith.constant 4 : index
    %c0_57 = arith.constant 0 : index
    %c0_58 = arith.constant 0 : index
    %57 = vector.load %arg17[%c4_56, %c0_57, %c0_58] : memref<16x8x128xf32, #tpu.memory_space<vmem>>, vector<1x8x128xf32>
    %58 = vector.shape_cast %57 : vector<1x8x128xf32> to vector<8x128xf32>
    %59 = vector.shape_cast %56 : vector<8x128xf32> to vector<1x8x128xf32>
    tpu.vector_store %arg17[%c4_56, %c0_57, %c0_58], %59 {strides = array<i32>} : memref<16x8x128xf32, #tpu.memory_space<vmem>>, vector<1x8x128xf32>,
    %c5 = arith.constant 5 : index
    %c0_59 = arith.constant 0 : index
    %c0_60 = arith.constant 0 : index
    %60 = vector.load %arg3[%c5, %c0_59, %c0_60] : memref<16x8x128xf32, #tpu.memory_space<vmem>>, vector<1x8x128xf32>
    %61 = vector.shape_cast %60 : vector<1x8x128xf32> to vector<8x128xf32>
    %c5_61 = arith.constant 5 : index
    %c0_62 = arith.constant 0 : index
    %c0_63 = arith.constant 0 : index
    %62 = vector.load %arg5[%c5_61, %c0_62, %c0_63] : memref<16x128x128xf32, #tpu.memory_space<vmem>>, vector<1x128x128xf32>
    %63 = vector.shape_cast %62 : vector<1x128x128xf32> to vector<128x128xf32>
    %cst_64 = arith.constant dense<0.000000e+00> : vector<8x128xf32>
    %64 = tpu.matmul %61, %63, %cst_64 {dimension_numbers = #tpu.dot_dimension_numbers<[1], [0], [0], [1], [0, 0, 1, 1], [], []>} : vector<8x128xf32>, vector<128x128xf32>, vector<8x128xf32> -> vector<8x128xf32>
    %c5_65 = arith.constant 5 : index
    %c0_66 = arith.constant 0 : index
    %c0_67 = arith.constant 0 : index
    %65 = vector.load %arg6[%c5_65, %c0_66, %c0_67] : memref<16x1x128xf32, #tpu.memory_space<vmem>>, vector<1x1x128xf32>
    %66 = vector.shape_cast %65 : vector<1x1x128xf32> to vector<1x128xf32>
    %67 = vector.broadcast %66 : vector<1x128xf32> to vector<8x128xf32>
    %68 = arith.addf %64, %67 : vector<8x128xf32>
    %c5_68 = arith.constant 5 : index
    %c0_69 = arith.constant 0 : index
    %c0_70 = arith.constant 0 : index
    %69 = vector.load %arg17[%c5_68, %c0_69, %c0_70] : memref<16x8x128xf32, #tpu.memory_space<vmem>>, vector<1x8x128xf32>
    %70 = vector.shape_cast %69 : vector<1x8x128xf32> to vector<8x128xf32>
    %71 = vector.shape_cast %68 : vector<8x128xf32> to vector<1x8x128xf32>
    tpu.vector_store %arg17[%c5_68, %c0_69, %c0_70], %71 {strides = array<i32>} : memref<16x8x128xf32, #tpu.memory_space<vmem>>, vector<1x8x128xf32>,
    %c6 = arith.constant 6 : index
    %c0_71 = arith.constant 0 : index
    %c0_72 = arith.constant 0 : index
    %72 = vector.load %arg3[%c6, %c0_71, %c0_72] : memref<16x8x128xf32, #tpu.memory_space<vmem>>, vector<1x8x128xf32>
    %73 = vector.shape_cast %72 : vector<1x8x128xf32> to vector<8x128xf32>
    %c6_73 = arith.constant 6 : index
    %c0_74 = arith.constant 0 : index
    %c0_75 = arith.constant 0 : index
    %74 = vector.load %arg5[%c6_73, %c0_74, %c0_75] : memref<16x128x128xf32, #tpu.memory_space<vmem>>, vector<1x128x128xf32>
    %75 = vector.shape_cast %74 : vector<1x128x128xf32> to vector<128x128xf32>
    %cst_76 = arith.constant dense<0.000000e+00> : vector<8x128xf32>
    %76 = tpu.matmul %73, %75, %cst_76 {dimension_numbers = #tpu.dot_dimension_numbers<[1], [0], [0], [1], [0, 0, 1, 1], [], []>} : vector<8x128xf32>, vector<128x128xf32>, vector<8x128xf32> -> vector<8x128xf32>
    %c6_77 = arith.constant 6 : index
    %c0_78 = arith.constant 0 : index
    %c0_79 = arith.constant 0 : index
    %77 = vector.load %arg6[%c6_77, %c0_78, %c0_79] : memref<16x1x128xf32, #tpu.memory_space<vmem>>, vector<1x1x128xf32>
    %78 = vector.shape_cast %77 : vector<1x1x128xf32> to vector<1x128xf32>
    %79 = vector.broadcast %78 : vector<1x128xf32> to vector<8x128xf32>
    %80 = arith.addf %76, %79 : vector<8x128xf32>
    %c6_80 = arith.constant 6 : index
    %c0_81 = arith.constant 0 : index
    %c0_82 = arith.constant 0 : index
    %81 = vector.load %arg17[%c6_80, %c0_81, %c0_82] : memref<16x8x128xf32, #tpu.memory_space<vmem>>, vector<1x8x128xf32>
    %82 = vector.shape_cast %81 : vector<1x8x128xf32> to vector<8x128xf32>
    %83 = vector.shape_cast %80 : vector<8x128xf32> to vector<1x8x128xf32>
    tpu.vector_store %arg17[%c6_80, %c0_81, %c0_82], %83 {strides = array<i32>} : memref<16x8x128xf32, #tpu.memory_space<vmem>>, vector<1x8x128xf32>,
    %c7 = arith.constant 7 : index
    %c0_83 = arith.constant 0 : index
    %c0_84 = arith.constant 0 : index
    %84 = vector.load %arg3[%c7, %c0_83, %c0_84] : memref<16x8x128xf32, #tpu.memory_space<vmem>>, vector<1x8x128xf32>
    %85 = vector.shape_cast %84 : vector<1x8x128xf32> to vector<8x128xf32>
    %c7_85 = arith.constant 7 : index
    %c0_86 = arith.constant 0 : index
    %c0_87 = arith.constant 0 : index
    %86 = vector.load %arg5[%c7_85, %c0_86, %c0_87] : memref<16x128x128xf32, #tpu.memory_space<vmem>>, vector<1x128x128xf32>
    %87 = vector.shape_cast %86 : vector<1x128x128xf32> to vector<128x128xf32>
    %cst_88 = arith.constant dense<0.000000e+00> : vector<8x128xf32>
    %88 = tpu.matmul %85, %87, %cst_88 {dimension_numbers = #tpu.dot_dimension_numbers<[1], [0], [0], [1], [0, 0, 1, 1], [], []>} : vector<8x128xf32>, vector<128x128xf32>, vector<8x128xf32> -> vector<8x128xf32>
    %c7_89 = arith.constant 7 : index
    %c0_90 = arith.constant 0 : index
    %c0_91 = arith.constant 0 : index
    %89 = vector.load %arg6[%c7_89, %c0_90, %c0_91] : memref<16x1x128xf32, #tpu.memory_space<vmem>>, vector<1x1x128xf32>
    %90 = vector.shape_cast %89 : vector<1x1x128xf32> to vector<1x128xf32>
    %91 = vector.broadcast %90 : vector<1x128xf32> to vector<8x128xf32>
    %92 = arith.addf %88, %91 : vector<8x128xf32>
    %c7_92 = arith.constant 7 : index
    %c0_93 = arith.constant 0 : index
    %c0_94 = arith.constant 0 : index
    %93 = vector.load %arg17[%c7_92, %c0_93, %c0_94] : memref<16x8x128xf32, #tpu.memory_space<vmem>>, vector<1x8x128xf32>
    %94 = vector.shape_cast %93 : vector<1x8x128xf32> to vector<8x128xf32>
    %95 = vector.shape_cast %92 : vector<8x128xf32> to vector<1x8x128xf32>
    tpu.vector_store %arg17[%c7_92, %c0_93, %c0_94], %95 {strides = array<i32>} : memref<16x8x128xf32, #tpu.memory_space<vmem>>, vector<1x8x128xf32>,
    %c8 = arith.constant 8 : index
    %c0_95 = arith.constant 0 : index
    %c0_96 = arith.constant 0 : index
    %96 = vector.load %arg3[%c8, %c0_95, %c0_96] : memref<16x8x128xf32, #tpu.memory_space<vmem>>, vector<1x8x128xf32>
    %97 = vector.shape_cast %96 : vector<1x8x128xf32> to vector<8x128xf32>
    %c8_97 = arith.constant 8 : index
    %c0_98 = arith.constant 0 : index
    %c0_99 = arith.constant 0 : index
    %98 = vector.load %arg5[%c8_97, %c0_98, %c0_99] : memref<16x128x128xf32, #tpu.memory_space<vmem>>, vector<1x128x128xf32>
    %99 = vector.shape_cast %98 : vector<1x128x128xf32> to vector<128x128xf32>
    %cst_100 = arith.constant dense<0.000000e+00> : vector<8x128xf32>
    %100 = tpu.matmul %97, %99, %cst_100 {dimension_numbers = #tpu.dot_dimension_numbers<[1], [0], [0], [1], [0, 0, 1, 1], [], []>} : vector<8x128xf32>, vector<128x128xf32>, vector<8x128xf32> -> vector<8x128xf32>
    %c8_101 = arith.constant 8 : index
    %c0_102 = arith.constant 0 : index
    %c0_103 = arith.constant 0 : index
    %101 = vector.load %arg6[%c8_101, %c0_102, %c0_103] : memref<16x1x128xf32, #tpu.memory_space<vmem>>, vector<1x1x128xf32>
    %102 = vector.shape_cast %101 : vector<1x1x128xf32> to vector<1x128xf32>
    %103 = vector.broadcast %102 : vector<1x128xf32> to vector<8x128xf32>
    %104 = arith.addf %100, %103 : vector<8x128xf32>
    %c8_104 = arith.constant 8 : index
    %c0_105 = arith.constant 0 : index
    %c0_106 = arith.constant 0 : index
    %105 = vector.load %arg17[%c8_104, %c0_105, %c0_106] : memref<16x8x128xf32, #tpu.memory_space<vmem>>, vector<1x8x128xf32>
    %106 = vector.shape_cast %105 : vector<1x8x128xf32> to vector<8x128xf32>
    %107 = vector.shape_cast %104 : vector<8x128xf32> to vector<1x8x128xf32>
    tpu.vector_store %arg17[%c8_104, %c0_105, %c0_106], %107 {strides = array<i32>} : memref<16x8x128xf32, #tpu.memory_space<vmem>>, vector<1x8x128xf32>,
    %c9 = arith.constant 9 : index
    %c0_107 = arith.constant 0 : index
    %c0_108 = arith.constant 0 : index
    %108 = vector.load %arg3[%c9, %c0_107, %c0_108] : memref<16x8x128xf32, #tpu.memory_space<vmem>>, vector<1x8x128xf32>
    %109 = vector.shape_cast %108 : vector<1x8x128xf32> to vector<8x128xf32>
    %c9_109 = arith.constant 9 : index
    %c0_110 = arith.constant 0 : index
    %c0_111 = arith.constant 0 : index
    %110 = vector.load %arg5[%c9_109, %c0_110, %c0_111] : memref<16x128x128xf32, #tpu.memory_space<vmem>>, vector<1x128x128xf32>
    %111 = vector.shape_cast %110 : vector<1x128x128xf32> to vector<128x128xf32>
    %cst_112 = arith.constant dense<0.000000e+00> : vector<8x128xf32>
    %112 = tpu.matmul %109, %111, %cst_112 {dimension_numbers = #tpu.dot_dimension_numbers<[1], [0], [0], [1], [0, 0, 1, 1], [], []>} : vector<8x128xf32>, vector<128x128xf32>, vector<8x128xf32> -> vector<8x128xf32>
    %c9_113 = arith.constant 9 : index
    %c0_114 = arith.constant 0 : index
    %c0_115 = arith.constant 0 : index
    %113 = vector.load %arg6[%c9_113, %c0_114, %c0_115] : memref<16x1x128xf32, #tpu.memory_space<vmem>>, vector<1x1x128xf32>
    %114 = vector.shape_cast %113 : vector<1x1x128xf32> to vector<1x128xf32>
    %115 = vector.broadcast %114 : vector<1x128xf32> to vector<8x128xf32>
    %116 = arith.addf %112, %115 : vector<8x128xf32>
    %c9_116 = arith.constant 9 : index
    %c0_117 = arith.constant 0 : index
    %c0_118 = arith.constant 0 : index
    %117 = vector.load %arg17[%c9_116, %c0_117, %c0_118] : memref<16x8x128xf32, #tpu.memory_space<vmem>>, vector<1x8x128xf32>
    %118 = vector.shape_cast %117 : vector<1x8x128xf32> to vector<8x128xf32>
    %119 = vector.shape_cast %116 : vector<8x128xf32> to vector<1x8x128xf32>
    tpu.vector_store %arg17[%c9_116, %c0_117, %c0_118], %119 {strides = array<i32>} : memref<16x8x128xf32, #tpu.memory_space<vmem>>, vector<1x8x128xf32>,
    %c10 = arith.constant 10 : index
    %c0_119 = arith.constant 0 : index
    %c0_120 = arith.constant 0 : index
    %120 = vector.load %arg3[%c10, %c0_119, %c0_120] : memref<16x8x128xf32, #tpu.memory_space<vmem>>, vector<1x8x128xf32>
    %121 = vector.shape_cast %120 : vector<1x8x128xf32> to vector<8x128xf32>
    %c10_121 = arith.constant 10 : index
    %c0_122 = arith.constant 0 : index
    %c0_123 = arith.constant 0 : index
    %122 = vector.load %arg5[%c10_121, %c0_122, %c0_123] : memref<16x128x128xf32, #tpu.memory_space<vmem>>, vector<1x128x128xf32>
    %123 = vector.shape_cast %122 : vector<1x128x128xf32> to vector<128x128xf32>
    %cst_124 = arith.constant dense<0.000000e+00> : vector<8x128xf32>
    %124 = tpu.matmul %121, %123, %cst_124 {dimension_numbers = #tpu.dot_dimension_numbers<[1], [0], [0], [1], [0, 0, 1, 1], [], []>} : vector<8x128xf32>, vector<128x128xf32>, vector<8x128xf32> -> vector<8x128xf32>
    %c10_125 = arith.constant 10 : index
    %c0_126 = arith.constant 0 : index
    %c0_127 = arith.constant 0 : index
    %125 = vector.load %arg6[%c10_125, %c0_126, %c0_127] : memref<16x1x128xf32, #tpu.memory_space<vmem>>, vector<1x1x128xf32>
    %126 = vector.shape_cast %125 : vector<1x1x128xf32> to vector<1x128xf32>
    %127 = vector.broadcast %126 : vector<1x128xf32> to vector<8x128xf32>
    %128 = arith.addf %124, %127 : vector<8x128xf32>
    %c10_128 = arith.constant 10 : index
    %c0_129 = arith.constant 0 : index
    %c0_130 = arith.constant 0 : index
    %129 = vector.load %arg17[%c10_128, %c0_129, %c0_130] : memref<16x8x128xf32, #tpu.memory_space<vmem>>, vector<1x8x128xf32>
    %130 = vector.shape_cast %129 : vector<1x8x128xf32> to vector<8x128xf32>
    %131 = vector.shape_cast %128 : vector<8x128xf32> to vector<1x8x128xf32>
    tpu.vector_store %arg17[%c10_128, %c0_129, %c0_130], %131 {strides = array<i32>} : memref<16x8x128xf32, #tpu.memory_space<vmem>>, vector<1x8x128xf32>,
    %c11 = arith.constant 11 : index
    %c0_131 = arith.constant 0 : index
    %c0_132 = arith.constant 0 : index
    %132 = vector.load %arg3[%c11, %c0_131, %c0_132] : memref<16x8x128xf32, #tpu.memory_space<vmem>>, vector<1x8x128xf32>
    %133 = vector.shape_cast %132 : vector<1x8x128xf32> to vector<8x128xf32>
    %c11_133 = arith.constant 11 : index
    %c0_134 = arith.constant 0 : index
    %c0_135 = arith.constant 0 : index
    %134 = vector.load %arg5[%c11_133, %c0_134, %c0_135] : memref<16x128x128xf32, #tpu.memory_space<vmem>>, vector<1x128x128xf32>
    %135 = vector.shape_cast %134 : vector<1x128x128xf32> to vector<128x128xf32>
    %cst_136 = arith.constant dense<0.000000e+00> : vector<8x128xf32>
    %136 = tpu.matmul %133, %135, %cst_136 {dimension_numbers = #tpu.dot_dimension_numbers<[1], [0], [0], [1], [0, 0, 1, 1], [], []>} : vector<8x128xf32>, vector<128x128xf32>, vector<8x128xf32> -> vector<8x128xf32>
    %c11_137 = arith.constant 11 : index
    %c0_138 = arith.constant 0 : index
    %c0_139 = arith.constant 0 : index
    %137 = vector.load %arg6[%c11_137, %c0_138, %c0_139] : memref<16x1x128xf32, #tpu.memory_space<vmem>>, vector<1x1x128xf32>
    %138 = vector.shape_cast %137 : vector<1x1x128xf32> to vector<1x128xf32>
    %139 = vector.broadcast %138 : vector<1x128xf32> to vector<8x128xf32>
    %140 = arith.addf %136, %139 : vector<8x128xf32>
    %c11_140 = arith.constant 11 : index
    %c0_141 = arith.constant 0 : index
    %c0_142 = arith.constant 0 : index
    %141 = vector.load %arg17[%c11_140, %c0_141, %c0_142] : memref<16x8x128xf32, #tpu.memory_space<vmem>>, vector<1x8x128xf32>
    %142 = vector.shape_cast %141 : vector<1x8x128xf32> to vector<8x128xf32>
    %143 = vector.shape_cast %140 : vector<8x128xf32> to vector<1x8x128xf32>
    tpu.vector_store %arg17[%c11_140, %c0_141, %c0_142], %143 {strides = array<i32>} : memref<16x8x128xf32, #tpu.memory_space<vmem>>, vector<1x8x128xf32>,
    %c12 = arith.constant 12 : index
    %c0_143 = arith.constant 0 : index
    %c0_144 = arith.constant 0 : index
    %144 = vector.load %arg3[%c12, %c0_143, %c0_144] : memref<16x8x128xf32, #tpu.memory_space<vmem>>, vector<1x8x128xf32>
    %145 = vector.shape_cast %144 : vector<1x8x128xf32> to vector<8x128xf32>
    %c12_145 = arith.constant 12 : index
    %c0_146 = arith.constant 0 : index
    %c0_147 = arith.constant 0 : index
    %146 = vector.load %arg5[%c12_145, %c0_146, %c0_147] : memref<16x128x128xf32, #tpu.memory_space<vmem>>, vector<1x128x128xf32>
    %147 = vector.shape_cast %146 : vector<1x128x128xf32> to vector<128x128xf32>
    %cst_148 = arith.constant dense<0.000000e+00> : vector<8x128xf32>
    %148 = tpu.matmul %145, %147, %cst_148 {dimension_numbers = #tpu.dot_dimension_numbers<[1], [0], [0], [1], [0, 0, 1, 1], [], []>} : vector<8x128xf32>, vector<128x128xf32>, vector<8x128xf32> -> vector<8x128xf32>
    %c12_149 = arith.constant 12 : index
    %c0_150 = arith.constant 0 : index
    %c0_151 = arith.constant 0 : index
    %149 = vector.load %arg6[%c12_149, %c0_150, %c0_151] : memref<16x1x128xf32, #tpu.memory_space<vmem>>, vector<1x1x128xf32>
    %150 = vector.shape_cast %149 : vector<1x1x128xf32> to vector<1x128xf32>
    %151 = vector.broadcast %150 : vector<1x128xf32> to vector<8x128xf32>
    %152 = arith.addf %148, %151 : vector<8x128xf32>
    %c12_152 = arith.constant 12 : index
    %c0_153 = arith.constant 0 : index
    %c0_154 = arith.constant 0 : index
    %153 = vector.load %arg17[%c12_152, %c0_153, %c0_154] : memref<16x8x128xf32, #tpu.memory_space<vmem>>, vector<1x8x128xf32>
    %154 = vector.shape_cast %153 : vector<1x8x128xf32> to vector<8x128xf32>
    %155 = vector.shape_cast %152 : vector<8x128xf32> to vector<1x8x128xf32>
    tpu.vector_store %arg17[%c12_152, %c0_153, %c0_154], %155 {strides = array<i32>} : memref<16x8x128xf32, #tpu.memory_space<vmem>>, vector<1x8x128xf32>,
    %c13 = arith.constant 13 : index
    %c0_155 = arith.constant 0 : index
    %c0_156 = arith.constant 0 : index
    %156 = vector.load %arg3[%c13, %c0_155, %c0_156] : memref<16x8x128xf32, #tpu.memory_space<vmem>>, vector<1x8x128xf32>
    %157 = vector.shape_cast %156 : vector<1x8x128xf32> to vector<8x128xf32>
    %c13_157 = arith.constant 13 : index
    %c0_158 = arith.constant 0 : index
    %c0_159 = arith.constant 0 : index
    %158 = vector.load %arg5[%c13_157, %c0_158, %c0_159] : memref<16x128x128xf32, #tpu.memory_space<vmem>>, vector<1x128x128xf32>
    %159 = vector.shape_cast %158 : vector<1x128x128xf32> to vector<128x128xf32>
    %cst_160 = arith.constant dense<0.000000e+00> : vector<8x128xf32>
    %160 = tpu.matmul %157, %159, %cst_160 {dimension_numbers = #tpu.dot_dimension_numbers<[1], [0], [0], [1], [0, 0, 1, 1], [], []>} : vector<8x128xf32>, vector<128x128xf32>, vector<8x128xf32> -> vector<8x128xf32>
    %c13_161 = arith.constant 13 : index
    %c0_162 = arith.constant 0 : index
    %c0_163 = arith.constant 0 : index
    %161 = vector.load %arg6[%c13_161, %c0_162, %c0_163] : memref<16x1x128xf32, #tpu.memory_space<vmem>>, vector<1x1x128xf32>
    %162 = vector.shape_cast %161 : vector<1x1x128xf32> to vector<1x128xf32>
    %163 = vector.broadcast %162 : vector<1x128xf32> to vector<8x128xf32>
    %164 = arith.addf %160, %163 : vector<8x128xf32>
    %c13_164 = arith.constant 13 : index
    %c0_165 = arith.constant 0 : index
    %c0_166 = arith.constant 0 : index
    %165 = vector.load %arg17[%c13_164, %c0_165, %c0_166] : memref<16x8x128xf32, #tpu.memory_space<vmem>>, vector<1x8x128xf32>
    %166 = vector.shape_cast %165 : vector<1x8x128xf32> to vector<8x128xf32>
    %167 = vector.shape_cast %164 : vector<8x128xf32> to vector<1x8x128xf32>
    tpu.vector_store %arg17[%c13_164, %c0_165, %c0_166], %167 {strides = array<i32>} : memref<16x8x128xf32, #tpu.memory_space<vmem>>, vector<1x8x128xf32>,
    %c14 = arith.constant 14 : index
    %c0_167 = arith.constant 0 : index
    %c0_168 = arith.constant 0 : index
    %168 = vector.load %arg3[%c14, %c0_167, %c0_168] : memref<16x8x128xf32, #tpu.memory_space<vmem>>, vector<1x8x128xf32>
    %169 = vector.shape_cast %168 : vector<1x8x128xf32> to vector<8x128xf32>
    %c14_169 = arith.constant 14 : index
    %c0_170 = arith.constant 0 : index
    %c0_171 = arith.constant 0 : index
    %170 = vector.load %arg5[%c14_169, %c0_170, %c0_171] : memref<16x128x128xf32, #tpu.memory_space<vmem>>, vector<1x128x128xf32>
    %171 = vector.shape_cast %170 : vector<1x128x128xf32> to vector<128x128xf32>
    %cst_172 = arith.constant dense<0.000000e+00> : vector<8x128xf32>
    %172 = tpu.matmul %169, %171, %cst_172 {dimension_numbers = #tpu.dot_dimension_numbers<[1], [0], [0], [1], [0, 0, 1, 1], [], []>} : vector<8x128xf32>, vector<128x128xf32>, vector<8x128xf32> -> vector<8x128xf32>
    %c14_173 = arith.constant 14 : index
    %c0_174 = arith.constant 0 : index
    %c0_175 = arith.constant 0 : index
    %173 = vector.load %arg6[%c14_173, %c0_174, %c0_175] : memref<16x1x128xf32, #tpu.memory_space<vmem>>, vector<1x1x128xf32>
    %174 = vector.shape_cast %173 : vector<1x1x128xf32> to vector<1x128xf32>
    %175 = vector.broadcast %174 : vector<1x128xf32> to vector<8x128xf32>
    %176 = arith.addf %172, %175 : vector<8x128xf32>
    %c14_176 = arith.constant 14 : index
    %c0_177 = arith.constant 0 : index
    %c0_178 = arith.constant 0 : index
    %177 = vector.load %arg17[%c14_176, %c0_177, %c0_178] : memref<16x8x128xf32, #tpu.memory_space<vmem>>, vector<1x8x128xf32>
    %178 = vector.shape_cast %177 : vector<1x8x128xf32> to vector<8x128xf32>
    %179 = vector.shape_cast %176 : vector<8x128xf32> to vector<1x8x128xf32>
    tpu.vector_store %arg17[%c14_176, %c0_177, %c0_178], %179 {strides = array<i32>} : memref<16x8x128xf32, #tpu.memory_space<vmem>>, vector<1x8x128xf32>,
    %c15 = arith.constant 15 : index
    %c0_179 = arith.constant 0 : index
    %c0_180 = arith.constant 0 : index
    %180 = vector.load %arg3[%c15, %c0_179, %c0_180] : memref<16x8x128xf32, #tpu.memory_space<vmem>>, vector<1x8x128xf32>
    %181 = vector.shape_cast %180 : vector<1x8x128xf32> to vector<8x128xf32>
    %c15_181 = arith.constant 15 : index
    %c0_182 = arith.constant 0 : index
    %c0_183 = arith.constant 0 : index
    %182 = vector.load %arg5[%c15_181, %c0_182, %c0_183] : memref<16x128x128xf32, #tpu.memory_space<vmem>>, vector<1x128x128xf32>
    %183 = vector.shape_cast %182 : vector<1x128x128xf32> to vector<128x128xf32>
    %cst_184 = arith.constant dense<0.000000e+00> : vector<8x128xf32>
    %184 = tpu.matmul %181, %183, %cst_184 {dimension_numbers = #tpu.dot_dimension_numbers<[1], [0], [0], [1], [0, 0, 1, 1], [], []>} : vector<8x128xf32>, vector<128x128xf32>, vector<8x128xf32> -> vector<8x128xf32>
    %c15_185 = arith.constant 15 : index
    %c0_186 = arith.constant 0 : index
    %c0_187 = arith.constant 0 : index
    %185 = vector.load %arg6[%c15_185, %c0_186, %c0_187] : memref<16x1x128xf32, #tpu.memory_space<vmem>>, vector<1x1x128xf32>
    %186 = vector.shape_cast %185 : vector<1x1x128xf32> to vector<1x128xf32>
    %187 = vector.broadcast %186 : vector<1x128xf32> to vector<8x128xf32>
    %188 = arith.addf %184, %187 : vector<8x128xf32>
    %c15_188 = arith.constant 15 : index
    %c0_189 = arith.constant 0 : index
    %c0_190 = arith.constant 0 : index
    %189 = vector.load %arg17[%c15_188, %c0_189, %c0_190] : memref<16x8x128xf32, #tpu.memory_space<vmem>>, vector<1x8x128xf32>
    %190 = vector.shape_cast %189 : vector<1x8x128xf32> to vector<8x128xf32>
    %191 = vector.shape_cast %188 : vector<8x128xf32> to vector<1x8x128xf32>
    tpu.vector_store %arg17[%c15_188, %c0_189, %c0_190], %191 {strides = array<i32>} : memref<16x8x128xf32, #tpu.memory_space<vmem>>, vector<1x8x128xf32>,
    %c0_191 = arith.constant 0 : index
    %c0_192 = arith.constant 0 : index
    %c0_193 = arith.constant 0 : index
    %192 = vector.load %arg0[%c0_191, %c0_192, %c0_193] : memref<8x8x1xf32, #tpu.memory_space<vmem>>, vector<1x8x1xf32>
    %193 = vector.shape_cast %192 : vector<1x8x1xf32> to vector<8x1xf32>
    %c0_194 = arith.constant 0 : index
    %c0_195 = arith.constant 0 : index
    %c0_196 = arith.constant 0 : index
    %194 = vector.load %arg7[%c0_194, %c0_195, %c0_196] : memref<8x1x512xf32, #tpu.memory_space<vmem>>, vector<1x1x512xf32>
    %195 = vector.shape_cast %194 : vector<1x1x512xf32> to vector<1x512xf32>
    %196 = vector.broadcast %193 : vector<8x1xf32> to vector<8x512xf32>
    %197 = vector.broadcast %195 : vector<1x512xf32> to vector<8x512xf32>
    %198 = arith.mulf %196, %197 : vector<8x512xf32>
    %c0_197 = arith.constant 0 : index
    %c0_198 = arith.constant 0 : index
    %c0_199 = arith.constant 0 : index
    %199 = vector.load %arg8[%c0_197, %c0_198, %c0_199] : memref<8x1x512xf32, #tpu.memory_space<vmem>>, vector<1x1x512xf32>
    %200 = vector.shape_cast %199 : vector<1x1x512xf32> to vector<1x512xf32>
    %201 = vector.broadcast %200 : vector<1x512xf32> to vector<8x512xf32>
    %202 = arith.addf %198, %201 : vector<8x512xf32>
    %c0_200 = arith.constant 0 : index
    %c0_201 = arith.constant 0 : index
    %c0_202 = arith.constant 0 : index
    %203 = vector.load %arg18[%c0_200, %c0_201, %c0_202] : memref<8x8x512xf32, #tpu.memory_space<vmem>>, vector<1x8x512xf32>
    %204 = vector.shape_cast %203 : vector<1x8x512xf32> to vector<8x512xf32>
    %205 = vector.shape_cast %202 : vector<8x512xf32> to vector<1x8x512xf32>
    tpu.vector_store %arg18[%c0_200, %c0_201, %c0_202], %205 {strides = array<i32>} : memref<8x8x512xf32, #tpu.memory_space<vmem>>, vector<1x8x512xf32>,
    %c1_203 = arith.constant 1 : index
    %c0_204 = arith.constant 0 : index
    %c0_205 = arith.constant 0 : index
    %206 = vector.load %arg0[%c1_203, %c0_204, %c0_205] : memref<8x8x1xf32, #tpu.memory_space<vmem>>, vector<1x8x1xf32>
    %207 = vector.shape_cast %206 : vector<1x8x1xf32> to vector<8x1xf32>
    %c1_206 = arith.constant 1 : index
    %c0_207 = arith.constant 0 : index
    %c0_208 = arith.constant 0 : index
    %208 = vector.load %arg7[%c1_206, %c0_207, %c0_208] : memref<8x1x512xf32, #tpu.memory_space<vmem>>, vector<1x1x512xf32>
    %209 = vector.shape_cast %208 : vector<1x1x512xf32> to vector<1x512xf32>
    %210 = vector.broadcast %207 : vector<8x1xf32> to vector<8x512xf32>
    %211 = vector.broadcast %209 : vector<1x512xf32> to vector<8x512xf32>
    %212 = arith.mulf %210, %211 : vector<8x512xf32>
    %c1_209 = arith.constant 1 : index
    %c0_210 = arith.constant 0 : index
    %c0_211 = arith.constant 0 : index
    %213 = vector.load %arg8[%c1_209, %c0_210, %c0_211] : memref<8x1x512xf32, #tpu.memory_space<vmem>>, vector<1x1x512xf32>
    %214 = vector.shape_cast %213 : vector<1x1x512xf32> to vector<1x512xf32>
    %215 = vector.broadcast %214 : vector<1x512xf32> to vector<8x512xf32>
    %216 = arith.addf %212, %215 : vector<8x512xf32>
    %c1_212 = arith.constant 1 : index
    %c0_213 = arith.constant 0 : index
    %c0_214 = arith.constant 0 : index
    %217 = vector.load %arg18[%c1_212, %c0_213, %c0_214] : memref<8x8x512xf32, #tpu.memory_space<vmem>>, vector<1x8x512xf32>
    %218 = vector.shape_cast %217 : vector<1x8x512xf32> to vector<8x512xf32>
    %219 = vector.shape_cast %216 : vector<8x512xf32> to vector<1x8x512xf32>
    tpu.vector_store %arg18[%c1_212, %c0_213, %c0_214], %219 {strides = array<i32>} : memref<8x8x512xf32, #tpu.memory_space<vmem>>, vector<1x8x512xf32>,
    %c2_215 = arith.constant 2 : index
    %c0_216 = arith.constant 0 : index
    %c0_217 = arith.constant 0 : index
    %220 = vector.load %arg0[%c2_215, %c0_216, %c0_217] : memref<8x8x1xf32, #tpu.memory_space<vmem>>, vector<1x8x1xf32>
    %221 = vector.shape_cast %220 : vector<1x8x1xf32> to vector<8x1xf32>
    %c2_218 = arith.constant 2 : index
    %c0_219 = arith.constant 0 : index
    %c0_220 = arith.constant 0 : index
    %222 = vector.load %arg7[%c2_218, %c0_219, %c0_220] : memref<8x1x512xf32, #tpu.memory_space<vmem>>, vector<1x1x512xf32>
    %223 = vector.shape_cast %222 : vector<1x1x512xf32> to vector<1x512xf32>
    %224 = vector.broadcast %221 : vector<8x1xf32> to vector<8x512xf32>
    %225 = vector.broadcast %223 : vector<1x512xf32> to vector<8x512xf32>
    %226 = arith.mulf %224, %225 : vector<8x512xf32>
    %c2_221 = arith.constant 2 : index
    %c0_222 = arith.constant 0 : index
    %c0_223 = arith.constant 0 : index
    %227 = vector.load %arg8[%c2_221, %c0_222, %c0_223] : memref<8x1x512xf32, #tpu.memory_space<vmem>>, vector<1x1x512xf32>
    %228 = vector.shape_cast %227 : vector<1x1x512xf32> to vector<1x512xf32>
    %229 = vector.broadcast %228 : vector<1x512xf32> to vector<8x512xf32>
    %230 = arith.addf %226, %229 : vector<8x512xf32>
    %c2_224 = arith.constant 2 : index
    %c0_225 = arith.constant 0 : index
    %c0_226 = arith.constant 0 : index
    %231 = vector.load %arg18[%c2_224, %c0_225, %c0_226] : memref<8x8x512xf32, #tpu.memory_space<vmem>>, vector<1x8x512xf32>
    %232 = vector.shape_cast %231 : vector<1x8x512xf32> to vector<8x512xf32>
    %233 = vector.shape_cast %230 : vector<8x512xf32> to vector<1x8x512xf32>
    tpu.vector_store %arg18[%c2_224, %c0_225, %c0_226], %233 {strides = array<i32>} : memref<8x8x512xf32, #tpu.memory_space<vmem>>, vector<1x8x512xf32>,
    %c3_227 = arith.constant 3 : index
    %c0_228 = arith.constant 0 : index
    %c0_229 = arith.constant 0 : index
    %234 = vector.load %arg0[%c3_227, %c0_228, %c0_229] : memref<8x8x1xf32, #tpu.memory_space<vmem>>, vector<1x8x1xf32>
    %235 = vector.shape_cast %234 : vector<1x8x1xf32> to vector<8x1xf32>
    %c3_230 = arith.constant 3 : index
    %c0_231 = arith.constant 0 : index
    %c0_232 = arith.constant 0 : index
    %236 = vector.load %arg7[%c3_230, %c0_231, %c0_232] : memref<8x1x512xf32, #tpu.memory_space<vmem>>, vector<1x1x512xf32>
    %237 = vector.shape_cast %236 : vector<1x1x512xf32> to vector<1x512xf32>
    %238 = vector.broadcast %235 : vector<8x1xf32> to vector<8x512xf32>
    %239 = vector.broadcast %237 : vector<1x512xf32> to vector<8x512xf32>
    %240 = arith.mulf %238, %239 : vector<8x512xf32>
    %c3_233 = arith.constant 3 : index
    %c0_234 = arith.constant 0 : index
    %c0_235 = arith.constant 0 : index
    %241 = vector.load %arg8[%c3_233, %c0_234, %c0_235] : memref<8x1x512xf32, #tpu.memory_space<vmem>>, vector<1x1x512xf32>
    %242 = vector.shape_cast %241 : vector<1x1x512xf32> to vector<1x512xf32>
    %243 = vector.broadcast %242 : vector<1x512xf32> to vector<8x512xf32>
    %244 = arith.addf %240, %243 : vector<8x512xf32>
    %c3_236 = arith.constant 3 : index
    %c0_237 = arith.constant 0 : index
    %c0_238 = arith.constant 0 : index
    %245 = vector.load %arg18[%c3_236, %c0_237, %c0_238] : memref<8x8x512xf32, #tpu.memory_space<vmem>>, vector<1x8x512xf32>
    %246 = vector.shape_cast %245 : vector<1x8x512xf32> to vector<8x512xf32>
    %247 = vector.shape_cast %244 : vector<8x512xf32> to vector<1x8x512xf32>
    tpu.vector_store %arg18[%c3_236, %c0_237, %c0_238], %247 {strides = array<i32>} : memref<8x8x512xf32, #tpu.memory_space<vmem>>, vector<1x8x512xf32>,
    %c4_239 = arith.constant 4 : index
    %c0_240 = arith.constant 0 : index
    %c0_241 = arith.constant 0 : index
    %248 = vector.load %arg0[%c4_239, %c0_240, %c0_241] : memref<8x8x1xf32, #tpu.memory_space<vmem>>, vector<1x8x1xf32>
    %249 = vector.shape_cast %248 : vector<1x8x1xf32> to vector<8x1xf32>
    %c4_242 = arith.constant 4 : index
    %c0_243 = arith.constant 0 : index
    %c0_244 = arith.constant 0 : index
    %250 = vector.load %arg7[%c4_242, %c0_243, %c0_244] : memref<8x1x512xf32, #tpu.memory_space<vmem>>, vector<1x1x512xf32>
    %251 = vector.shape_cast %250 : vector<1x1x512xf32> to vector<1x512xf32>
    %252 = vector.broadcast %249 : vector<8x1xf32> to vector<8x512xf32>
    %253 = vector.broadcast %251 : vector<1x512xf32> to vector<8x512xf32>
    %254 = arith.mulf %252, %253 : vector<8x512xf32>
    %c4_245 = arith.constant 4 : index
    %c0_246 = arith.constant 0 : index
    %c0_247 = arith.constant 0 : index
    %255 = vector.load %arg8[%c4_245, %c0_246, %c0_247] : memref<8x1x512xf32, #tpu.memory_space<vmem>>, vector<1x1x512xf32>
    %256 = vector.shape_cast %255 : vector<1x1x512xf32> to vector<1x512xf32>
    %257 = vector.broadcast %256 : vector<1x512xf32> to vector<8x512xf32>
    %258 = arith.addf %254, %257 : vector<8x512xf32>
    %c4_248 = arith.constant 4 : index
    %c0_249 = arith.constant 0 : index
    %c0_250 = arith.constant 0 : index
    %259 = vector.load %arg18[%c4_248, %c0_249, %c0_250] : memref<8x8x512xf32, #tpu.memory_space<vmem>>, vector<1x8x512xf32>
    %260 = vector.shape_cast %259 : vector<1x8x512xf32> to vector<8x512xf32>
    %261 = vector.shape_cast %258 : vector<8x512xf32> to vector<1x8x512xf32>
    tpu.vector_store %arg18[%c4_248, %c0_249, %c0_250], %261 {strides = array<i32>} : memref<8x8x512xf32, #tpu.memory_space<vmem>>, vector<1x8x512xf32>,
    %c5_251 = arith.constant 5 : index
    %c0_252 = arith.constant 0 : index
    %c0_253 = arith.constant 0 : index
    %262 = vector.load %arg0[%c5_251, %c0_252, %c0_253] : memref<8x8x1xf32, #tpu.memory_space<vmem>>, vector<1x8x1xf32>
    %263 = vector.shape_cast %262 : vector<1x8x1xf32> to vector<8x1xf32>
    %c5_254 = arith.constant 5 : index
    %c0_255 = arith.constant 0 : index
    %c0_256 = arith.constant 0 : index
    %264 = vector.load %arg7[%c5_254, %c0_255, %c0_256] : memref<8x1x512xf32, #tpu.memory_space<vmem>>, vector<1x1x512xf32>
    %265 = vector.shape_cast %264 : vector<1x1x512xf32> to vector<1x512xf32>
    %266 = vector.broadcast %263 : vector<8x1xf32> to vector<8x512xf32>
    %267 = vector.broadcast %265 : vector<1x512xf32> to vector<8x512xf32>
    %268 = arith.mulf %266, %267 : vector<8x512xf32>
    %c5_257 = arith.constant 5 : index
    %c0_258 = arith.constant 0 : index
    %c0_259 = arith.constant 0 : index
    %269 = vector.load %arg8[%c5_257, %c0_258, %c0_259] : memref<8x1x512xf32, #tpu.memory_space<vmem>>, vector<1x1x512xf32>
    %270 = vector.shape_cast %269 : vector<1x1x512xf32> to vector<1x512xf32>
    %271 = vector.broadcast %270 : vector<1x512xf32> to vector<8x512xf32>
    %272 = arith.addf %268, %271 : vector<8x512xf32>
    %c5_260 = arith.constant 5 : index
    %c0_261 = arith.constant 0 : index
    %c0_262 = arith.constant 0 : index
    %273 = vector.load %arg18[%c5_260, %c0_261, %c0_262] : memref<8x8x512xf32, #tpu.memory_space<vmem>>, vector<1x8x512xf32>
    %274 = vector.shape_cast %273 : vector<1x8x512xf32> to vector<8x512xf32>
    %275 = vector.shape_cast %272 : vector<8x512xf32> to vector<1x8x512xf32>
    tpu.vector_store %arg18[%c5_260, %c0_261, %c0_262], %275 {strides = array<i32>} : memref<8x8x512xf32, #tpu.memory_space<vmem>>, vector<1x8x512xf32>,
    %c6_263 = arith.constant 6 : index
    %c0_264 = arith.constant 0 : index
    %c0_265 = arith.constant 0 : index
    %276 = vector.load %arg0[%c6_263, %c0_264, %c0_265] : memref<8x8x1xf32, #tpu.memory_space<vmem>>, vector<1x8x1xf32>
    %277 = vector.shape_cast %276 : vector<1x8x1xf32> to vector<8x1xf32>
    %c6_266 = arith.constant 6 : index
    %c0_267 = arith.constant 0 : index
    %c0_268 = arith.constant 0 : index
    %278 = vector.load %arg7[%c6_266, %c0_267, %c0_268] : memref<8x1x512xf32, #tpu.memory_space<vmem>>, vector<1x1x512xf32>
    %279 = vector.shape_cast %278 : vector<1x1x512xf32> to vector<1x512xf32>
    %280 = vector.broadcast %277 : vector<8x1xf32> to vector<8x512xf32>
    %281 = vector.broadcast %279 : vector<1x512xf32> to vector<8x512xf32>
    %282 = arith.mulf %280, %281 : vector<8x512xf32>
    %c6_269 = arith.constant 6 : index
    %c0_270 = arith.constant 0 : index
    %c0_271 = arith.constant 0 : index
    %283 = vector.load %arg8[%c6_269, %c0_270, %c0_271] : memref<8x1x512xf32, #tpu.memory_space<vmem>>, vector<1x1x512xf32>
    %284 = vector.shape_cast %283 : vector<1x1x512xf32> to vector<1x512xf32>
    %285 = vector.broadcast %284 : vector<1x512xf32> to vector<8x512xf32>
    %286 = arith.addf %282, %285 : vector<8x512xf32>
    %c6_272 = arith.constant 6 : index
    %c0_273 = arith.constant 0 : index
    %c0_274 = arith.constant 0 : index
    %287 = vector.load %arg18[%c6_272, %c0_273, %c0_274] : memref<8x8x512xf32, #tpu.memory_space<vmem>>, vector<1x8x512xf32>
    %288 = vector.shape_cast %287 : vector<1x8x512xf32> to vector<8x512xf32>
    %289 = vector.shape_cast %286 : vector<8x512xf32> to vector<1x8x512xf32>
    tpu.vector_store %arg18[%c6_272, %c0_273, %c0_274], %289 {strides = array<i32>} : memref<8x8x512xf32, #tpu.memory_space<vmem>>, vector<1x8x512xf32>,
    %c7_275 = arith.constant 7 : index
    %c0_276 = arith.constant 0 : index
    %c0_277 = arith.constant 0 : index
    %290 = vector.load %arg0[%c7_275, %c0_276, %c0_277] : memref<8x8x1xf32, #tpu.memory_space<vmem>>, vector<1x8x1xf32>
    %291 = vector.shape_cast %290 : vector<1x8x1xf32> to vector<8x1xf32>
    %c7_278 = arith.constant 7 : index
    %c0_279 = arith.constant 0 : index
    %c0_280 = arith.constant 0 : index
    %292 = vector.load %arg7[%c7_278, %c0_279, %c0_280] : memref<8x1x512xf32, #tpu.memory_space<vmem>>, vector<1x1x512xf32>
    %293 = vector.shape_cast %292 : vector<1x1x512xf32> to vector<1x512xf32>
    %294 = vector.broadcast %291 : vector<8x1xf32> to vector<8x512xf32>
    %295 = vector.broadcast %293 : vector<1x512xf32> to vector<8x512xf32>
    %296 = arith.mulf %294, %295 : vector<8x512xf32>
    %c7_281 = arith.constant 7 : index
    %c0_282 = arith.constant 0 : index
    %c0_283 = arith.constant 0 : index
    %297 = vector.load %arg8[%c7_281, %c0_282, %c0_283] : memref<8x1x512xf32, #tpu.memory_space<vmem>>, vector<1x1x512xf32>
    %298 = vector.shape_cast %297 : vector<1x1x512xf32> to vector<1x512xf32>
    %299 = vector.broadcast %298 : vector<1x512xf32> to vector<8x512xf32>
    %300 = arith.addf %296, %299 : vector<8x512xf32>
    %c7_284 = arith.constant 7 : index
    %c0_285 = arith.constant 0 : index
    %c0_286 = arith.constant 0 : index
    %301 = vector.load %arg18[%c7_284, %c0_285, %c0_286] : memref<8x8x512xf32, #tpu.memory_space<vmem>>, vector<1x8x512xf32>
    %302 = vector.shape_cast %301 : vector<1x8x512xf32> to vector<8x512xf32>
    %303 = vector.shape_cast %300 : vector<8x512xf32> to vector<1x8x512xf32>
    tpu.vector_store %arg18[%c7_284, %c0_285, %c0_286], %303 {strides = array<i32>} : memref<8x8x512xf32, #tpu.memory_space<vmem>>, vector<1x8x512xf32>,
    %c0_287 = arith.constant 0 : index
    %c0_288 = arith.constant 0 : index
    %304 = vector.load %arg1[%c0_287, %c0_288] : memref<8x128xf32, #tpu.memory_space<vmem>>, vector<8x128xf32>
    %c0_289 = arith.constant 0 : index
    %c0_290 = arith.constant 0 : index
    %305 = vector.load %arg2[%c0_289, %c0_290] : memref<8x128xf32, #tpu.memory_space<vmem>>, vector<8x128xf32>
    %c0_291 = arith.constant 0 : index
    %c0_292 = arith.constant 0 : index
    %c0_293 = arith.constant 0 : index
    %306 = vector.load %arg4[%c0_291, %c0_292, %c0_293] : memref<16x128x128xf32, #tpu.memory_space<vmem>>, vector<1x128x128xf32>
    %307 = vector.shape_cast %306 : vector<1x128x128xf32> to vector<128x128xf32>
    %cst_294 = arith.constant dense<0.000000e+00> : vector<8x128xf32>
    %308 = tpu.matmul %304, %307, %cst_294 {dimension_numbers = #tpu.dot_dimension_numbers<[1], [0], [0], [1], [0, 0, 1, 1], [], []>} : vector<8x128xf32>, vector<128x128xf32>, vector<8x128xf32> -> vector<8x128xf32>
    %c0_295 = arith.constant 0 : index
    %c0_296 = arith.constant 0 : index
    %c0_297 = arith.constant 0 : index
    %309 = vector.load %arg17[%c0_295, %c0_296, %c0_297] : memref<16x8x128xf32, #tpu.memory_space<vmem>>, vector<1x8x128xf32>
    %310 = vector.shape_cast %309 : vector<1x8x128xf32> to vector<8x128xf32>
    %311 = arith.addf %308, %310 : vector<8x128xf32>
    %cst_298 = arith.constant 0.000000e+00 : f32
    %312 = vector.broadcast %cst_298 : f32 to vector<8x128xf32>
    %313 = arith.maximumf %311, %312 : vector<8x128xf32>
    %c8_299 = arith.constant 8 : index
    %c0_300 = arith.constant 0 : index
    %c0_301 = arith.constant 0 : index
    %314 = vector.load %arg4[%c8_299, %c0_300, %c0_301] : memref<16x128x128xf32, #tpu.memory_space<vmem>>, vector<1x128x128xf32>
    %315 = vector.shape_cast %314 : vector<1x128x128xf32> to vector<128x128xf32>
    %cst_302 = arith.constant dense<0.000000e+00> : vector<8x128xf32>
    %316 = tpu.matmul %305, %315, %cst_302 {dimension_numbers = #tpu.dot_dimension_numbers<[1], [0], [0], [1], [0, 0, 1, 1], [], []>} : vector<8x128xf32>, vector<128x128xf32>, vector<8x128xf32> -> vector<8x128xf32>
    %c8_303 = arith.constant 8 : index
    %c0_304 = arith.constant 0 : index
    %c0_305 = arith.constant 0 : index
    %317 = vector.load %arg17[%c8_303, %c0_304, %c0_305] : memref<16x8x128xf32, #tpu.memory_space<vmem>>, vector<1x8x128xf32>
    %318 = vector.shape_cast %317 : vector<1x8x128xf32> to vector<8x128xf32>
    %319 = arith.addf %316, %318 : vector<8x128xf32>
    %cst_306 = arith.constant 0.000000e+00 : f32
    %320 = vector.broadcast %cst_306 : f32 to vector<8x128xf32>
    %321 = arith.maximumf %319, %320 : vector<8x128xf32>
    %c0_307 = arith.constant 0 : index
    %c0_308 = arith.constant 0 : index
    %c0_309 = arith.constant 0 : index
    %322 = vector.load %arg18[%c0_307, %c0_308, %c0_309] : memref<8x8x512xf32, #tpu.memory_space<vmem>>, vector<1x8x512xf32>
    %323 = vector.shape_cast %322 : vector<1x8x512xf32> to vector<8x512xf32>
    %c0_310 = arith.constant 0 : index
    %c0_311 = arith.constant 0 : index
    %c0_312 = arith.constant 0 : index
    %324 = vector.load %arg9[%c0_310, %c0_311, %c0_312] : memref<8x128x512xf32, #tpu.memory_space<vmem>>, vector<1x128x512xf32>
    %325 = vector.shape_cast %324 : vector<1x128x512xf32> to vector<128x512xf32>
    %cst_313 = arith.constant dense<0.000000e+00> : vector<8x512xf32>
    %326 = tpu.matmul %313, %325, %cst_313 {dimension_numbers = #tpu.dot_dimension_numbers<[1], [0], [0], [1], [0, 0, 1, 1], [], []>} : vector<8x128xf32>, vector<128x512xf32>, vector<8x512xf32> -> vector<8x512xf32>
    %327 = arith.addf %323, %326 : vector<8x512xf32>
    %328 = vector.extract_strided_slice %327 {offsets = [0, 0], sizes = [8, 128], strides = [1, 1]} : vector<8x512xf32> to vector<8x128xf32>
    %329 = arith.negf %328 : vector<8x128xf32>
    %330 = math.exp %329 : vector<8x128xf32>
    %cst_314 = arith.constant 1.000000e+00 : f32
    %331 = vector.broadcast %cst_314 : f32 to vector<8x128xf32>
    %332 = arith.addf %331, %330 : vector<8x128xf32>
    %333 = arith.divf %331, %332 : vector<8x128xf32>
    %334 = vector.extract_strided_slice %327 {offsets = [0, 128], sizes = [8, 128], strides = [1, 1]} : vector<8x512xf32> to vector<8x128xf32>
    %335 = arith.negf %334 : vector<8x128xf32>
    %336 = math.exp %335 : vector<8x128xf32>
    %cst_315 = arith.constant 1.000000e+00 : f32
    %337 = vector.broadcast %cst_315 : f32 to vector<8x128xf32>
    %338 = arith.addf %337, %336 : vector<8x128xf32>
    %339 = arith.divf %337, %338 : vector<8x128xf32>
    %340 = vector.extract_strided_slice %327 {offsets = [0, 256], sizes = [8, 128], strides = [1, 1]} : vector<8x512xf32> to vector<8x128xf32>
    %341 = math.tanh %340 : vector<8x128xf32>
    %342 = vector.extract_strided_slice %327 {offsets = [0, 384], sizes = [8, 128], strides = [1, 1]} : vector<8x512xf32> to vector<8x128xf32>
    %343 = arith.negf %342 : vector<8x128xf32>
    %344 = math.exp %343 : vector<8x128xf32>
    %cst_316 = arith.constant 1.000000e+00 : f32
    %345 = vector.broadcast %cst_316 : f32 to vector<8x128xf32>
    %346 = arith.addf %345, %344 : vector<8x128xf32>
    %347 = arith.divf %345, %346 : vector<8x128xf32>
    %348 = arith.mulf %339, %321 : vector<8x128xf32>
    %349 = arith.mulf %333, %341 : vector<8x128xf32>
    %350 = arith.addf %348, %349 : vector<8x128xf32>
    %351 = math.tanh %350 : vector<8x128xf32>
    %352 = arith.mulf %347, %351 : vector<8x128xf32>
    %c0_317 = arith.constant 0 : index
    %c0_318 = arith.constant 0 : index
    %c0_319 = arith.constant 0 : index
    %353 = vector.load %arg14[%c0_317, %c0_318, %c0_319] : memref<8x8x128xf32, #tpu.memory_space<vmem>>, vector<1x8x128xf32>
    %354 = vector.shape_cast %353 : vector<1x8x128xf32> to vector<8x128xf32>
    %355 = vector.shape_cast %352 : vector<8x128xf32> to vector<1x8x128xf32>
    tpu.vector_store %arg14[%c0_317, %c0_318, %c0_319], %355 {strides = array<i32>} : memref<8x8x128xf32, #tpu.memory_space<vmem>>, vector<1x8x128xf32>,
    %c0_320 = arith.constant 0 : index
    %c0_321 = arith.constant 0 : index
    %c0_322 = arith.constant 0 : index
    %356 = vector.load %arg15[%c0_320, %c0_321, %c0_322] : memref<8x8x128xf32, #tpu.memory_space<vmem>>, vector<1x8x128xf32>
    %357 = vector.shape_cast %356 : vector<1x8x128xf32> to vector<8x128xf32>
    %358 = vector.shape_cast %350 : vector<8x128xf32> to vector<1x8x128xf32>
    tpu.vector_store %arg15[%c0_320, %c0_321, %c0_322], %358 {strides = array<i32>} : memref<8x8x128xf32, #tpu.memory_space<vmem>>, vector<1x8x128xf32>,
    %c1_323 = arith.constant 1 : index
    %c0_324 = arith.constant 0 : index
    %c0_325 = arith.constant 0 : index
    %359 = vector.load %arg4[%c1_323, %c0_324, %c0_325] : memref<16x128x128xf32, #tpu.memory_space<vmem>>, vector<1x128x128xf32>
    %360 = vector.shape_cast %359 : vector<1x128x128xf32> to vector<128x128xf32>
    %cst_326 = arith.constant dense<0.000000e+00> : vector<8x128xf32>
    %361 = tpu.matmul %352, %360, %cst_326 {dimension_numbers = #tpu.dot_dimension_numbers<[1], [0], [0], [1], [0, 0, 1, 1], [], []>} : vector<8x128xf32>, vector<128x128xf32>, vector<8x128xf32> -> vector<8x128xf32>
    %c1_327 = arith.constant 1 : index
    %c0_328 = arith.constant 0 : index
    %c0_329 = arith.constant 0 : index
    %362 = vector.load %arg17[%c1_327, %c0_328, %c0_329] : memref<16x8x128xf32, #tpu.memory_space<vmem>>, vector<1x8x128xf32>
    %363 = vector.shape_cast %362 : vector<1x8x128xf32> to vector<8x128xf32>
    %364 = arith.addf %361, %363 : vector<8x128xf32>
    %cst_330 = arith.constant 0.000000e+00 : f32
    %365 = vector.broadcast %cst_330 : f32 to vector<8x128xf32>
    %366 = arith.maximumf %364, %365 : vector<8x128xf32>
    %c9_331 = arith.constant 9 : index
    %c0_332 = arith.constant 0 : index
    %c0_333 = arith.constant 0 : index
    %367 = vector.load %arg4[%c9_331, %c0_332, %c0_333] : memref<16x128x128xf32, #tpu.memory_space<vmem>>, vector<1x128x128xf32>
    %368 = vector.shape_cast %367 : vector<1x128x128xf32> to vector<128x128xf32>
    %cst_334 = arith.constant dense<0.000000e+00> : vector<8x128xf32>
    %369 = tpu.matmul %350, %368, %cst_334 {dimension_numbers = #tpu.dot_dimension_numbers<[1], [0], [0], [1], [0, 0, 1, 1], [], []>} : vector<8x128xf32>, vector<128x128xf32>, vector<8x128xf32> -> vector<8x128xf32>
    %c9_335 = arith.constant 9 : index
    %c0_336 = arith.constant 0 : index
    %c0_337 = arith.constant 0 : index
    %370 = vector.load %arg17[%c9_335, %c0_336, %c0_337] : memref<16x8x128xf32, #tpu.memory_space<vmem>>, vector<1x8x128xf32>
    %371 = vector.shape_cast %370 : vector<1x8x128xf32> to vector<8x128xf32>
    %372 = arith.addf %369, %371 : vector<8x128xf32>
    %cst_338 = arith.constant 0.000000e+00 : f32
    %373 = vector.broadcast %cst_338 : f32 to vector<8x128xf32>
    %374 = arith.maximumf %372, %373 : vector<8x128xf32>
    %c1_339 = arith.constant 1 : index
    %c0_340 = arith.constant 0 : index
    %c0_341 = arith.constant 0 : index
    %375 = vector.load %arg18[%c1_339, %c0_340, %c0_341] : memref<8x8x512xf32, #tpu.memory_space<vmem>>, vector<1x8x512xf32>
    %376 = vector.shape_cast %375 : vector<1x8x512xf32> to vector<8x512xf32>
    %c1_342 = arith.constant 1 : index
    %c0_343 = arith.constant 0 : index
    %c0_344 = arith.constant 0 : index
    %377 = vector.load %arg9[%c1_342, %c0_343, %c0_344] : memref<8x128x512xf32, #tpu.memory_space<vmem>>, vector<1x128x512xf32>
    %378 = vector.shape_cast %377 : vector<1x128x512xf32> to vector<128x512xf32>
    %cst_345 = arith.constant dense<0.000000e+00> : vector<8x512xf32>
    %379 = tpu.matmul %366, %378, %cst_345 {dimension_numbers = #tpu.dot_dimension_numbers<[1], [0], [0], [1], [0, 0, 1, 1], [], []>} : vector<8x128xf32>, vector<128x512xf32>, vector<8x512xf32> -> vector<8x512xf32>
    %380 = arith.addf %376, %379 : vector<8x512xf32>
    %381 = vector.extract_strided_slice %380 {offsets = [0, 0], sizes = [8, 128], strides = [1, 1]} : vector<8x512xf32> to vector<8x128xf32>
    %382 = arith.negf %381 : vector<8x128xf32>
    %383 = math.exp %382 : vector<8x128xf32>
    %cst_346 = arith.constant 1.000000e+00 : f32
    %384 = vector.broadcast %cst_346 : f32 to vector<8x128xf32>
    %385 = arith.addf %384, %383 : vector<8x128xf32>
    %386 = arith.divf %384, %385 : vector<8x128xf32>
    %387 = vector.extract_strided_slice %380 {offsets = [0, 128], sizes = [8, 128], strides = [1, 1]} : vector<8x512xf32> to vector<8x128xf32>
    %388 = arith.negf %387 : vector<8x128xf32>
    %389 = math.exp %388 : vector<8x128xf32>
    %cst_347 = arith.constant 1.000000e+00 : f32
    %390 = vector.broadcast %cst_347 : f32 to vector<8x128xf32>
    %391 = arith.addf %390, %389 : vector<8x128xf32>
    %392 = arith.divf %390, %391 : vector<8x128xf32>
    %393 = vector.extract_strided_slice %380 {offsets = [0, 256], sizes = [8, 128], strides = [1, 1]} : vector<8x512xf32> to vector<8x128xf32>
    %394 = math.tanh %393 : vector<8x128xf32>
    %395 = vector.extract_strided_slice %380 {offsets = [0, 384], sizes = [8, 128], strides = [1, 1]} : vector<8x512xf32> to vector<8x128xf32>
    %396 = arith.negf %395 : vector<8x128xf32>
    %397 = math.exp %396 : vector<8x128xf32>
    %cst_348 = arith.constant 1.000000e+00 : f32
    %398 = vector.broadcast %cst_348 : f32 to vector<8x128xf32>
    %399 = arith.addf %398, %397 : vector<8x128xf32>
    %400 = arith.divf %398, %399 : vector<8x128xf32>
    %401 = arith.mulf %392, %374 : vector<8x128xf32>
    %402 = arith.mulf %386, %394 : vector<8x128xf32>
    %403 = arith.addf %401, %402 : vector<8x128xf32>
    %404 = math.tanh %403 : vector<8x128xf32>
    %405 = arith.mulf %400, %404 : vector<8x128xf32>
    %c1_349 = arith.constant 1 : index
    %c0_350 = arith.constant 0 : index
    %c0_351 = arith.constant 0 : index
    %406 = vector.load %arg14[%c1_349, %c0_350, %c0_351] : memref<8x8x128xf32, #tpu.memory_space<vmem>>, vector<1x8x128xf32>
    %407 = vector.shape_cast %406 : vector<1x8x128xf32> to vector<8x128xf32>
    %408 = vector.shape_cast %405 : vector<8x128xf32> to vector<1x8x128xf32>
    tpu.vector_store %arg14[%c1_349, %c0_350, %c0_351], %408 {strides = array<i32>} : memref<8x8x128xf32, #tpu.memory_space<vmem>>, vector<1x8x128xf32>,
    %c1_352 = arith.constant 1 : index
    %c0_353 = arith.constant 0 : index
    %c0_354 = arith.constant 0 : index
    %409 = vector.load %arg15[%c1_352, %c0_353, %c0_354] : memref<8x8x128xf32, #tpu.memory_space<vmem>>, vector<1x8x128xf32>
    %410 = vector.shape_cast %409 : vector<1x8x128xf32> to vector<8x128xf32>
    %411 = vector.shape_cast %403 : vector<8x128xf32> to vector<1x8x128xf32>
    tpu.vector_store %arg15[%c1_352, %c0_353, %c0_354], %411 {strides = array<i32>} : memref<8x8x128xf32, #tpu.memory_space<vmem>>, vector<1x8x128xf32>,
    %c2_355 = arith.constant 2 : index
    %c0_356 = arith.constant 0 : index
    %c0_357 = arith.constant 0 : index
    %412 = vector.load %arg4[%c2_355, %c0_356, %c0_357] : memref<16x128x128xf32, #tpu.memory_space<vmem>>, vector<1x128x128xf32>
    %413 = vector.shape_cast %412 : vector<1x128x128xf32> to vector<128x128xf32>
    %cst_358 = arith.constant dense<0.000000e+00> : vector<8x128xf32>
    %414 = tpu.matmul %405, %413, %cst_358 {dimension_numbers = #tpu.dot_dimension_numbers<[1], [0], [0], [1], [0, 0, 1, 1], [], []>} : vector<8x128xf32>, vector<128x128xf32>, vector<8x128xf32> -> vector<8x128xf32>
    %c2_359 = arith.constant 2 : index
    %c0_360 = arith.constant 0 : index
    %c0_361 = arith.constant 0 : index
    %415 = vector.load %arg17[%c2_359, %c0_360, %c0_361] : memref<16x8x128xf32, #tpu.memory_space<vmem>>, vector<1x8x128xf32>
    %416 = vector.shape_cast %415 : vector<1x8x128xf32> to vector<8x128xf32>
    %417 = arith.addf %414, %416 : vector<8x128xf32>
    %cst_362 = arith.constant 0.000000e+00 : f32
    %418 = vector.broadcast %cst_362 : f32 to vector<8x128xf32>
    %419 = arith.maximumf %417, %418 : vector<8x128xf32>
    %c10_363 = arith.constant 10 : index
    %c0_364 = arith.constant 0 : index
    %c0_365 = arith.constant 0 : index
    %420 = vector.load %arg4[%c10_363, %c0_364, %c0_365] : memref<16x128x128xf32, #tpu.memory_space<vmem>>, vector<1x128x128xf32>
    %421 = vector.shape_cast %420 : vector<1x128x128xf32> to vector<128x128xf32>
    %cst_366 = arith.constant dense<0.000000e+00> : vector<8x128xf32>
    %422 = tpu.matmul %403, %421, %cst_366 {dimension_numbers = #tpu.dot_dimension_numbers<[1], [0], [0], [1], [0, 0, 1, 1], [], []>} : vector<8x128xf32>, vector<128x128xf32>, vector<8x128xf32> -> vector<8x128xf32>
    %c10_367 = arith.constant 10 : index
    %c0_368 = arith.constant 0 : index
    %c0_369 = arith.constant 0 : index
    %423 = vector.load %arg17[%c10_367, %c0_368, %c0_369] : memref<16x8x128xf32, #tpu.memory_space<vmem>>, vector<1x8x128xf32>
    %424 = vector.shape_cast %423 : vector<1x8x128xf32> to vector<8x128xf32>
    %425 = arith.addf %422, %424 : vector<8x128xf32>
    %cst_370 = arith.constant 0.000000e+00 : f32
    %426 = vector.broadcast %cst_370 : f32 to vector<8x128xf32>
    %427 = arith.maximumf %425, %426 : vector<8x128xf32>
    %c2_371 = arith.constant 2 : index
    %c0_372 = arith.constant 0 : index
    %c0_373 = arith.constant 0 : index
    %428 = vector.load %arg18[%c2_371, %c0_372, %c0_373] : memref<8x8x512xf32, #tpu.memory_space<vmem>>, vector<1x8x512xf32>
    %429 = vector.shape_cast %428 : vector<1x8x512xf32> to vector<8x512xf32>
    %c2_374 = arith.constant 2 : index
    %c0_375 = arith.constant 0 : index
    %c0_376 = arith.constant 0 : index
    %430 = vector.load %arg9[%c2_374, %c0_375, %c0_376] : memref<8x128x512xf32, #tpu.memory_space<vmem>>, vector<1x128x512xf32>
    %431 = vector.shape_cast %430 : vector<1x128x512xf32> to vector<128x512xf32>
    %cst_377 = arith.constant dense<0.000000e+00> : vector<8x512xf32>
    %432 = tpu.matmul %419, %431, %cst_377 {dimension_numbers = #tpu.dot_dimension_numbers<[1], [0], [0], [1], [0, 0, 1, 1], [], []>} : vector<8x128xf32>, vector<128x512xf32>, vector<8x512xf32> -> vector<8x512xf32>
    %433 = arith.addf %429, %432 : vector<8x512xf32>
    %434 = vector.extract_strided_slice %433 {offsets = [0, 0], sizes = [8, 128], strides = [1, 1]} : vector<8x512xf32> to vector<8x128xf32>
    %435 = arith.negf %434 : vector<8x128xf32>
    %436 = math.exp %435 : vector<8x128xf32>
    %cst_378 = arith.constant 1.000000e+00 : f32
    %437 = vector.broadcast %cst_378 : f32 to vector<8x128xf32>
    %438 = arith.addf %437, %436 : vector<8x128xf32>
    %439 = arith.divf %437, %438 : vector<8x128xf32>
    %440 = vector.extract_strided_slice %433 {offsets = [0, 128], sizes = [8, 128], strides = [1, 1]} : vector<8x512xf32> to vector<8x128xf32>
    %441 = arith.negf %440 : vector<8x128xf32>
    %442 = math.exp %441 : vector<8x128xf32>
    %cst_379 = arith.constant 1.000000e+00 : f32
    %443 = vector.broadcast %cst_379 : f32 to vector<8x128xf32>
    %444 = arith.addf %443, %442 : vector<8x128xf32>
    %445 = arith.divf %443, %444 : vector<8x128xf32>
    %446 = vector.extract_strided_slice %433 {offsets = [0, 256], sizes = [8, 128], strides = [1, 1]} : vector<8x512xf32> to vector<8x128xf32>
    %447 = math.tanh %446 : vector<8x128xf32>
    %448 = vector.extract_strided_slice %433 {offsets = [0, 384], sizes = [8, 128], strides = [1, 1]} : vector<8x512xf32> to vector<8x128xf32>
    %449 = arith.negf %448 : vector<8x128xf32>
    %450 = math.exp %449 : vector<8x128xf32>
    %cst_380 = arith.constant 1.000000e+00 : f32
    %451 = vector.broadcast %cst_380 : f32 to vector<8x128xf32>
    %452 = arith.addf %451, %450 : vector<8x128xf32>
    %453 = arith.divf %451, %452 : vector<8x128xf32>
    %454 = arith.mulf %445, %427 : vector<8x128xf32>
    %455 = arith.mulf %439, %447 : vector<8x128xf32>
    %456 = arith.addf %454, %455 : vector<8x128xf32>
    %457 = math.tanh %456 : vector<8x128xf32>
    %458 = arith.mulf %453, %457 : vector<8x128xf32>
    %c2_381 = arith.constant 2 : index
    %c0_382 = arith.constant 0 : index
    %c0_383 = arith.constant 0 : index
    %459 = vector.load %arg14[%c2_381, %c0_382, %c0_383] : memref<8x8x128xf32, #tpu.memory_space<vmem>>, vector<1x8x128xf32>
    %460 = vector.shape_cast %459 : vector<1x8x128xf32> to vector<8x128xf32>
    %461 = vector.shape_cast %458 : vector<8x128xf32> to vector<1x8x128xf32>
    tpu.vector_store %arg14[%c2_381, %c0_382, %c0_383], %461 {strides = array<i32>} : memref<8x8x128xf32, #tpu.memory_space<vmem>>, vector<1x8x128xf32>,
    %c2_384 = arith.constant 2 : index
    %c0_385 = arith.constant 0 : index
    %c0_386 = arith.constant 0 : index
    %462 = vector.load %arg15[%c2_384, %c0_385, %c0_386] : memref<8x8x128xf32, #tpu.memory_space<vmem>>, vector<1x8x128xf32>
    %463 = vector.shape_cast %462 : vector<1x8x128xf32> to vector<8x128xf32>
    %464 = vector.shape_cast %456 : vector<8x128xf32> to vector<1x8x128xf32>
    tpu.vector_store %arg15[%c2_384, %c0_385, %c0_386], %464 {strides = array<i32>} : memref<8x8x128xf32, #tpu.memory_space<vmem>>, vector<1x8x128xf32>,
    %c3_387 = arith.constant 3 : index
    %c0_388 = arith.constant 0 : index
    %c0_389 = arith.constant 0 : index
    %465 = vector.load %arg4[%c3_387, %c0_388, %c0_389] : memref<16x128x128xf32, #tpu.memory_space<vmem>>, vector<1x128x128xf32>
    %466 = vector.shape_cast %465 : vector<1x128x128xf32> to vector<128x128xf32>
    %cst_390 = arith.constant dense<0.000000e+00> : vector<8x128xf32>
    %467 = tpu.matmul %458, %466, %cst_390 {dimension_numbers = #tpu.dot_dimension_numbers<[1], [0], [0], [1], [0, 0, 1, 1], [], []>} : vector<8x128xf32>, vector<128x128xf32>, vector<8x128xf32> -> vector<8x128xf32>
    %c3_391 = arith.constant 3 : index
    %c0_392 = arith.constant 0 : index
    %c0_393 = arith.constant 0 : index
    %468 = vector.load %arg17[%c3_391, %c0_392, %c0_393] : memref<16x8x128xf32, #tpu.memory_space<vmem>>, vector<1x8x128xf32>
    %469 = vector.shape_cast %468 : vector<1x8x128xf32> to vector<8x128xf32>
    %470 = arith.addf %467, %469 : vector<8x128xf32>
    %cst_394 = arith.constant 0.000000e+00 : f32
    %471 = vector.broadcast %cst_394 : f32 to vector<8x128xf32>
    %472 = arith.maximumf %470, %471 : vector<8x128xf32>
    %c11_395 = arith.constant 11 : index
    %c0_396 = arith.constant 0 : index
    %c0_397 = arith.constant 0 : index
    %473 = vector.load %arg4[%c11_395, %c0_396, %c0_397] : memref<16x128x128xf32, #tpu.memory_space<vmem>>, vector<1x128x128xf32>
    %474 = vector.shape_cast %473 : vector<1x128x128xf32> to vector<128x128xf32>
    %cst_398 = arith.constant dense<0.000000e+00> : vector<8x128xf32>
    %475 = tpu.matmul %456, %474, %cst_398 {dimension_numbers = #tpu.dot_dimension_numbers<[1], [0], [0], [1], [0, 0, 1, 1], [], []>} : vector<8x128xf32>, vector<128x128xf32>, vector<8x128xf32> -> vector<8x128xf32>
    %c11_399 = arith.constant 11 : index
    %c0_400 = arith.constant 0 : index
    %c0_401 = arith.constant 0 : index
    %476 = vector.load %arg17[%c11_399, %c0_400, %c0_401] : memref<16x8x128xf32, #tpu.memory_space<vmem>>, vector<1x8x128xf32>
    %477 = vector.shape_cast %476 : vector<1x8x128xf32> to vector<8x128xf32>
    %478 = arith.addf %475, %477 : vector<8x128xf32>
    %cst_402 = arith.constant 0.000000e+00 : f32
    %479 = vector.broadcast %cst_402 : f32 to vector<8x128xf32>
    %480 = arith.maximumf %478, %479 : vector<8x128xf32>
    %c3_403 = arith.constant 3 : index
    %c0_404 = arith.constant 0 : index
    %c0_405 = arith.constant 0 : index
    %481 = vector.load %arg18[%c3_403, %c0_404, %c0_405] : memref<8x8x512xf32, #tpu.memory_space<vmem>>, vector<1x8x512xf32>
    %482 = vector.shape_cast %481 : vector<1x8x512xf32> to vector<8x512xf32>
    %c3_406 = arith.constant 3 : index
    %c0_407 = arith.constant 0 : index
    %c0_408 = arith.constant 0 : index
    %483 = vector.load %arg9[%c3_406, %c0_407, %c0_408] : memref<8x128x512xf32, #tpu.memory_space<vmem>>, vector<1x128x512xf32>
    %484 = vector.shape_cast %483 : vector<1x128x512xf32> to vector<128x512xf32>
    %cst_409 = arith.constant dense<0.000000e+00> : vector<8x512xf32>
    %485 = tpu.matmul %472, %484, %cst_409 {dimension_numbers = #tpu.dot_dimension_numbers<[1], [0], [0], [1], [0, 0, 1, 1], [], []>} : vector<8x128xf32>, vector<128x512xf32>, vector<8x512xf32> -> vector<8x512xf32>
    %486 = arith.addf %482, %485 : vector<8x512xf32>
    %487 = vector.extract_strided_slice %486 {offsets = [0, 0], sizes = [8, 128], strides = [1, 1]} : vector<8x512xf32> to vector<8x128xf32>
    %488 = arith.negf %487 : vector<8x128xf32>
    %489 = math.exp %488 : vector<8x128xf32>
    %cst_410 = arith.constant 1.000000e+00 : f32
    %490 = vector.broadcast %cst_410 : f32 to vector<8x128xf32>
    %491 = arith.addf %490, %489 : vector<8x128xf32>
    %492 = arith.divf %490, %491 : vector<8x128xf32>
    %493 = vector.extract_strided_slice %486 {offsets = [0, 128], sizes = [8, 128], strides = [1, 1]} : vector<8x512xf32> to vector<8x128xf32>
    %494 = arith.negf %493 : vector<8x128xf32>
    %495 = math.exp %494 : vector<8x128xf32>
    %cst_411 = arith.constant 1.000000e+00 : f32
    %496 = vector.broadcast %cst_411 : f32 to vector<8x128xf32>
    %497 = arith.addf %496, %495 : vector<8x128xf32>
    %498 = arith.divf %496, %497 : vector<8x128xf32>
    %499 = vector.extract_strided_slice %486 {offsets = [0, 256], sizes = [8, 128], strides = [1, 1]} : vector<8x512xf32> to vector<8x128xf32>
    %500 = math.tanh %499 : vector<8x128xf32>
    %501 = vector.extract_strided_slice %486 {offsets = [0, 384], sizes = [8, 128], strides = [1, 1]} : vector<8x512xf32> to vector<8x128xf32>
    %502 = arith.negf %501 : vector<8x128xf32>
    %503 = math.exp %502 : vector<8x128xf32>
    %cst_412 = arith.constant 1.000000e+00 : f32
    %504 = vector.broadcast %cst_412 : f32 to vector<8x128xf32>
    %505 = arith.addf %504, %503 : vector<8x128xf32>
    %506 = arith.divf %504, %505 : vector<8x128xf32>
    %507 = arith.mulf %498, %480 : vector<8x128xf32>
    %508 = arith.mulf %492, %500 : vector<8x128xf32>
    %509 = arith.addf %507, %508 : vector<8x128xf32>
    %510 = math.tanh %509 : vector<8x128xf32>
    %511 = arith.mulf %506, %510 : vector<8x128xf32>
    %c3_413 = arith.constant 3 : index
    %c0_414 = arith.constant 0 : index
    %c0_415 = arith.constant 0 : index
    %512 = vector.load %arg14[%c3_413, %c0_414, %c0_415] : memref<8x8x128xf32, #tpu.memory_space<vmem>>, vector<1x8x128xf32>
    %513 = vector.shape_cast %512 : vector<1x8x128xf32> to vector<8x128xf32>
    %514 = vector.shape_cast %511 : vector<8x128xf32> to vector<1x8x128xf32>
    tpu.vector_store %arg14[%c3_413, %c0_414, %c0_415], %514 {strides = array<i32>} : memref<8x8x128xf32, #tpu.memory_space<vmem>>, vector<1x8x128xf32>,
    %c3_416 = arith.constant 3 : index
    %c0_417 = arith.constant 0 : index
    %c0_418 = arith.constant 0 : index
    %515 = vector.load %arg15[%c3_416, %c0_417, %c0_418] : memref<8x8x128xf32, #tpu.memory_space<vmem>>, vector<1x8x128xf32>
    %516 = vector.shape_cast %515 : vector<1x8x128xf32> to vector<8x128xf32>
    %517 = vector.shape_cast %509 : vector<8x128xf32> to vector<1x8x128xf32>
    tpu.vector_store %arg15[%c3_416, %c0_417, %c0_418], %517 {strides = array<i32>} : memref<8x8x128xf32, #tpu.memory_space<vmem>>, vector<1x8x128xf32>,
    %c4_419 = arith.constant 4 : index
    %c0_420 = arith.constant 0 : index
    %c0_421 = arith.constant 0 : index
    %518 = vector.load %arg4[%c4_419, %c0_420, %c0_421] : memref<16x128x128xf32, #tpu.memory_space<vmem>>, vector<1x128x128xf32>
    %519 = vector.shape_cast %518 : vector<1x128x128xf32> to vector<128x128xf32>
    %cst_422 = arith.constant dense<0.000000e+00> : vector<8x128xf32>
    %520 = tpu.matmul %511, %519, %cst_422 {dimension_numbers = #tpu.dot_dimension_numbers<[1], [0], [0], [1], [0, 0, 1, 1], [], []>} : vector<8x128xf32>, vector<128x128xf32>, vector<8x128xf32> -> vector<8x128xf32>
    %c4_423 = arith.constant 4 : index
    %c0_424 = arith.constant 0 : index
    %c0_425 = arith.constant 0 : index
    %521 = vector.load %arg17[%c4_423, %c0_424, %c0_425] : memref<16x8x128xf32, #tpu.memory_space<vmem>>, vector<1x8x128xf32>
    %522 = vector.shape_cast %521 : vector<1x8x128xf32> to vector<8x128xf32>
    %523 = arith.addf %520, %522 : vector<8x128xf32>
    %cst_426 = arith.constant 0.000000e+00 : f32
    %524 = vector.broadcast %cst_426 : f32 to vector<8x128xf32>
    %525 = arith.maximumf %523, %524 : vector<8x128xf32>
    %c12_427 = arith.constant 12 : index
    %c0_428 = arith.constant 0 : index
    %c0_429 = arith.constant 0 : index
    %526 = vector.load %arg4[%c12_427, %c0_428, %c0_429] : memref<16x128x128xf32, #tpu.memory_space<vmem>>, vector<1x128x128xf32>
    %527 = vector.shape_cast %526 : vector<1x128x128xf32> to vector<128x128xf32>
    %cst_430 = arith.constant dense<0.000000e+00> : vector<8x128xf32>
    %528 = tpu.matmul %509, %527, %cst_430 {dimension_numbers = #tpu.dot_dimension_numbers<[1], [0], [0], [1], [0, 0, 1, 1], [], []>} : vector<8x128xf32>, vector<128x128xf32>, vector<8x128xf32> -> vector<8x128xf32>
    %c12_431 = arith.constant 12 : index
    %c0_432 = arith.constant 0 : index
    %c0_433 = arith.constant 0 : index
    %529 = vector.load %arg17[%c12_431, %c0_432, %c0_433] : memref<16x8x128xf32, #tpu.memory_space<vmem>>, vector<1x8x128xf32>
    %530 = vector.shape_cast %529 : vector<1x8x128xf32> to vector<8x128xf32>
    %531 = arith.addf %528, %530 : vector<8x128xf32>
    %cst_434 = arith.constant 0.000000e+00 : f32
    %532 = vector.broadcast %cst_434 : f32 to vector<8x128xf32>
    %533 = arith.maximumf %531, %532 : vector<8x128xf32>
    %c4_435 = arith.constant 4 : index
    %c0_436 = arith.constant 0 : index
    %c0_437 = arith.constant 0 : index
    %534 = vector.load %arg18[%c4_435, %c0_436, %c0_437] : memref<8x8x512xf32, #tpu.memory_space<vmem>>, vector<1x8x512xf32>
    %535 = vector.shape_cast %534 : vector<1x8x512xf32> to vector<8x512xf32>
    %c4_438 = arith.constant 4 : index
    %c0_439 = arith.constant 0 : index
    %c0_440 = arith.constant 0 : index
    %536 = vector.load %arg9[%c4_438, %c0_439, %c0_440] : memref<8x128x512xf32, #tpu.memory_space<vmem>>, vector<1x128x512xf32>
    %537 = vector.shape_cast %536 : vector<1x128x512xf32> to vector<128x512xf32>
    %cst_441 = arith.constant dense<0.000000e+00> : vector<8x512xf32>
    %538 = tpu.matmul %525, %537, %cst_441 {dimension_numbers = #tpu.dot_dimension_numbers<[1], [0], [0], [1], [0, 0, 1, 1], [], []>} : vector<8x128xf32>, vector<128x512xf32>, vector<8x512xf32> -> vector<8x512xf32>
    %539 = arith.addf %535, %538 : vector<8x512xf32>
    %540 = vector.extract_strided_slice %539 {offsets = [0, 0], sizes = [8, 128], strides = [1, 1]} : vector<8x512xf32> to vector<8x128xf32>
    %541 = arith.negf %540 : vector<8x128xf32>
    %542 = math.exp %541 : vector<8x128xf32>
    %cst_442 = arith.constant 1.000000e+00 : f32
    %543 = vector.broadcast %cst_442 : f32 to vector<8x128xf32>
    %544 = arith.addf %543, %542 : vector<8x128xf32>
    %545 = arith.divf %543, %544 : vector<8x128xf32>
    %546 = vector.extract_strided_slice %539 {offsets = [0, 128], sizes = [8, 128], strides = [1, 1]} : vector<8x512xf32> to vector<8x128xf32>
    %547 = arith.negf %546 : vector<8x128xf32>
    %548 = math.exp %547 : vector<8x128xf32>
    %cst_443 = arith.constant 1.000000e+00 : f32
    %549 = vector.broadcast %cst_443 : f32 to vector<8x128xf32>
    %550 = arith.addf %549, %548 : vector<8x128xf32>
    %551 = arith.divf %549, %550 : vector<8x128xf32>
    %552 = vector.extract_strided_slice %539 {offsets = [0, 256], sizes = [8, 128], strides = [1, 1]} : vector<8x512xf32> to vector<8x128xf32>
    %553 = math.tanh %552 : vector<8x128xf32>
    %554 = vector.extract_strided_slice %539 {offsets = [0, 384], sizes = [8, 128], strides = [1, 1]} : vector<8x512xf32> to vector<8x128xf32>
    %555 = arith.negf %554 : vector<8x128xf32>
    %556 = math.exp %555 : vector<8x128xf32>
    %cst_444 = arith.constant 1.000000e+00 : f32
    %557 = vector.broadcast %cst_444 : f32 to vector<8x128xf32>
    %558 = arith.addf %557, %556 : vector<8x128xf32>
    %559 = arith.divf %557, %558 : vector<8x128xf32>
    %560 = arith.mulf %551, %533 : vector<8x128xf32>
    %561 = arith.mulf %545, %553 : vector<8x128xf32>
    %562 = arith.addf %560, %561 : vector<8x128xf32>
    %563 = math.tanh %562 : vector<8x128xf32>
    %564 = arith.mulf %559, %563 : vector<8x128xf32>
    %c4_445 = arith.constant 4 : index
    %c0_446 = arith.constant 0 : index
    %c0_447 = arith.constant 0 : index
    %565 = vector.load %arg14[%c4_445, %c0_446, %c0_447] : memref<8x8x128xf32, #tpu.memory_space<vmem>>, vector<1x8x128xf32>
    %566 = vector.shape_cast %565 : vector<1x8x128xf32> to vector<8x128xf32>
    %567 = vector.shape_cast %564 : vector<8x128xf32> to vector<1x8x128xf32>
    tpu.vector_store %arg14[%c4_445, %c0_446, %c0_447], %567 {strides = array<i32>} : memref<8x8x128xf32, #tpu.memory_space<vmem>>, vector<1x8x128xf32>,
    %c4_448 = arith.constant 4 : index
    %c0_449 = arith.constant 0 : index
    %c0_450 = arith.constant 0 : index
    %568 = vector.load %arg15[%c4_448, %c0_449, %c0_450] : memref<8x8x128xf32, #tpu.memory_space<vmem>>, vector<1x8x128xf32>
    %569 = vector.shape_cast %568 : vector<1x8x128xf32> to vector<8x128xf32>
    %570 = vector.shape_cast %562 : vector<8x128xf32> to vector<1x8x128xf32>
    tpu.vector_store %arg15[%c4_448, %c0_449, %c0_450], %570 {strides = array<i32>} : memref<8x8x128xf32, #tpu.memory_space<vmem>>, vector<1x8x128xf32>,
    %c5_451 = arith.constant 5 : index
    %c0_452 = arith.constant 0 : index
    %c0_453 = arith.constant 0 : index
    %571 = vector.load %arg4[%c5_451, %c0_452, %c0_453] : memref<16x128x128xf32, #tpu.memory_space<vmem>>, vector<1x128x128xf32>
    %572 = vector.shape_cast %571 : vector<1x128x128xf32> to vector<128x128xf32>
    %cst_454 = arith.constant dense<0.000000e+00> : vector<8x128xf32>
    %573 = tpu.matmul %564, %572, %cst_454 {dimension_numbers = #tpu.dot_dimension_numbers<[1], [0], [0], [1], [0, 0, 1, 1], [], []>} : vector<8x128xf32>, vector<128x128xf32>, vector<8x128xf32> -> vector<8x128xf32>
    %c5_455 = arith.constant 5 : index
    %c0_456 = arith.constant 0 : index
    %c0_457 = arith.constant 0 : index
    %574 = vector.load %arg17[%c5_455, %c0_456, %c0_457] : memref<16x8x128xf32, #tpu.memory_space<vmem>>, vector<1x8x128xf32>
    %575 = vector.shape_cast %574 : vector<1x8x128xf32> to vector<8x128xf32>
    %576 = arith.addf %573, %575 : vector<8x128xf32>
    %cst_458 = arith.constant 0.000000e+00 : f32
    %577 = vector.broadcast %cst_458 : f32 to vector<8x128xf32>
    %578 = arith.maximumf %576, %577 : vector<8x128xf32>
    %c13_459 = arith.constant 13 : index
    %c0_460 = arith.constant 0 : index
    %c0_461 = arith.constant 0 : index
    %579 = vector.load %arg4[%c13_459, %c0_460, %c0_461] : memref<16x128x128xf32, #tpu.memory_space<vmem>>, vector<1x128x128xf32>
    %580 = vector.shape_cast %579 : vector<1x128x128xf32> to vector<128x128xf32>
    %cst_462 = arith.constant dense<0.000000e+00> : vector<8x128xf32>
    %581 = tpu.matmul %562, %580, %cst_462 {dimension_numbers = #tpu.dot_dimension_numbers<[1], [0], [0], [1], [0, 0, 1, 1], [], []>} : vector<8x128xf32>, vector<128x128xf32>, vector<8x128xf32> -> vector<8x128xf32>
    %c13_463 = arith.constant 13 : index
    %c0_464 = arith.constant 0 : index
    %c0_465 = arith.constant 0 : index
    %582 = vector.load %arg17[%c13_463, %c0_464, %c0_465] : memref<16x8x128xf32, #tpu.memory_space<vmem>>, vector<1x8x128xf32>
    %583 = vector.shape_cast %582 : vector<1x8x128xf32> to vector<8x128xf32>
    %584 = arith.addf %581, %583 : vector<8x128xf32>
    %cst_466 = arith.constant 0.000000e+00 : f32
    %585 = vector.broadcast %cst_466 : f32 to vector<8x128xf32>
    %586 = arith.maximumf %584, %585 : vector<8x128xf32>
    %c5_467 = arith.constant 5 : index
    %c0_468 = arith.constant 0 : index
    %c0_469 = arith.constant 0 : index
    %587 = vector.load %arg18[%c5_467, %c0_468, %c0_469] : memref<8x8x512xf32, #tpu.memory_space<vmem>>, vector<1x8x512xf32>
    %588 = vector.shape_cast %587 : vector<1x8x512xf32> to vector<8x512xf32>
    %c5_470 = arith.constant 5 : index
    %c0_471 = arith.constant 0 : index
    %c0_472 = arith.constant 0 : index
    %589 = vector.load %arg9[%c5_470, %c0_471, %c0_472] : memref<8x128x512xf32, #tpu.memory_space<vmem>>, vector<1x128x512xf32>
    %590 = vector.shape_cast %589 : vector<1x128x512xf32> to vector<128x512xf32>
    %cst_473 = arith.constant dense<0.000000e+00> : vector<8x512xf32>
    %591 = tpu.matmul %578, %590, %cst_473 {dimension_numbers = #tpu.dot_dimension_numbers<[1], [0], [0], [1], [0, 0, 1, 1], [], []>} : vector<8x128xf32>, vector<128x512xf32>, vector<8x512xf32> -> vector<8x512xf32>
    %592 = arith.addf %588, %591 : vector<8x512xf32>
    %593 = vector.extract_strided_slice %592 {offsets = [0, 0], sizes = [8, 128], strides = [1, 1]} : vector<8x512xf32> to vector<8x128xf32>
    %594 = arith.negf %593 : vector<8x128xf32>
    %595 = math.exp %594 : vector<8x128xf32>
    %cst_474 = arith.constant 1.000000e+00 : f32
    %596 = vector.broadcast %cst_474 : f32 to vector<8x128xf32>
    %597 = arith.addf %596, %595 : vector<8x128xf32>
    %598 = arith.divf %596, %597 : vector<8x128xf32>
    %599 = vector.extract_strided_slice %592 {offsets = [0, 128], sizes = [8, 128], strides = [1, 1]} : vector<8x512xf32> to vector<8x128xf32>
    %600 = arith.negf %599 : vector<8x128xf32>
    %601 = math.exp %600 : vector<8x128xf32>
    %cst_475 = arith.constant 1.000000e+00 : f32
    %602 = vector.broadcast %cst_475 : f32 to vector<8x128xf32>
    %603 = arith.addf %602, %601 : vector<8x128xf32>
    %604 = arith.divf %602, %603 : vector<8x128xf32>
    %605 = vector.extract_strided_slice %592 {offsets = [0, 256], sizes = [8, 128], strides = [1, 1]} : vector<8x512xf32> to vector<8x128xf32>
    %606 = math.tanh %605 : vector<8x128xf32>
    %607 = vector.extract_strided_slice %592 {offsets = [0, 384], sizes = [8, 128], strides = [1, 1]} : vector<8x512xf32> to vector<8x128xf32>
    %608 = arith.negf %607 : vector<8x128xf32>
    %609 = math.exp %608 : vector<8x128xf32>
    %cst_476 = arith.constant 1.000000e+00 : f32
    %610 = vector.broadcast %cst_476 : f32 to vector<8x128xf32>
    %611 = arith.addf %610, %609 : vector<8x128xf32>
    %612 = arith.divf %610, %611 : vector<8x128xf32>
    %613 = arith.mulf %604, %586 : vector<8x128xf32>
    %614 = arith.mulf %598, %606 : vector<8x128xf32>
    %615 = arith.addf %613, %614 : vector<8x128xf32>
    %616 = math.tanh %615 : vector<8x128xf32>
    %617 = arith.mulf %612, %616 : vector<8x128xf32>
    %c5_477 = arith.constant 5 : index
    %c0_478 = arith.constant 0 : index
    %c0_479 = arith.constant 0 : index
    %618 = vector.load %arg14[%c5_477, %c0_478, %c0_479] : memref<8x8x128xf32, #tpu.memory_space<vmem>>, vector<1x8x128xf32>
    %619 = vector.shape_cast %618 : vector<1x8x128xf32> to vector<8x128xf32>
    %620 = vector.shape_cast %617 : vector<8x128xf32> to vector<1x8x128xf32>
    tpu.vector_store %arg14[%c5_477, %c0_478, %c0_479], %620 {strides = array<i32>} : memref<8x8x128xf32, #tpu.memory_space<vmem>>, vector<1x8x128xf32>,
    %c5_480 = arith.constant 5 : index
    %c0_481 = arith.constant 0 : index
    %c0_482 = arith.constant 0 : index
    %621 = vector.load %arg15[%c5_480, %c0_481, %c0_482] : memref<8x8x128xf32, #tpu.memory_space<vmem>>, vector<1x8x128xf32>
    %622 = vector.shape_cast %621 : vector<1x8x128xf32> to vector<8x128xf32>
    %623 = vector.shape_cast %615 : vector<8x128xf32> to vector<1x8x128xf32>
    tpu.vector_store %arg15[%c5_480, %c0_481, %c0_482], %623 {strides = array<i32>} : memref<8x8x128xf32, #tpu.memory_space<vmem>>, vector<1x8x128xf32>,
    %c6_483 = arith.constant 6 : index
    %c0_484 = arith.constant 0 : index
    %c0_485 = arith.constant 0 : index
    %624 = vector.load %arg4[%c6_483, %c0_484, %c0_485] : memref<16x128x128xf32, #tpu.memory_space<vmem>>, vector<1x128x128xf32>
    %625 = vector.shape_cast %624 : vector<1x128x128xf32> to vector<128x128xf32>
    %cst_486 = arith.constant dense<0.000000e+00> : vector<8x128xf32>
    %626 = tpu.matmul %617, %625, %cst_486 {dimension_numbers = #tpu.dot_dimension_numbers<[1], [0], [0], [1], [0, 0, 1, 1], [], []>} : vector<8x128xf32>, vector<128x128xf32>, vector<8x128xf32> -> vector<8x128xf32>
    %c6_487 = arith.constant 6 : index
    %c0_488 = arith.constant 0 : index
    %c0_489 = arith.constant 0 : index
    %627 = vector.load %arg17[%c6_487, %c0_488, %c0_489] : memref<16x8x128xf32, #tpu.memory_space<vmem>>, vector<1x8x128xf32>
    %628 = vector.shape_cast %627 : vector<1x8x128xf32> to vector<8x128xf32>
    %629 = arith.addf %626, %628 : vector<8x128xf32>
    %cst_490 = arith.constant 0.000000e+00 : f32
    %630 = vector.broadcast %cst_490 : f32 to vector<8x128xf32>
    %631 = arith.maximumf %629, %630 : vector<8x128xf32>
    %c14_491 = arith.constant 14 : index
    %c0_492 = arith.constant 0 : index
    %c0_493 = arith.constant 0 : index
    %632 = vector.load %arg4[%c14_491, %c0_492, %c0_493] : memref<16x128x128xf32, #tpu.memory_space<vmem>>, vector<1x128x128xf32>
    %633 = vector.shape_cast %632 : vector<1x128x128xf32> to vector<128x128xf32>
    %cst_494 = arith.constant dense<0.000000e+00> : vector<8x128xf32>
    %634 = tpu.matmul %615, %633, %cst_494 {dimension_numbers = #tpu.dot_dimension_numbers<[1], [0], [0], [1], [0, 0, 1, 1], [], []>} : vector<8x128xf32>, vector<128x128xf32>, vector<8x128xf32> -> vector<8x128xf32>
    %c14_495 = arith.constant 14 : index
    %c0_496 = arith.constant 0 : index
    %c0_497 = arith.constant 0 : index
    %635 = vector.load %arg17[%c14_495, %c0_496, %c0_497] : memref<16x8x128xf32, #tpu.memory_space<vmem>>, vector<1x8x128xf32>
    %636 = vector.shape_cast %635 : vector<1x8x128xf32> to vector<8x128xf32>
    %637 = arith.addf %634, %636 : vector<8x128xf32>
    %cst_498 = arith.constant 0.000000e+00 : f32
    %638 = vector.broadcast %cst_498 : f32 to vector<8x128xf32>
    %639 = arith.maximumf %637, %638 : vector<8x128xf32>
    %c6_499 = arith.constant 6 : index
    %c0_500 = arith.constant 0 : index
    %c0_501 = arith.constant 0 : index
    %640 = vector.load %arg18[%c6_499, %c0_500, %c0_501] : memref<8x8x512xf32, #tpu.memory_space<vmem>>, vector<1x8x512xf32>
    %641 = vector.shape_cast %640 : vector<1x8x512xf32> to vector<8x512xf32>
    %c6_502 = arith.constant 6 : index
    %c0_503 = arith.constant 0 : index
    %c0_504 = arith.constant 0 : index
    %642 = vector.load %arg9[%c6_502, %c0_503, %c0_504] : memref<8x128x512xf32, #tpu.memory_space<vmem>>, vector<1x128x512xf32>
    %643 = vector.shape_cast %642 : vector<1x128x512xf32> to vector<128x512xf32>
    %cst_505 = arith.constant dense<0.000000e+00> : vector<8x512xf32>
    %644 = tpu.matmul %631, %643, %cst_505 {dimension_numbers = #tpu.dot_dimension_numbers<[1], [0], [0], [1], [0, 0, 1, 1], [], []>} : vector<8x128xf32>, vector<128x512xf32>, vector<8x512xf32> -> vector<8x512xf32>
    %645 = arith.addf %641, %644 : vector<8x512xf32>
    %646 = vector.extract_strided_slice %645 {offsets = [0, 0], sizes = [8, 128], strides = [1, 1]} : vector<8x512xf32> to vector<8x128xf32>
    %647 = arith.negf %646 : vector<8x128xf32>
    %648 = math.exp %647 : vector<8x128xf32>
    %cst_506 = arith.constant 1.000000e+00 : f32
    %649 = vector.broadcast %cst_506 : f32 to vector<8x128xf32>
    %650 = arith.addf %649, %648 : vector<8x128xf32>
    %651 = arith.divf %649, %650 : vector<8x128xf32>
    %652 = vector.extract_strided_slice %645 {offsets = [0, 128], sizes = [8, 128], strides = [1, 1]} : vector<8x512xf32> to vector<8x128xf32>
    %653 = arith.negf %652 : vector<8x128xf32>
    %654 = math.exp %653 : vector<8x128xf32>
    %cst_507 = arith.constant 1.000000e+00 : f32
    %655 = vector.broadcast %cst_507 : f32 to vector<8x128xf32>
    %656 = arith.addf %655, %654 : vector<8x128xf32>
    %657 = arith.divf %655, %656 : vector<8x128xf32>
    %658 = vector.extract_strided_slice %645 {offsets = [0, 256], sizes = [8, 128], strides = [1, 1]} : vector<8x512xf32> to vector<8x128xf32>
    %659 = math.tanh %658 : vector<8x128xf32>
    %660 = vector.extract_strided_slice %645 {offsets = [0, 384], sizes = [8, 128], strides = [1, 1]} : vector<8x512xf32> to vector<8x128xf32>
    %661 = arith.negf %660 : vector<8x128xf32>
    %662 = math.exp %661 : vector<8x128xf32>
    %cst_508 = arith.constant 1.000000e+00 : f32
    %663 = vector.broadcast %cst_508 : f32 to vector<8x128xf32>
    %664 = arith.addf %663, %662 : vector<8x128xf32>
    %665 = arith.divf %663, %664 : vector<8x128xf32>
    %666 = arith.mulf %657, %639 : vector<8x128xf32>
    %667 = arith.mulf %651, %659 : vector<8x128xf32>
    %668 = arith.addf %666, %667 : vector<8x128xf32>
    %669 = math.tanh %668 : vector<8x128xf32>
    %670 = arith.mulf %665, %669 : vector<8x128xf32>
    %c6_509 = arith.constant 6 : index
    %c0_510 = arith.constant 0 : index
    %c0_511 = arith.constant 0 : index
    %671 = vector.load %arg14[%c6_509, %c0_510, %c0_511] : memref<8x8x128xf32, #tpu.memory_space<vmem>>, vector<1x8x128xf32>
    %672 = vector.shape_cast %671 : vector<1x8x128xf32> to vector<8x128xf32>
    %673 = vector.shape_cast %670 : vector<8x128xf32> to vector<1x8x128xf32>
    tpu.vector_store %arg14[%c6_509, %c0_510, %c0_511], %673 {strides = array<i32>} : memref<8x8x128xf32, #tpu.memory_space<vmem>>, vector<1x8x128xf32>,
    %c6_512 = arith.constant 6 : index
    %c0_513 = arith.constant 0 : index
    %c0_514 = arith.constant 0 : index
    %674 = vector.load %arg15[%c6_512, %c0_513, %c0_514] : memref<8x8x128xf32, #tpu.memory_space<vmem>>, vector<1x8x128xf32>
    %675 = vector.shape_cast %674 : vector<1x8x128xf32> to vector<8x128xf32>
    %676 = vector.shape_cast %668 : vector<8x128xf32> to vector<1x8x128xf32>
    tpu.vector_store %arg15[%c6_512, %c0_513, %c0_514], %676 {strides = array<i32>} : memref<8x8x128xf32, #tpu.memory_space<vmem>>, vector<1x8x128xf32>,
    %c7_515 = arith.constant 7 : index
    %c0_516 = arith.constant 0 : index
    %c0_517 = arith.constant 0 : index
    %677 = vector.load %arg4[%c7_515, %c0_516, %c0_517] : memref<16x128x128xf32, #tpu.memory_space<vmem>>, vector<1x128x128xf32>
    %678 = vector.shape_cast %677 : vector<1x128x128xf32> to vector<128x128xf32>
    %cst_518 = arith.constant dense<0.000000e+00> : vector<8x128xf32>
    %679 = tpu.matmul %670, %678, %cst_518 {dimension_numbers = #tpu.dot_dimension_numbers<[1], [0], [0], [1], [0, 0, 1, 1], [], []>} : vector<8x128xf32>, vector<128x128xf32>, vector<8x128xf32> -> vector<8x128xf32>
    %c7_519 = arith.constant 7 : index
    %c0_520 = arith.constant 0 : index
    %c0_521 = arith.constant 0 : index
    %680 = vector.load %arg17[%c7_519, %c0_520, %c0_521] : memref<16x8x128xf32, #tpu.memory_space<vmem>>, vector<1x8x128xf32>
    %681 = vector.shape_cast %680 : vector<1x8x128xf32> to vector<8x128xf32>
    %682 = arith.addf %679, %681 : vector<8x128xf32>
    %cst_522 = arith.constant 0.000000e+00 : f32
    %683 = vector.broadcast %cst_522 : f32 to vector<8x128xf32>
    %684 = arith.maximumf %682, %683 : vector<8x128xf32>
    %c15_523 = arith.constant 15 : index
    %c0_524 = arith.constant 0 : index
    %c0_525 = arith.constant 0 : index
    %685 = vector.load %arg4[%c15_523, %c0_524, %c0_525] : memref<16x128x128xf32, #tpu.memory_space<vmem>>, vector<1x128x128xf32>
    %686 = vector.shape_cast %685 : vector<1x128x128xf32> to vector<128x128xf32>
    %cst_526 = arith.constant dense<0.000000e+00> : vector<8x128xf32>
    %687 = tpu.matmul %668, %686, %cst_526 {dimension_numbers = #tpu.dot_dimension_numbers<[1], [0], [0], [1], [0, 0, 1, 1], [], []>} : vector<8x128xf32>, vector<128x128xf32>, vector<8x128xf32> -> vector<8x128xf32>
    %c15_527 = arith.constant 15 : index
    %c0_528 = arith.constant 0 : index
    %c0_529 = arith.constant 0 : index
    %688 = vector.load %arg17[%c15_527, %c0_528, %c0_529] : memref<16x8x128xf32, #tpu.memory_space<vmem>>, vector<1x8x128xf32>
    %689 = vector.shape_cast %688 : vector<1x8x128xf32> to vector<8x128xf32>
    %690 = arith.addf %687, %689 : vector<8x128xf32>
    %cst_530 = arith.constant 0.000000e+00 : f32
    %691 = vector.broadcast %cst_530 : f32 to vector<8x128xf32>
    %692 = arith.maximumf %690, %691 : vector<8x128xf32>
    %c7_531 = arith.constant 7 : index
    %c0_532 = arith.constant 0 : index
    %c0_533 = arith.constant 0 : index
    %693 = vector.load %arg18[%c7_531, %c0_532, %c0_533] : memref<8x8x512xf32, #tpu.memory_space<vmem>>, vector<1x8x512xf32>
    %694 = vector.shape_cast %693 : vector<1x8x512xf32> to vector<8x512xf32>
    %c7_534 = arith.constant 7 : index
    %c0_535 = arith.constant 0 : index
    %c0_536 = arith.constant 0 : index
    %695 = vector.load %arg9[%c7_534, %c0_535, %c0_536] : memref<8x128x512xf32, #tpu.memory_space<vmem>>, vector<1x128x512xf32>
    %696 = vector.shape_cast %695 : vector<1x128x512xf32> to vector<128x512xf32>
    %cst_537 = arith.constant dense<0.000000e+00> : vector<8x512xf32>
    %697 = tpu.matmul %684, %696, %cst_537 {dimension_numbers = #tpu.dot_dimension_numbers<[1], [0], [0], [1], [0, 0, 1, 1], [], []>} : vector<8x128xf32>, vector<128x512xf32>, vector<8x512xf32> -> vector<8x512xf32>
    %698 = arith.addf %694, %697 : vector<8x512xf32>
    %699 = vector.extract_strided_slice %698 {offsets = [0, 0], sizes = [8, 128], strides = [1, 1]} : vector<8x512xf32> to vector<8x128xf32>
    %700 = arith.negf %699 : vector<8x128xf32>
    %701 = math.exp %700 : vector<8x128xf32>
    %cst_538 = arith.constant 1.000000e+00 : f32
    %702 = vector.broadcast %cst_538 : f32 to vector<8x128xf32>
    %703 = arith.addf %702, %701 : vector<8x128xf32>
    %704 = arith.divf %702, %703 : vector<8x128xf32>
    %705 = vector.extract_strided_slice %698 {offsets = [0, 128], sizes = [8, 128], strides = [1, 1]} : vector<8x512xf32> to vector<8x128xf32>
    %706 = arith.negf %705 : vector<8x128xf32>
    %707 = math.exp %706 : vector<8x128xf32>
    %cst_539 = arith.constant 1.000000e+00 : f32
    %708 = vector.broadcast %cst_539 : f32 to vector<8x128xf32>
    %709 = arith.addf %708, %707 : vector<8x128xf32>
    %710 = arith.divf %708, %709 : vector<8x128xf32>
    %711 = vector.extract_strided_slice %698 {offsets = [0, 256], sizes = [8, 128], strides = [1, 1]} : vector<8x512xf32> to vector<8x128xf32>
    %712 = math.tanh %711 : vector<8x128xf32>
    %713 = vector.extract_strided_slice %698 {offsets = [0, 384], sizes = [8, 128], strides = [1, 1]} : vector<8x512xf32> to vector<8x128xf32>
    %714 = arith.negf %713 : vector<8x128xf32>
    %715 = math.exp %714 : vector<8x128xf32>
    %cst_540 = arith.constant 1.000000e+00 : f32
    %716 = vector.broadcast %cst_540 : f32 to vector<8x128xf32>
    %717 = arith.addf %716, %715 : vector<8x128xf32>
    %718 = arith.divf %716, %717 : vector<8x128xf32>
    %719 = arith.mulf %710, %692 : vector<8x128xf32>
    %720 = arith.mulf %704, %712 : vector<8x128xf32>
    %721 = arith.addf %719, %720 : vector<8x128xf32>
    %722 = math.tanh %721 : vector<8x128xf32>
    %723 = arith.mulf %718, %722 : vector<8x128xf32>
    %c7_541 = arith.constant 7 : index
    %c0_542 = arith.constant 0 : index
    %c0_543 = arith.constant 0 : index
    %724 = vector.load %arg14[%c7_541, %c0_542, %c0_543] : memref<8x8x128xf32, #tpu.memory_space<vmem>>, vector<1x8x128xf32>
    %725 = vector.shape_cast %724 : vector<1x8x128xf32> to vector<8x128xf32>
    %726 = vector.shape_cast %723 : vector<8x128xf32> to vector<1x8x128xf32>
    tpu.vector_store %arg14[%c7_541, %c0_542, %c0_543], %726 {strides = array<i32>} : memref<8x8x128xf32, #tpu.memory_space<vmem>>, vector<1x8x128xf32>,
    %c7_544 = arith.constant 7 : index
    %c0_545 = arith.constant 0 : index
    %c0_546 = arith.constant 0 : index
    %727 = vector.load %arg15[%c7_544, %c0_545, %c0_546] : memref<8x8x128xf32, #tpu.memory_space<vmem>>, vector<1x8x128xf32>
    %728 = vector.shape_cast %727 : vector<1x8x128xf32> to vector<8x128xf32>
    %729 = vector.shape_cast %721 : vector<8x128xf32> to vector<1x8x128xf32>
    tpu.vector_store %arg15[%c7_544, %c0_545, %c0_546], %729 {strides = array<i32>} : memref<8x8x128xf32, #tpu.memory_space<vmem>>, vector<1x8x128xf32>,
    %c0_547 = arith.constant 0 : index
    %c0_548 = arith.constant 0 : index
    %730 = vector.load %arg10[%c0_547, %c0_548] : memref<128x8xf32, #tpu.memory_space<vmem>>, vector<128x8xf32>
    %cst_549 = arith.constant dense<0.000000e+00> : vector<8x8xf32>
    %731 = tpu.matmul %723, %730, %cst_549 {dimension_numbers = #tpu.dot_dimension_numbers<[1], [0], [0], [1], [0, 0, 1, 1], [], []>} : vector<8x128xf32>, vector<128x8xf32>, vector<8x8xf32> -> vector<8x8xf32>
    %c0_550 = arith.constant 0 : index
    %c0_551 = arith.constant 0 : index
    %732 = vector.load %arg11[%c0_550, %c0_551] : memref<1x8xf32, #tpu.memory_space<vmem>>, vector<1x8xf32>
    %733 = vector.broadcast %732 : vector<1x8xf32> to vector<8x8xf32>
    %734 = arith.addf %731, %733 : vector<8x8xf32>
    %cst_552 = arith.constant 0.000000e+00 : f32
    %735 = vector.broadcast %cst_552 : f32 to vector<8x8xf32>
    %736 = arith.maximumf %734, %735 : vector<8x8xf32>
    %cst_553 = arith.constant dense<0.000000e+00> : vector<8xf32>
    %737 = vector.multi_reduction <add>, %736, %cst_553 [0] : vector<8x8xf32> to vector<8xf32>
    %738 = vector.shape_cast %737 : vector<8xf32> to vector<1x8xf32>
    %cst_554 = arith.constant 8.000000e+00 : f32
    %739 = vector.broadcast %cst_554 : f32 to vector<1x8xf32>
    %740 = arith.divf %738, %739 : vector<1x8xf32>
    %741 = vector.broadcast %740 : vector<1x8xf32> to vector<8x8xf32>
    %742 = arith.subf %736, %741 : vector<8x8xf32>
    %743 = arith.mulf %742, %742 : vector<8x8xf32>
    %cst_555 = arith.constant dense<0.000000e+00> : vector<8xf32>
    %744 = vector.multi_reduction <add>, %743, %cst_555 [0] : vector<8x8xf32> to vector<8xf32>
    %745 = vector.shape_cast %744 : vector<8xf32> to vector<1x8xf32>
    %cst_556 = arith.constant 8.000000e+00 : f32
    %746 = vector.broadcast %cst_556 : f32 to vector<1x8xf32>
    %747 = arith.divf %745, %746 : vector<1x8xf32>
    %748 = vector.broadcast %740 : vector<1x8xf32> to vector<8x8xf32>
    %749 = arith.subf %736, %748 : vector<8x8xf32>
    %cst_557 = arith.constant 9.99999974E-6 : f32
    %750 = vector.broadcast %cst_557 : f32 to vector<1x8xf32>
    %751 = arith.addf %747, %750 : vector<1x8xf32>
    %752 = math.rsqrt %751 : vector<1x8xf32>
    %753 = vector.broadcast %752 : vector<1x8xf32> to vector<8x8xf32>
    %754 = arith.mulf %749, %753 : vector<8x8xf32>
    %c0_558 = arith.constant 0 : index
    %c0_559 = arith.constant 0 : index
    %755 = vector.load %arg12[%c0_558, %c0_559] : memref<1x8xf32, #tpu.memory_space<vmem>>, vector<1x8xf32>
    %756 = vector.broadcast %755 : vector<1x8xf32> to vector<8x8xf32>
    %757 = arith.mulf %754, %756 : vector<8x8xf32>
    %c0_560 = arith.constant 0 : index
    %c0_561 = arith.constant 0 : index
    %758 = vector.load %arg13[%c0_560, %c0_561] : memref<1x8xf32, #tpu.memory_space<vmem>>, vector<1x8xf32>
    %759 = vector.broadcast %758 : vector<1x8xf32> to vector<8x8xf32>
    %760 = arith.addf %757, %759 : vector<8x8xf32>
    %761 = arith.negf %760 : vector<8x8xf32>
    %762 = math.exp %761 : vector<8x8xf32>
    %cst_562 = arith.constant 1.000000e+00 : f32
    %763 = vector.broadcast %cst_562 : f32 to vector<8x8xf32>
    %764 = arith.addf %763, %762 : vector<8x8xf32>
    %765 = arith.divf %763, %764 : vector<8x8xf32>
    %c0_563 = arith.constant 0 : index
    %c0_564 = arith.constant 0 : index
    %766 = vector.load %arg16[%c0_563, %c0_564] : memref<8x8xf32, #tpu.memory_space<vmem>>, vector<8x8xf32>
    tpu.vector_store %arg16[%c0_563, %c0_564], %765 {strides = array<i32>} : memref<8x8xf32, #tpu.memory_space<vmem>>, vector<8x8xf32>,
    return
  }
}

</mosaic_0001>

<bundles_post_ra>
// kernel: lattice_rnn_forward.1
= control target key start
LH: loop header
LB: loop body
LE: loop exit
PB: predicated region body
PF: predicated region fallthrough
CT: control target
= control target key end

     0   :  { %s13875_s0 = inlined_call_operand.vmem [shape: f32[8,8,1], index: 0, kind: input, shape index: {}]   ;;  %s13876_s1 = inlined_call_operand.vmem [shape: f32[8,128], index: 1, kind: input, shape index: {}]   ;;  %s13877_s2 = inlined_call_operand.vmem [shape: f32[8,128], index: 2, kind: input, shape index: {}]   ;;  %s13878_s3 = inlined_call_operand.vmem [shape: f32[16,8,128], index: 3, kind: input, shape index: {}]   ;;  %s13879_s4 = inlined_call_operand.vmem [shape: f32[16,128,128], index: 4, kind: input, shape index: {}]   ;;  %s13880_s5 = inlined_call_operand.vmem [shape: f32[16,128,128], index: 5, kind: input, shape index: {}]   ;;  %s13881_s6 = inlined_call_operand.vmem [shape: f32[16,1,128], index: 6, kind: input, shape index: {}]   ;;  %s13882_s7 = inlined_call_operand.vmem [shape: f32[8,1,512], index: 7, kind: input, shape index: {}]   ;;  %s13883_s8 = inlined_call_operand.vmem [shape: f32[8,1,512], index: 8, kind: input, shape index: {}]   ;;  %s13884_s9 = inlined_call_operand.vmem [shape: f32[8,128,512], index: 9, kind: input, shape index: {}]   ;;  %s13885_s10 = inlined_call_operand.vmem [shape: f32[128,8], index: 10, kind: input, shape index: {}]   ;;  %s13886_s11 = inlined_call_operand.vmem [shape: f32[1,8], index: 11, kind: input, shape index: {}]   ;;  %s13887_s12 = inlined_call_operand.vmem [shape: f32[1,8], index: 12, kind: input, shape index: {}]   ;;  %s13888_s13 = inlined_call_operand.vmem [shape: f32[1,8], index: 13, kind: input, shape index: {}]   ;;  %s13889_s14 = inlined_call_operand.vmem [shape: f32[8,8,128], index: 14, kind: output, shape index: {0}]   ;;  %s13890_s15 = inlined_call_operand.vmem [shape: f32[8,8,128], index: 15, kind: output, shape index: {1}]   ;;  %s13891_s16 = inlined_call_operand.hbm [shape: f32[8,8], index: 16, kind: output, shape index: {2}]  }
   0x1   :  { %13893 = sst [smem:[#allocation7_spill]] %s13875_s0 }
   0x2   :  { %v52_v0 = vld [vmem:[%s13880_s5] sm:$0xff]  ;;  %v53_v1 = vld [vmem:[%s13880_s5 + $0x8] sm:$0xff]  ;;  %v54_v2 = vld [vmem:[%s13880_s5 + $0x10] sm:$0xff]  ;;  %v9953_v3 = vmov 0.0|0.0   ;;  %vm9954_vm0 = vmmov 0   ;;  %v9955_v6 = vmov 0.0  }
   0x3   :  { %8436 = vmatprep.subr.bf16.mxu0 %v9953_v3  ;;  %v8437_v4 = vpack.c.bf16 %v53_v1, %v52_v0  ;;  %v55_v5 = vld [vmem:[%s13880_s5 + $0x18] sm:$0xff]  ;;  %7313 = vmatprep.mubr.msk.f32.mxu0 %vm9954_vm0, %v9955_v6  ;;  %v56_v8 = vld [vmem:[%s13880_s5 + $0x20] sm:$0xff]  ;;  %v57_v9 = vld [vmem:[%s13880_s5 + $0x28] sm:$0xff] }
   0x4   :  { %8460 = vmatprep.subr.bf16.mxu1 %v9953_v3  ;;  %7348 = vmatprep.mubr.msk.f32.mxu1 %vm9954_vm0, %v9955_v6  ;;  %v8440_v7 = vpack.c.bf16 %v55_v5, %v54_v2  ;;  %v8443_v10 = vpack.c.bf16 %v57_v9, %v56_v8  ;;  %v58_v11 = vld [vmem:[%s13880_s5 + $0x30] sm:$0xff]  ;;  %v59_v12 = vld [vmem:[%s13880_s5 + $0x38] sm:$0xff]  ;;  %v60_v14 = vld [vmem:[%s13880_s5 + $0x40] sm:$0xff] }
   0x5   :  { %8438 = vmatpush3.bf16.msra.mxu0 %v8437_v4  ;;  %v8446_v13 = vpack.c.bf16 %v59_v12, %v58_v11  ;;  %v61_v15 = vld [vmem:[%s13880_s5 + $0x48] sm:$0xff]  ;;  %v62_v17 = vld [vmem:[%s13880_s5 + $0x50] sm:$0xff]  ;;  %v63_v18 = vld [vmem:[%s13880_s5 + $0x58] sm:$0xff] }
   0x6   :  { %8439 = vmatprep.subr.bf16.mxu0 %v9953_v3  ;;  %v8449_v16 = vpack.c.bf16 %v61_v15, %v60_v14  ;;  %v8452_v19 = vpack.c.bf16 %v63_v18, %v62_v17  ;;  %v64_v20 = vld [vmem:[%s13880_s5 + $0x60] sm:$0xff]  ;;  %v65_v21 = vld [vmem:[%s13880_s5 + $0x68] sm:$0xff]  ;;  %v66_v23 = vld [vmem:[%s13880_s5 + $0x70] sm:$0xff] }
   0x7   :  { %v8455_v22 = vpack.c.bf16 %v65_v21, %v64_v20  ;;  %v67_v24 = vld [vmem:[%s13880_s5 + $0x78] sm:$0xff] }
   0x8   :  { %v8458_v25 = vpack.c.bf16 %v67_v24, %v66_v23 }
   0x9   :  { %8441 = vmatpush3.bf16.msra.mxu0 %v8440_v7 }
   0xa   :  { %8442 = vmatprep.subr.bf16.mxu0 %v9953_v3 }
   0xd   :  { %8444 = vmatpush3.bf16.msra.mxu0 %v8443_v10 }
   0xe   :  { %8445 = vmatprep.subr.bf16.mxu0 %v9953_v3 }
  0x11   :  { %8447 = vmatpush3.bf16.msra.mxu0 %v8446_v13 }
  0x12   :  { %8448 = vmatprep.subr.bf16.mxu0 %v9953_v3 }
  0x15   :  { %8450 = vmatpush3.bf16.msra.mxu0 %v8449_v16 }
  0x16   :  { %8451 = vmatprep.subr.bf16.mxu0 %v9953_v3 }
  0x19   :  { %8453 = vmatpush3.bf16.msra.mxu0 %v8452_v19 }
  0x1a   :  { %8454 = vmatprep.subr.bf16.mxu0 %v9953_v3 }
  0x1d   :  { %8456 = vmatpush3.bf16.msra.mxu0 %v8455_v22 }
  0x1e   :  { %22 = vsyncpa [#allocation5], 0  ;;  %8457 = vmatprep.subr.bf16.mxu0 %v9953_v3  ;;  %v5704_v26 = vld [vmem:[%s13880_s5 + $0x100] sm:$0xff]  ;;  %v5705_v27 = vld [vmem:[%s13880_s5 + $0x108] sm:$0xff]  ;;  %s13894_s22 = sld [smem:[#allocation7_spill]]  ;;  %vm5615_vm1 = vcmask 64512  }
  0x1f   :  { %v51_v28 = vld [vmem:[%s13878_s3] sm:$0xff]  ;;  %v8485_v29 = vpack.c.bf16 %v5705_v27, %v5704_v26  ;;  %v5706_v30 = vld [vmem:[%s13880_s5 + $0x110] sm:$0xff]  ;;  %v5707_v31 = vld [vmem:[%s13880_s5 + $0x118] sm:$0xff]  ;;  %s9957_s25 = smov [#allocation4]  }
  0x20   :  { %v8488_v32 = vpack.c.bf16 %v5707_v31, %v5706_v30  ;;  %v5708_v33 = vld [vmem:[%s13880_s5 + $0x120] sm:$0xff]  ;;  %v5709_v34 = vld [vmem:[%s13880_s5 + $0x128] sm:$0xff]  ;;  %v5710_v36 = vld [vmem:[%s13880_s5 + $0x130] sm:$0xff]  ;;  %s5671_s26 = sshll.u32 %s9957_s25, 4  ;;  %s5672_s26 = int_to_ptr.vmem [resolvable:$true] %s5671_s26 }
  0x21   :  { %8459 = vmatpush3.bf16.msra.mxu0 %v8458_v25  ;;  %v8491_v35 = vpack.c.bf16 %v5709_v34, %v5708_v33  ;;  %v5711_v37 = vld [vmem:[%s13880_s5 + $0x138] sm:$0xff]  ;;  %v5712_v39 = vld [vmem:[%s13880_s5 + $0x140] sm:$0xff]  ;;  %v5713_v40 = vld [vmem:[%s13880_s5 + $0x148] sm:$0xff]  ;;  %s9929_s27 = scalar_lea.vmem %s5672_s26, 128  ;;  %p9934_p1 = scmp.lt.s32.totalorder %s5672_s26, %s5672_s26 }
  0x22   :  { %8484 = vmatprep.subr.bf16.mxu0 %v9953_v3  ;;  %v8494_v38 = vpack.c.bf16 %v5711_v37, %v5710_v36  ;;  %v8497_v41 = vpack.c.bf16 %v5713_v40, %v5712_v39  ;;  %v5714_v42 = vld [vmem:[%s13880_s5 + $0x150] sm:$0xff]  ;;  %v5715_v43 = vld [vmem:[%s13880_s5 + $0x158] sm:$0xff]  ;;  %v5716_v45 = vld [vmem:[%s13880_s5 + $0x160] sm:$0xff]  ;;  %p9930_p0 = scmp.ne.s32.totalorder %s5672_s26, %s9929_s27  ;;  %p9935_p2 = scmp.lt.s32.totalorder %s9929_s27, %s9929_s27 }
  0x23   :  { %v8500_v44 = vpack.c.bf16 %v5715_v43, %v5714_v42  ;;  %v5717_v46 = vld [vmem:[%s13880_s5 + $0x168] sm:$0xff]  ;;  %v5718_v48 = vld [vmem:[%s13880_s5 + $0x170] sm:$0xff]  ;;  %v5719_v49 = vld [vmem:[%s13880_s5 + $0x178] sm:$0xff] }
  0x24   :  { %7314 = vmatmul.mubr.f32.vlgmr.msra.gmra.mrb[0].mxu0 %v51_v28  ;;  %v8503_v47 = vpack.c.bf16 %v5717_v46, %v5716_v45  ;;  %v8506_v50 = vpack.c.bf16 %v5719_v49, %v5718_v48  ;;  %v5742_v51 = vld [vmem:[%s13880_s5 + $0x200] sm:$0xff]  ;;  %v5743_v52 = vld [vmem:[%s13880_s5 + $0x208] sm:$0xff]  ;;  %v5703_v53 = vld [vmem:[%s13878_s3 + $0x10] sm:$0xff]  ;;  %p9936_p3 = por %p9935_p2, %p9934_p1 }
  0x25   :  { %8486 = vmatpush3.bf16.msra.mxu0 %v8485_v29  ;;  %7383 = vmatprep.mubr.msk.f32.mxu0 %vm9954_vm0, %v9955_v6  ;;  %v8533_v54 = vpack.c.bf16 %v5743_v52, %v5742_v51  ;;  %v5744_v55 = vld [vmem:[%s13880_s5 + $0x210] sm:$0xff]  ;;  %v5745_v56 = vld [vmem:[%s13880_s5 + $0x218] sm:$0xff]  ;;  %v5746_v58 = vld [vmem:[%s13880_s5 + $0x220] sm:$0xff] }
  0x26   :  { %8487 = vmatprep.subr.bf16.mxu0 %v9953_v3  ;;  %v8536_v57 = vpack.c.bf16 %v5745_v56, %v5744_v55  ;;  %v5747_v59 = vld [vmem:[%s13880_s5 + $0x228] sm:$0xff]  ;;  %v5748_v61 = vld [vmem:[%s13880_s5 + $0x230] sm:$0xff]  ;;  %v5749_v62 = vld [vmem:[%s13880_s5 + $0x238] sm:$0xff]  ;;  %p9937_p4 = pnand %p9936_p3, %p9930_p0 }
  0x27   :  { %v8539_v60 = vpack.c.bf16 %v5747_v59, %v5746_v58  ;;  %v8542_v63 = vpack.c.bf16 %v5749_v62, %v5748_v61  ;;  %v5750_v0 = vld [vmem:[%s13880_s5 + $0x240] sm:$0xff]  ;;  %v5751_v1 = vld [vmem:[%s13880_s5 + $0x248] sm:$0xff]  ;;  %v5752_v4 = vld [vmem:[%s13880_s5 + $0x250] sm:$0xff] }
  0x28   :  { %v8545_v2 = vpack.c.bf16 %v5751_v1, %v5750_v0  ;;  %v5753_v5 = vld [vmem:[%s13880_s5 + $0x258] sm:$0xff]  ;;  %v5754_v8 = vld [vmem:[%s13880_s5 + $0x260] sm:$0xff]  ;;  %v5755_v9 = vld [vmem:[%s13880_s5 + $0x268] sm:$0xff] }
  0x29   :  { %8489 = vmatpush3.bf16.msra.mxu0 %v8488_v32  ;;  %v8548_v7 = vpack.c.bf16 %v5753_v5, %v5752_v4  ;;  %v8551_v10 = vpack.c.bf16 %v5755_v9, %v5754_v8  ;;  %v5685_v11 = vld [vmem:[%s13880_s5 + $0x80] sm:$0xff]  ;;  %v5686_v12 = vld [vmem:[%s13880_s5 + $0x88] sm:$0xff]  ;;  %v5756_v13 = vld [vmem:[%s13880_s5 + $0x270] sm:$0xff] }
  0x2a   :  { %8490 = vmatprep.subr.bf16.mxu0 %v9953_v3  ;;  %v5757_v14 = vld [vmem:[%s13880_s5 + $0x278] sm:$0xff]  ;;  %v8461_v15 = vpack.c.bf16 %v5686_v12, %v5685_v11  ;;  %v5687_v17 = vld [vmem:[%s13880_s5 + $0x90] sm:$0xff]  ;;  %v5780_v19 = vld [vmem:[%s13880_s5 + $0x300] sm:$0xff] }
  0x2b   :  { %v8554_v16 = vpack.c.bf16 %v5757_v14, %v5756_v13  ;;  %v5688_v18 = vld [vmem:[%s13880_s5 + $0x98] sm:$0xff]  ;;  %v5781_v20 = vld [vmem:[%s13880_s5 + $0x308] sm:$0xff]  ;;  %v5741_v22 = vld [vmem:[%s13878_s3 + $0x20] sm:$0xff] }
  0x2c   :  { %8462 = vmatpush3.bf16.msra.mxu1 %v8461_v15  ;;  %v8464_v21 = vpack.c.bf16 %v5688_v18, %v5687_v17  ;;  %v8581_v23 = vpack.c.bf16 %v5781_v20, %v5780_v19  ;;  %v5689_v24 = vld [vmem:[%s13880_s5 + $0xa0] sm:$0xff]  ;;  %v5690_v25 = vld [vmem:[%s13880_s5 + $0xa8] sm:$0xff]  ;;  %v5782_v26 = vld [vmem:[%s13880_s5 + $0x310] sm:$0xff] }
  0x2d   :  { %8492 = vmatpush3.bf16.msra.mxu0 %v8491_v35  ;;  %8463 = vmatprep.subr.bf16.mxu1 %v9953_v3  ;;  %v5783_v27 = vld [vmem:[%s13880_s5 + $0x318] sm:$0xff]  ;;  %v8467_v28 = vpack.c.bf16 %v5690_v25, %v5689_v24  ;;  %v5691_v30 = vld [vmem:[%s13880_s5 + $0xb0] sm:$0xff]  ;;  %v5784_v32 = vld [vmem:[%s13880_s5 + $0x320] sm:$0xff] }
  0x2e   :  { %8493 = vmatprep.subr.bf16.mxu0 %v9953_v3  ;;  %v8584_v29 = vpack.c.bf16 %v5783_v27, %v5782_v26  ;;  %v5692_v31 = vld [vmem:[%s13880_s5 + $0xb8] sm:$0xff]  ;;  %v5785_v33 = vld [vmem:[%s13880_s5 + $0x328] sm:$0xff]  ;;  %v5693_v36 = vld [vmem:[%s13880_s5 + $0xc0] sm:$0xff] }
  0x2f   :  { %v8470_v34 = vpack.c.bf16 %v5692_v31, %v5691_v30  ;;  %v8587_v35 = vpack.c.bf16 %v5785_v33, %v5784_v32  ;;  %v5694_v37 = vld [vmem:[%s13880_s5 + $0xc8] sm:$0xff]  ;;  %v5787_v39 = vld [vmem:[%s13880_s5 + $0x338] sm:$0xff]  ;;  %v5695_v42 = vld [vmem:[%s13880_s5 + $0xd0] sm:$0xff] }
  0x30   :  { %8465 = vmatpush3.bf16.msra.mxu1 %v8464_v21  ;;  %v8473_v40 = vpack.c.bf16 %v5694_v37, %v5693_v36  ;;  %v5696_v43 = vld [vmem:[%s13880_s5 + $0xd8] sm:$0xff]  ;;  %v5789_v45 = vld [vmem:[%s13880_s5 + $0x348] sm:$0xff]  ;;  %v5697_v48 = vld [vmem:[%s13880_s5 + $0xe0] sm:$0xff] }
  0x31   :  { %8495 = vmatpush3.bf16.msra.mxu0 %v8494_v38  ;;  %8466 = vmatprep.subr.bf16.mxu1 %v9953_v3  ;;  %v5786_v38 = vld [vmem:[%s13880_s5 + $0x330] sm:$0xff]  ;;  %v8476_v46 = vpack.c.bf16 %v5696_v43, %v5695_v42  ;;  %v5698_v49 = vld [vmem:[%s13880_s5 + $0xe8] sm:$0xff]  ;;  %v5791_v51 = vld [vmem:[%s13880_s5 + $0x358] sm:$0xff] }
  0x32   :  { %8496 = vmatprep.subr.bf16.mxu0 %v9953_v3  ;;  %v8479_v52 = vpack.c.bf16 %v5698_v49, %v5697_v48  ;;  %v5700_v55 = vld [vmem:[%s13880_s5 + $0xf8] sm:$0xff]  ;;  %v5792_v56 = vld [vmem:[%s13880_s5 + $0x360] sm:$0xff]  ;;  %v5724_v62 = vld [vmem:[%s13880_s5 + $0x188] sm:$0xff] }
  0x33   :  { %v5723_v61 = vld [vmem:[%s13880_s5 + $0x180] sm:$0xff]  ;;  %v5795_v0 = vld [vmem:[%s13880_s5 + $0x378] sm:$0xff]  ;;  %v5725_v4 = vld [vmem:[%s13880_s5 + $0x190] sm:$0xff] }
  0x34   :  { %8468 = vmatpush3.bf16.msra.mxu1 %v8467_v28  ;;  %v8509_v1 = vpack.c.bf16 %v5724_v62, %v5723_v61  ;;  %v5726_v5 = vld [vmem:[%s13880_s5 + $0x198] sm:$0xff]  ;;  %v5819_v8 = vld [vmem:[%s13880_s5 + $0x408] sm:$0xff]  ;;  %v5727_v12 = vld [vmem:[%s13880_s5 + $0x1a0] sm:$0xff] }
  0x35   :  { %8498 = vmatpush3.bf16.msra.mxu0 %v8497_v41  ;;  %8469 = vmatprep.subr.bf16.mxu1 %v9953_v3  ;;  %v8590_v41 = vpack.c.bf16 %v5787_v39, %v5786_v38  ;;  %v8512_v9 = vpack.c.bf16 %v5726_v5, %v5725_v4  ;;  %v5728_v13 = vld [vmem:[%s13880_s5 + $0x1a8] sm:$0xff]  ;;  %v5820_v14 = vld [vmem:[%s13880_s5 + $0x410] sm:$0xff]  ;;  %v5821_v15 = vld [vmem:[%s13880_s5 + $0x418] sm:$0xff] }
  0x36   :  { %8499 = vmatprep.subr.bf16.mxu0 %v9953_v3  ;;  %v8632_v17 = vpack.c.bf16 %v5821_v15, %v5820_v14  ;;  %v5729_v18 = vld [vmem:[%s13880_s5 + $0x1b0] sm:$0xff]  ;;  %v5730_v19 = vld [vmem:[%s13880_s5 + $0x1b8] sm:$0xff]  ;;  %v5822_v20 = vld [vmem:[%s13880_s5 + $0x420] sm:$0xff] }
  0x37   :  { %v5823_v21 = vld [vmem:[%s13880_s5 + $0x428] sm:$0xff]  ;;  %v5731_v24 = vld [vmem:[%s13880_s5 + $0x1c0] sm:$0xff]  ;;  %v5824_v26 = vld [vmem:[%s13880_s5 + $0x430] sm:$0xff] }
  0x38   :  { %8471 = vmatpush3.bf16.msra.mxu1 %v8470_v34  ;;  %v5732_v25 = vld [vmem:[%s13880_s5 + $0x1c8] sm:$0xff]  ;;  %v5825_v27 = vld [vmem:[%s13880_s5 + $0x438] sm:$0xff]  ;;  %v5733_v30 = vld [vmem:[%s13880_s5 + $0x1d0] sm:$0xff] }
  0x39   :  { %8501 = vmatpush3.bf16.msra.mxu0 %v8500_v44  ;;  %8472 = vmatprep.subr.bf16.mxu1 %v9953_v3  ;;  %v5788_v44 = vld [vmem:[%s13880_s5 + $0x340] sm:$0xff]  ;;  %v8521_v28 = vpack.c.bf16 %v5732_v25, %v5731_v24  ;;  %v5734_v31 = vld [vmem:[%s13880_s5 + $0x1d8] sm:$0xff]  ;;  %v5827_v33 = vld [vmem:[%s13880_s5 + $0x448] sm:$0xff] }
  0x3a   :  { %8502 = vmatprep.subr.bf16.mxu0 %v9953_v3  ;;  %v5826_v32 = vld [vmem:[%s13880_s5 + $0x440] sm:$0xff]  ;;  %v8524_v34 = vpack.c.bf16 %v5734_v31, %v5733_v30  ;;  %v5736_v37 = vld [vmem:[%s13880_s5 + $0x1e8] sm:$0xff]  ;;  %v5828_v38 = vld [vmem:[%s13880_s5 + $0x450] sm:$0xff] }
  0x3b   :  { %v5735_v36 = vld [vmem:[%s13880_s5 + $0x1e0] sm:$0xff]  ;;  %v5829_v39 = vld [vmem:[%s13880_s5 + $0x458] sm:$0xff]  ;;  %v5737_v42 = vld [vmem:[%s13880_s5 + $0x1f0] sm:$0xff] }
  0x3c   :  { %8474 = vmatpush3.bf16.msra.mxu1 %v8473_v40  ;;  %v8527_v40 = vpack.c.bf16 %v5736_v37, %v5735_v36  ;;  %v5738_v43 = vld [vmem:[%s13880_s5 + $0x1f8] sm:$0xff]  ;;  %v5761_v49 = vld [vmem:[%s13880_s5 + $0x280] sm:$0xff]  ;;  %v5767_v5 = vld [vmem:[%s13880_s5 + $0x2b0] sm:$0xff] }
  0x3d   :  { %8504 = vmatpush3.bf16.msra.mxu0 %v8503_v47  ;;  %8475 = vmatprep.subr.bf16.mxu1 %v9953_v3  ;;  %v8593_v47 = vpack.c.bf16 %v5789_v45, %v5788_v44  ;;  %v5830_v44 = vld [vmem:[%s13880_s5 + $0x460] sm:$0xff]  ;;  %v5831_v45 = vld [vmem:[%s13880_s5 + $0x468] sm:$0xff]  ;;  %v5722_v48 = vld [vmem:[%s13878_s3 + $0x18] sm:$0xff] }
  0x3e   :  { %8505 = vmatprep.subr.bf16.mxu0 %v9953_v3  ;;  %v5765_v62 = vld [vmem:[%s13880_s5 + $0x2a0] sm:$0xff]  ;;  %v5862_v14 = vld [vmem:[%s13880_s5 + $0x530] sm:$0xff]  ;;  %v5863_v15 = vld [vmem:[%s13880_s5 + $0x538] sm:$0xff] }
  0x3f   :  { %v5773_v24 = vld [vmem:[%s13880_s5 + $0x2e0] sm:$0xff]  ;;  %v5774_v25 = vld [vmem:[%s13880_s5 + $0x2e8] sm:$0xff]  ;;  %v5775_v30 = vld [vmem:[%s13880_s5 + $0x2f0] sm:$0xff] }
  0x40   :  { %8477 = vmatpush3.bf16.msra.mxu1 %v8476_v46  ;;  %v8530_v46 = vpack.c.bf16 %v5738_v43, %v5737_v42  ;;  %v5776_v31 = vld [vmem:[%s13880_s5 + $0x2f8] sm:$0xff]  ;;  %v5760_v36 = vld [vmem:[%s13878_s3 + $0x28] sm:$0xff]  ;;  %v5799_v37 = vld [vmem:[%s13880_s5 + $0x380] sm:$0xff] }
  0x41   :  { %8507 = vmatpush3.bf16.msra.mxu0 %v8506_v50  ;;  %8478 = vmatprep.subr.bf16.mxu1 %v9953_v3  ;;  %v5790_v50 = vld [vmem:[%s13880_s5 + $0x350] sm:$0xff] }
  0x42   :  { %8532 = vmatprep.subr.bf16.mxu0 %v9953_v3  ;;  %v5801_v43 = vld [vmem:[%s13880_s5 + $0x390] sm:$0xff] }
  0x44   :  { %7384 = vmatmul.mubr.f32.vlgmr.msra.gmra.mrb[2].mxu0 %v5703_v53  ;;  %8480 = vmatpush3.bf16.msra.mxu1 %v8479_v52  ;;  %v8596_v53 = vpack.c.bf16 %v5791_v51, %v5790_v50  ;;  %v5762_v50 = vld [vmem:[%s13880_s5 + $0x288] sm:$0xff]  ;;  %v5832_v51 = vld [vmem:[%s13880_s5 + $0x470] sm:$0xff]  ;;  %v5833_v52 = vld [vmem:[%s13880_s5 + $0x478] sm:$0xff] }
  0x45   :  { %8534 = vmatpush3.bf16.msra.mxu0 %v8533_v54  ;;  %7453 = vmatprep.mubr.msk.f32.mxu0 %vm9954_vm0, %v9955_v6  ;;  %v5699_v54 = vld [vmem:[%s13880_s5 + $0xf0] sm:$0xff] }
  0x46   :  { %8535 = vmatprep.subr.bf16.mxu0 %v9953_v3  ;;  %8481 = vmatprep.subr.bf16.mxu1 %v9953_v3  ;;  %v8482_v58 = vpack.c.bf16 %v5700_v55, %v5699_v54  ;;  %v8650_v54 = vpack.c.bf16 %v5833_v52, %v5832_v51  ;;  %v5763_v55 = vld [vmem:[%s13880_s5 + $0x290] sm:$0xff]  ;;  %v5804_v51 = vld [vmem:[%s13880_s5 + $0x3a8] sm:$0xff] }
  0x47   :  { %v5896_v52 = vld [vmem:[%s13880_s5 + $0x610] sm:$0xff] }
  0x48   :  { %8483 = vmatpush3.bf16.msra.mxu1 %v8482_v58  ;;  %v5857_v58 = vld [vmem:[%s13880_s5 + $0x508] sm:$0xff] }
  0x49   :  { %8537 = vmatpush3.bf16.msra.mxu0 %v8536_v57  ;;  %v5793_v57 = vld [vmem:[%s13880_s5 + $0x368] sm:$0xff]  ;;  %8508 = vmatprep.subr.bf16.mxu1 %v9953_v3 }
  0x4a   :  { %8538 = vmatprep.subr.bf16.mxu0 %v9953_v3  ;;  %v8599_v59 = vpack.c.bf16 %v5793_v57, %v5792_v56  ;;  %v5764_v56 = vld [vmem:[%s13880_s5 + $0x298] sm:$0xff]  ;;  %v5856_v57 = vld [vmem:[%s13880_s5 + $0x500] sm:$0xff] }
  0x4b   :  { %v8677_v61 = vpack.c.bf16 %v5857_v58, %v5856_v57 }
  0x4d   :  { %8540 = vmatpush3.bf16.msra.mxu0 %v8539_v60  ;;  %v5684_v60 = vld [vmem:[%s13878_s3 + $0x8] sm:$0xff] }
  0x4e   :  { %8541 = vmatprep.subr.bf16.mxu0 %v9953_v3  ;;  %7349 = vmatmul.mubr.f32.vlgmr.msra.gmra.mrb[0].mxu1 %v5684_v60  ;;  %v5817_v60 = vld [vmem:[%s13878_s3 + $0x40] sm:$0xff] }
  0x4f   :  { %8510 = vmatpush3.bf16.msra.mxu1 %v8509_v1  ;;  %7418 = vmatprep.mubr.msk.f32.mxu1 %vm9954_vm0, %v9955_v6  ;;  %v5859_v1 = vld [vmem:[%s13880_s5 + $0x518] sm:$0xff] }
  0x50   :  { %8511 = vmatprep.subr.bf16.mxu1 %v9953_v3 }
  0x51   :  { %8543 = vmatpush3.bf16.msra.mxu0 %v8542_v63  ;;  %v5794_v63 = vld [vmem:[%s13880_s5 + $0x370] sm:$0xff] }
  0x52   :  { %8544 = vmatprep.subr.bf16.mxu0 %v9953_v3 }
  0x53   :  { %8513 = vmatpush3.bf16.msra.mxu1 %v8512_v9  ;;  %v5861_v9 = vld [vmem:[%s13880_s5 + $0x528] sm:$0xff] }
  0x54   :  { %8514 = vmatprep.subr.bf16.mxu1 %v9953_v3 }
  0x55   :  { %8546 = vmatpush3.bf16.msra.mxu0 %v8545_v2  ;;  %v8602_v2 = vpack.c.bf16 %v5795_v0, %v5794_v63  ;;  %v5766_v63 = vld [vmem:[%s13880_s5 + $0x2a8] sm:$0xff]  ;;  %v5858_v0 = vld [vmem:[%s13880_s5 + $0x510] sm:$0xff] }
  0x56   :  { %8547 = vmatprep.subr.bf16.mxu0 %v9953_v3  ;;  %v8680_v4 = vpack.c.bf16 %v5859_v1, %v5858_v0  ;;  %v5809_v1 = vld [vmem:[%s13880_s5 + $0x3d0] sm:$0xff] }
  0x59   :  { %8549 = vmatpush3.bf16.msra.mxu0 %v8548_v7  ;;  %v5818_v7 = vld [vmem:[%s13880_s5 + $0x400] sm:$0xff] }
  0x5a   :  { %8550 = vmatprep.subr.bf16.mxu0 %v9953_v3  ;;  %v8629_v11 = vpack.c.bf16 %v5819_v8, %v5818_v7  ;;  %v5768_v7 = vld [vmem:[%s13880_s5 + $0x2b8] sm:$0xff]  ;;  %v5860_v8 = vld [vmem:[%s13880_s5 + $0x520] sm:$0xff] }
  0x5d   :  { %8552 = vmatpush3.bf16.msra.mxu0 %v8551_v10  ;;  %v5779_v10 = vld [vmem:[%s13878_s3 + $0x30] sm:$0xff] }
  0x5e   :  { %8553 = vmatprep.subr.bf16.mxu0 %v9953_v3 }
  0x61   :  { %8555 = vmatpush3.bf16.msra.mxu0 %v8554_v16  ;;  %v8515_v16 = vpack.c.bf16 %v5728_v13, %v5727_v12  ;;  %v5769_v12 = vld [vmem:[%s13880_s5 + $0x2c0] sm:$0xff]  ;;  %v5770_v13 = vld [vmem:[%s13880_s5 + $0x2c8] sm:$0xff] }
  0x62   :  { %8580 = vmatprep.subr.bf16.mxu0 %v9953_v3 }
  0x63   :  { %8516 = vmatpush3.bf16.msra.mxu1 %v8515_v16  ;;  %v8569_v16 = vpack.c.bf16 %v5770_v13, %v5769_v12  ;;  %v5903_v12 = vld [vmem:[%s13880_s5 + $0x648] sm:$0xff] }
  0x64   :  { %7454 = vmatmul.mubr.f32.vlgmr.msra.gmra.mrb[4].mxu0 %v5741_v22  ;;  %8517 = vmatprep.subr.bf16.mxu1 %v9953_v3  ;;  %v8518_v22 = vpack.c.bf16 %v5730_v19, %v5729_v18  ;;  %v5771_v18 = vld [vmem:[%s13880_s5 + $0x2d0] sm:$0xff]  ;;  %v5772_v19 = vld [vmem:[%s13880_s5 + $0x2d8] sm:$0xff] }
  0x65   :  { %8582 = vmatpush3.bf16.msra.mxu0 %v8581_v23  ;;  %7523 = vmatprep.mubr.msk.f32.mxu0 %vm9954_vm0, %v9955_v6  ;;  %v8635_v23 = vpack.c.bf16 %v5823_v21, %v5822_v20  ;;  %v5864_v20 = vld [vmem:[%s13880_s5 + $0x540] sm:$0xff]  ;;  %v5865_v21 = vld [vmem:[%s13880_s5 + $0x548] sm:$0xff] }
  0x66   :  { %8583 = vmatprep.subr.bf16.mxu0 %v9953_v3 }
  0x67   :  { %8519 = vmatpush3.bf16.msra.mxu1 %v8518_v22  ;;  %v8572_v22 = vpack.c.bf16 %v5772_v19, %v5771_v18  ;;  %v5905_v18 = vld [vmem:[%s13880_s5 + $0x658] sm:$0xff] }
  0x68   :  { %8520 = vmatprep.subr.bf16.mxu1 %v9953_v3 }
  0x69   :  { %8585 = vmatpush3.bf16.msra.mxu0 %v8584_v29  ;;  %v8638_v29 = vpack.c.bf16 %v5825_v27, %v5824_v26  ;;  %v5866_v26 = vld [vmem:[%s13880_s5 + $0x550] sm:$0xff]  ;;  %v5867_v27 = vld [vmem:[%s13880_s5 + $0x558] sm:$0xff] }
  0x6a   :  { %8586 = vmatprep.subr.bf16.mxu0 %v9953_v3 }
  0x6b   :  { %8522 = vmatpush3.bf16.msra.mxu1 %v8521_v28  ;;  %v8575_v28 = vpack.c.bf16 %v5774_v25, %v5773_v24  ;;  %v5907_v24 = vld [vmem:[%s13880_s5 + $0x668] sm:$0xff]  ;;  %v5798_v25 = vld [vmem:[%s13878_s3 + $0x38] sm:$0xff] }
  0x6c   :  { %8523 = vmatprep.subr.bf16.mxu1 %v9953_v3 }
  0x6d   :  { %8588 = vmatpush3.bf16.msra.mxu0 %v8587_v35  ;;  %v8641_v35 = vpack.c.bf16 %v5827_v33, %v5826_v32  ;;  %v5868_v32 = vld [vmem:[%s13880_s5 + $0x560] sm:$0xff]  ;;  %v5869_v33 = vld [vmem:[%s13880_s5 + $0x568] sm:$0xff] }
  0x6e   :  { %8589 = vmatprep.subr.bf16.mxu0 %v9953_v3 }
  0x6f   :  { %8525 = vmatpush3.bf16.msra.mxu1 %v8524_v34  ;;  %v8578_v34 = vpack.c.bf16 %v5776_v31, %v5775_v30  ;;  %v5908_v30 = vld [vmem:[%s13880_s5 + $0x670] sm:$0xff]  ;;  %v5909_v31 = vld [vmem:[%s13880_s5 + $0x678] sm:$0xff] }
  0x70   :  { %8526 = vmatprep.subr.bf16.mxu1 %v9953_v3 }
  0x71   :  { %8591 = vmatpush3.bf16.msra.mxu0 %v8590_v41  ;;  %v8644_v41 = vpack.c.bf16 %v5829_v39, %v5828_v38  ;;  %v5800_v38 = vld [vmem:[%s13880_s5 + $0x388] sm:$0xff]  ;;  %v5870_v39 = vld [vmem:[%s13880_s5 + $0x570] sm:$0xff] }
  0x72   :  { %8592 = vmatprep.subr.bf16.mxu0 %v9953_v3 }
  0x73   :  { %8528 = vmatpush3.bf16.msra.mxu1 %v8527_v40  ;;  %v5871_v40 = vld [vmem:[%s13880_s5 + $0x578] sm:$0xff] }
  0x74   :  { %8529 = vmatprep.subr.bf16.mxu1 %v9953_v3  ;;  %v8698_v42 = vpack.c.bf16 %v5871_v40, %v5870_v39  ;;  %v5893_v39 = vld [vmem:[%s13878_s3 + $0x60] sm:$0xff] }
  0x75   :  { %8594 = vmatpush3.bf16.msra.mxu0 %v8593_v47  ;;  %v8647_v47 = vpack.c.bf16 %v5831_v45, %v5830_v44  ;;  %v5802_v44 = vld [vmem:[%s13880_s5 + $0x398] sm:$0xff]  ;;  %v5894_v45 = vld [vmem:[%s13880_s5 + $0x600] sm:$0xff] }
  0x76   :  { %8595 = vmatprep.subr.bf16.mxu0 %v9953_v3 }
  0x77   :  { %8531 = vmatpush3.bf16.msra.mxu1 %v8530_v46  ;;  %v5895_v46 = vld [vmem:[%s13880_s5 + $0x608] sm:$0xff] }
  0x78   :  { %8556 = vmatprep.subr.bf16.mxu1 %v9953_v3 }
  0x79   :  { %8597 = vmatpush3.bf16.msra.mxu0 %v8596_v53  ;;  %v8557_v53 = vpack.c.bf16 %v5762_v50, %v5761_v49  ;;  %v8725_v49 = vpack.c.bf16 %v5895_v46, %v5894_v45  ;;  %v5803_v50 = vld [vmem:[%s13880_s5 + $0x3a0] sm:$0xff] }
  0x7a   :  { %8598 = vmatprep.subr.bf16.mxu0 %v9953_v3  ;;  %7419 = vmatmul.mubr.f32.vlgmr.msra.gmra.mrb[2].mxu1 %v5722_v48  ;;  %v5855_v48 = vld [vmem:[%s13878_s3 + $0x50] sm:$0xff] }
  0x7b   :  { %8558 = vmatpush3.bf16.msra.mxu1 %v8557_v53  ;;  %7488 = vmatprep.mubr.msk.f32.mxu1 %vm9954_vm0, %v9955_v6  ;;  %v5897_v53 = vld [vmem:[%s13880_s5 + $0x618] sm:$0xff] }
  0x7c   :  { %8559 = vmatprep.subr.bf16.mxu1 %v9953_v3  ;;  %v8728_v57 = vpack.c.bf16 %v5897_v53, %v5896_v52  ;;  %v5847_v53 = vld [vmem:[%s13880_s5 + $0x4d0] sm:$0xff] }
  0x7d   :  { %8600 = vmatpush3.bf16.msra.mxu0 %v8599_v59  ;;  %v8560_v59 = vpack.c.bf16 %v5764_v56, %v5763_v55  ;;  %v5805_v55 = vld [vmem:[%s13880_s5 + $0x3b0] sm:$0xff]  ;;  %v5806_v56 = vld [vmem:[%s13880_s5 + $0x3b8] sm:$0xff] }
  0x7e   :  { %8601 = vmatprep.subr.bf16.mxu0 %v9953_v3  ;;  %v8614_v58 = vpack.c.bf16 %v5806_v56, %v5805_v55  ;;  %v5938_v55 = vld [vmem:[%s13880_s5 + $0x730] sm:$0xff]  ;;  %v5939_v56 = vld [vmem:[%s13880_s5 + $0x738] sm:$0xff] }
  0x7f   :  { %8561 = vmatpush3.bf16.msra.mxu1 %v8560_v59  ;;  %v5807_v59 = vld [vmem:[%s13880_s5 + $0x3c0] sm:$0xff] }
  0x80   :  { %8562 = vmatprep.subr.bf16.mxu1 %v9953_v3 }
  0x81   :  { %8603 = vmatpush3.bf16.msra.mxu0 %v8602_v2  ;;  %v8563_v2 = vpack.c.bf16 %v5766_v63, %v5765_v62  ;;  %v5899_v62 = vld [vmem:[%s13880_s5 + $0x628] sm:$0xff] }
  0x82   :  { %8628 = vmatprep.subr.bf16.mxu0 %v9953_v3 }
  0x83   :  { %8564 = vmatpush3.bf16.msra.mxu1 %v8563_v2  ;;  %v5810_v2 = vld [vmem:[%s13880_s5 + $0x3d8] sm:$0xff] }
  0x84   :  { %7524 = vmatmul.mubr.f32.vlgmr.msra.gmra.mrb[6].mxu0 %v5779_v10  ;;  %8565 = vmatprep.subr.bf16.mxu1 %v9953_v3  ;;  %v8566_v10 = vpack.c.bf16 %v5768_v7, %v5767_v5  ;;  %v5901_v5 = vld [vmem:[%s13880_s5 + $0x638] sm:$0xff]  ;;  %v8620_v7 = vpack.c.bf16 %v5810_v2, %v5809_v1  ;;  %v5851_v1 = vld [vmem:[%s13880_s5 + $0x4f0] sm:$0xff] }
  0x85   :  { %8630 = vmatpush3.bf16.msra.mxu0 %v8629_v11  ;;  %7593 = vmatprep.mubr.msk.f32.mxu0 %vm9954_vm0, %v9955_v6  ;;  %v8683_v11 = vpack.c.bf16 %v5861_v9, %v5860_v8  ;;  %v5811_v9 = vld [vmem:[%s13880_s5 + $0x3e0] sm:$0xff]  ;;  %v5852_v2 = vld [vmem:[%s13880_s5 + $0x4f8] sm:$0xff] }
  0x86   :  { %8631 = vmatprep.subr.bf16.mxu0 %v9953_v3 }
  0x87   :  { %8567 = vmatpush3.bf16.msra.mxu1 %v8566_v10  ;;  %v5812_v10 = vld [vmem:[%s13880_s5 + $0x3e8] sm:$0xff] }
  0x88   :  { %8568 = vmatprep.subr.bf16.mxu1 %v9953_v3  ;;  %v8623_v13 = vpack.c.bf16 %v5812_v10, %v5811_v9  ;;  %v5875_v9 = vld [vmem:[%s13880_s5 + $0x580] sm:$0xff]  ;;  %v5876_v10 = vld [vmem:[%s13880_s5 + $0x588] sm:$0xff] }
  0x89   :  { %8633 = vmatpush3.bf16.msra.mxu0 %v8632_v17  ;;  %v8686_v17 = vpack.c.bf16 %v5863_v15, %v5862_v14  ;;  %v5813_v15 = vld [vmem:[%s13880_s5 + $0x3f0] sm:$0xff] }
  0x8a   :  { %8634 = vmatprep.subr.bf16.mxu0 %v9953_v3 }
  0x8b   :  { %8570 = vmatpush3.bf16.msra.mxu1 %v8569_v16  ;;  %v5814_v16 = vld [vmem:[%s13880_s5 + $0x3f8] sm:$0xff] }
  0x8c   :  { %8571 = vmatprep.subr.bf16.mxu1 %v9953_v3  ;;  %v8626_v19 = vpack.c.bf16 %v5814_v16, %v5813_v15  ;;  %v5877_v16 = vld [vmem:[%s13880_s5 + $0x590] sm:$0xff] }
  0x8d   :  { %8636 = vmatpush3.bf16.msra.mxu0 %v8635_v23  ;;  %v8689_v23 = vpack.c.bf16 %v5865_v21, %v5864_v20  ;;  %v5837_v21 = vld [vmem:[%s13880_s5 + $0x480] sm:$0xff] }
  0x8e   :  { %8637 = vmatprep.subr.bf16.mxu0 %v9953_v3 }
  0x8f   :  { %8573 = vmatpush3.bf16.msra.mxu1 %v8572_v22  ;;  %v5838_v22 = vld [vmem:[%s13880_s5 + $0x488] sm:$0xff] }
  0x90   :  { %8574 = vmatprep.subr.bf16.mxu1 %v9953_v3 }
  0x91   :  { %8639 = vmatpush3.bf16.msra.mxu0 %v8638_v29  ;;  %v8692_v29 = vpack.c.bf16 %v5867_v27, %v5866_v26  ;;  %v8653_v26 = vpack.c.bf16 %v5838_v22, %v5837_v21  ;;  %v5879_v22 = vld [vmem:[%s13880_s5 + $0x5a0] sm:$0xff] }
  0x92   :  { %8640 = vmatprep.subr.bf16.mxu0 %v9953_v3 }
  0x93   :  { %8576 = vmatpush3.bf16.msra.mxu1 %v8575_v28  ;;  %v5839_v28 = vld [vmem:[%s13880_s5 + $0x490] sm:$0xff] }
  0x94   :  { %8577 = vmatprep.subr.bf16.mxu1 %v9953_v3 }
  0x95   :  { %8642 = vmatpush3.bf16.msra.mxu0 %v8641_v35  ;;  %v8695_v35 = vpack.c.bf16 %v5869_v33, %v5868_v32  ;;  %v8746_v33 = vpack.c.bf16 %v5909_v31, %v5908_v30  ;;  %v5882_v30 = vld [vmem:[%s13880_s5 + $0x5b8] sm:$0xff]  ;;  %v2159_v31 = vld [vmem:[%s13879_s4 + $0x10] sm:$0xff] }
  0x96   :  { %8643 = vmatprep.subr.bf16.mxu0 %v9953_v3 }
  0x97   :  { %8579 = vmatpush3.bf16.msra.mxu1 %v8578_v34  ;;  %v5841_v34 = vld [vmem:[%s13880_s5 + $0x4a0] sm:$0xff] }
  0x98   :  { %8604 = vmatprep.subr.bf16.mxu1 %v9953_v3 }
  0x99   :  { %8645 = vmatpush3.bf16.msra.mxu0 %v8644_v41  ;;  %v8605_v41 = vpack.c.bf16 %v5800_v38, %v5799_v37  ;;  %v5933_v37 = vld [vmem:[%s13880_s5 + $0x708] sm:$0xff] }
  0x9a   :  { %8646 = vmatprep.subr.bf16.mxu0 %v9953_v3  ;;  %7489 = vmatmul.mubr.f32.vlgmr.msra.gmra.mrb[4].mxu1 %v5760_v36  ;;  %v5932_v36 = vld [vmem:[%s13880_s5 + $0x700] sm:$0xff] }
  0x9b   :  { %8606 = vmatpush3.bf16.msra.mxu1 %v8605_v41  ;;  %7558 = vmatprep.mubr.msk.f32.mxu1 %vm9954_vm0, %v9955_v6  ;;  %v8773_v40 = vpack.c.bf16 %v5933_v37, %v5932_v36  ;;  %v5843_v41 = vld [vmem:[%s13880_s5 + $0x4b0] sm:$0xff]  ;;  %v5884_v36 = vld [vmem:[%s13880_s5 + $0x5c8] sm:$0xff]  ;;  %v2161_v37 = vld [vmem:[%s13879_s4 + $0x20] sm:$0xff] }
  0x9c   :  { %8607 = vmatprep.subr.bf16.mxu1 %v9953_v3 }
  0x9d   :  { %8648 = vmatpush3.bf16.msra.mxu0 %v8647_v47  ;;  %v8608_v47 = vpack.c.bf16 %v5802_v44, %v5801_v43  ;;  %v5934_v43 = vld [vmem:[%s13880_s5 + $0x710] sm:$0xff]  ;;  %v5935_v44 = vld [vmem:[%s13880_s5 + $0x718] sm:$0xff] }
  0x9e   :  { %8649 = vmatprep.subr.bf16.mxu0 %v9953_v3  ;;  %v8776_v46 = vpack.c.bf16 %v5935_v44, %v5934_v43  ;;  %v2163_v43 = vld [vmem:[%s13879_s4 + $0x30] sm:$0xff]  ;;  %v2164_v44 = vld [vmem:[%s13879_s4 + $0x38] sm:$0xff] }
  0x9f   :  { %8609 = vmatpush3.bf16.msra.mxu1 %v8608_v47  ;;  %v5845_v47 = vld [vmem:[%s13880_s5 + $0x4c0] sm:$0xff] }
  0xa0   :  { %8610 = vmatprep.subr.bf16.mxu1 %v9953_v3 }
  0xa1   :  { %8651 = vmatpush3.bf16.msra.mxu0 %v8650_v54  ;;  %v8611_v54 = vpack.c.bf16 %v5804_v51, %v5803_v50  ;;  %v5937_v50 = vld [vmem:[%s13880_s5 + $0x728] sm:$0xff] }
  0xa2   :  { %8676 = vmatprep.subr.bf16.mxu0 %v9953_v3 }
  0xa3   :  { %8612 = vmatpush3.bf16.msra.mxu1 %v8611_v54  ;;  %v5848_v54 = vld [vmem:[%s13880_s5 + $0x4d8] sm:$0xff] }
  0xa4   :  { %7594 = vmatmul.mubr.f32.vlgmr.msra.gmra.mrb[8].mxu0 %v5817_v60  ;;  %v5808_v60 = vld [vmem:[%s13880_s5 + $0x3c8] sm:$0xff]  ;;  %8613 = vmatprep.subr.bf16.mxu1 %v9953_v3 }
  0xa5   :  { %8678 = vmatpush3.bf16.msra.mxu0 %v8677_v61  ;;  %7663 = vmatprep.mubr.msk.f32.mxu0 %vm9954_vm0, %v9955_v6  ;;  %v5898_v61 = vld [vmem:[%s13880_s5 + $0x620] sm:$0xff]  ;;  %v8617_v63 = vpack.c.bf16 %v5808_v60, %v5807_v59  ;;  %v5850_v60 = vld [vmem:[%s13880_s5 + $0x4e8] sm:$0xff] }
  0xa6   :  { %8679 = vmatprep.subr.bf16.mxu0 %v9953_v3  ;;  %v8731_v0 = vpack.c.bf16 %v5899_v62, %v5898_v61  ;;  %v5849_v59 = vld [vmem:[%s13880_s5 + $0x4e0] sm:$0xff]  ;;  %v5941_v62 = vld [vmem:[%s13880_s5 + $0x748] sm:$0xff] }
  0xa7   :  { %8615 = vmatpush3.bf16.msra.mxu1 %v8614_v58  ;;  %v8782_v58 = vpack.c.bf16 %v5939_v56, %v5938_v55  ;;  %v5940_v61 = vld [vmem:[%s13880_s5 + $0x740] sm:$0xff]  ;;  %v2167_v55 = vld [vmem:[%s13879_s4 + $0x50] sm:$0xff]  ;;  %v2168_v56 = vld [vmem:[%s13879_s4 + $0x58] sm:$0xff] }
  0xa8   :  { %8616 = vmatprep.subr.bf16.mxu1 %v9953_v3 }
  0xa9   :  { %8681 = vmatpush3.bf16.msra.mxu0 %v8680_v4  ;;  %v5900_v4 = vld [vmem:[%s13880_s5 + $0x630] sm:$0xff] }
  0xaa   :  { %8682 = vmatprep.subr.bf16.mxu0 %v9953_v3  ;;  %v8734_v8 = vpack.c.bf16 %v5901_v5, %v5900_v4  ;;  %v5942_v4 = vld [vmem:[%s13880_s5 + $0x750] sm:$0xff]  ;;  %v5943_v5 = vld [vmem:[%s13880_s5 + $0x758] sm:$0xff] }
  0xab   :  { %8618 = vmatpush3.bf16.msra.mxu1 %v8617_v63  ;;  %v8671_v63 = vpack.c.bf16 %v5850_v60, %v5849_v59  ;;  %v5913_v59 = vld [vmem:[%s13880_s5 + $0x680] sm:$0xff]  ;;  %v5914_v60 = vld [vmem:[%s13880_s5 + $0x688] sm:$0xff] }
  0xac   :  { %8619 = vmatprep.subr.bf16.mxu1 %v9953_v3 }
  0xad   :  { %8684 = vmatpush3.bf16.msra.mxu0 %v8683_v11  ;;  %v5902_v11 = vld [vmem:[%s13880_s5 + $0x640] sm:$0xff] }
  0xae   :  { %8685 = vmatprep.subr.bf16.mxu0 %v9953_v3  ;;  %v8737_v14 = vpack.c.bf16 %v5903_v12, %v5902_v11  ;;  %v5944_v11 = vld [vmem:[%s13880_s5 + $0x760] sm:$0xff]  ;;  %v5945_v12 = vld [vmem:[%s13880_s5 + $0x768] sm:$0xff] }
  0xaf   :  { %8621 = vmatpush3.bf16.msra.mxu1 %v8620_v7  ;;  %v8674_v7 = vpack.c.bf16 %v5852_v2, %v5851_v1  ;;  %v8791_v15 = vpack.c.bf16 %v5945_v12, %v5944_v11  ;;  %v5915_v2 = vld [vmem:[%s13880_s5 + $0x690] sm:$0xff]  ;;  %v5918_v11 = vld [vmem:[%s13880_s5 + $0x6a8] sm:$0xff]  ;;  %v5990_v12 = vld [vmem:[%s13879_s4 + $0x400] sm:$0xff] }
  0xb0   :  { %8622 = vmatprep.subr.bf16.mxu1 %v9953_v3 }
  0xb1   :  { %8687 = vmatpush3.bf16.msra.mxu0 %v8686_v17  ;;  %v5904_v17 = vld [vmem:[%s13880_s5 + $0x650] sm:$0xff] }
  0xb2   :  { %8688 = vmatprep.subr.bf16.mxu0 %v9953_v3  ;;  %v8740_v20 = vpack.c.bf16 %v5905_v18, %v5904_v17  ;;  %v5878_v17 = vld [vmem:[%s13880_s5 + $0x598] sm:$0xff]  ;;  %v5946_v18 = vld [vmem:[%s13880_s5 + $0x770] sm:$0xff] }
  0xb3   :  { %8624 = vmatpush3.bf16.msra.mxu1 %v8623_v13  ;;  %v5836_v13 = vld [vmem:[%s13878_s3 + $0x48] sm:$0xff] }
  0xb4   :  { %8625 = vmatprep.subr.bf16.mxu1 %v9953_v3 }
  0xb5   :  { %8690 = vmatpush3.bf16.msra.mxu0 %v8689_v23  ;;  %v5906_v23 = vld [vmem:[%s13880_s5 + $0x660] sm:$0xff] }
  0xb6   :  { %8691 = vmatprep.subr.bf16.mxu0 %v9953_v3  ;;  %v8743_v27 = vpack.c.bf16 %v5907_v24, %v5906_v23  ;;  %v5880_v23 = vld [vmem:[%s13880_s5 + $0x5a8] sm:$0xff]  ;;  %v2157_v24 = vld [vmem:[%s13879_s4] sm:$0xff] }
  0xb7   :  { %8627 = vmatpush3.bf16.msra.mxu1 %v8626_v19  ;;  %v5947_v19 = vld [vmem:[%s13880_s5 + $0x778] sm:$0xff] }
  0xb8   :  { %8652 = vmatprep.subr.bf16.mxu1 %v9953_v3  ;;  %v8794_v21 = vpack.c.bf16 %v5947_v19, %v5946_v18  ;;  %v5920_v18 = vld [vmem:[%s13880_s5 + $0x6b8] sm:$0xff]  ;;  %v5992_v19 = vld [vmem:[%s13879_s4 + $0x410] sm:$0xff] }
  0xb9   :  { %8693 = vmatpush3.bf16.msra.mxu0 %v8692_v29  ;;  %v5840_v29 = vld [vmem:[%s13880_s5 + $0x498] sm:$0xff] }
  0xba   :  { %8694 = vmatprep.subr.bf16.mxu0 %v9953_v3  ;;  %7559 = vmatmul.mubr.f32.vlgmr.msra.gmra.mrb[6].mxu1 %v5798_v25  ;;  %v8656_v32 = vpack.c.bf16 %v5840_v29, %v5839_v28  ;;  %v2158_v25 = vld [vmem:[%s13879_s4 + $0x8] sm:$0xff]  ;;  %v5881_v29 = vld [vmem:[%s13880_s5 + $0x5b0] sm:$0xff] }
  0xbb   :  { %8654 = vmatpush3.bf16.msra.mxu1 %v8653_v26  ;;  %7628 = vmatprep.mubr.msk.f32.mxu1 %vm9954_vm0, %v9955_v6  ;;  %v8707_v26 = vpack.c.bf16 %v5880_v23, %v5879_v22  ;;  %v8821_v28 = vpack.c.bf16 %v2158_v25, %v2157_v24  ;;  %v5921_v23 = vld [vmem:[%s13880_s5 + $0x6c0] sm:$0xff]  ;;  %v5922_v24 = vld [vmem:[%s13880_s5 + $0x6c8] sm:$0xff] }
  0xbc   :  { %8655 = vmatprep.subr.bf16.mxu1 %v9953_v3  ;;  %v5994_v25 = vld [vmem:[%s13879_s4 + $0x420] sm:$0xff] }
  0xbd   :  { %8696 = vmatpush3.bf16.msra.mxu0 %v8695_v35  ;;  %v5842_v35 = vld [vmem:[%s13880_s5 + $0x4a8] sm:$0xff] }
  0xbe   :  { %8697 = vmatprep.subr.bf16.mxu0 %v9953_v3  ;;  %v8659_v38 = vpack.c.bf16 %v5842_v35, %v5841_v34  ;;  %v5883_v35 = vld [vmem:[%s13880_s5 + $0x5c0] sm:$0xff] }
  0xbf   :  { %8657 = vmatpush3.bf16.msra.mxu1 %v8656_v32  ;;  %v2160_v32 = vld [vmem:[%s13879_s4 + $0x18] sm:$0xff] }
  0xc0   :  { %8658 = vmatprep.subr.bf16.mxu1 %v9953_v3  ;;  %v8824_v34 = vpack.c.bf16 %v2160_v32, %v2159_v31  ;;  %v5996_v31 = vld [vmem:[%s13879_s4 + $0x430] sm:$0xff]  ;;  %v5997_v32 = vld [vmem:[%s13879_s4 + $0x438] sm:$0xff] }
  0xc1   :  { %8699 = vmatpush3.bf16.msra.mxu0 %v8698_v42  ;;  %v5844_v42 = vld [vmem:[%s13880_s5 + $0x4b8] sm:$0xff] }
  0xc2   :  { %8724 = vmatprep.subr.bf16.mxu0 %v9953_v3  ;;  %v8662_v45 = vpack.c.bf16 %v5844_v42, %v5843_v41  ;;  %v5885_v41 = vld [vmem:[%s13880_s5 + $0x5d0] sm:$0xff]  ;;  %v5886_v42 = vld [vmem:[%s13880_s5 + $0x5d8] sm:$0xff] }
  0xc3   :  { %8660 = vmatpush3.bf16.msra.mxu1 %v8659_v38  ;;  %v2162_v38 = vld [vmem:[%s13879_s4 + $0x28] sm:$0xff] }
  0xc4   :  { %7664 = vmatmul.mubr.f32.vlgmr.msra.gmra.mrb[10].mxu0 %v5855_v48  ;;  %v5846_v48 = vld [vmem:[%s13880_s5 + $0x4c8] sm:$0xff]  ;;  %8661 = vmatprep.subr.bf16.mxu1 %v9953_v3 }
  0xc5   :  { %8726 = vmatpush3.bf16.msra.mxu0 %v8725_v49  ;;  %7733 = vmatprep.mubr.msk.f32.mxu0 %vm9954_vm0, %v9955_v6  ;;  %v5936_v49 = vld [vmem:[%s13880_s5 + $0x720] sm:$0xff]  ;;  %v8665_v51 = vpack.c.bf16 %v5846_v48, %v5845_v47  ;;  %v5888_v48 = vld [vmem:[%s13880_s5 + $0x5e8] sm:$0xff] }
  0xc6   :  { %8727 = vmatprep.subr.bf16.mxu0 %v9953_v3  ;;  %v8779_v52 = vpack.c.bf16 %v5937_v50, %v5936_v49  ;;  %v5887_v47 = vld [vmem:[%s13880_s5 + $0x5e0] sm:$0xff]  ;;  %v2166_v50 = vld [vmem:[%s13879_s4 + $0x48] sm:$0xff] }
  0xc7   :  { %8663 = vmatpush3.bf16.msra.mxu1 %v8662_v45  ;;  %v8716_v45 = vpack.c.bf16 %v5886_v42, %v5885_v41  ;;  %v2165_v49 = vld [vmem:[%s13879_s4 + $0x40] sm:$0xff]  ;;  %v5927_v41 = vld [vmem:[%s13880_s5 + $0x6f0] sm:$0xff]  ;;  %v5928_v42 = vld [vmem:[%s13880_s5 + $0x6f8] sm:$0xff] }
  0xc8   :  { %8664 = vmatprep.subr.bf16.mxu1 %v9953_v3 }
  0xc9   :  { %8729 = vmatpush3.bf16.msra.mxu0 %v8728_v57  ;;  %v8668_v57 = vpack.c.bf16 %v5848_v54, %v5847_v53  ;;  %v5889_v53 = vld [vmem:[%s13880_s5 + $0x5f0] sm:$0xff]  ;;  %v5890_v54 = vld [vmem:[%s13880_s5 + $0x5f8] sm:$0xff] }
  0xca   :  { %8730 = vmatprep.subr.bf16.mxu0 %v9953_v3 }
  0xcb   :  { %8666 = vmatpush3.bf16.msra.mxu1 %v8665_v51  ;;  %v8719_v51 = vpack.c.bf16 %v5888_v48, %v5887_v47  ;;  %v5951_v47 = vld [vmem:[%s13880_s5 + $0x780] sm:$0xff]  ;;  %v5952_v48 = vld [vmem:[%s13880_s5 + $0x788] sm:$0xff] }
  0xcc   :  { %8667 = vmatprep.subr.bf16.mxu1 %v9953_v3 }
  0xcd   :  { %8732 = vmatpush3.bf16.msra.mxu0 %v8731_v0  ;;  %v8785_v0 = vpack.c.bf16 %v5941_v62, %v5940_v61  ;;  %v2169_v61 = vld [vmem:[%s13879_s4 + $0x60] sm:$0xff]  ;;  %v2170_v62 = vld [vmem:[%s13879_s4 + $0x68] sm:$0xff] }
  0xce   :  { %8733 = vmatprep.subr.bf16.mxu0 %v9953_v3  ;;  %v8839_v1 = vpack.c.bf16 %v2170_v62, %v2169_v61  ;;  %v5956_v61 = vld [vmem:[%s13880_s5 + $0x7a8] sm:$0xff] }
  0xcf   :  { %8669 = vmatpush3.bf16.msra.mxu1 %v8668_v57  ;;  %v8722_v57 = vpack.c.bf16 %v5890_v54, %v5889_v53  ;;  %v5953_v54 = vld [vmem:[%s13880_s5 + $0x790] sm:$0xff] }
  0xd0   :  { %8670 = vmatprep.subr.bf16.mxu1 %v9953_v3 }
  0xd1   :  { %8735 = vmatpush3.bf16.msra.mxu0 %v8734_v8  ;;  %v8788_v8 = vpack.c.bf16 %v5943_v5, %v5942_v4  ;;  %v5916_v4 = vld [vmem:[%s13880_s5 + $0x698] sm:$0xff]  ;;  %v2171_v5 = vld [vmem:[%s13879_s4 + $0x70] sm:$0xff] }
  0xd2   :  { %8736 = vmatprep.subr.bf16.mxu0 %v9953_v3 }
  0xd3   :  { %8672 = vmatpush3.bf16.msra.mxu1 %v8671_v63  ;;  %v5874_v63 = vld [vmem:[%s13878_s3 + $0x58] sm:$0xff] }
  0xd4   :  { %8673 = vmatprep.subr.bf16.mxu1 %v9953_v3 }
  0xd5   :  { %8738 = vmatpush3.bf16.msra.mxu0 %v8737_v14  ;;  %v8701_v14 = vpack.c.bf16 %v5876_v10, %v5875_v9  ;;  %v5917_v10 = vld [vmem:[%s13880_s5 + $0x6a0] sm:$0xff] }
  0xd6   :  { %8739 = vmatprep.subr.bf16.mxu0 %v9953_v3 }
  0xd7   :  { %8675 = vmatpush3.bf16.msra.mxu1 %v8674_v7  ;;  %v2172_v7 = vld [vmem:[%s13879_s4 + $0x78] sm:$0xff] }
  0xd8   :  { %8700 = vmatprep.subr.bf16.mxu1 %v9953_v3  ;;  %v8842_v9 = vpack.c.bf16 %v2172_v7, %v2171_v5  ;;  %v5960_v5 = vld [vmem:[%s13880_s5 + $0x7c8] sm:$0xff] }
  0xd9   :  { %8741 = vmatpush3.bf16.msra.mxu0 %v8740_v20  ;;  %v8704_v20 = vpack.c.bf16 %v5878_v17, %v5877_v16  ;;  %v5919_v17 = vld [vmem:[%s13880_s5 + $0x6b0] sm:$0xff] }
  0xda   :  { %8742 = vmatprep.subr.bf16.mxu0 %v9953_v3  ;;  %7629 = vmatmul.mubr.f32.vlgmr.msra.gmra.mrb[8].mxu1 %v5836_v13  ;;  %v5991_v13 = vld [vmem:[%s13879_s4 + $0x408] sm:$0xff] }
  0xdb   :  { %8702 = vmatpush3.bf16.msra.mxu1 %v8701_v14  ;;  %7698 = vmatprep.mubr.msk.f32.mxu1 %vm9954_vm0, %v9955_v6  ;;  %v8755_v14 = vpack.c.bf16 %v5918_v11, %v5917_v10  ;;  %v8845_v16 = vpack.c.bf16 %v5991_v13, %v5990_v12  ;;  %v5963_v11 = vld [vmem:[%s13880_s5 + $0x7e0] sm:$0xff]  ;;  %v5964_v12 = vld [vmem:[%s13880_s5 + $0x7e8] sm:$0xff] }
  0xdc   :  { %8703 = vmatprep.subr.bf16.mxu1 %v9953_v3  ;;  %v8815_v13 = vpack.c.bf16 %v5964_v12, %v5963_v11  ;;  %v5984_v11 = vld [vmem:[%s13894_s22 + $0x30] sm:$0xff]  ;;  %v5683_v12 = vld [vmem:[%s13881_s6] ss:$0 sm:$0xff] }
  0xdd   :  { %8744 = vmatpush3.bf16.msra.mxu0 %v8743_v27  ;;  %v5931_v27 = vld [vmem:[%s13878_s3 + $0x70] sm:$0xff] }
  0xde   :  { %8745 = vmatprep.subr.bf16.mxu0 %v9953_v3 }
  0xdf   :  { %8705 = vmatpush3.bf16.msra.mxu1 %v8704_v20  ;;  %v5993_v20 = vld [vmem:[%s13879_s4 + $0x418] sm:$0xff] }
  0xe0   :  { %8706 = vmatprep.subr.bf16.mxu1 %v9953_v3  ;;  %v8848_v22 = vpack.c.bf16 %v5993_v20, %v5992_v19  ;;  %v2338_v20 = vld [vmem:[%s13884_s9] sm:$0xff] }
  0xe1   :  { %8747 = vmatpush3.bf16.msra.mxu0 %v8746_v33  ;;  %v8710_v33 = vpack.c.bf16 %v5882_v30, %v5881_v29  ;;  %v5923_v29 = vld [vmem:[%s13880_s5 + $0x6d0] sm:$0xff]  ;;  %v5924_v30 = vld [vmem:[%s13880_s5 + $0x6d8] sm:$0xff] }
  0xe2   :  { %8772 = vmatprep.subr.bf16.mxu0 %v9953_v3 }
  0xe3   :  { %8708 = vmatpush3.bf16.msra.mxu1 %v8707_v26  ;;  %v5995_v26 = vld [vmem:[%s13879_s4 + $0x428] sm:$0xff] }
  0xe4   :  { %7734 = vmatmul.mubr.f32.vlgmr.msra.gmra.mrb[12].mxu0 %v5893_v39  ;;  %8709 = vmatprep.subr.bf16.mxu1 %v9953_v3  ;;  %v8713_v39 = vpack.c.bf16 %v5884_v36, %v5883_v35  ;;  %v5925_v35 = vld [vmem:[%s13880_s5 + $0x6e0] sm:$0xff]  ;;  %v5926_v36 = vld [vmem:[%s13880_s5 + $0x6e8] sm:$0xff] }
  0xe5   :  { %8774 = vmatpush3.bf16.msra.mxu0 %v8773_v40  ;;  %7803 = vmatprep.mubr.msk.f32.mxu0 %vm9954_vm0, %v9955_v6  ;;  %v8827_v40 = vpack.c.bf16 %v2162_v38, %v2161_v37  ;;  %v5998_v37 = vld [vmem:[%s13879_s4 + $0x440] sm:$0xff]  ;;  %v5999_v38 = vld [vmem:[%s13879_s4 + $0x448] sm:$0xff] }
  0xe6   :  { %8775 = vmatprep.subr.bf16.mxu0 %v9953_v3 }
  0xe7   :  { %8711 = vmatpush3.bf16.msra.mxu1 %v8710_v33  ;;  %v8764_v33 = vpack.c.bf16 %v5924_v30, %v5923_v29  ;;  %v2355_v29 = vld [vmem:[%s13884_s9 + $0x88] sm:$0xff] }
  0xe8   :  { %8712 = vmatprep.subr.bf16.mxu1 %v9953_v3  ;;  %v2359_v30 = vld [vmem:[%s13884_s9 + $0xa8] sm:$0xff] }
  0xe9   :  { %8777 = vmatpush3.bf16.msra.mxu0 %v8776_v46  ;;  %v8830_v46 = vpack.c.bf16 %v2164_v44, %v2163_v43  ;;  %v6000_v43 = vld [vmem:[%s13879_s4 + $0x450] sm:$0xff]  ;;  %v6001_v44 = vld [vmem:[%s13879_s4 + $0x458] sm:$0xff] }
  0xea   :  { %8778 = vmatprep.subr.bf16.mxu0 %v9953_v3 }
  0xeb   :  { %8714 = vmatpush3.bf16.msra.mxu1 %v8713_v39  ;;  %v8767_v39 = vpack.c.bf16 %v5926_v36, %v5925_v35  ;;  %v2363_v35 = vld [vmem:[%s13884_s9 + $0xc8] sm:$0xff] }
  0xec   :  { %8715 = vmatprep.subr.bf16.mxu1 %v9953_v3  ;;  %v2367_v36 = vld [vmem:[%s13884_s9 + $0xe8] sm:$0xff] }
  0xed   :  { %8780 = vmatpush3.bf16.msra.mxu0 %v8779_v52  ;;  %v8833_v52 = vpack.c.bf16 %v2166_v50, %v2165_v49  ;;  %v6002_v49 = vld [vmem:[%s13879_s4 + $0x460] sm:$0xff]  ;;  %v6003_v50 = vld [vmem:[%s13879_s4 + $0x468] sm:$0xff] }
  0xee   :  { %8781 = vmatprep.subr.bf16.mxu0 %v9953_v3  ;;  %v8863_v53 = vpack.c.bf16 %v6003_v50, %v6002_v49 }
  0xef   :  { %8717 = vmatpush3.bf16.msra.mxu1 %v8716_v45  ;;  %v8770_v45 = vpack.c.bf16 %v5928_v42, %v5927_v41  ;;  %v2371_v41 = vld [vmem:[%s13884_s9 + $0x108] sm:$0xff] }
  0xf0   :  { %8718 = vmatprep.subr.bf16.mxu1 %v9953_v3  ;;  %v2375_v42 = vld [vmem:[%s13884_s9 + $0x128] sm:$0xff] }
  0xf1   :  { %8783 = vmatpush3.bf16.msra.mxu0 %v8782_v58  ;;  %v8836_v58 = vpack.c.bf16 %v2168_v56, %v2167_v55  ;;  %v5954_v55 = vld [vmem:[%s13880_s5 + $0x798] sm:$0xff]  ;;  %v6004_v56 = vld [vmem:[%s13879_s4 + $0x470] sm:$0xff] }
  0xf2   :  { %8784 = vmatprep.subr.bf16.mxu0 %v9953_v3 }
  0xf3   :  { %8720 = vmatpush3.bf16.msra.mxu1 %v8719_v51  ;;  %v5912_v51 = vld [vmem:[%s13878_s3 + $0x68] sm:$0xff] }
  0xf4   :  { %8721 = vmatprep.subr.bf16.mxu1 %v9953_v3 }
  0xf5   :  { %8786 = vmatpush3.bf16.msra.mxu0 %v8785_v0  ;;  %v8749_v0 = vpack.c.bf16 %v5914_v60, %v5913_v59  ;;  %v5955_v60 = vld [vmem:[%s13880_s5 + $0x7a0] sm:$0xff] }
  0xf6   :  { %8787 = vmatprep.subr.bf16.mxu0 %v9953_v3  ;;  %v8803_v62 = vpack.c.bf16 %v5956_v61, %v5955_v60  ;;  %v2395_v60 = vld [vmem:[%s13884_s9 + $0x1c8] sm:$0xff] }
  0xf7   :  { %8723 = vmatpush3.bf16.msra.mxu1 %v8722_v57  ;;  %v6005_v57 = vld [vmem:[%s13879_s4 + $0x478] sm:$0xff]  ;;  %v2399_v61 = vld [vmem:[%s13884_s9 + $0x1e8] sm:$0xff] }
  0xf8   :  { %8748 = vmatprep.subr.bf16.mxu1 %v9953_v3  ;;  %v8866_v59 = vpack.c.bf16 %v6005_v57, %v6004_v56  ;;  %v2386_v57 = vld [vmem:[%s13884_s9 + $0x180] sm:$0xff] }
  0xf9   :  { %8789 = vmatpush3.bf16.msra.mxu0 %v8788_v8  ;;  %v8752_v8 = vpack.c.bf16 %v5916_v4, %v5915_v2  ;;  %v5959_v4 = vld [vmem:[%s13880_s5 + $0x7c0] sm:$0xff] }
  0xfa   :  { %8790 = vmatprep.subr.bf16.mxu0 %v9953_v3  ;;  %7699 = vmatmul.mubr.f32.vlgmr.msra.gmra.mrb[10].mxu1 %v5874_v63  ;;  %v2156_v63 = vld [vmem:[%s13877_s2] sm:$0xff]  ;;  %v8809_v7 = vpack.c.bf16 %v5960_v5, %v5959_v4  ;;  %v2345_v4 = vld [vmem:[%s13884_s9 + $0x38] sm:$0xff] }
  0xfb   :  { %8750 = vmatpush3.bf16.msra.mxu1 %v8749_v0  ;;  %7768 = vmatprep.mubr.msk.f32.mxu1 %vm9954_vm0, %v9955_v6  ;;  %v5957_v0 = vld [vmem:[%s13880_s5 + $0x7b0] sm:$0xff] }
  0xfc   :  { %8751 = vmatprep.subr.bf16.mxu1 %v9953_v3 }
  0xfd   :  { %8792 = vmatpush3.bf16.msra.mxu0 %v8791_v15  ;;  %v2155_v15 = vld [vmem:[%s13876_s1] sm:$0xff] }
  0xfe   :  { %8793 = vmatprep.subr.bf16.mxu0 %v9953_v3 }
  0xff   :  { %8753 = vmatpush3.bf16.msra.mxu1 %v8752_v8  ;;  %v5961_v8 = vld [vmem:[%s13880_s5 + $0x7d0] sm:$0xff] }
 0x100   :  { %8754 = vmatprep.subr.bf16.mxu1 %v9953_v3 }
 0x101   :  { %8795 = vmatpush3.bf16.msra.mxu0 %v8794_v21  ;;  %v8758_v21 = vpack.c.bf16 %v5920_v18, %v5919_v17  ;;  %v2343_v17 = vld [vmem:[%s13884_s9 + $0x28] sm:$0xff] }
 0x102   :  { %8820 = vmatprep.subr.bf16.mxu0 %v9953_v3 }
 0x103   :  { %8756 = vmatpush3.bf16.msra.mxu1 %v8755_v14  ;;  %v5965_v14 = vld [vmem:[%s13880_s5 + $0x7f0] sm:$0xff] }
 0x104   :  { %7804 = vmatmul.mubr.f32.vlgmr.msra.gmra.mrb[14].mxu0 %v5931_v27  ;;  %8757 = vmatprep.subr.bf16.mxu1 %v9953_v3  ;;  %v8761_v27 = vpack.c.bf16 %v5922_v24, %v5921_v23  ;;  %v2351_v23 = vld [vmem:[%s13884_s9 + $0x68] sm:$0xff]  ;;  %v5950_v24 = vld [vmem:[%s13878_s3 + $0x78] sm:$0xff] }
 0x105   :  { %8822 = vmatpush3.bf16.msra.mxu0 %v8821_v28  ;;  %7873 = vmatprep.mubr.msk.f32.mxu0 %vm9954_vm0, %v9955_v6  ;;  %v8851_v28 = vpack.c.bf16 %v5995_v26, %v5994_v25 }
 0x106   :  { %8823 = vmatprep.subr.bf16.mxu0 %v9953_v3 }
 0x107   :  { %8759 = vmatpush3.bf16.msra.mxu1 %v8758_v21  ;;  %v2342_v21 = vld [vmem:[%s13884_s9 + $0x20] sm:$0xff] }
 0x108   :  { %8760 = vmatprep.subr.bf16.mxu1 %v9953_v3  ;;  %v8870_v25 = vpack.c.bf16 %v2342_v21, %v2338_v20 }
 0x109   :  { %8825 = vmatpush3.bf16.msra.mxu0 %v8824_v34  ;;  %v8854_v34 = vpack.c.bf16 %v5997_v32, %v5996_v31  ;;  %v8876_v32 = vpack.c.bf16 %v2359_v30, %v2355_v29  ;;  %v2356_v29 = vld [vmem:[%s13884_s9 + $0x90] sm:$0xff] }
 0x10a   :  { %8826 = vmatprep.subr.bf16.mxu0 %v9953_v3  ;;  %v2360_v30 = vld [vmem:[%s13884_s9 + $0xb0] sm:$0xff] }
 0x10b   :  { %8762 = vmatpush3.bf16.msra.mxu1 %v8761_v27  ;;  %v2346_v27 = vld [vmem:[%s13884_s9 + $0x40] sm:$0xff] }
 0x10c   :  { %8763 = vmatprep.subr.bf16.mxu1 %v9953_v3 }
 0x10d   :  { %8828 = vmatpush3.bf16.msra.mxu0 %v8827_v40  ;;  %v8857_v40 = vpack.c.bf16 %v5999_v38, %v5998_v37  ;;  %v8880_v38 = vpack.c.bf16 %v2367_v36, %v2363_v35  ;;  %v2364_v35 = vld [vmem:[%s13884_s9 + $0xd0] sm:$0xff] }
 0x10e   :  { %8829 = vmatprep.subr.bf16.mxu0 %v9953_v3  ;;  %v2368_v36 = vld [vmem:[%s13884_s9 + $0xf0] sm:$0xff] }
 0x10f   :  { %8765 = vmatpush3.bf16.msra.mxu1 %v8764_v33  ;;  %v2354_v33 = vld [vmem:[%s13884_s9 + $0x80] sm:$0xff] }
 0x110   :  { %8766 = vmatprep.subr.bf16.mxu1 %v9953_v3 }
 0x111   :  { %8831 = vmatpush3.bf16.msra.mxu0 %v8830_v46  ;;  %v8860_v46 = vpack.c.bf16 %v6001_v44, %v6000_v43  ;;  %v8884_v44 = vpack.c.bf16 %v2375_v42, %v2371_v41  ;;  %v2372_v41 = vld [vmem:[%s13884_s9 + $0x110] sm:$0xff] }
 0x112   :  { %8832 = vmatprep.subr.bf16.mxu0 %v9953_v3  ;;  %v2376_v42 = vld [vmem:[%s13884_s9 + $0x130] sm:$0xff] }
 0x113   :  { %8768 = vmatpush3.bf16.msra.mxu1 %v8767_v39  ;;  %v2362_v39 = vld [vmem:[%s13884_s9 + $0xc0] sm:$0xff] }
 0x114   :  { %8769 = vmatprep.subr.bf16.mxu1 %v9953_v3 }
 0x115   :  { %8834 = vmatpush3.bf16.msra.mxu0 %v8833_v52  ;;  %v8797_v52 = vpack.c.bf16 %v5952_v48, %v5951_v47  ;;  %v2379_v47 = vld [vmem:[%s13884_s9 + $0x148] sm:$0xff] }
 0x116   :  { %8835 = vmatprep.subr.bf16.mxu0 %v9953_v3  ;;  %v2383_v48 = vld [vmem:[%s13884_s9 + $0x168] sm:$0xff] }
 0x117   :  { %8771 = vmatpush3.bf16.msra.mxu1 %v8770_v45  ;;  %v2370_v45 = vld [vmem:[%s13884_s9 + $0x100] sm:$0xff]  ;;  %v8888_v50 = vpack.c.bf16 %v2383_v48, %v2379_v47  ;;  %v2380_v47 = vld [vmem:[%s13884_s9 + $0x150] sm:$0xff] }
 0x118   :  { %8796 = vmatprep.subr.bf16.mxu1 %v9953_v3  ;;  %v2384_v48 = vld [vmem:[%s13884_s9 + $0x170] sm:$0xff] }
 0x119   :  { %8837 = vmatpush3.bf16.msra.mxu0 %v8836_v58  ;;  %v8800_v58 = vpack.c.bf16 %v5954_v55, %v5953_v54  ;;  %v2391_v54 = vld [vmem:[%s13884_s9 + $0x1a8] sm:$0xff] }
 0x11a   :  { %8838 = vmatprep.subr.bf16.mxu0 %v9953_v3  ;;  %7769 = vmatmul.mubr.f32.vlgmr.msra.gmra.mrb[12].mxu1 %v5912_v51  ;;  %v2378_v51 = vld [vmem:[%s13884_s9 + $0x140] sm:$0xff] }
 0x11b   :  { %8798 = vmatpush3.bf16.msra.mxu1 %v8797_v52  ;;  %7838 = vmatprep.mubr.msk.f32.mxu1 %vm9954_vm0, %v9955_v6  ;;  %v2382_v52 = vld [vmem:[%s13884_s9 + $0x160] sm:$0xff] }
 0x11c   :  { %8799 = vmatprep.subr.bf16.mxu1 %v9953_v3  ;;  %v8890_v55 = vpack.c.bf16 %v2382_v52, %v2378_v51  ;;  %v8922_v51 = vpack.c.bf16 %v2384_v48, %v2380_v47  ;;  %v6065_v47 = vld [vmem:[%s13884_s9 + $0x2c0] sm:$0xff] }
 0x11d   :  { %8840 = vmatpush3.bf16.msra.mxu0 %v8839_v1  ;;  %v5958_v1 = vld [vmem:[%s13880_s5 + $0x7b8] sm:$0xff]  ;;  %v6069_v48 = vld [vmem:[%s13884_s9 + $0x2e0] sm:$0xff] }
 0x11e   :  { %8841 = vmatprep.subr.bf16.mxu0 %v9953_v3  ;;  %v8806_v2 = vpack.c.bf16 %v5958_v1, %v5957_v0  ;;  %v2398_v0 = vld [vmem:[%s13884_s9 + $0x1e0] sm:$0xff] }
 0x11f   :  { %8801 = vmatpush3.bf16.msra.mxu1 %v8800_v58  ;;  %v2390_v58 = vld [vmem:[%s13884_s9 + $0x1a0] sm:$0xff] }
 0x120   :  { %8802 = vmatprep.subr.bf16.mxu1 %v9953_v3 }
 0x121   :  { %8843 = vmatpush3.bf16.msra.mxu0 %v8842_v9  ;;  %v5962_v9 = vld [vmem:[%s13880_s5 + $0x7d8] sm:$0xff] }
 0x122   :  { %8844 = vmatprep.subr.bf16.mxu0 %v9953_v3  ;;  %v8812_v10 = vpack.c.bf16 %v5962_v9, %v5961_v8  ;;  %v9956_v8 = vmov 0   ;;  %v5969_v9 = vld [vmem:[%s13894_s22 + $0x8] sm:$0xff] }
 0x123   :  { %8804 = vmatpush3.bf16.msra.mxu1 %v8803_v62  ;;  %v8896_v62 = vpack.c.bf16 %v2399_v61, %v2395_v60  ;;  %9793 = vset.pattern.permute.xlu0 %v9956_v8  ;;  %v2400_v60 = vld [vmem:[%s13884_s9 + $0x1f0] sm:$0xff] }
 0x124   :  { %7874 = vmatmul.mubr.f32.vlgmr.msra.gmra.mrb[0].mxu0 %v2155_v15  ;;  %8805 = vmatprep.subr.bf16.mxu1 %v9953_v3  ;;  %v5966_v15 = vld [vmem:[%s13880_s5 + $0x7f8] sm:$0xff] }
 0x125   :  { %8846 = vmatpush3.bf16.msra.mxu0 %v8845_v16  ;;  %7908 = vmatprep.mubr.msk.f32.mxu0 %vm9954_vm0, %v9955_v6  ;;  %v2339_v16 = vld [vmem:[%s13884_s9 + $0x8] sm:$0xff]  ;;  %v8818_v18 = vpack.c.bf16 %v5966_v15, %v5965_v14  ;;  %v2344_v14 = vld [vmem:[%s13884_s9 + $0x30] sm:$0xff] }
 0x126   :  { %8847 = vmatprep.subr.bf16.mxu0 %v9953_v3  ;;  %v8868_v19 = vpack.c.bf16 %v2343_v17, %v2339_v16  ;;  %9794 = vset.pattern.permute.xlu1 %v9956_v8  ;;  %v2349_v16 = vld [vmem:[%s13884_s9 + $0x58] sm:$0xff]  ;;  %v6013_v8 = vld [vmem:[%s13879_s4 + $0xa0] sm:$0xff] }
 0x127   :  { %8807 = vmatpush3.bf16.msra.mxu1 %v8806_v2  ;;  %v2341_v2 = vld [vmem:[%s13884_s9 + $0x18] sm:$0xff] }
 0x128   :  { %8808 = vmatprep.subr.bf16.mxu1 %v9953_v3  ;;  %v8900_v5 = vpack.c.bf16 %v2345_v4, %v2341_v2  ;;  %v2353_v17 = vld [vmem:[%s13884_s9 + $0x78] sm:$0xff]  ;;  %v6011_v4 = vld [vmem:[%s13879_s4 + $0x90] sm:$0xff] }
 0x129   :  { %8849 = vmatpush3.bf16.msra.mxu0 %v8848_v22  ;;  %v2347_v22 = vld [vmem:[%s13884_s9 + $0x48] sm:$0xff] }
 0x12a   :  { %8850 = vmatprep.subr.bf16.mxu0 %v9953_v3  ;;  %v8872_v26 = vpack.c.bf16 %v2351_v23, %v2347_v22  ;;  %v8904_v22 = vpack.c.bf16 %v2353_v17, %v2349_v16  ;;  %v2348_v23 = vld [vmem:[%s13884_s9 + $0x50] sm:$0xff] }
 0x12b   :  { %8810 = vmatpush3.bf16.msra.mxu1 %v8809_v7  ;;  %v1631_v7 = vld [vmem:[%s13894_s22] sm:$0xff]  ;;  %v6019_v17 = vld [vmem:[%s13879_s4 + $0xd0] sm:$0xff] }
 0x12c   :  { %8811 = vmatprep.subr.bf16.mxu1 %v9953_v3  ;;  %1635 = vperm.xlu0 %9793, %v1631_v7  }
 0x12d   :  { %8852 = vmatpush3.bf16.msra.mxu0 %v8851_v28  ;;  %v2350_v28 = vld [vmem:[%s13884_s9 + $0x60] sm:$0xff] }
 0x12e   :  { %8853 = vmatprep.subr.bf16.mxu0 %v9953_v3  ;;  %v8874_v31 = vpack.c.bf16 %v2350_v28, %v2346_v27 }
 0x12f   :  { %8813 = vmatpush3.bf16.msra.mxu1 %v8812_v10  ;;  %v5978_v10 = vld [vmem:[%s13894_s22 + $0x20] sm:$0xff] }
 0x130   :  { %8814 = vmatprep.subr.bf16.mxu1 %v9953_v3  ;;  %1699 = vperm.xlu0 %9793, %v5969_v9   ;;  %v6014_v9 = vld [vmem:[%s13879_s4 + $0xa8] sm:$0xff] }
 0x131   :  { %8855 = vmatpush3.bf16.msra.mxu0 %v8854_v34  ;;  %v2358_v34 = vld [vmem:[%s13884_s9 + $0xa0] sm:$0xff] }
 0x132   :  { %8856 = vmatprep.subr.bf16.mxu0 %v9953_v3  ;;  %v8878_v37 = vpack.c.bf16 %v2358_v34, %v2354_v33  ;;  %v8910_v33 = vpack.c.bf16 %v2360_v30, %v2356_v29  ;;  %v6045_v30 = vld [vmem:[%s13884_s9 + $0x220] sm:$0xff] }
 0x133   :  { %8816 = vmatpush3.bf16.msra.mxu1 %v8815_v13  ;;  %v2340_v13 = vld [vmem:[%s13884_s9 + $0x10] sm:$0xff] }
 0x134   :  { %8817 = vmatprep.subr.bf16.mxu1 %v9953_v3  ;;  %1897 = vperm.xlu0 %9793, %v5978_v10   ;;  %v8902_v20 = vpack.c.bf16 %v2344_v14, %v2340_v13  ;;  %v8939_v10 = vpack.c.bf16 %v6014_v9, %v6013_v8  ;;  %v6017_v14 = vld [vmem:[%s13879_s4 + $0xc0] sm:$0xff] }
 0x135   :  { %8858 = vmatpush3.bf16.msra.mxu0 %v8857_v40  ;;  %v2366_v40 = vld [vmem:[%s13884_s9 + $0xe0] sm:$0xff] }
 0x136   :  { %8859 = vmatprep.subr.bf16.mxu0 %v9953_v3  ;;  %v8882_v43 = vpack.c.bf16 %v2366_v40, %v2362_v39  ;;  %v8914_v39 = vpack.c.bf16 %v2368_v36, %v2364_v35  ;;  %v6049_v35 = vld [vmem:[%s13884_s9 + $0x240] sm:$0xff] }
 0x137   :  { %8819 = vmatpush3.bf16.msra.mxu1 %v8818_v18  ;;  %v6053_v36 = vld [vmem:[%s13884_s9 + $0x260] sm:$0xff] }
 0x138   :  { %8869 = vmatprep.subr.bf16.mxu1 %v8868_v19  ;;  %2029 = vperm.xlu0 %9793, %v5984_v11   ;;  %v6015_v11 = vld [vmem:[%s13879_s4 + $0xb0] sm:$0xff]  ;;  %v6089_v8 = vld [vmem:[%s13884_s9 + $0x380] sm:$0xff] }
 0x139   :  { %8861 = vmatpush3.bf16.msra.mxu0 %v8860_v46  ;;  %v2374_v46 = vld [vmem:[%s13884_s9 + $0x120] sm:$0xff] }
 0x13a   :  { %8862 = vmatprep.subr.bf16.mxu0 %v9953_v3  ;;  %7839 = vmatmul.mubr.f32.vlgmr.msra.gmra.mrb[14].mxu1 %v5950_v24  ;;  %v8886_v49 = vpack.c.bf16 %v2374_v46, %v2370_v45  ;;  %v2352_v24 = vld [vmem:[%s13884_s9 + $0x70] sm:$0xff]  ;;  %v8918_v45 = vpack.c.bf16 %v2376_v42, %v2372_v41  ;;  %v6057_v41 = vld [vmem:[%s13884_s9 + $0x280] sm:$0xff] }
 0x13b   :  { %8871 = vmatpush1.bf16.msra.mxu1 %v8870_v25  ;;  %2466 = vmatprep.mubr.f32.mxu1 %v9955_v6  ;;  %v2357_v25 = vld [vmem:[%s13884_s9 + $0x98] sm:$0xff]  ;;  %v8906_v27 = vpack.c.bf16 %v2352_v24, %v2348_v23  ;;  %v6023_v23 = vld [vmem:[%s13879_s4 + $0xf0] sm:$0xff]  ;;  %v6061_v42 = vld [vmem:[%s13884_s9 + $0x2a0] sm:$0xff] }
 0x13c   :  { %8873 = vmatprep.subr.bf16.mxu1 %v8872_v26  ;;  %v2361_v26 = vld [vmem:[%s13884_s9 + $0xb8] sm:$0xff]  ;;  %v6093_v9 = vld [vmem:[%s13884_s9 + $0x3a0] sm:$0xff] }
 0x13d   :  { %8864 = vmatpush3.bf16.msra.mxu0 %v8863_v53  ;;  %v2387_v53 = vld [vmem:[%s13884_s9 + $0x188] sm:$0xff]  ;;  %v8908_v28 = vpack.c.bf16 %v2361_v26, %v2357_v25  ;;  %v6024_v24 = vld [vmem:[%s13879_s4 + $0xf8] sm:$0xff] }
 0x13e   :  { %8865 = vmatprep.subr.bf16.mxu0 %v9953_v3  ;;  %v8892_v56 = vpack.c.bf16 %v2391_v54, %v2387_v53  ;;  %v2388_v53 = vld [vmem:[%s13884_s9 + $0x190] sm:$0xff]  ;;  %v8954_v25 = vpack.c.bf16 %v6024_v24, %v6023_v23  ;;  %v6042_v26 = vld [vmem:[%s13884_s9 + $0x208] sm:$0xff] }
 0x13f   :  { %8875 = vmatpush1.bf16.msra.mxu1 %v8874_v31  ;;  %v2365_v31 = vld [vmem:[%s13884_s9 + $0xd8] sm:$0xff]  ;;  %v2392_v54 = vld [vmem:[%s13884_s9 + $0x1b0] sm:$0xff] }
 0x140   :  { %8877 = vmatprep.subr.bf16.mxu1 %v8876_v32  ;;  %v2369_v32 = vld [vmem:[%s13884_s9 + $0xf8] sm:$0xff] }
 0x141   :  { %8867 = vmatpush3.bf16.msra.mxu0 %v8866_v59  ;;  %v8894_v59 = vpack.c.bf16 %v2390_v58, %v2386_v57  ;;  %v8912_v34 = vpack.c.bf16 %v2369_v32, %v2365_v31  ;;  %v8926_v57 = vpack.c.bf16 %v2392_v54, %v2388_v53  ;;  %v6050_v31 = vld [vmem:[%s13884_s9 + $0x248] sm:$0xff]  ;;  %v6073_v54 = vld [vmem:[%s13884_s9 + $0x300] sm:$0xff] }
 0x142   :  { %v6054_v32 = vld [vmem:[%s13884_s9 + $0x268] sm:$0xff] }
 0x143   :  { %8879 = vmatpush1.bf16.msra.mxu1 %v8878_v37  ;;  %v2373_v37 = vld [vmem:[%s13884_s9 + $0x118] sm:$0xff] }
 0x144   :  { %7909 = vmatmul.mubr.f32.vlgmr.msra.gmra.mrb[8].mxu0 %v2156_v63  ;;  %8881 = vmatprep.subr.bf16.mxu1 %v8880_v38  ;;  %v2394_v63 = vld [vmem:[%s13884_s9 + $0x1c0] sm:$0xff]  ;;  %v2377_v38 = vld [vmem:[%s13884_s9 + $0x138] sm:$0xff] }
 0x145   :  { %2885 = vmatprep.mubr.f32.mxu0 %v9955_v6  ;;  %v8898_v1 = vpack.c.bf16 %v2398_v0, %v2394_v63  ;;  %v8916_v40 = vpack.c.bf16 %v2377_v38, %v2373_v37  ;;  %v6009_v0 = vld [vmem:[%s13879_s4 + $0x80] sm:$0xff]  ;;  %v6058_v37 = vld [vmem:[%s13884_s9 + $0x288] sm:$0xff] }
 0x146   :  { %v6062_v38 = vld [vmem:[%s13884_s9 + $0x2a8] sm:$0xff] }
 0x147   :  { %8883 = vmatpush1.bf16.msra.mxu1 %v8882_v43  ;;  %v2381_v43 = vld [vmem:[%s13884_s9 + $0x158] sm:$0xff] }
 0x148   :  { %8885 = vmatprep.subr.bf16.mxu1 %v8884_v44  ;;  %v2385_v44 = vld [vmem:[%s13884_s9 + $0x178] sm:$0xff] }
 0x149   :  { %v8920_v46 = vpack.c.bf16 %v2385_v44, %v2381_v43  ;;  %v6066_v43 = vld [vmem:[%s13884_s9 + $0x2c8] sm:$0xff] }
 0x14a   :  { %v6070_v44 = vld [vmem:[%s13884_s9 + $0x2e8] sm:$0xff] }
 0x14b   :  { %8887 = vmatpush1.bf16.msra.mxu1 %v8886_v49  ;;  %v2389_v49 = vld [vmem:[%s13884_s9 + $0x198] sm:$0xff] }
 0x14c   :  { %8889 = vmatprep.subr.bf16.mxu1 %v8888_v50  ;;  %v2393_v50 = vld [vmem:[%s13884_s9 + $0x1b8] sm:$0xff] }
 0x14d   :  { %v8924_v52 = vpack.c.bf16 %v2393_v50, %v2389_v49  ;;  %v1639_v49 = vlaneseq  ;;  %v6074_v50 = vld [vmem:[%s13884_s9 + $0x308] sm:$0xff] }
 0x14f   :  { %8891 = vmatpush1.bf16.msra.mxu1 %v8890_v55  ;;  %v2397_v55 = vld [vmem:[%s13884_s9 + $0x1d8] sm:$0xff] }
 0x150   :  { %8893 = vmatprep.subr.bf16.mxu1 %v8892_v56  ;;  %v2401_v56 = vld [vmem:[%s13884_s9 + $0x1f8] sm:$0xff] }
 0x151   :  { %v8928_v58 = vpack.c.bf16 %v2401_v56, %v2397_v55  ;;  %v6077_v55 = vld [vmem:[%s13884_s9 + $0x320] sm:$0xff]  ;;  %v1640_v56 = vshrl.u32 %v1639_v49, 7 }
 0x153   :  { %8895 = vmatpush1.bf16.msra.mxu1 %v8894_v59  ;;  %v2396_v59 = vld [vmem:[%s13884_s9 + $0x1d0] sm:$0xff] }
 0x154   :  { %8897 = vmatprep.subr.bf16.mxu1 %v8896_v62  ;;  %v8930_v61 = vpack.c.bf16 %v2400_v60, %v2396_v59  ;;  %v8998_v59 = vpack.c.bf16 %v6077_v55, %v6073_v54 }
 0x157   :  { %8899 = vmatpush1.bf16.msra.mxu1 %v8898_v1  ;;  %v6010_v1 = vld [vmem:[%s13879_s4 + $0x88] sm:$0xff] }
 0x158   :  { %8901 = vmatprep.subr.bf16.mxu1 %v8900_v5  ;;  %v8933_v2 = vpack.c.bf16 %v6010_v1, %v6009_v0  ;;  %v6012_v5 = vld [vmem:[%s13879_s4 + $0x98] sm:$0xff]  ;;  %v11487_v0 = vsub.s32 1, %v1640_v56  ;;  %v6090_v1 = vld [vmem:[%s13884_s9 + $0x388] sm:$0xff] }
 0x159   :  { %v8936_v7 = vpack.c.bf16 %v6012_v5, %v6011_v4  ;;  %v1632_v4 = vld [vmem:[%s13882_s7] sm:$0xf] }
 0x1f7   :  { %v2240_v15 = vpop.f32.mrb[0].mxu0 }
 0x1f8   :  { %v11272_v18 = vadd.f32 %v5683_v12, %v2240_v15  ;;  %v7875_v19 = vpop.f32.mrb[1].mxu0  ;;  %v6016_v12 = vld [vmem:[%s13879_s4 + $0xb8] sm:$0xff]  ;;  %v6018_v15 = vld [vmem:[%s13879_s4 + $0xc8] sm:$0xff] }
 0x1f9   :  { %v8942_v13 = vpack.c.bf16 %v6016_v12, %v6015_v11  ;;  %v8945_v16 = vpack.c.bf16 %v6018_v15, %v6017_v14  ;;  %v1636_v11 = vpop.permute.xlu0 %1635  ;;  %v1663_v12 = vld [vmem:[%s13883_s8] sm:$0xf]  ;;  %v11508_v14 = vsub.s32 0, %v1640_v56 }
 0x1fa   :  { %v2244_v21 = vmax.f32 %v11272_v18, 0.0  ;;  %v6020_v18 = vld [vmem:[%s13879_s4 + $0xd8] sm:$0xff] }
 0x1fb   :  { %v8948_v19 = vpack.c.bf16 %v6020_v18, %v6019_v17  ;;  %v1642_v17 = vrot.slane %v1632_v4, %v11508_v14 }
 0x1fc   :  { %2467 = vmatmul.mubr.f32.vlgmr.msra.gmra.mrb[16].mxu1 %v2244_v21 }
 0x1fd   :  { %8903 = vmatpush1.bf16.msra.mxu1 %v8902_v20  ;;  %2537 = vmatprep.mubr.f32.mxu1 %v9955_v6  ;;  %v6021_v20 = vld [vmem:[%s13879_s4 + $0xe0] sm:$0xff] }
 0x1fe   :  { %8905 = vmatprep.subr.bf16.mxu1 %v8904_v22 }
 0x201   :  { %8907 = vmatpush1.bf16.msra.mxu1 %v8906_v27  ;;  %v6046_v27 = vld [vmem:[%s13884_s9 + $0x228] sm:$0xff] }
 0x202   :  { %8909 = vmatprep.subr.bf16.mxu1 %v8908_v28  ;;  %v6041_v28 = vld [vmem:[%s13884_s9 + $0x200] sm:$0xff]  ;;  %v8980_v29 = vpack.c.bf16 %v6046_v27, %v6042_v26 }
 0x204   :  { %8981 = vmatprep.subr.bf16.mxu0 %v8980_v29 }
 0x205   :  { %8911 = vmatpush1.bf16.msra.mxu1 %v8910_v33  ;;  %v8982_v33 = vpack.c.bf16 %v6045_v30, %v6041_v28  ;;  %v11513_v30 = vsub.s32 2, %v1640_v56 }
 0x206   :  { %8913 = vmatprep.subr.bf16.mxu1 %v8912_v34  ;;  %v8984_v34 = vpack.c.bf16 %v6054_v32, %v6050_v31  ;;  %v11515_v31 = vsub.s32 3, %v1640_v56  ;;  %v5835_v32 = vld [vmem:[%s13881_s6 + $0x8] ss:$0 sm:$0xff] }
 0x207   :  { %8983 = vmatpush1.bf16.msra.mxu0 %v8982_v33  ;;  %v1650_v33 = vrot.slane %v1632_v4, %v11513_v30 }
 0x208   :  { %8985 = vmatprep.subr.bf16.mxu0 %v8984_v34 }
 0x209   :  { %8915 = vmatpush1.bf16.msra.mxu1 %v8914_v39  ;;  %v8986_v39 = vpack.c.bf16 %v6053_v36, %v6049_v35  ;;  %v1654_v35 = vrot.slane %v1632_v4, %v11515_v31 }
 0x20a   :  { %8917 = vmatprep.subr.bf16.mxu1 %v8916_v40  ;;  %v8988_v40 = vpack.c.bf16 %v6062_v38, %v6058_v37  ;;  %v1661_v37 = vmul.f32 %v1650_v33, %v1636_v11  ;;  %v1676_v38 = vrot.slane %v1663_v12, %v11513_v30  ;;  %v6044_v33 = vld [vmem:[%s13884_s9 + $0x218] sm:$0xff] }
 0x20b   :  { %8987 = vmatpush1.bf16.msra.mxu0 %v8986_v39 }
 0x20c   :  { %8989 = vmatprep.subr.bf16.mxu0 %v8988_v40  ;;  %v1662_v40 = vmul.f32 %v1654_v35, %v1636_v11 }
 0x20d   :  { %8919 = vmatpush1.bf16.msra.mxu1 %v8918_v45  ;;  %v8990_v45 = vpack.c.bf16 %v6061_v42, %v6057_v41  ;;  %v1680_v41 = vrot.slane %v1663_v12, %v11515_v31 }
 0x20e   :  { %8921 = vmatprep.subr.bf16.mxu1 %v8920_v46  ;;  %v8992_v46 = vpack.c.bf16 %v6070_v44, %v6066_v43 }
 0x20f   :  { %8991 = vmatpush1.bf16.msra.mxu0 %v8990_v45  ;;  %v1687_v45 = vadd.f32 %v1676_v38, %v1661_v37  ;;  %v6043_v37 = vld [vmem:[%s13884_s9 + $0x210] sm:$0xff] }
 0x210   :  { %8993 = vmatprep.subr.bf16.mxu0 %v8992_v46  ;;  %v6047_v38 = vld [vmem:[%s13884_s9 + $0x230] sm:$0xff] }
 0x211   :  { %8923 = vmatpush1.bf16.msra.mxu1 %v8922_v51  ;;  %v6078_v51 = vld [vmem:[%s13884_s9 + $0x328] sm:$0xff] }
 0x212   :  { %8925 = vmatprep.subr.bf16.mxu1 %v8924_v52  ;;  %v8994_v52 = vpack.c.bf16 %v6069_v48, %v6065_v47  ;;  %v8996_v53 = vpack.c.bf16 %v6078_v51, %v6074_v50  ;;  %v1688_v47 = vadd.f32 %v1680_v41, %v1662_v40  ;;  %v6052_v40 = vld [vmem:[%s13884_s9 + $0x258] sm:$0xff] }
 0x213   :  { %v6056_v41 = vld [vmem:[%s13884_s9 + $0x278] sm:$0xff] }
 0x214   :  { %8995 = vmatpush1.bf16.msra.mxu0 %v8994_v52 }
 0x215   :  { %8927 = vmatpush1.bf16.msra.mxu1 %v8926_v57  ;;  %v6082_v57 = vld [vmem:[%s13884_s9 + $0x348] sm:$0xff]  ;;  %8997 = vmatprep.subr.bf16.mxu0 %v8996_v53 }
 0x216   :  { %8929 = vmatprep.subr.bf16.mxu1 %v8928_v58  ;;  %v6086_v58 = vld [vmem:[%s13884_s9 + $0x368] sm:$0xff] }
 0x217   :  { %v11354_v62 = vpop.f32.mrb[8].mxu0  ;;  %v9000_v60 = vpack.c.bf16 %v6086_v58, %v6082_v57  ;;  %v6025_v57 = vld [vmem:[%s13879_s4 + $0x480] sm:$0xff]  ;;  %v6026_v58 = vld [vmem:[%s13879_s4 + $0x488] sm:$0xff] }
 0x218   :  { %v7910_v63 = vpop.f32.mrb[9].mxu0  ;;  %8999 = vmatpush1.bf16.msra.mxu0 %v8998_v59  ;;  %v9748_v34 = vadd.f32 %v5835_v32, %v11354_v62 }
 0x219   :  { %8931 = vmatpush1.bf16.msra.mxu1 %v8930_v61  ;;  %v6081_v61 = vld [vmem:[%s13884_s9 + $0x340] sm:$0xff]  ;;  %9001 = vmatprep.subr.bf16.mxu0 %v9000_v60 }
 0x21a   :  { %8932 = vmatprep.subr.bf16.mxu1 %v9953_v3  ;;  %v6085_v63 = vld [vmem:[%s13884_s9 + $0x360] sm:$0xff]  ;;  %v2333_v39 = vmax.f32 %v9748_v34, 0.0  ;;  %v6048_v34 = vld [vmem:[%s13884_s9 + $0x238] sm:$0xff] }
 0x21b   :  { %v9002_v5 = vpack.c.bf16 %v6085_v63, %v6081_v61  ;;  %v8957_v61 = vpack.c.bf16 %v6026_v58, %v6025_v57  ;;  %v9012_v35 = vpack.c.bf16 %v6048_v34, %v6044_v33  ;;  %v6067_v58 = vld [vmem:[%s13884_s9 + $0x2d0] sm:$0xff]  ;;  %v6113_v34 = vld [vmem:[%s13879_s4 + $0x118] sm:$0xff] }
 0x21c   :  { %2538 = vmatmul.mubr.f32.vlgmr.msra.gmra.mrb[18].mxu1 %v2244_v21  ;;  %v6022_v21 = vld [vmem:[%s13879_s4 + $0xe8] sm:$0xff]  ;;  %v6112_v33 = vld [vmem:[%s13879_s4 + $0x110] sm:$0xff] }
 0x21d   :  { %7943 = vmatprep.mubr.msk.f32.mxu1 %vm9954_vm0, %v9955_v6  ;;  %8934 = vmatpush3.bf16.msra.mxu1 %v8933_v2  ;;  %v8951_v22 = vpack.c.bf16 %v6022_v21, %v6021_v20  ;;  %v6094_v2 = vld [vmem:[%s13884_s9 + $0x3a8] sm:$0xff]  ;;  %v1659_v20 = vmul.f32 %v1642_v17, %v1636_v11  ;;  %v1668_v21 = vrot.slane %v1663_v12, %v11508_v14  ;;  %v6036_v17 = vld [vmem:[%s13879_s4 + $0x4d8] sm:$0xff] }
 0x21e   :  { %8935 = vmatprep.subr.bf16.mxu1 %v9953_v3  ;;  %9003 = vmatpush1.bf16.msra.mxu0 %v9002_v5  ;;  %v6029_v5 = vld [vmem:[%s13879_s4 + $0x4a0] sm:$0xff] }
 0x221   :  { %8937 = vmatpush3.bf16.msra.mxu1 %v8936_v7  ;;  %v9004_v7 = vpack.c.bf16 %v6094_v2, %v6090_v1  ;;  %v6027_v1 = vld [vmem:[%s13879_s4 + $0x490] sm:$0xff]  ;;  %v6028_v2 = vld [vmem:[%s13879_s4 + $0x498] sm:$0xff] }
 0x222   :  { %8938 = vmatprep.subr.bf16.mxu1 %v9953_v3 }
 0x223   :  { %9005 = vmatprep.subr.bf16.mxu0 %v9004_v7  ;;  %v6030_v7 = vld [vmem:[%s13879_s4 + $0x4a8] sm:$0xff] }
 0x225   :  { %8940 = vmatpush3.bf16.msra.mxu1 %v8939_v10  ;;  %v1646_v10 = vrot.slane %v1632_v4, %v11487_v0  ;;  %v8960_v4 = vpack.c.bf16 %v6028_v2, %v6027_v1  ;;  %v6075_v2 = vld [vmem:[%s13884_s9 + $0x310] sm:$0xff] }
 0x226   :  { %8941 = vmatprep.subr.bf16.mxu1 %v9953_v3 }
 0x227   :  { %v1660_v15 = vmul.f32 %v1646_v10, %v1636_v11  ;;  %v6032_v10 = vld [vmem:[%s13879_s4 + $0x4b8] sm:$0xff] }
 0x229   :  { %8943 = vmatpush3.bf16.msra.mxu1 %v8942_v13  ;;  %v9006_v13 = vpack.c.bf16 %v6093_v9, %v6089_v8  ;;  %v8963_v8 = vpack.c.bf16 %v6030_v7, %v6029_v5  ;;  %v6031_v9 = vld [vmem:[%s13879_s4 + $0x4b0] sm:$0xff]  ;;  %v6084_v5 = vld [vmem:[%s13884_s9 + $0x358] sm:$0xff] }
 0x22a   :  { %8944 = vmatprep.subr.bf16.mxu1 %v9953_v3  ;;  %v8966_v11 = vpack.c.bf16 %v6032_v10, %v6031_v9  ;;  %v6088_v7 = vld [vmem:[%s13884_s9 + $0x378] sm:$0xff]  ;;  %v6083_v10 = vld [vmem:[%s13884_s9 + $0x350] sm:$0xff] }
 0x22b   :  { %9007 = vmatpush1.bf16.msra.mxu0 %v9006_v13  ;;  %v6034_v13 = vld [vmem:[%s13879_s4 + $0x4c8] sm:$0xff]  ;;  %v9032_v9 = vpack.c.bf16 %v6088_v7, %v6084_v5 }
 0x22d   :  { %8946 = vmatpush3.bf16.msra.mxu1 %v8945_v16  ;;  %v1672_v16 = vrot.slane %v1663_v12, %v11487_v0  ;;  %v6033_v12 = vld [vmem:[%s13879_s4 + $0x4c0] sm:$0xff] }
 0x22e   :  { %8947 = vmatprep.subr.bf16.mxu1 %v9953_v3 }
 0x22f   :  { %v1686_v18 = vadd.f32 %v1672_v16, %v1660_v15  ;;  %v8969_v15 = vpack.c.bf16 %v6034_v13, %v6033_v12  ;;  %v6035_v16 = vld [vmem:[%s13879_s4 + $0x4d0] sm:$0xff]  ;;  %v6092_v12 = vld [vmem:[%s13884_s9 + $0x398] sm:$0xff] }
 0x230   :  { %v6096_v13 = vld [vmem:[%s13884_s9 + $0x3b8] sm:$0xff] }
 0x231   :  { %8949 = vmatpush3.bf16.msra.mxu1 %v8948_v19 }
 0x232   :  { %8950 = vmatprep.subr.bf16.mxu1 %v9953_v3 }
 0x235   :  { %8952 = vmatpush3.bf16.msra.mxu1 %v8951_v22 }
 0x236   :  { %8953 = vmatprep.subr.bf16.mxu1 %v9953_v3 }
 0x239   :  { %8955 = vmatpush3.bf16.msra.mxu1 %v8954_v25  ;;  %v1685_v25 = vadd.f32 %v1668_v21, %v1659_v20  ;;  %v6038_v20 = vld [vmem:[%s13879_s4 + $0x4e8] sm:$0xff] }
 0x23a   :  { %8956 = vmatprep.subr.bf16.mxu1 %v9953_v3 }
 0x2cf   :  { %v2468_v19 = vpop.f32.mrb[16].mxu1 }
 0x2d0   :  { %v2470_v22 = vpop.f32.mrb[17].mxu1  ;;  %v2544_v26 = vadd.f32 %v2468_v19, %v1685_v25  ;;  %v6037_v19 = vld [vmem:[%s13879_s4 + $0x4e0] sm:$0xff]  ;;  %v6098_v25 = vld [vmem:[%s13884_s9 + $0x3c8] sm:$0xff] }
 0x2d1   :  { %v2545_v23 = vadd.f32 %v2470_v22, %v1686_v18  ;;  %v8972_v18 = vpack.c.bf16 %v6036_v17, %v6035_v16  ;;  %v8975_v21 = vpack.c.bf16 %v6038_v20, %v6037_v19  ;;  %v6039_v22 = vld [vmem:[%s13879_s4 + $0x4f0] sm:$0xff]  ;;  %v9036_v16 = vpack.c.bf16 %v6096_v13, %v6092_v12  ;;  %v6100_v19 = vld [vmem:[%s13884_s9 + $0x3d8] sm:$0xff] }
 0x2d2   :  { %v6006_v27 = vmul.f32 -1.442695, %v2544_v26  ;;  %v6102_v26 = vld [vmem:[%s13884_s9 + $0x3e8] sm:$0xff]  ;;  %v6091_v17 = vld [vmem:[%s13884_s9 + $0x390] sm:$0xff]  ;;  %v6104_v20 = vld [vmem:[%s13884_s9 + $0x3f8] sm:$0xff] }
 0x2d3   :  { %v6007_v24 = vmul.f32 -1.442695, %v2545_v23  ;;  %v6040_v23 = vld [vmem:[%s13879_s4 + $0x4f8] sm:$0xff] }
 0x2d5   :  { %9795 = vpow2.f32 %v6007_v24  ;;  %v8978_v24 = vpack.c.bf16 %v6040_v23, %v6039_v22  ;;  %v9040_v22 = vpack.c.bf16 %v6104_v20, %v6100_v19  ;;  %v6099_v23 = vld [vmem:[%s13884_s9 + $0x3d0] sm:$0xff] }
 0x2d6   :  { %9797 = vpow2.f32 %v6006_v27  ;;  %v9008_v27 = vpack.c.bf16 %v6102_v26, %v6098_v25 }
 0x2d8   :  { %9009 = vmatprep.subr.bf16.mxu0 %v9008_v27 }
 0x2df   :  { %v9796_v28 = vpop.eup %9795 }
 0x2e0   :  { %v2557_v29 = vadd.f32 1.0, %v9796_v28  ;;  %v9798_v36 = vpop.eup %9797  ;;  %v6097_v28 = vld [vmem:[%s13884_s9 + $0x3c0] sm:$0xff] }
 0x2e1   :  { %v2551_v43 = vadd.f32 1.0, %v9798_v36  ;;  %v5702_v36 = vld [vmem:[%s13881_s6 + $0x1] ss:$0 sm:$0xff] }
 0x2e2   :  { %9799 = vrcp.f32 %v2557_v29  ;;  %v6101_v29 = vld [vmem:[%s13884_s9 + $0x3e0] sm:$0xff] }
 0x2e3   :  { %9801 = vrcp.f32 %v2551_v43  ;;  %v9010_v32 = vpack.c.bf16 %v6101_v29, %v6097_v28  ;;  %v6110_v28 = vld [vmem:[%s13879_s4 + $0x100] sm:$0xff]  ;;  %v6111_v29 = vld [vmem:[%s13879_s4 + $0x108] sm:$0xff] }
 0x2e5   :  { %9011 = vmatpush1.bf16.msra.mxu0 %v9010_v32  ;;  %v9045_v32 = vpack.c.bf16 %v6111_v29, %v6110_v28  ;;  %v6182_v28 = vld [vmem:[%s13884_s9 + $0x540] sm:$0xff] }
 0x2e6   :  { %9013 = vmatprep.subr.bf16.mxu0 %v9012_v35  ;;  %v9048_v35 = vpack.c.bf16 %v6113_v34, %v6112_v33  ;;  %v6186_v29 = vld [vmem:[%s13884_s9 + $0x560] sm:$0xff]  ;;  %v6195_v33 = vld [vmem:[%s13884_s9 + $0x5a8] sm:$0xff] }
 0x2e7   :  { %v9114_v34 = vpack.c.bf16 %v6186_v29, %v6182_v28 }
 0x2ec   :  { %v9800_v42 = vpop.eup %9799 }
 0x2ed   :  { %v2567_v44 = vmul.f32 %v9800_v42, %v2333_v39  ;;  %v9802_v51 = vpop.eup %9801 }
 0x2ef   :  { %v2539_v46 = vpop.f32.mrb[18].mxu1 }
 0x2f0   :  { %v2546_v48 = vadd.f32 %v2539_v46, %v1687_v45  ;;  %v2541_v49 = vpop.f32.mrb[19].mxu1  ;;  %v9016_v46 = vpack.c.bf16 %v6056_v41, %v6052_v40  ;;  %v6117_v40 = vld [vmem:[%s13879_s4 + $0x138] sm:$0xff] }
 0x2f1   :  { %v2547_v62 = vadd.f32 %v2541_v49, %v1688_v47  ;;  %v6051_v47 = vld [vmem:[%s13884_s9 + $0x250] sm:$0xff]  ;;  %v6060_v49 = vld [vmem:[%s13884_s9 + $0x298] sm:$0xff] }
 0x2f2   :  { %9803 = vtanh.f32 %v2546_v48  ;;  %v6055_v48 = vld [vmem:[%s13884_s9 + $0x270] sm:$0xff] }
 0x2f3   :  { %v6008_v50 = vmul.f32 -1.442695, %v2547_v62  ;;  %v6064_v62 = vld [vmem:[%s13884_s9 + $0x2b8] sm:$0xff] }
 0x2f5   :  { %9805 = vpow2.f32 %v6008_v50  ;;  %v9018_v50 = vpack.c.bf16 %v6055_v48, %v6051_v47  ;;  %v6122_v48 = vld [vmem:[%s13879_s4 + $0x160] sm:$0xff] }
 0x2fc   :  { %v9804_v52 = vpop.eup %9803 }
 0x2fd   :  { %v2568_v53 = vmul.f32 %v9804_v52, %v9802_v51  ;;  %v9020_v51 = vpack.c.bf16 %v6064_v62, %v6060_v49  ;;  %v6059_v52 = vld [vmem:[%s13884_s9 + $0x290] sm:$0xff]  ;;  %v6123_v49 = vld [vmem:[%s13879_s4 + $0x168] sm:$0xff] }
 0x2fe   :  { %v9063_v62 = vpack.c.bf16 %v6123_v49, %v6122_v48 }
 0x2ff   :  { %v9806_v54 = vpop.eup %9805  ;;  %v2569_v55 = vadd.f32 %v2568_v53, %v2567_v44  ;;  %v9014_v44 = vpack.c.bf16 %v6047_v38, %v6043_v37  ;;  %v6063_v53 = vld [vmem:[%s13884_s9 + $0x2b0] sm:$0xff]  ;;  %v6115_v37 = vld [vmem:[%s13879_s4 + $0x128] sm:$0xff] }
 0x300   :  { %v2564_v56 = vadd.f32 1.0, %v9806_v54  ;;  %v6068_v54 = vld [vmem:[%s13884_s9 + $0x2d8] sm:$0xff] }
 0x301   :  { %2573 = vst [vmem:[%s13890_s15] sm:$0xff] %v2569_v55  ;;  %9807 = vtanh.f32 %v2569_v55 }
 0x302   :  { %9809 = vrcp.f32 %v2564_v56  ;;  %v9022_v56 = vpack.c.bf16 %v6063_v53, %v6059_v52  ;;  %v6143_v53 = vld [vmem:[%s13884_s9 + $0x408] sm:$0xff] }
 0x30b   :  { %v9808_v59 = vpop.eup %9807 }
 0x30c   :  { %v9810_v60 = vpop.eup %9809 }
 0x30d   :  { %v2571_v63 = vmul.f32 %v9810_v60, %v9808_v59  ;;  %v6071_v59 = vld [vmem:[%s13884_s9 + $0x2f0] sm:$0xff]  ;;  %v6076_v60 = vld [vmem:[%s13884_s9 + $0x318] sm:$0xff] }
 0x30f   :  { %2572 = vst [vmem:[%s13889_s14] sm:$0xff] %v2571_v63  ;;  %7944 = vmatmul.mubr.f32.vlgmr.msra.gmra.mrb[0].mxu1 %v2571_v63  ;;  %v9026_v63 = vpack.c.bf16 %v6071_v59, %v6067_v58  ;;  %v6151_v58 = vld [vmem:[%s13884_s9 + $0x448] sm:$0xff] }
 0x310   :  { %8958 = vmatpush3.bf16.msra.mxu1 %v8957_v61  ;;  %7978 = vmatprep.mubr.msk.f32.mxu1 %vm9954_vm0, %v9955_v6  ;;  %v6080_v61 = vld [vmem:[%s13884_s9 + $0x338] sm:$0xff]  ;;  %v6155_v59 = vld [vmem:[%s13884_s9 + $0x468] sm:$0xff] }
 0x311   :  { %8959 = vmatprep.subr.bf16.mxu1 %v9953_v3  ;;  %v9028_v1 = vpack.c.bf16 %v6080_v61, %v6076_v60  ;;  %v9096_v61 = vpack.c.bf16 %v6155_v59, %v6151_v58 }
 0x314   :  { %8961 = vmatpush3.bf16.msra.mxu1 %v8960_v4  ;;  %v6079_v4 = vld [vmem:[%s13884_s9 + $0x330] sm:$0xff] }
 0x315   :  { %8962 = vmatprep.subr.bf16.mxu1 %v9953_v3 }
 0x318   :  { %8964 = vmatpush3.bf16.msra.mxu1 %v8963_v8  ;;  %v9030_v8 = vpack.c.bf16 %v6079_v4, %v6075_v2  ;;  %v6159_v2 = vld [vmem:[%s13884_s9 + $0x488] sm:$0xff] }
 0x319   :  { %8965 = vmatprep.subr.bf16.mxu1 %v9953_v3  ;;  %v6163_v4 = vld [vmem:[%s13884_s9 + $0x4a8] sm:$0xff] }
 0x31a   :  { %v9100_v7 = vpack.c.bf16 %v6163_v4, %v6159_v2 }
 0x31c   :  { %8967 = vmatpush3.bf16.msra.mxu1 %v8966_v11  ;;  %v6087_v11 = vld [vmem:[%s13884_s9 + $0x370] sm:$0xff] }
 0x31d   :  { %8968 = vmatprep.subr.bf16.mxu1 %v9953_v3 }
 0x320   :  { %8970 = vmatpush3.bf16.msra.mxu1 %v8969_v15  ;;  %v9034_v15 = vpack.c.bf16 %v6087_v11, %v6083_v10  ;;  %v6167_v10 = vld [vmem:[%s13884_s9 + $0x4c8] sm:$0xff] }
 0x321   :  { %8971 = vmatprep.subr.bf16.mxu1 %v9953_v3  ;;  %v6171_v11 = vld [vmem:[%s13884_s9 + $0x4e8] sm:$0xff] }
 0x322   :  { %v9104_v13 = vpack.c.bf16 %v6171_v11, %v6167_v10 }
 0x324   :  { %8973 = vmatpush3.bf16.msra.mxu1 %v8972_v18  ;;  %v6095_v18 = vld [vmem:[%s13884_s9 + $0x3b0] sm:$0xff] }
 0x325   :  { %8974 = vmatprep.subr.bf16.mxu1 %v9953_v3 }
 0x328   :  { %8976 = vmatpush3.bf16.msra.mxu1 %v8975_v21  ;;  %v9038_v21 = vpack.c.bf16 %v6095_v18, %v6091_v17  ;;  %v6175_v17 = vld [vmem:[%s13884_s9 + $0x508] sm:$0xff] }
 0x329   :  { %8977 = vmatprep.subr.bf16.mxu1 %v9953_v3  ;;  %v6179_v18 = vld [vmem:[%s13884_s9 + $0x528] sm:$0xff] }
 0x32a   :  { %v9108_v20 = vpack.c.bf16 %v6179_v18, %v6175_v17 }
 0x32c   :  { %8979 = vmatpush3.bf16.msra.mxu1 %v8978_v24  ;;  %v6103_v24 = vld [vmem:[%s13884_s9 + $0x3f0] sm:$0xff] }
 0x32d   :  { %v9042_v25 = vpack.c.bf16 %v6103_v24, %v6099_v23  ;;  %v6183_v23 = vld [vmem:[%s13884_s9 + $0x548] sm:$0xff] }
 0x32e   :  { %v6187_v24 = vld [vmem:[%s13884_s9 + $0x568] sm:$0xff] }
 0x32f   :  { %7979 = vmatmul.mubr.f32.vlgmr.msra.gmra.mrb[8].mxu1 %v2569_v55  ;;  %v6072_v55 = vld [vmem:[%s13884_s9 + $0x2f8] sm:$0xff] }
 0x330   :  { %3306 = vmatprep.mubr.f32.mxu1 %v9955_v6  ;;  %v9024_v57 = vpack.c.bf16 %v6072_v55, %v6068_v54  ;;  %v6147_v54 = vld [vmem:[%s13884_s9 + $0x428] sm:$0xff]  ;;  %v6142_v55 = vld [vmem:[%s13884_s9 + $0x400] sm:$0xff] }
 0x3e2   :  { %v2658_v39 = vpop.f32.mrb[0].mxu1 }
 0x3e3   :  { %v11622_v42 = vadd.f32 %v5702_v36, %v2658_v39  ;;  %v7945_v43 = vpop.f32.mrb[1].mxu1  ;;  %v6114_v36 = vld [vmem:[%s13879_s4 + $0x120] sm:$0xff]  ;;  %v6116_v39 = vld [vmem:[%s13879_s4 + $0x130] sm:$0xff] }
 0x3e4   :  { %v9051_v38 = vpack.c.bf16 %v6115_v37, %v6114_v36  ;;  %v9054_v41 = vpack.c.bf16 %v6117_v40, %v6116_v39  ;;  %v6119_v43 = vld [vmem:[%s13879_s4 + $0x148] sm:$0xff]  ;;  %v6190_v37 = vld [vmem:[%s13884_s9 + $0x580] sm:$0xff] }
 0x3e5   :  { %v2662_v45 = vmax.f32 %v11622_v42, 0.0  ;;  %v6118_v42 = vld [vmem:[%s13879_s4 + $0x140] sm:$0xff] }
 0x3e7   :  { %2886 = vmatmul.mubr.f32.vlgmr.msra.gmra.mrb[16].mxu0 %v2662_v45 }
 0x3e8   :  { %9015 = vmatpush1.bf16.msra.mxu0 %v9014_v44  ;;  %2956 = vmatprep.mubr.f32.mxu0 %v9955_v6  ;;  %v9057_v44 = vpack.c.bf16 %v6119_v43, %v6118_v42  ;;  %v1700_v42 = vpop.permute.xlu0 %1699 }
 0x3e9   :  { %9017 = vmatprep.subr.bf16.mxu0 %v9016_v46  ;;  %v6121_v46 = vld [vmem:[%s13879_s4 + $0x158] sm:$0xff] }
 0x3ec   :  { %9019 = vmatpush1.bf16.msra.mxu0 %v9018_v50  ;;  %v6124_v50 = vld [vmem:[%s13879_s4 + $0x170] sm:$0xff] }
 0x3ed   :  { %9021 = vmatprep.subr.bf16.mxu0 %v9020_v51  ;;  %v6125_v51 = vld [vmem:[%s13879_s4 + $0x178] sm:$0xff] }
 0x3ee   :  { %v9066_v52 = vpack.c.bf16 %v6125_v51, %v6124_v50 }
 0x3f0   :  { %9023 = vmatpush1.bf16.msra.mxu0 %v9022_v56  ;;  %v9092_v56 = vpack.c.bf16 %v6147_v54, %v6143_v53 }
 0x3f1   :  { %9025 = vmatprep.subr.bf16.mxu0 %v9024_v57  ;;  %v6146_v57 = vld [vmem:[%s13884_s9 + $0x420] sm:$0xff] }
 0x3f2   :  { %v9094_v60 = vpack.c.bf16 %v6146_v57, %v6142_v55  ;;  %9093 = vmatprep.subr.bf16.mxu1 %v9092_v56  ;;  %v5854_v57 = vld [vmem:[%s13881_s6 + $0x9] ss:$0 sm:$0xff] }
 0x3f4   :  { %9027 = vmatpush1.bf16.msra.mxu0 %v9026_v63  ;;  %v6150_v63 = vld [vmem:[%s13884_s9 + $0x440] sm:$0xff]  ;;  %9095 = vmatpush1.bf16.msra.mxu1 %v9094_v60 }
 0x3f5   :  { %9029 = vmatprep.subr.bf16.mxu0 %v9028_v1  ;;  %v6154_v1 = vld [vmem:[%s13884_s9 + $0x460] sm:$0xff]  ;;  %9097 = vmatprep.subr.bf16.mxu1 %v9096_v61 }
 0x3f6   :  { %v9098_v5 = vpack.c.bf16 %v6154_v1, %v6150_v63 }
 0x3f8   :  { %9031 = vmatpush1.bf16.msra.mxu0 %v9030_v8  ;;  %v6158_v8 = vld [vmem:[%s13884_s9 + $0x480] sm:$0xff]  ;;  %9099 = vmatpush1.bf16.msra.mxu1 %v9098_v5 }
 0x3f9   :  { %9033 = vmatprep.subr.bf16.mxu0 %v9032_v9  ;;  %v6162_v9 = vld [vmem:[%s13884_s9 + $0x4a0] sm:$0xff]  ;;  %9101 = vmatprep.subr.bf16.mxu1 %v9100_v7 }
 0x3fa   :  { %v9102_v12 = vpack.c.bf16 %v6162_v9, %v6158_v8 }
 0x3fc   :  { %9035 = vmatpush1.bf16.msra.mxu0 %v9034_v15  ;;  %v6166_v15 = vld [vmem:[%s13884_s9 + $0x4c0] sm:$0xff]  ;;  %9103 = vmatpush1.bf16.msra.mxu1 %v9102_v12 }
 0x3fd   :  { %9037 = vmatprep.subr.bf16.mxu0 %v9036_v16  ;;  %v6170_v16 = vld [vmem:[%s13884_s9 + $0x4e0] sm:$0xff]  ;;  %9105 = vmatprep.subr.bf16.mxu1 %v9104_v13 }
 0x3fe   :  { %v9106_v19 = vpack.c.bf16 %v6170_v16, %v6166_v15 }
 0x400   :  { %9039 = vmatpush1.bf16.msra.mxu0 %v9038_v21  ;;  %v6174_v21 = vld [vmem:[%s13884_s9 + $0x500] sm:$0xff]  ;;  %9107 = vmatpush1.bf16.msra.mxu1 %v9106_v19 }
 0x401   :  { %9041 = vmatprep.subr.bf16.mxu0 %v9040_v22  ;;  %v6178_v22 = vld [vmem:[%s13884_s9 + $0x520] sm:$0xff]  ;;  %9109 = vmatprep.subr.bf16.mxu1 %v9108_v20 }
 0x402   :  { %v11704_v26 = vpop.f32.mrb[8].mxu1 }
 0x403   :  { %v7980_v27 = vpop.f32.mrb[9].mxu1  ;;  %v9749_v59 = vadd.f32 %v5854_v57, %v11704_v26 }
 0x404   :  { %9043 = vmatpush1.bf16.msra.mxu0 %v9042_v25  ;;  %v9110_v25 = vpack.c.bf16 %v6178_v22, %v6174_v21  ;;  %v9112_v27 = vpack.c.bf16 %v6187_v24, %v6183_v23  ;;  %v6126_v23 = vld [vmem:[%s13879_s4 + $0x500] sm:$0xff]  ;;  %v6127_v24 = vld [vmem:[%s13879_s4 + $0x508] sm:$0xff] }
 0x405   :  { %9044 = vmatprep.subr.bf16.mxu0 %v9953_v3  ;;  %v2751_v2 = vmax.f32 %v9749_v59, 0.0  ;;  %v9069_v28 = vpack.c.bf16 %v6127_v24, %v6126_v23  ;;  %v6149_v59 = vld [vmem:[%s13884_s9 + $0x438] sm:$0xff]  ;;  %v6164_v23 = vld [vmem:[%s13884_s9 + $0x4b0] sm:$0xff] }
 0x406   :  { %9111 = vmatpush1.bf16.msra.mxu1 %v9110_v25  ;;  %v6169_v24 = vld [vmem:[%s13884_s9 + $0x4d8] sm:$0xff] }
 0x407   :  { %2957 = vmatmul.mubr.f32.vlgmr.msra.gmra.mrb[18].mxu0 %v2662_v45  ;;  %v6120_v45 = vld [vmem:[%s13879_s4 + $0x150] sm:$0xff]  ;;  %9113 = vmatprep.subr.bf16.mxu1 %v9112_v27 }
 0x408   :  { %8013 = vmatprep.mubr.msk.f32.mxu0 %vm9954_vm0, %v9955_v6  ;;  %9046 = vmatpush3.bf16.msra.mxu0 %v9045_v32  ;;  %v9060_v47 = vpack.c.bf16 %v6121_v46, %v6120_v45  ;;  %v6191_v32 = vld [vmem:[%s13884_s9 + $0x588] sm:$0xff] }
 0x409   :  { %9047 = vmatprep.subr.bf16.mxu0 %v9953_v3  ;;  %v9116_v36 = vpack.c.bf16 %v6195_v33, %v6191_v32  ;;  %v6128_v32 = vld [vmem:[%s13879_s4 + $0x510] sm:$0xff]  ;;  %v6129_v33 = vld [vmem:[%s13879_s4 + $0x518] sm:$0xff] }
 0x40a   :  { %9115 = vmatpush1.bf16.msra.mxu1 %v9114_v34  ;;  %v9072_v34 = vpack.c.bf16 %v6129_v33, %v6128_v32  ;;  %v6172_v32 = vld [vmem:[%s13884_s9 + $0x4f0] sm:$0xff]  ;;  %v6177_v33 = vld [vmem:[%s13884_s9 + $0x518] sm:$0xff] }
 0x40b   :  { %9117 = vmatprep.subr.bf16.mxu1 %v9116_v36  ;;  %v6131_v36 = vld [vmem:[%s13879_s4 + $0x528] sm:$0xff] }
 0x40c   :  { %9049 = vmatpush3.bf16.msra.mxu0 %v9048_v35  ;;  %v5970_v35 = vld [vmem:[%s13882_s7 + $0x4] sm:$0xf] }
 0x40d   :  { %9050 = vmatprep.subr.bf16.mxu0 %v9953_v3  ;;  %v1710_v39 = vrot.slane %v5970_v35, %v11487_v0  ;;  %v1706_v45 = vrot.slane %v5970_v35, %v11508_v14  ;;  %v1714_v58 = vrot.slane %v5970_v35, %v11513_v30  ;;  %v1718_v60 = vrot.slane %v5970_v35, %v11515_v31  ;;  %v6130_v35 = vld [vmem:[%s13879_s4 + $0x520] sm:$0xff] }
 0x40f   :  { %v1724_v43 = vmul.f32 %v1710_v39, %v1700_v42  ;;  %v1725_v63 = vmul.f32 %v1714_v58, %v1700_v42  ;;  %v1726_v4 = vmul.f32 %v1718_v60, %v1700_v42  ;;  %v6133_v39 = vld [vmem:[%s13879_s4 + $0x538] sm:$0xff] }
 0x410   :  { %9052 = vmatpush3.bf16.msra.mxu0 %v9051_v38  ;;  %v6194_v38 = vld [vmem:[%s13884_s9 + $0x5a0] sm:$0xff]  ;;  %v6145_v58 = vld [vmem:[%s13884_s9 + $0x418] sm:$0xff] }
 0x411   :  { %9053 = vmatprep.subr.bf16.mxu0 %v9953_v3  ;;  %v9118_v40 = vpack.c.bf16 %v6194_v38, %v6190_v37  ;;  %v9075_v37 = vpack.c.bf16 %v6131_v36, %v6130_v35  ;;  %v6132_v38 = vld [vmem:[%s13879_s4 + $0x530] sm:$0xff]  ;;  %v9124_v60 = vpack.c.bf16 %v6149_v59, %v6145_v58  ;;  %v6211_v59 = vld [vmem:[%s13879_s4 + $0x180] sm:$0xff] }
 0x413   :  { %9119 = vmatpush1.bf16.msra.mxu1 %v9118_v40  ;;  %v9078_v40 = vpack.c.bf16 %v6133_v39, %v6132_v38  ;;  %v6180_v38 = vld [vmem:[%s13884_s9 + $0x530] sm:$0xff]  ;;  %v6185_v39 = vld [vmem:[%s13884_s9 + $0x558] sm:$0xff] }
 0x414   :  { %9055 = vmatpush3.bf16.msra.mxu0 %v9054_v41  ;;  %v5971_v41 = vld [vmem:[%s13883_s8 + $0x4] sm:$0xf] }
 0x415   :  { %9056 = vmatprep.subr.bf16.mxu0 %v9953_v3  ;;  %v1733_v50 = vrot.slane %v5971_v41, %v11508_v14  ;;  %v1741_v1 = vrot.slane %v5971_v41, %v11513_v30  ;;  %v1745_v5 = vrot.slane %v5971_v41, %v11515_v31 }
 0x417   :  { %v1752_v10 = vadd.f32 %v1741_v1, %v1725_v63  ;;  %v1753_v12 = vadd.f32 %v1745_v5, %v1726_v4  ;;  %v5975_v63 = vld [vmem:[%s13894_s22 + $0x18] sm:$0xff]  ;;  %v5981_v1 = vld [vmem:[%s13894_s22 + $0x28] sm:$0xff]  ;;  %v5721_v4 = vld [vmem:[%s13881_s6 + $0x2] ss:$0 sm:$0xff] }
 0x418   :  { %9058 = vmatpush3.bf16.msra.mxu0 %v9057_v44  ;;  %v1737_v44 = vrot.slane %v5971_v41, %v11487_v0  ;;  %v6134_v41 = vld [vmem:[%s13879_s4 + $0x540] sm:$0xff]  ;;  %v6144_v5 = vld [vmem:[%s13884_s9 + $0x410] sm:$0xff] }
 0x419   :  { %9059 = vmatprep.subr.bf16.mxu0 %v9953_v3 }
 0x41c   :  { %9061 = vmatpush3.bf16.msra.mxu0 %v9060_v47  ;;  %v1751_v47 = vadd.f32 %v1737_v44, %v1724_v43  ;;  %v6136_v44 = vld [vmem:[%s13879_s4 + $0x550] sm:$0xff] }
 0x41d   :  { %9062 = vmatprep.subr.bf16.mxu0 %v9953_v3 }
 0x420   :  { %9064 = vmatpush3.bf16.msra.mxu0 %v9063_v62  ;;  %v1723_v62 = vmul.f32 %v1706_v45, %v1700_v42  ;;  %v6135_v42 = vld [vmem:[%s13879_s4 + $0x548] sm:$0xff]  ;;  %v6137_v45 = vld [vmem:[%s13879_s4 + $0x558] sm:$0xff] }
 0x421   :  { %9065 = vmatprep.subr.bf16.mxu0 %v9953_v3  ;;  %v9081_v43 = vpack.c.bf16 %v6135_v42, %v6134_v41 }
 0x424   :  { %9067 = vmatpush3.bf16.msra.mxu0 %v9066_v52  ;;  %v1750_v52 = vadd.f32 %v1733_v50, %v1723_v62  ;;  %v6140_v62 = vld [vmem:[%s13879_s4 + $0x570] sm:$0xff]  ;;  %v6141_v50 = vld [vmem:[%s13879_s4 + $0x578] sm:$0xff] }
 0x425   :  { %9068 = vmatprep.subr.bf16.mxu0 %v9953_v3 }
 0x4ba   :  { %v2887_v46 = vpop.f32.mrb[16].mxu0 }
 0x4bb   :  { %v2889_v48 = vpop.f32.mrb[17].mxu0  ;;  %v2963_v53 = vadd.f32 %v2887_v46, %v1750_v52  ;;  %v9084_v46 = vpack.c.bf16 %v6137_v45, %v6136_v44  ;;  %v6199_v52 = vld [vmem:[%s13884_s9 + $0x5c8] sm:$0xff]  ;;  %v6188_v44 = vld [vmem:[%s13884_s9 + $0x570] sm:$0xff]  ;;  %v6193_v45 = vld [vmem:[%s13884_s9 + $0x598] sm:$0xff] }
 0x4bc   :  { %v2964_v49 = vadd.f32 %v2889_v48, %v1751_v47  ;;  %v6138_v47 = vld [vmem:[%s13879_s4 + $0x560] sm:$0xff]  ;;  %v6139_v48 = vld [vmem:[%s13879_s4 + $0x568] sm:$0xff] }
 0x4bd   :  { %v6105_v54 = vmul.f32 -1.442695, %v2963_v53  ;;  %v6203_v53 = vld [vmem:[%s13884_s9 + $0x5e8] sm:$0xff] }
 0x4be   :  { %v6106_v51 = vmul.f32 -1.442695, %v2964_v49  ;;  %v9087_v49 = vpack.c.bf16 %v6139_v48, %v6138_v47 }
 0x4c0   :  { %9811 = vpow2.f32 %v6106_v51  ;;  %v9090_v51 = vpack.c.bf16 %v6141_v50, %v6140_v62  ;;  %v6196_v62 = vld [vmem:[%s13884_s9 + $0x5b0] sm:$0xff]  ;;  %v6201_v50 = vld [vmem:[%s13884_s9 + $0x5d8] sm:$0xff] }
 0x4c1   :  { %9813 = vpow2.f32 %v6105_v54  ;;  %v9120_v54 = vpack.c.bf16 %v6203_v53, %v6199_v52 }
 0x4c3   :  { %9121 = vmatprep.subr.bf16.mxu1 %v9120_v54  ;;  %v6200_v54 = vld [vmem:[%s13884_s9 + $0x5d0] sm:$0xff] }
 0x4ca   :  { %v9812_v55 = vpop.eup %9811 }
 0x4cb   :  { %v2976_v56 = vadd.f32 1.0, %v9812_v55  ;;  %v9814_v61 = vpop.eup %9813  ;;  %v6198_v55 = vld [vmem:[%s13884_s9 + $0x5c0] sm:$0xff] }
 0x4cc   :  { %v2970_v8 = vadd.f32 1.0, %v9814_v61  ;;  %v5972_v61 = vld [vmem:[%s13894_s22 + $0x10] sm:$0xff] }
 0x4cd   :  { %9815 = vrcp.f32 %v2976_v56  ;;  %v6202_v56 = vld [vmem:[%s13884_s9 + $0x5e0] sm:$0xff]  ;;  %1765 = vperm.xlu1 %9794, %v5972_v61  }
 0x4ce   :  { %9817 = vrcp.f32 %v2970_v8  ;;  %v9122_v57 = vpack.c.bf16 %v6202_v56, %v6198_v55  ;;  %v6204_v55 = vld [vmem:[%s13884_s9 + $0x5f0] sm:$0xff] }
 0x4cf   :  { %v9154_v56 = vpack.c.bf16 %v6204_v55, %v6200_v54  ;;  %v6284_v54 = vld [vmem:[%s13884_s9 + $0x748] sm:$0xff] }
 0x4d0   :  { %9123 = vmatpush1.bf16.msra.mxu1 %v9122_v57  ;;  %v6288_v55 = vld [vmem:[%s13884_s9 + $0x768] sm:$0xff] }
 0x4d1   :  { %9125 = vmatprep.subr.bf16.mxu1 %v9124_v60  ;;  %1831 = vperm.xlu1 %9794, %v5975_v63   ;;  %v6212_v60 = vld [vmem:[%s13879_s4 + $0x188] sm:$0xff]  ;;  %v6213_v63 = vld [vmem:[%s13879_s4 + $0x190] sm:$0xff] }
 0x4d2   :  { %v9157_v61 = vpack.c.bf16 %v6212_v60, %v6211_v59  ;;  %v6283_v59 = vld [vmem:[%s13884_s9 + $0x740] sm:$0xff] }
 0x4d3   :  { %v6287_v60 = vld [vmem:[%s13884_s9 + $0x760] sm:$0xff] }
 0x4d5   :  { %1963 = vperm.xlu1 %9794, %v5981_v1   ;;  %v6214_v1 = vld [vmem:[%s13879_s4 + $0x198] sm:$0xff] }
 0x4d7   :  { %v9816_v7 = vpop.eup %9815 }
 0x4d8   :  { %v2986_v9 = vmul.f32 %v9816_v7, %v2751_v2  ;;  %v9818_v17 = vpop.eup %9817  ;;  %v5987_v2 = vld [vmem:[%s13894_s22 + $0x38] sm:$0xff]  ;;  %v6148_v7 = vld [vmem:[%s13884_s9 + $0x430] sm:$0xff] }
 0x4d9   :  { %2095 = vperm.xlu1 %9794, %v5987_v2   ;;  %v9160_v2 = vpack.c.bf16 %v6214_v1, %v6213_v63  ;;  %v6296_v63 = vld [vmem:[%s13884_s9 + $0x7a8] sm:$0xff] }
 0x4da   :  { %v2958_v11 = vpop.f32.mrb[18].mxu0  ;;  %v5973_v1 = vld [vmem:[%s13882_s7 + $0x8] sm:$0xf] }
 0x4db   :  { %v2965_v13 = vadd.f32 %v2958_v11, %v1752_v10  ;;  %v2960_v15 = vpop.f32.mrb[19].mxu0  ;;  %v6157_v10 = vld [vmem:[%s13884_s9 + $0x478] sm:$0xff] }
 0x4dc   :  { %v2966_v26 = vadd.f32 %v2960_v15, %v1753_v12 }
 0x4dd   :  { %9819 = vtanh.f32 %v2965_v13  ;;  %v9126_v13 = vpack.c.bf16 %v6148_v7, %v6144_v5  ;;  %v6216_v5 = vld [vmem:[%s13879_s4 + $0x1a8] sm:$0xff] }
 0x4de   :  { %v6107_v16 = vmul.f32 -1.442695, %v2966_v26 }
 0x4e0   :  { %9821 = vpow2.f32 %v6107_v16  ;;  %v6152_v16 = vld [vmem:[%s13884_s9 + $0x450] sm:$0xff] }
 0x4e7   :  { %v9820_v18 = vpop.eup %9819 }
 0x4e8   :  { %v2987_v19 = vmul.f32 %v9820_v18, %v9818_v17  ;;  %v6156_v17 = vld [vmem:[%s13884_s9 + $0x470] sm:$0xff]  ;;  %v6161_v18 = vld [vmem:[%s13884_s9 + $0x498] sm:$0xff] }
 0x4ea   :  { %v9822_v20 = vpop.eup %9821  ;;  %v2988_v21 = vadd.f32 %v2987_v19, %v2986_v9  ;;  %v6153_v9 = vld [vmem:[%s13884_s9 + $0x458] sm:$0xff] }
 0x4eb   :  { %v2983_v22 = vadd.f32 1.0, %v9822_v20  ;;  %v9128_v26 = vpack.c.bf16 %v6157_v10, %v6153_v9  ;;  %v6165_v19 = vld [vmem:[%s13884_s9 + $0x4b8] sm:$0xff]  ;;  %v9130_v20 = vpack.c.bf16 %v6156_v17, %v6152_v16  ;;  %v6223_v17 = vld [vmem:[%s13879_s4 + $0x1e0] sm:$0xff] }
 0x4ec   :  { %6109 = vst [vmem:[%s13890_s15 + $0x8] sm:$0xff] %v2988_v21  ;;  %9823 = vtanh.f32 %v2988_v21  ;;  %v6218_v9 = vld [vmem:[%s13879_s4 + $0x1b8] sm:$0xff] }
 0x4ed   :  { %9825 = vrcp.f32 %v2983_v22  ;;  %v6160_v22 = vld [vmem:[%s13884_s9 + $0x490] sm:$0xff] }
 0x4f6   :  { %v9824_v25 = vpop.eup %9823 }
 0x4f7   :  { %v9826_v27 = vpop.eup %9825 }
 0x4f8   :  { %v2990_v29 = vmul.f32 %v9826_v27, %v9824_v25  ;;  %v6173_v25 = vld [vmem:[%s13884_s9 + $0x4f8] sm:$0xff]  ;;  %v9134_v27 = vpack.c.bf16 %v6164_v23, %v6160_v22  ;;  %v6244_v23 = vld [vmem:[%s13884_s9 + $0x608] sm:$0xff] }
 0x4fa   :  { %6108 = vst [vmem:[%s13889_s14 + $0x8] sm:$0xff] %v2990_v29  ;;  %8014 = vmatmul.mubr.f32.vlgmr.msra.gmra.mrb[2].mxu0 %v2990_v29  ;;  %v6168_v29 = vld [vmem:[%s13884_s9 + $0x4d0] sm:$0xff] }
 0x4fb   :  { %9070 = vmatpush3.bf16.msra.mxu0 %v9069_v28  ;;  %8048 = vmatprep.mubr.msk.f32.mxu0 %vm9954_vm0, %v9955_v6  ;;  %v9136_v28 = vpack.c.bf16 %v6173_v25, %v6169_v24  ;;  %v9138_v35 = vpack.c.bf16 %v6172_v32, %v6168_v29  ;;  %v6248_v24 = vld [vmem:[%s13884_s9 + $0x628] sm:$0xff]  ;;  %v6243_v25 = vld [vmem:[%s13884_s9 + $0x600] sm:$0xff] }
 0x4fc   :  { %9071 = vmatprep.subr.bf16.mxu0 %v9953_v3  ;;  %v6252_v29 = vld [vmem:[%s13884_s9 + $0x648] sm:$0xff] }
 0x4fd   :  { %v6256_v32 = vld [vmem:[%s13884_s9 + $0x668] sm:$0xff] }
 0x4ff   :  { %9073 = vmatpush3.bf16.msra.mxu0 %v9072_v34  ;;  %v6181_v34 = vld [vmem:[%s13884_s9 + $0x538] sm:$0xff] }
 0x500   :  { %9074 = vmatprep.subr.bf16.mxu0 %v9953_v3  ;;  %v9140_v36 = vpack.c.bf16 %v6181_v34, %v6177_v33  ;;  %v9208_v34 = vpack.c.bf16 %v6256_v32, %v6252_v29  ;;  %v1780_v29 = vrot.slane %v5973_v1, %v11513_v30 }
 0x503   :  { %9076 = vmatpush3.bf16.msra.mxu0 %v9075_v37  ;;  %v6176_v37 = vld [vmem:[%s13884_s9 + $0x510] sm:$0xff] }
 0x504   :  { %9077 = vmatprep.subr.bf16.mxu0 %v9953_v3  ;;  %v9142_v41 = vpack.c.bf16 %v6180_v38, %v6176_v37  ;;  %v6260_v37 = vld [vmem:[%s13884_s9 + $0x688] sm:$0xff] }
 0x505   :  { %v6264_v38 = vld [vmem:[%s13884_s9 + $0x6a8] sm:$0xff] }
 0x507   :  { %9079 = vmatpush3.bf16.msra.mxu0 %v9078_v40  ;;  %v6189_v40 = vld [vmem:[%s13884_s9 + $0x578] sm:$0xff] }
 0x508   :  { %9080 = vmatprep.subr.bf16.mxu0 %v9953_v3  ;;  %v9144_v42 = vpack.c.bf16 %v6189_v40, %v6185_v39  ;;  %v9212_v40 = vpack.c.bf16 %v6264_v38, %v6260_v37 }
 0x50b   :  { %9082 = vmatpush3.bf16.msra.mxu0 %v9081_v43  ;;  %v6184_v43 = vld [vmem:[%s13884_s9 + $0x550] sm:$0xff] }
 0x50c   :  { %9083 = vmatprep.subr.bf16.mxu0 %v9953_v3  ;;  %v9146_v47 = vpack.c.bf16 %v6188_v44, %v6184_v43  ;;  %v6268_v43 = vld [vmem:[%s13884_s9 + $0x6c8] sm:$0xff] }
 0x50d   :  { %v6272_v44 = vld [vmem:[%s13884_s9 + $0x6e8] sm:$0xff] }
 0x50f   :  { %9085 = vmatpush3.bf16.msra.mxu0 %v9084_v46  ;;  %v6197_v46 = vld [vmem:[%s13884_s9 + $0x5b8] sm:$0xff] }
 0x510   :  { %9086 = vmatprep.subr.bf16.mxu0 %v9953_v3  ;;  %v9148_v48 = vpack.c.bf16 %v6197_v46, %v6193_v45  ;;  %v9216_v46 = vpack.c.bf16 %v6272_v44, %v6268_v43 }
 0x513   :  { %9088 = vmatpush3.bf16.msra.mxu0 %v9087_v49  ;;  %v6192_v49 = vld [vmem:[%s13884_s9 + $0x590] sm:$0xff] }
 0x514   :  { %9089 = vmatprep.subr.bf16.mxu0 %v9953_v3  ;;  %v9150_v52 = vpack.c.bf16 %v6196_v62, %v6192_v49  ;;  %v6276_v49 = vld [vmem:[%s13884_s9 + $0x708] sm:$0xff] }
 0x515   :  { %v6280_v62 = vld [vmem:[%s13884_s9 + $0x728] sm:$0xff] }
 0x517   :  { %9091 = vmatpush3.bf16.msra.mxu0 %v9090_v51  ;;  %v6205_v51 = vld [vmem:[%s13884_s9 + $0x5f8] sm:$0xff] }
 0x518   :  { %v9152_v53 = vpack.c.bf16 %v6205_v51, %v6201_v50  ;;  %v9220_v51 = vpack.c.bf16 %v6280_v62, %v6276_v49 }
 0x51a   :  { %8049 = vmatmul.mubr.f32.vlgmr.msra.gmra.mrb[10].mxu0 %v2988_v21  ;;  %v9132_v21 = vpack.c.bf16 %v6165_v19, %v6161_v18  ;;  %v6224_v18 = vld [vmem:[%s13879_s4 + $0x1e8] sm:$0xff] }
 0x51b   :  { %3727 = vmatprep.mubr.f32.mxu0 %v9955_v6  ;;  %v9175_v19 = vpack.c.bf16 %v6224_v18, %v6223_v17 }
 0x5cd   :  { %v3079_v8 = vpop.f32.mrb[2].mxu0 }
 0x5ce   :  { %v11976_v11 = vadd.f32 %v5721_v4, %v3079_v8  ;;  %v8015_v12 = vpop.f32.mrb[3].mxu0  ;;  %v6215_v4 = vld [vmem:[%s13879_s4 + $0x1a0] sm:$0xff]  ;;  %v6217_v8 = vld [vmem:[%s13879_s4 + $0x1b0] sm:$0xff] }
 0x5cf   :  { %v9163_v7 = vpack.c.bf16 %v6216_v5, %v6215_v4  ;;  %v9166_v10 = vpack.c.bf16 %v6218_v9, %v6217_v8  ;;  %v6220_v12 = vld [vmem:[%s13879_s4 + $0x1c8] sm:$0xff]  ;;  %v6291_v5 = vld [vmem:[%s13884_s9 + $0x780] sm:$0xff]  ;;  %v1776_v8 = vrot.slane %v5973_v1, %v11487_v0  ;;  %v1766_v9 = vpop.permute.xlu1 %1765 }
 0x5d0   :  { %v3083_v15 = vmax.f32 %v11976_v11, 0.0  ;;  %v6219_v11 = vld [vmem:[%s13879_s4 + $0x1c0] sm:$0xff] }
 0x5d2   :  { %3307 = vmatmul.mubr.f32.vlgmr.msra.gmra.mrb[20].mxu1 %v3083_v15 }
 0x5d3   :  { %9127 = vmatpush1.bf16.msra.mxu1 %v9126_v13  ;;  %3377 = vmatprep.mubr.f32.mxu1 %v9955_v6  ;;  %v9169_v13 = vpack.c.bf16 %v6220_v12, %v6219_v11  ;;  %v1790_v12 = vmul.f32 %v1776_v8, %v1766_v9  ;;  %v6234_v8 = vld [vmem:[%s13879_s4 + $0x5b8] sm:$0xff] }
 0x5d4   :  { %9129 = vmatprep.subr.bf16.mxu1 %v9128_v26  ;;  %v6222_v26 = vld [vmem:[%s13879_s4 + $0x1d8] sm:$0xff] }
 0x5d7   :  { %9131 = vmatpush1.bf16.msra.mxu1 %v9130_v20  ;;  %v6225_v20 = vld [vmem:[%s13879_s4 + $0x1f0] sm:$0xff] }
 0x5d8   :  { %9133 = vmatprep.subr.bf16.mxu1 %v9132_v21  ;;  %v6226_v21 = vld [vmem:[%s13879_s4 + $0x1f8] sm:$0xff] }
 0x5d9   :  { %v9178_v22 = vpack.c.bf16 %v6226_v21, %v6225_v20 }
 0x5db   :  { %9135 = vmatpush1.bf16.msra.mxu1 %v9134_v27  ;;  %v9204_v27 = vpack.c.bf16 %v6248_v24, %v6244_v23 }
 0x5dc   :  { %9137 = vmatprep.subr.bf16.mxu1 %v9136_v28  ;;  %v6247_v28 = vld [vmem:[%s13884_s9 + $0x620] sm:$0xff] }
 0x5dd   :  { %v9206_v33 = vpack.c.bf16 %v6247_v28, %v6243_v25  ;;  %9205 = vmatprep.subr.bf16.mxu0 %v9204_v27  ;;  %v5873_v28 = vld [vmem:[%s13881_s6 + $0xa] ss:$0 sm:$0xff] }
 0x5df   :  { %9139 = vmatpush1.bf16.msra.mxu1 %v9138_v35  ;;  %v6251_v35 = vld [vmem:[%s13884_s9 + $0x640] sm:$0xff]  ;;  %9207 = vmatpush1.bf16.msra.mxu0 %v9206_v33  ;;  %v1784_v33 = vrot.slane %v5973_v1, %v11515_v31 }
 0x5e0   :  { %9141 = vmatprep.subr.bf16.mxu1 %v9140_v36  ;;  %v6255_v36 = vld [vmem:[%s13884_s9 + $0x660] sm:$0xff]  ;;  %9209 = vmatprep.subr.bf16.mxu0 %v9208_v34 }
 0x5e1   :  { %v9210_v39 = vpack.c.bf16 %v6255_v36, %v6251_v35  ;;  %v1791_v35 = vmul.f32 %v1780_v29, %v1766_v9  ;;  %v1792_v38 = vmul.f32 %v1784_v33, %v1766_v9  ;;  %v6246_v29 = vld [vmem:[%s13884_s9 + $0x618] sm:$0xff] }
 0x5e3   :  { %9143 = vmatpush1.bf16.msra.mxu1 %v9142_v41  ;;  %v6259_v41 = vld [vmem:[%s13884_s9 + $0x680] sm:$0xff]  ;;  %9211 = vmatpush1.bf16.msra.mxu0 %v9210_v39 }
 0x5e4   :  { %9145 = vmatprep.subr.bf16.mxu1 %v9144_v42  ;;  %v6263_v42 = vld [vmem:[%s13884_s9 + $0x6a0] sm:$0xff]  ;;  %9213 = vmatprep.subr.bf16.mxu0 %v9212_v40 }
 0x5e5   :  { %v9214_v45 = vpack.c.bf16 %v6263_v42, %v6259_v41 }
 0x5e7   :  { %9147 = vmatpush1.bf16.msra.mxu1 %v9146_v47  ;;  %v6267_v47 = vld [vmem:[%s13884_s9 + $0x6c0] sm:$0xff]  ;;  %9215 = vmatpush1.bf16.msra.mxu0 %v9214_v45 }
 0x5e8   :  { %9149 = vmatprep.subr.bf16.mxu1 %v9148_v48  ;;  %v6271_v48 = vld [vmem:[%s13884_s9 + $0x6e0] sm:$0xff]  ;;  %9217 = vmatprep.subr.bf16.mxu0 %v9216_v46 }
 0x5e9   :  { %v9218_v50 = vpack.c.bf16 %v6271_v48, %v6267_v47 }
 0x5eb   :  { %9151 = vmatpush1.bf16.msra.mxu1 %v9150_v52  ;;  %v6275_v52 = vld [vmem:[%s13884_s9 + $0x700] sm:$0xff]  ;;  %9219 = vmatpush1.bf16.msra.mxu0 %v9218_v50 }
 0x5ec   :  { %9153 = vmatprep.subr.bf16.mxu1 %v9152_v53  ;;  %v6279_v53 = vld [vmem:[%s13884_s9 + $0x720] sm:$0xff]  ;;  %9221 = vmatprep.subr.bf16.mxu0 %v9220_v51 }
 0x5ed   :  { %v12058_v57 = vpop.f32.mrb[10].mxu0 }
 0x5ee   :  { %v8050_v58 = vpop.f32.mrb[11].mxu0  ;;  %v9750_v32 = vadd.f32 %v5873_v28, %v12058_v57 }
 0x5ef   :  { %9155 = vmatpush1.bf16.msra.mxu1 %v9154_v56  ;;  %v9222_v56 = vpack.c.bf16 %v6279_v53, %v6275_v52  ;;  %v9224_v58 = vpack.c.bf16 %v6288_v55, %v6284_v54  ;;  %v6227_v54 = vld [vmem:[%s13879_s4 + $0x580] sm:$0xff]  ;;  %v6228_v55 = vld [vmem:[%s13879_s4 + $0x588] sm:$0xff] }
 0x5f0   :  { %9156 = vmatprep.subr.bf16.mxu1 %v9953_v3  ;;  %v3172_v37 = vmax.f32 %v9750_v32, 0.0  ;;  %v6250_v32 = vld [vmem:[%s13884_s9 + $0x638] sm:$0xff] }
 0x5f1   :  { %9223 = vmatpush1.bf16.msra.mxu0 %v9222_v56  ;;  %v9236_v33 = vpack.c.bf16 %v6250_v32, %v6246_v29  ;;  %v6314_v29 = vld [vmem:[%s13879_s4 + $0x210] sm:$0xff]  ;;  %v6315_v32 = vld [vmem:[%s13879_s4 + $0x218] sm:$0xff] }
 0x5f2   :  { %3378 = vmatmul.mubr.f32.vlgmr.msra.gmra.mrb[22].mxu1 %v3083_v15  ;;  %v6221_v15 = vld [vmem:[%s13879_s4 + $0x1d0] sm:$0xff]  ;;  %9225 = vmatprep.subr.bf16.mxu0 %v9224_v58 }
 0x5f3   :  { %8083 = vmatprep.mubr.msk.f32.mxu1 %vm9954_vm0, %v9955_v6  ;;  %9158 = vmatpush3.bf16.msra.mxu1 %v9157_v61  ;;  %v9172_v16 = vpack.c.bf16 %v6222_v26, %v6221_v15  ;;  %v6292_v61 = vld [vmem:[%s13884_s9 + $0x788] sm:$0xff]  ;;  %v1772_v15 = vrot.slane %v5973_v1, %v11508_v14 }
 0x5f4   :  { %9159 = vmatprep.subr.bf16.mxu1 %v9953_v3  ;;  %v9228_v4 = vpack.c.bf16 %v6296_v63, %v6292_v61  ;;  %v6229_v61 = vld [vmem:[%s13879_s4 + $0x590] sm:$0xff]  ;;  %v6230_v63 = vld [vmem:[%s13879_s4 + $0x598] sm:$0xff] }
 0x5f5   :  { %v1789_v17 = vmul.f32 %v1772_v15, %v1766_v9  ;;  %v9184_v1 = vpack.c.bf16 %v6230_v63, %v6229_v61  ;;  %v6238_v15 = vld [vmem:[%s13879_s4 + $0x5d8] sm:$0xff]  ;;  %v6277_v63 = vld [vmem:[%s13884_s9 + $0x710] sm:$0xff] }
 0x5f7   :  { %9161 = vmatpush3.bf16.msra.mxu1 %v9160_v2  ;;  %v9226_v2 = vpack.c.bf16 %v6287_v60, %v6283_v59  ;;  %v9181_v59 = vpack.c.bf16 %v6228_v55, %v6227_v54  ;;  %v6269_v55 = vld [vmem:[%s13884_s9 + $0x6d0] sm:$0xff] }
 0x5f8   :  { %9162 = vmatprep.subr.bf16.mxu1 %v9953_v3 }
 0x5f9   :  { %9227 = vmatpush1.bf16.msra.mxu0 %v9226_v2  ;;  %v6231_v2 = vld [vmem:[%s13879_s4 + $0x5a0] sm:$0xff] }
 0x5fa   :  { %9229 = vmatprep.subr.bf16.mxu0 %v9228_v4  ;;  %v6232_v4 = vld [vmem:[%s13879_s4 + $0x5a8] sm:$0xff] }
 0x5fb   :  { %9164 = vmatpush3.bf16.msra.mxu1 %v9163_v7  ;;  %v6295_v7 = vld [vmem:[%s13884_s9 + $0x7a0] sm:$0xff] }
 0x5fc   :  { %9165 = vmatprep.subr.bf16.mxu1 %v9953_v3  ;;  %v9230_v11 = vpack.c.bf16 %v6295_v7, %v6291_v5  ;;  %v9187_v5 = vpack.c.bf16 %v6232_v4, %v6231_v2  ;;  %v6233_v7 = vld [vmem:[%s13879_s4 + $0x5b0] sm:$0xff]  ;;  %v6286_v2 = vld [vmem:[%s13884_s9 + $0x758] sm:$0xff] }
 0x5fd   :  { %v9190_v9 = vpack.c.bf16 %v6234_v8, %v6233_v7  ;;  %v6290_v4 = vld [vmem:[%s13884_s9 + $0x778] sm:$0xff]  ;;  %v6285_v8 = vld [vmem:[%s13884_s9 + $0x750] sm:$0xff] }
 0x5fe   :  { %9231 = vmatpush1.bf16.msra.mxu0 %v9230_v11  ;;  %v6236_v11 = vld [vmem:[%s13879_s4 + $0x5c8] sm:$0xff]  ;;  %v9256_v7 = vpack.c.bf16 %v6290_v4, %v6286_v2 }
 0x5ff   :  { %9167 = vmatpush3.bf16.msra.mxu1 %v9166_v10  ;;  %v5974_v10 = vld [vmem:[%s13883_s8 + $0x8] sm:$0xf] }
 0x600   :  { %9168 = vmatprep.subr.bf16.mxu1 %v9953_v3  ;;  %v1799_v18 = vrot.slane %v5974_v10, %v11508_v14  ;;  %v1807_v36 = vrot.slane %v5974_v10, %v11513_v30  ;;  %v1811_v39 = vrot.slane %v5974_v10, %v11515_v31 }
 0x602   :  { %v1818_v43 = vadd.f32 %v1807_v36, %v1791_v35  ;;  %v1819_v45 = vadd.f32 %v1811_v39, %v1792_v38  ;;  %v6245_v35 = vld [vmem:[%s13884_s9 + $0x610] sm:$0xff]  ;;  %v6254_v38 = vld [vmem:[%s13884_s9 + $0x658] sm:$0xff] }
 0x603   :  { %9170 = vmatpush3.bf16.msra.mxu1 %v9169_v13  ;;  %v1803_v13 = vrot.slane %v5974_v10, %v11487_v0  ;;  %v6235_v10 = vld [vmem:[%s13879_s4 + $0x5c0] sm:$0xff]  ;;  %v6249_v36 = vld [vmem:[%s13884_s9 + $0x630] sm:$0xff]  ;;  %v6258_v39 = vld [vmem:[%s13884_s9 + $0x678] sm:$0xff] }
 0x604   :  { %9171 = vmatprep.subr.bf16.mxu1 %v9953_v3 }
 0x605   :  { %v1817_v26 = vadd.f32 %v1803_v13, %v1790_v12  ;;  %v9193_v12 = vpack.c.bf16 %v6236_v11, %v6235_v10  ;;  %v6237_v13 = vld [vmem:[%s13879_s4 + $0x5d0] sm:$0xff]  ;;  %v6294_v10 = vld [vmem:[%s13884_s9 + $0x798] sm:$0xff] }
 0x606   :  { %v6298_v11 = vld [vmem:[%s13884_s9 + $0x7b8] sm:$0xff] }
 0x607   :  { %9173 = vmatpush3.bf16.msra.mxu1 %v9172_v16 }
 0x608   :  { %9174 = vmatprep.subr.bf16.mxu1 %v9953_v3 }
 0x60b   :  { %9176 = vmatpush3.bf16.msra.mxu1 %v9175_v19 }
 0x60c   :  { %9177 = vmatprep.subr.bf16.mxu1 %v9953_v3 }
 0x60f   :  { %9179 = vmatpush3.bf16.msra.mxu1 %v9178_v22  ;;  %v1816_v22 = vadd.f32 %v1799_v18, %v1789_v17  ;;  %v6240_v17 = vld [vmem:[%s13879_s4 + $0x5e8] sm:$0xff] }
 0x610   :  { %9180 = vmatprep.subr.bf16.mxu1 %v9953_v3 }
 0x6a5   :  { %v3308_v16 = vpop.f32.mrb[20].mxu1 }
 0x6a6   :  { %v3310_v19 = vpop.f32.mrb[21].mxu1  ;;  %v3384_v23 = vadd.f32 %v3308_v16, %v1816_v22  ;;  %v6239_v16 = vld [vmem:[%s13879_s4 + $0x5e0] sm:$0xff]  ;;  %v6300_v22 = vld [vmem:[%s13884_s9 + $0x7c8] sm:$0xff] }
 0x6a7   :  { %v3385_v20 = vadd.f32 %v3310_v19, %v1817_v26  ;;  %v9196_v26 = vpack.c.bf16 %v6238_v15, %v6237_v13  ;;  %v9199_v18 = vpack.c.bf16 %v6240_v17, %v6239_v16  ;;  %v6241_v19 = vld [vmem:[%s13879_s4 + $0x5f0] sm:$0xff]  ;;  %v9260_v13 = vpack.c.bf16 %v6298_v11, %v6294_v10  ;;  %v6302_v16 = vld [vmem:[%s13884_s9 + $0x7d8] sm:$0xff] }
 0x6a8   :  { %v6206_v24 = vmul.f32 -1.442695, %v3384_v23  ;;  %v6304_v23 = vld [vmem:[%s13884_s9 + $0x7e8] sm:$0xff]  ;;  %v6293_v15 = vld [vmem:[%s13884_s9 + $0x790] sm:$0xff]  ;;  %v6306_v17 = vld [vmem:[%s13884_s9 + $0x7f8] sm:$0xff] }
 0x6a9   :  { %v6207_v21 = vmul.f32 -1.442695, %v3385_v20  ;;  %v6242_v20 = vld [vmem:[%s13879_s4 + $0x5f8] sm:$0xff] }
 0x6ab   :  { %9827 = vpow2.f32 %v6207_v21  ;;  %v9202_v21 = vpack.c.bf16 %v6242_v20, %v6241_v19  ;;  %v9264_v19 = vpack.c.bf16 %v6306_v17, %v6302_v16  ;;  %v6301_v20 = vld [vmem:[%s13884_s9 + $0x7d0] sm:$0xff] }
 0x6ac   :  { %9829 = vpow2.f32 %v6206_v24  ;;  %v9232_v24 = vpack.c.bf16 %v6304_v23, %v6300_v22 }
 0x6ae   :  { %9233 = vmatprep.subr.bf16.mxu0 %v9232_v24 }
 0x6b5   :  { %v9828_v25 = vpop.eup %9827 }
 0x6b6   :  { %v3397_v27 = vadd.f32 1.0, %v9828_v25  ;;  %v9830_v34 = vpop.eup %9829  ;;  %v6299_v25 = vld [vmem:[%s13884_s9 + $0x7c0] sm:$0xff] }
 0x6b7   :  { %v3391_v41 = vadd.f32 1.0, %v9830_v34  ;;  %v5740_v34 = vld [vmem:[%s13881_s6 + $0x3] ss:$0 sm:$0xff] }
 0x6b8   :  { %9831 = vrcp.f32 %v3397_v27  ;;  %v6303_v27 = vld [vmem:[%s13884_s9 + $0x7e0] sm:$0xff] }
 0x6b9   :  { %9833 = vrcp.f32 %v3391_v41  ;;  %v9234_v28 = vpack.c.bf16 %v6303_v27, %v6299_v25  ;;  %v6312_v25 = vld [vmem:[%s13879_s4 + $0x200] sm:$0xff]  ;;  %v6313_v27 = vld [vmem:[%s13879_s4 + $0x208] sm:$0xff] }
 0x6bb   :  { %9235 = vmatpush1.bf16.msra.mxu0 %v9234_v28  ;;  %v9269_v28 = vpack.c.bf16 %v6313_v27, %v6312_v25  ;;  %v6384_v25 = vld [vmem:[%s13884_s9 + $0x940] sm:$0xff] }
 0x6bc   :  { %9237 = vmatprep.subr.bf16.mxu0 %v9236_v33  ;;  %v9272_v33 = vpack.c.bf16 %v6315_v32, %v6314_v29  ;;  %v6388_v27 = vld [vmem:[%s13884_s9 + $0x960] sm:$0xff]  ;;  %v6397_v29 = vld [vmem:[%s13884_s9 + $0x9a8] sm:$0xff] }
 0x6bd   :  { %v9338_v32 = vpack.c.bf16 %v6388_v27, %v6384_v25 }
 0x6c2   :  { %v9832_v40 = vpop.eup %9831 }
 0x6c3   :  { %v3407_v42 = vmul.f32 %v9832_v40, %v3172_v37  ;;  %v9834_v49 = vpop.eup %9833 }
 0x6c5   :  { %v3379_v44 = vpop.f32.mrb[22].mxu1 }
 0x6c6   :  { %v3386_v46 = vadd.f32 %v3379_v44, %v1818_v43  ;;  %v3381_v47 = vpop.f32.mrb[23].mxu1  ;;  %v9240_v44 = vpack.c.bf16 %v6258_v39, %v6254_v38  ;;  %v6319_v38 = vld [vmem:[%s13879_s4 + $0x238] sm:$0xff] }
 0x6c7   :  { %v3387_v57 = vadd.f32 %v3381_v47, %v1819_v45  ;;  %v6253_v45 = vld [vmem:[%s13884_s9 + $0x650] sm:$0xff]  ;;  %v6262_v47 = vld [vmem:[%s13884_s9 + $0x698] sm:$0xff] }
 0x6c8   :  { %9835 = vtanh.f32 %v3386_v46  ;;  %v6257_v46 = vld [vmem:[%s13884_s9 + $0x670] sm:$0xff] }
 0x6c9   :  { %v6208_v48 = vmul.f32 -1.442695, %v3387_v57  ;;  %v6266_v57 = vld [vmem:[%s13884_s9 + $0x6b8] sm:$0xff] }
 0x6cb   :  { %9837 = vpow2.f32 %v6208_v48  ;;  %v9242_v48 = vpack.c.bf16 %v6257_v46, %v6253_v45  ;;  %v6324_v46 = vld [vmem:[%s13879_s4 + $0x260] sm:$0xff] }
 0x6d2   :  { %v9836_v62 = vpop.eup %9835 }
 0x6d3   :  { %v3408_v50 = vmul.f32 %v9836_v62, %v9834_v49  ;;  %v9244_v49 = vpack.c.bf16 %v6266_v57, %v6262_v47  ;;  %v6261_v62 = vld [vmem:[%s13884_s9 + $0x690] sm:$0xff]  ;;  %v6325_v47 = vld [vmem:[%s13879_s4 + $0x268] sm:$0xff] }
 0x6d4   :  { %v9287_v57 = vpack.c.bf16 %v6325_v47, %v6324_v46 }
 0x6d5   :  { %v9838_v51 = vpop.eup %9837  ;;  %v3409_v52 = vadd.f32 %v3408_v50, %v3407_v42  ;;  %v9238_v42 = vpack.c.bf16 %v6249_v36, %v6245_v35  ;;  %v6265_v50 = vld [vmem:[%s13884_s9 + $0x6b0] sm:$0xff]  ;;  %v6317_v35 = vld [vmem:[%s13879_s4 + $0x228] sm:$0xff] }
 0x6d6   :  { %v3404_v53 = vadd.f32 1.0, %v9838_v51  ;;  %v6270_v51 = vld [vmem:[%s13884_s9 + $0x6d8] sm:$0xff] }
 0x6d7   :  { %6210 = vst [vmem:[%s13890_s15 + $0x10] sm:$0xff] %v3409_v52  ;;  %9839 = vtanh.f32 %v3409_v52 }
 0x6d8   :  { %9841 = vrcp.f32 %v3404_v53  ;;  %v9246_v53 = vpack.c.bf16 %v6265_v50, %v6261_v62  ;;  %v6345_v50 = vld [vmem:[%s13884_s9 + $0x808] sm:$0xff] }
 0x6e1   :  { %v9840_v56 = vpop.eup %9839 }
 0x6e2   :  { %v9842_v58 = vpop.eup %9841 }
 0x6e3   :  { %v3411_v60 = vmul.f32 %v9842_v58, %v9840_v56  ;;  %v6273_v56 = vld [vmem:[%s13884_s9 + $0x6f0] sm:$0xff]  ;;  %v6278_v58 = vld [vmem:[%s13884_s9 + $0x718] sm:$0xff] }
 0x6e5   :  { %6209 = vst [vmem:[%s13889_s14 + $0x10] sm:$0xff] %v3411_v60  ;;  %8084 = vmatmul.mubr.f32.vlgmr.msra.gmra.mrb[2].mxu1 %v3411_v60  ;;  %v9250_v60 = vpack.c.bf16 %v6273_v56, %v6269_v55  ;;  %v6353_v55 = vld [vmem:[%s13884_s9 + $0x848] sm:$0xff] }
 0x6e6   :  { %9182 = vmatpush3.bf16.msra.mxu1 %v9181_v59  ;;  %8118 = vmatprep.mubr.msk.f32.mxu1 %vm9954_vm0, %v9955_v6  ;;  %v6282_v59 = vld [vmem:[%s13884_s9 + $0x738] sm:$0xff]  ;;  %v6357_v56 = vld [vmem:[%s13884_s9 + $0x868] sm:$0xff] }
 0x6e7   :  { %9183 = vmatprep.subr.bf16.mxu1 %v9953_v3  ;;  %v9252_v61 = vpack.c.bf16 %v6282_v59, %v6278_v58  ;;  %v9320_v59 = vpack.c.bf16 %v6357_v56, %v6353_v55 }
 0x6ea   :  { %9185 = vmatpush3.bf16.msra.mxu1 %v9184_v1  ;;  %v6281_v1 = vld [vmem:[%s13884_s9 + $0x730] sm:$0xff] }
 0x6eb   :  { %9186 = vmatprep.subr.bf16.mxu1 %v9953_v3 }
 0x6ee   :  { %9188 = vmatpush3.bf16.msra.mxu1 %v9187_v5  ;;  %v9254_v5 = vpack.c.bf16 %v6281_v1, %v6277_v63  ;;  %v6361_v63 = vld [vmem:[%s13884_s9 + $0x888] sm:$0xff] }
 0x6ef   :  { %9189 = vmatprep.subr.bf16.mxu1 %v9953_v3  ;;  %v6365_v1 = vld [vmem:[%s13884_s9 + $0x8a8] sm:$0xff] }
 0x6f0   :  { %v9324_v4 = vpack.c.bf16 %v6365_v1, %v6361_v63 }
 0x6f2   :  { %9191 = vmatpush3.bf16.msra.mxu1 %v9190_v9  ;;  %v6289_v9 = vld [vmem:[%s13884_s9 + $0x770] sm:$0xff] }
 0x6f3   :  { %9192 = vmatprep.subr.bf16.mxu1 %v9953_v3 }
 0x6f6   :  { %9194 = vmatpush3.bf16.msra.mxu1 %v9193_v12  ;;  %v9258_v12 = vpack.c.bf16 %v6289_v9, %v6285_v8  ;;  %v6369_v8 = vld [vmem:[%s13884_s9 + $0x8c8] sm:$0xff] }
 0x6f7   :  { %9195 = vmatprep.subr.bf16.mxu1 %v9953_v3  ;;  %v6373_v9 = vld [vmem:[%s13884_s9 + $0x8e8] sm:$0xff] }
 0x6f8   :  { %v9328_v11 = vpack.c.bf16 %v6373_v9, %v6369_v8 }
 0x6fa   :  { %9197 = vmatpush3.bf16.msra.mxu1 %v9196_v26  ;;  %v6297_v26 = vld [vmem:[%s13884_s9 + $0x7b0] sm:$0xff] }
 0x6fb   :  { %9198 = vmatprep.subr.bf16.mxu1 %v9953_v3 }
 0x6fe   :  { %9200 = vmatpush3.bf16.msra.mxu1 %v9199_v18  ;;  %v9262_v18 = vpack.c.bf16 %v6297_v26, %v6293_v15  ;;  %v6377_v15 = vld [vmem:[%s13884_s9 + $0x908] sm:$0xff] }
 0x6ff   :  { %9201 = vmatprep.subr.bf16.mxu1 %v9953_v3  ;;  %v6381_v26 = vld [vmem:[%s13884_s9 + $0x928] sm:$0xff] }
 0x700   :  { %v9332_v17 = vpack.c.bf16 %v6381_v26, %v6377_v15 }
 0x702   :  { %9203 = vmatpush3.bf16.msra.mxu1 %v9202_v21  ;;  %v6305_v21 = vld [vmem:[%s13884_s9 + $0x7f0] sm:$0xff] }
 0x703   :  { %v9266_v22 = vpack.c.bf16 %v6305_v21, %v6301_v20  ;;  %v6385_v20 = vld [vmem:[%s13884_s9 + $0x948] sm:$0xff] }
 0x704   :  { %v6389_v21 = vld [vmem:[%s13884_s9 + $0x968] sm:$0xff] }
 0x705   :  { %8119 = vmatmul.mubr.f32.vlgmr.msra.gmra.mrb[10].mxu1 %v3409_v52  ;;  %v6274_v52 = vld [vmem:[%s13884_s9 + $0x6f8] sm:$0xff] }
 0x706   :  { %4148 = vmatprep.mubr.f32.mxu1 %v9955_v6  ;;  %v9248_v54 = vpack.c.bf16 %v6274_v52, %v6270_v51  ;;  %v6349_v51 = vld [vmem:[%s13884_s9 + $0x828] sm:$0xff]  ;;  %v6344_v52 = vld [vmem:[%s13884_s9 + $0x800] sm:$0xff] }
 0x7b8   :  { %v3500_v37 = vpop.f32.mrb[2].mxu1 }
 0x7b9   :  { %v12318_v40 = vadd.f32 %v5740_v34, %v3500_v37  ;;  %v8085_v41 = vpop.f32.mrb[3].mxu1  ;;  %v6316_v34 = vld [vmem:[%s13879_s4 + $0x220] sm:$0xff]  ;;  %v6318_v37 = vld [vmem:[%s13879_s4 + $0x230] sm:$0xff] }
 0x7ba   :  { %v9275_v36 = vpack.c.bf16 %v6317_v35, %v6316_v34  ;;  %v9278_v39 = vpack.c.bf16 %v6319_v38, %v6318_v37  ;;  %v6321_v41 = vld [vmem:[%s13879_s4 + $0x248] sm:$0xff]  ;;  %v6392_v35 = vld [vmem:[%s13884_s9 + $0x980] sm:$0xff] }
 0x7bb   :  { %v3504_v43 = vmax.f32 %v12318_v40, 0.0  ;;  %v6320_v40 = vld [vmem:[%s13879_s4 + $0x240] sm:$0xff] }
 0x7bd   :  { %3728 = vmatmul.mubr.f32.vlgmr.msra.gmra.mrb[20].mxu0 %v3504_v43 }
 0x7be   :  { %9239 = vmatpush1.bf16.msra.mxu0 %v9238_v42  ;;  %3798 = vmatprep.mubr.f32.mxu0 %v9955_v6  ;;  %v9281_v42 = vpack.c.bf16 %v6321_v41, %v6320_v40  ;;  %v1832_v40 = vpop.permute.xlu1 %1831 }
 0x7bf   :  { %9241 = vmatprep.subr.bf16.mxu0 %v9240_v44  ;;  %v6323_v44 = vld [vmem:[%s13879_s4 + $0x258] sm:$0xff] }
 0x7c2   :  { %9243 = vmatpush1.bf16.msra.mxu0 %v9242_v48  ;;  %v6326_v48 = vld [vmem:[%s13879_s4 + $0x270] sm:$0xff] }
 0x7c3   :  { %9245 = vmatprep.subr.bf16.mxu0 %v9244_v49  ;;  %v6327_v49 = vld [vmem:[%s13879_s4 + $0x278] sm:$0xff] }
 0x7c4   :  { %v9290_v62 = vpack.c.bf16 %v6327_v49, %v6326_v48 }
 0x7c6   :  { %9247 = vmatpush1.bf16.msra.mxu0 %v9246_v53  ;;  %v9316_v53 = vpack.c.bf16 %v6349_v51, %v6345_v50 }
 0x7c7   :  { %9249 = vmatprep.subr.bf16.mxu0 %v9248_v54  ;;  %v6348_v54 = vld [vmem:[%s13884_s9 + $0x820] sm:$0xff] }
 0x7c8   :  { %v9318_v58 = vpack.c.bf16 %v6348_v54, %v6344_v52  ;;  %9317 = vmatprep.subr.bf16.mxu1 %v9316_v53  ;;  %v5892_v54 = vld [vmem:[%s13881_s6 + $0xb] ss:$0 sm:$0xff] }
 0x7ca   :  { %9251 = vmatpush1.bf16.msra.mxu0 %v9250_v60  ;;  %v6352_v60 = vld [vmem:[%s13884_s9 + $0x840] sm:$0xff]  ;;  %9319 = vmatpush1.bf16.msra.mxu1 %v9318_v58 }
 0x7cb   :  { %9253 = vmatprep.subr.bf16.mxu0 %v9252_v61  ;;  %v6356_v61 = vld [vmem:[%s13884_s9 + $0x860] sm:$0xff]  ;;  %9321 = vmatprep.subr.bf16.mxu1 %v9320_v59 }
 0x7cc   :  { %v9322_v2 = vpack.c.bf16 %v6356_v61, %v6352_v60 }
 0x7ce   :  { %9255 = vmatpush1.bf16.msra.mxu0 %v9254_v5  ;;  %v6360_v5 = vld [vmem:[%s13884_s9 + $0x880] sm:$0xff]  ;;  %9323 = vmatpush1.bf16.msra.mxu1 %v9322_v2 }
 0x7cf   :  { %9257 = vmatprep.subr.bf16.mxu0 %v9256_v7  ;;  %v6364_v7 = vld [vmem:[%s13884_s9 + $0x8a0] sm:$0xff]  ;;  %9325 = vmatprep.subr.bf16.mxu1 %v9324_v4 }
 0x7d0   :  { %v9326_v10 = vpack.c.bf16 %v6364_v7, %v6360_v5 }
 0x7d2   :  { %9259 = vmatpush1.bf16.msra.mxu0 %v9258_v12  ;;  %v6368_v12 = vld [vmem:[%s13884_s9 + $0x8c0] sm:$0xff]  ;;  %9327 = vmatpush1.bf16.msra.mxu1 %v9326_v10 }
 0x7d3   :  { %9261 = vmatprep.subr.bf16.mxu0 %v9260_v13  ;;  %v6372_v13 = vld [vmem:[%s13884_s9 + $0x8e0] sm:$0xff]  ;;  %9329 = vmatprep.subr.bf16.mxu1 %v9328_v11 }
 0x7d4   :  { %v9330_v16 = vpack.c.bf16 %v6372_v13, %v6368_v12 }
 0x7d6   :  { %9263 = vmatpush1.bf16.msra.mxu0 %v9262_v18  ;;  %v6376_v18 = vld [vmem:[%s13884_s9 + $0x900] sm:$0xff]  ;;  %9331 = vmatpush1.bf16.msra.mxu1 %v9330_v16 }
 0x7d7   :  { %9265 = vmatprep.subr.bf16.mxu0 %v9264_v19  ;;  %v6380_v19 = vld [vmem:[%s13884_s9 + $0x920] sm:$0xff]  ;;  %9333 = vmatprep.subr.bf16.mxu1 %v9332_v17 }
 0x7d8   :  { %v12400_v23 = vpop.f32.mrb[10].mxu1 }
 0x7d9   :  { %v8120_v24 = vpop.f32.mrb[11].mxu1  ;;  %v9751_v56 = vadd.f32 %v5892_v54, %v12400_v23 }
 0x7da   :  { %9267 = vmatpush1.bf16.msra.mxu0 %v9266_v22  ;;  %v9334_v22 = vpack.c.bf16 %v6380_v19, %v6376_v18  ;;  %v9336_v24 = vpack.c.bf16 %v6389_v21, %v6385_v20  ;;  %v6328_v20 = vld [vmem:[%s13879_s4 + $0x600] sm:$0xff]  ;;  %v6329_v21 = vld [vmem:[%s13879_s4 + $0x608] sm:$0xff] }
 0x7db   :  { %9268 = vmatprep.subr.bf16.mxu0 %v9953_v3  ;;  %v3593_v63 = vmax.f32 %v9751_v56, 0.0  ;;  %v9293_v25 = vpack.c.bf16 %v6329_v21, %v6328_v20  ;;  %v6351_v56 = vld [vmem:[%s13884_s9 + $0x838] sm:$0xff]  ;;  %v6370_v21 = vld [vmem:[%s13884_s9 + $0x8d0] sm:$0xff] }
 0x7dc   :  { %9335 = vmatpush1.bf16.msra.mxu1 %v9334_v22 }
 0x7dd   :  { %3799 = vmatmul.mubr.f32.vlgmr.msra.gmra.mrb[22].mxu0 %v3504_v43  ;;  %v6322_v43 = vld [vmem:[%s13879_s4 + $0x250] sm:$0xff]  ;;  %9337 = vmatprep.subr.bf16.mxu1 %v9336_v24 }
 0x7de   :  { %8153 = vmatprep.mubr.msk.f32.mxu0 %vm9954_vm0, %v9955_v6  ;;  %9270 = vmatpush3.bf16.msra.mxu0 %v9269_v28  ;;  %v9284_v45 = vpack.c.bf16 %v6323_v44, %v6322_v43  ;;  %v6393_v28 = vld [vmem:[%s13884_s9 + $0x988] sm:$0xff] }
 0x7df   :  { %9271 = vmatprep.subr.bf16.mxu0 %v9953_v3  ;;  %v9340_v34 = vpack.c.bf16 %v6397_v29, %v6393_v28  ;;  %v6330_v28 = vld [vmem:[%s13879_s4 + $0x610] sm:$0xff]  ;;  %v6331_v29 = vld [vmem:[%s13879_s4 + $0x618] sm:$0xff] }
 0x7e0   :  { %9339 = vmatpush1.bf16.msra.mxu1 %v9338_v32  ;;  %v9296_v32 = vpack.c.bf16 %v6331_v29, %v6330_v28  ;;  %v6378_v29 = vld [vmem:[%s13884_s9 + $0x910] sm:$0xff] }
 0x7e1   :  { %9341 = vmatprep.subr.bf16.mxu1 %v9340_v34  ;;  %v6333_v34 = vld [vmem:[%s13879_s4 + $0x628] sm:$0xff] }
 0x7e2   :  { %9273 = vmatpush3.bf16.msra.mxu0 %v9272_v33  ;;  %v5976_v33 = vld [vmem:[%s13882_s7 + $0xc] sm:$0xf] }
 0x7e3   :  { %9274 = vmatprep.subr.bf16.mxu0 %v9953_v3  ;;  %v1842_v37 = vrot.slane %v5976_v33, %v11487_v0  ;;  %v1838_v43 = vrot.slane %v5976_v33, %v11508_v14  ;;  %v1846_v55 = vrot.slane %v5976_v33, %v11513_v30  ;;  %v1850_v58 = vrot.slane %v5976_v33, %v11515_v31  ;;  %v6332_v33 = vld [vmem:[%s13879_s4 + $0x620] sm:$0xff] }
 0x7e5   :  { %v1856_v41 = vmul.f32 %v1842_v37, %v1832_v40  ;;  %v1857_v60 = vmul.f32 %v1846_v55, %v1832_v40  ;;  %v1858_v1 = vmul.f32 %v1850_v58, %v1832_v40  ;;  %v6335_v37 = vld [vmem:[%s13879_s4 + $0x638] sm:$0xff] }
 0x7e6   :  { %9276 = vmatpush3.bf16.msra.mxu0 %v9275_v36  ;;  %v6396_v36 = vld [vmem:[%s13884_s9 + $0x9a0] sm:$0xff]  ;;  %v6347_v55 = vld [vmem:[%s13884_s9 + $0x818] sm:$0xff] }
 0x7e7   :  { %9277 = vmatprep.subr.bf16.mxu0 %v9953_v3  ;;  %v9342_v38 = vpack.c.bf16 %v6396_v36, %v6392_v35  ;;  %v9299_v35 = vpack.c.bf16 %v6333_v34, %v6332_v33  ;;  %v6334_v36 = vld [vmem:[%s13879_s4 + $0x630] sm:$0xff]  ;;  %v9348_v58 = vpack.c.bf16 %v6351_v56, %v6347_v55  ;;  %v6387_v33 = vld [vmem:[%s13884_s9 + $0x958] sm:$0xff] }
 0x7e8   :  { %v6391_v34 = vld [vmem:[%s13884_s9 + $0x978] sm:$0xff]  ;;  %v6415_v55 = vld [vmem:[%s13879_s4 + $0x290] sm:$0xff] }
 0x7e9   :  { %9343 = vmatpush1.bf16.msra.mxu1 %v9342_v38  ;;  %v9302_v38 = vpack.c.bf16 %v6335_v37, %v6334_v36  ;;  %v9368_v36 = vpack.c.bf16 %v6391_v34, %v6387_v33  ;;  %v6386_v37 = vld [vmem:[%s13884_s9 + $0x950] sm:$0xff]  ;;  %v6416_v56 = vld [vmem:[%s13879_s4 + $0x298] sm:$0xff] }
 0x7ea   :  { %9279 = vmatpush3.bf16.msra.mxu0 %v9278_v39  ;;  %v5977_v39 = vld [vmem:[%s13883_s8 + $0xc] sm:$0xf] }
 0x7eb   :  { %9280 = vmatprep.subr.bf16.mxu0 %v9953_v3  ;;  %v1865_v48 = vrot.slane %v5977_v39, %v11508_v14  ;;  %v1873_v61 = vrot.slane %v5977_v39, %v11513_v30  ;;  %v1877_v2 = vrot.slane %v5977_v39, %v11515_v31 }
 0x7ed   :  { %v1884_v8 = vadd.f32 %v1873_v61, %v1857_v60  ;;  %v1885_v10 = vadd.f32 %v1877_v2, %v1858_v1  ;;  %v6346_v60 = vld [vmem:[%s13884_s9 + $0x810] sm:$0xff]  ;;  %v6355_v1 = vld [vmem:[%s13884_s9 + $0x858] sm:$0xff] }
 0x7ee   :  { %9282 = vmatpush3.bf16.msra.mxu0 %v9281_v42  ;;  %v1869_v42 = vrot.slane %v5977_v39, %v11487_v0  ;;  %v6336_v39 = vld [vmem:[%s13879_s4 + $0x640] sm:$0xff]  ;;  %v6350_v61 = vld [vmem:[%s13884_s9 + $0x830] sm:$0xff]  ;;  %v6359_v2 = vld [vmem:[%s13884_s9 + $0x878] sm:$0xff] }
 0x7ef   :  { %9283 = vmatprep.subr.bf16.mxu0 %v9953_v3 }
 0x7f2   :  { %9285 = vmatpush3.bf16.msra.mxu0 %v9284_v45  ;;  %v1883_v45 = vadd.f32 %v1869_v42, %v1856_v41  ;;  %v6338_v42 = vld [vmem:[%s13879_s4 + $0x650] sm:$0xff] }
 0x7f3   :  { %9286 = vmatprep.subr.bf16.mxu0 %v9953_v3 }
 0x7f6   :  { %9288 = vmatpush3.bf16.msra.mxu0 %v9287_v57  ;;  %v1855_v57 = vmul.f32 %v1838_v43, %v1832_v40  ;;  %v6337_v40 = vld [vmem:[%s13879_s4 + $0x648] sm:$0xff]  ;;  %v6339_v43 = vld [vmem:[%s13879_s4 + $0x658] sm:$0xff] }
 0x7f7   :  { %9289 = vmatprep.subr.bf16.mxu0 %v9953_v3  ;;  %v9305_v41 = vpack.c.bf16 %v6337_v40, %v6336_v39  ;;  %v6395_v39 = vld [vmem:[%s13884_s9 + $0x998] sm:$0xff] }
 0x7f8   :  { %v6399_v40 = vld [vmem:[%s13884_s9 + $0x9b8] sm:$0xff] }
 0x7fa   :  { %9291 = vmatpush3.bf16.msra.mxu0 %v9290_v62  ;;  %v1882_v62 = vadd.f32 %v1865_v48, %v1855_v57  ;;  %v6342_v57 = vld [vmem:[%s13879_s4 + $0x670] sm:$0xff]  ;;  %v6343_v48 = vld [vmem:[%s13879_s4 + $0x678] sm:$0xff] }
 0x7fb   :  { %9292 = vmatprep.subr.bf16.mxu0 %v9953_v3 }
 0x890   :  { %v3729_v44 = vpop.f32.mrb[20].mxu0 }
 0x891   :  { %v3731_v46 = vpop.f32.mrb[21].mxu0  ;;  %v3805_v50 = vadd.f32 %v3729_v44, %v1882_v62  ;;  %v9308_v44 = vpack.c.bf16 %v6339_v43, %v6338_v42  ;;  %v6401_v62 = vld [vmem:[%s13884_s9 + $0x9c8] sm:$0xff]  ;;  %v9372_v42 = vpack.c.bf16 %v6399_v40, %v6395_v39  ;;  %v6394_v43 = vld [vmem:[%s13884_s9 + $0x990] sm:$0xff] }
 0x892   :  { %v3806_v47 = vadd.f32 %v3731_v46, %v1883_v45  ;;  %v6340_v45 = vld [vmem:[%s13879_s4 + $0x660] sm:$0xff]  ;;  %v6341_v46 = vld [vmem:[%s13879_s4 + $0x668] sm:$0xff] }
 0x893   :  { %v6307_v51 = vmul.f32 -1.442695, %v3805_v50  ;;  %v6405_v50 = vld [vmem:[%s13884_s9 + $0x9e8] sm:$0xff] }
 0x894   :  { %v6308_v49 = vmul.f32 -1.442695, %v3806_v47  ;;  %v9311_v47 = vpack.c.bf16 %v6341_v46, %v6340_v45  ;;  %v6403_v45 = vld [vmem:[%s13884_s9 + $0x9d8] sm:$0xff] }
 0x895   :  { %v6407_v46 = vld [vmem:[%s13884_s9 + $0x9f8] sm:$0xff] }
 0x896   :  { %9843 = vpow2.f32 %v6308_v49  ;;  %v9314_v49 = vpack.c.bf16 %v6343_v48, %v6342_v57  ;;  %v9376_v57 = vpack.c.bf16 %v6407_v46, %v6403_v45  ;;  %v6402_v48 = vld [vmem:[%s13884_s9 + $0x9d0] sm:$0xff] }
 0x897   :  { %9845 = vpow2.f32 %v6307_v51  ;;  %v9344_v51 = vpack.c.bf16 %v6405_v50, %v6401_v62 }
 0x899   :  { %9345 = vmatprep.subr.bf16.mxu1 %v9344_v51 }
 0x8a0   :  { %v9844_v52 = vpop.eup %9843 }
 0x8a1   :  { %v3818_v53 = vadd.f32 1.0, %v9844_v52  ;;  %v9846_v59 = vpop.eup %9845  ;;  %v6400_v52 = vld [vmem:[%s13884_s9 + $0x9c0] sm:$0xff] }
 0x8a2   :  { %v3812_v5 = vadd.f32 1.0, %v9846_v59  ;;  %v5759_v59 = vld [vmem:[%s13881_s6 + $0x4] ss:$0 sm:$0xff] }
 0x8a3   :  { %9847 = vrcp.f32 %v3818_v53  ;;  %v6404_v53 = vld [vmem:[%s13884_s9 + $0x9e0] sm:$0xff] }
 0x8a4   :  { %9849 = vrcp.f32 %v3812_v5  ;;  %v9346_v54 = vpack.c.bf16 %v6404_v53, %v6400_v52  ;;  %v6413_v52 = vld [vmem:[%s13879_s4 + $0x280] sm:$0xff]  ;;  %v6414_v53 = vld [vmem:[%s13879_s4 + $0x288] sm:$0xff] }
 0x8a6   :  { %9347 = vmatpush1.bf16.msra.mxu1 %v9346_v54  ;;  %v9381_v54 = vpack.c.bf16 %v6414_v53, %v6413_v52  ;;  %v6485_v52 = vld [vmem:[%s13884_s9 + $0xb40] sm:$0xff] }
 0x8a7   :  { %9349 = vmatprep.subr.bf16.mxu1 %v9348_v58  ;;  %v9384_v58 = vpack.c.bf16 %v6416_v56, %v6415_v55  ;;  %v6489_v53 = vld [vmem:[%s13884_s9 + $0xb60] sm:$0xff]  ;;  %v6498_v55 = vld [vmem:[%s13884_s9 + $0xba8] sm:$0xff] }
 0x8a8   :  { %v9450_v56 = vpack.c.bf16 %v6489_v53, %v6485_v52 }
 0x8ad   :  { %v9848_v4 = vpop.eup %9847 }
 0x8ae   :  { %v3828_v7 = vmul.f32 %v9848_v4, %v3593_v63  ;;  %v9850_v15 = vpop.eup %9849 }
 0x8b0   :  { %v3800_v9 = vpop.f32.mrb[22].mxu0 }
 0x8b1   :  { %v3807_v11 = vadd.f32 %v3800_v9, %v1884_v8  ;;  %v3802_v12 = vpop.f32.mrb[23].mxu0  ;;  %v9352_v9 = vpack.c.bf16 %v6359_v2, %v6355_v1  ;;  %v6420_v1 = vld [vmem:[%s13879_s4 + $0x2b8] sm:$0xff] }
 0x8b2   :  { %v3808_v23 = vadd.f32 %v3802_v12, %v1885_v10  ;;  %v6354_v10 = vld [vmem:[%s13884_s9 + $0x850] sm:$0xff]  ;;  %v6363_v12 = vld [vmem:[%s13884_s9 + $0x898] sm:$0xff] }
 0x8b3   :  { %9851 = vtanh.f32 %v3807_v11  ;;  %v6358_v11 = vld [vmem:[%s13884_s9 + $0x870] sm:$0xff] }
 0x8b4   :  { %v6309_v13 = vmul.f32 -1.442695, %v3808_v23  ;;  %v6367_v23 = vld [vmem:[%s13884_s9 + $0x8b8] sm:$0xff] }
 0x8b6   :  { %9853 = vpow2.f32 %v6309_v13  ;;  %v9354_v13 = vpack.c.bf16 %v6358_v11, %v6354_v10  ;;  %v6425_v11 = vld [vmem:[%s13879_s4 + $0x2e0] sm:$0xff] }
 0x8bd   :  { %v9852_v26 = vpop.eup %9851 }
 0x8be   :  { %v3829_v16 = vmul.f32 %v9852_v26, %v9850_v15  ;;  %v9356_v15 = vpack.c.bf16 %v6367_v23, %v6363_v12  ;;  %v6362_v26 = vld [vmem:[%s13884_s9 + $0x890] sm:$0xff]  ;;  %v6426_v12 = vld [vmem:[%s13879_s4 + $0x2e8] sm:$0xff] }
 0x8bf   :  { %v9399_v23 = vpack.c.bf16 %v6426_v12, %v6425_v11 }
 0x8c0   :  { %v9854_v17 = vpop.eup %9853  ;;  %v3830_v18 = vadd.f32 %v3829_v16, %v3828_v7  ;;  %v9350_v7 = vpack.c.bf16 %v6350_v61, %v6346_v60  ;;  %v6366_v16 = vld [vmem:[%s13884_s9 + $0x8b0] sm:$0xff]  ;;  %v6418_v60 = vld [vmem:[%s13879_s4 + $0x2a8] sm:$0xff] }
 0x8c1   :  { %v3825_v19 = vadd.f32 1.0, %v9854_v17  ;;  %v6371_v17 = vld [vmem:[%s13884_s9 + $0x8d8] sm:$0xff] }
 0x8c2   :  { %6311 = vst [vmem:[%s13890_s15 + $0x18] sm:$0xff] %v3830_v18  ;;  %9855 = vtanh.f32 %v3830_v18 }
 0x8c3   :  { %9857 = vrcp.f32 %v3825_v19  ;;  %v9358_v19 = vpack.c.bf16 %v6366_v16, %v6362_v26  ;;  %v6446_v16 = vld [vmem:[%s13884_s9 + $0xa08] sm:$0xff] }
 0x8cc   :  { %v9856_v22 = vpop.eup %9855 }
 0x8cd   :  { %v9858_v24 = vpop.eup %9857 }
 0x8ce   :  { %v3832_v27 = vmul.f32 %v9858_v24, %v9856_v22  ;;  %v6374_v22 = vld [vmem:[%s13884_s9 + $0x8f0] sm:$0xff]  ;;  %v6379_v24 = vld [vmem:[%s13884_s9 + $0x918] sm:$0xff] }
 0x8d0   :  { %6310 = vst [vmem:[%s13889_s14 + $0x18] sm:$0xff] %v3832_v27  ;;  %8154 = vmatmul.mubr.f32.vlgmr.msra.gmra.mrb[4].mxu0 %v3832_v27  ;;  %v9362_v27 = vpack.c.bf16 %v6374_v22, %v6370_v21  ;;  %v6454_v21 = vld [vmem:[%s13884_s9 + $0xa48] sm:$0xff] }
 0x8d1   :  { %9294 = vmatpush3.bf16.msra.mxu0 %v9293_v25  ;;  %8188 = vmatprep.mubr.msk.f32.mxu0 %vm9954_vm0, %v9955_v6  ;;  %v6383_v25 = vld [vmem:[%s13884_s9 + $0x938] sm:$0xff]  ;;  %v6458_v22 = vld [vmem:[%s13884_s9 + $0xa68] sm:$0xff] }
 0x8d2   :  { %9295 = vmatprep.subr.bf16.mxu0 %v9953_v3  ;;  %v9364_v28 = vpack.c.bf16 %v6383_v25, %v6379_v24  ;;  %v9432_v25 = vpack.c.bf16 %v6458_v22, %v6454_v21 }
 0x8d5   :  { %9297 = vmatpush3.bf16.msra.mxu0 %v9296_v32  ;;  %v6382_v32 = vld [vmem:[%s13884_s9 + $0x930] sm:$0xff] }
 0x8d6   :  { %9298 = vmatprep.subr.bf16.mxu0 %v9953_v3 }
 0x8d9   :  { %9300 = vmatpush3.bf16.msra.mxu0 %v9299_v35  ;;  %v9366_v35 = vpack.c.bf16 %v6382_v32, %v6378_v29  ;;  %v6462_v29 = vld [vmem:[%s13884_s9 + $0xa88] sm:$0xff] }
 0x8da   :  { %9301 = vmatprep.subr.bf16.mxu0 %v9953_v3  ;;  %v6466_v32 = vld [vmem:[%s13884_s9 + $0xaa8] sm:$0xff] }
 0x8db   :  { %v9436_v34 = vpack.c.bf16 %v6466_v32, %v6462_v29 }
 0x8dd   :  { %9303 = vmatpush3.bf16.msra.mxu0 %v9302_v38  ;;  %v6390_v38 = vld [vmem:[%s13884_s9 + $0x970] sm:$0xff] }
 0x8de   :  { %9304 = vmatprep.subr.bf16.mxu0 %v9953_v3 }
 0x8e1   :  { %9306 = vmatpush3.bf16.msra.mxu0 %v9305_v41  ;;  %v9370_v41 = vpack.c.bf16 %v6390_v38, %v6386_v37  ;;  %v6470_v37 = vld [vmem:[%s13884_s9 + $0xac8] sm:$0xff] }
 0x8e2   :  { %9307 = vmatprep.subr.bf16.mxu0 %v9953_v3  ;;  %v6474_v38 = vld [vmem:[%s13884_s9 + $0xae8] sm:$0xff] }
 0x8e3   :  { %v9440_v40 = vpack.c.bf16 %v6474_v38, %v6470_v37 }
 0x8e5   :  { %9309 = vmatpush3.bf16.msra.mxu0 %v9308_v44  ;;  %v6398_v44 = vld [vmem:[%s13884_s9 + $0x9b0] sm:$0xff] }
 0x8e6   :  { %9310 = vmatprep.subr.bf16.mxu0 %v9953_v3 }
 0x8e9   :  { %9312 = vmatpush3.bf16.msra.mxu0 %v9311_v47  ;;  %v9374_v47 = vpack.c.bf16 %v6398_v44, %v6394_v43  ;;  %v6478_v43 = vld [vmem:[%s13884_s9 + $0xb08] sm:$0xff] }
 0x8ea   :  { %9313 = vmatprep.subr.bf16.mxu0 %v9953_v3  ;;  %v6482_v44 = vld [vmem:[%s13884_s9 + $0xb28] sm:$0xff] }
 0x8eb   :  { %v9444_v46 = vpack.c.bf16 %v6482_v44, %v6478_v43 }
 0x8ed   :  { %9315 = vmatpush3.bf16.msra.mxu0 %v9314_v49  ;;  %v6406_v49 = vld [vmem:[%s13884_s9 + $0x9f0] sm:$0xff] }
 0x8ee   :  { %v9378_v62 = vpack.c.bf16 %v6406_v49, %v6402_v48  ;;  %v6486_v48 = vld [vmem:[%s13884_s9 + $0xb48] sm:$0xff] }
 0x8ef   :  { %v6490_v49 = vld [vmem:[%s13884_s9 + $0xb68] sm:$0xff] }
 0x8f0   :  { %8189 = vmatmul.mubr.f32.vlgmr.msra.gmra.mrb[12].mxu0 %v3830_v18  ;;  %v6375_v18 = vld [vmem:[%s13884_s9 + $0x8f8] sm:$0xff] }
 0x8f1   :  { %4569 = vmatprep.mubr.f32.mxu0 %v9955_v6  ;;  %v9360_v20 = vpack.c.bf16 %v6375_v18, %v6371_v17  ;;  %v6450_v17 = vld [vmem:[%s13884_s9 + $0xa28] sm:$0xff]  ;;  %v6445_v18 = vld [vmem:[%s13884_s9 + $0xa00] sm:$0xff] }
 0x9a3   :  { %v3921_v63 = vpop.f32.mrb[4].mxu0 }
 0x9a4   :  { %v12660_v4 = vadd.f32 %v5759_v59, %v3921_v63  ;;  %v8155_v5 = vpop.f32.mrb[5].mxu0  ;;  %v6417_v59 = vld [vmem:[%s13879_s4 + $0x2a0] sm:$0xff]  ;;  %v6419_v63 = vld [vmem:[%s13879_s4 + $0x2b0] sm:$0xff] }
 0x9a5   :  { %v9387_v61 = vpack.c.bf16 %v6418_v60, %v6417_v59  ;;  %v9390_v2 = vpack.c.bf16 %v6420_v1, %v6419_v63  ;;  %v6422_v5 = vld [vmem:[%s13879_s4 + $0x2c8] sm:$0xff]  ;;  %v6493_v60 = vld [vmem:[%s13884_s9 + $0xb80] sm:$0xff] }
 0x9a6   :  { %v3925_v8 = vmax.f32 %v12660_v4, 0.0  ;;  %v6421_v4 = vld [vmem:[%s13879_s4 + $0x2c0] sm:$0xff] }
 0x9a8   :  { %4149 = vmatmul.mubr.f32.vlgmr.msra.gmra.mrb[24].mxu1 %v3925_v8 }
 0x9a9   :  { %9351 = vmatpush1.bf16.msra.mxu1 %v9350_v7  ;;  %4219 = vmatprep.mubr.f32.mxu1 %v9955_v6  ;;  %v9393_v7 = vpack.c.bf16 %v6422_v5, %v6421_v4  ;;  %v1898_v4 = vpop.permute.xlu0 %1897 }
 0x9aa   :  { %9353 = vmatprep.subr.bf16.mxu1 %v9352_v9  ;;  %v6424_v9 = vld [vmem:[%s13879_s4 + $0x2d8] sm:$0xff] }
 0x9ad   :  { %9355 = vmatpush1.bf16.msra.mxu1 %v9354_v13  ;;  %v6427_v13 = vld [vmem:[%s13879_s4 + $0x2f0] sm:$0xff] }
 0x9ae   :  { %9357 = vmatprep.subr.bf16.mxu1 %v9356_v15  ;;  %v6428_v15 = vld [vmem:[%s13879_s4 + $0x2f8] sm:$0xff] }
 0x9af   :  { %v9402_v26 = vpack.c.bf16 %v6428_v15, %v6427_v13 }
 0x9b1   :  { %9359 = vmatpush1.bf16.msra.mxu1 %v9358_v19  ;;  %v9428_v19 = vpack.c.bf16 %v6450_v17, %v6446_v16 }
 0x9b2   :  { %9361 = vmatprep.subr.bf16.mxu1 %v9360_v20  ;;  %v6449_v20 = vld [vmem:[%s13884_s9 + $0xa20] sm:$0xff] }
 0x9b3   :  { %v9430_v24 = vpack.c.bf16 %v6449_v20, %v6445_v18  ;;  %9429 = vmatprep.subr.bf16.mxu0 %v9428_v19  ;;  %v5911_v20 = vld [vmem:[%s13881_s6 + $0xc] ss:$0 sm:$0xff] }
 0x9b5   :  { %9363 = vmatpush1.bf16.msra.mxu1 %v9362_v27  ;;  %v6453_v27 = vld [vmem:[%s13884_s9 + $0xa40] sm:$0xff]  ;;  %9431 = vmatpush1.bf16.msra.mxu0 %v9430_v24 }
 0x9b6   :  { %9365 = vmatprep.subr.bf16.mxu1 %v9364_v28  ;;  %v6457_v28 = vld [vmem:[%s13884_s9 + $0xa60] sm:$0xff]  ;;  %9433 = vmatprep.subr.bf16.mxu0 %v9432_v25 }
 0x9b7   :  { %v9434_v33 = vpack.c.bf16 %v6457_v28, %v6453_v27 }
 0x9b9   :  { %9367 = vmatpush1.bf16.msra.mxu1 %v9366_v35  ;;  %v6461_v35 = vld [vmem:[%s13884_s9 + $0xa80] sm:$0xff]  ;;  %9435 = vmatpush1.bf16.msra.mxu0 %v9434_v33 }
 0x9ba   :  { %9369 = vmatprep.subr.bf16.mxu1 %v9368_v36  ;;  %v6465_v36 = vld [vmem:[%s13884_s9 + $0xaa0] sm:$0xff]  ;;  %9437 = vmatprep.subr.bf16.mxu0 %v9436_v34 }
 0x9bb   :  { %v9438_v39 = vpack.c.bf16 %v6465_v36, %v6461_v35 }
 0x9bd   :  { %9371 = vmatpush1.bf16.msra.mxu1 %v9370_v41  ;;  %v6469_v41 = vld [vmem:[%s13884_s9 + $0xac0] sm:$0xff]  ;;  %9439 = vmatpush1.bf16.msra.mxu0 %v9438_v39 }
 0x9be   :  { %9373 = vmatprep.subr.bf16.mxu1 %v9372_v42  ;;  %v6473_v42 = vld [vmem:[%s13884_s9 + $0xae0] sm:$0xff]  ;;  %9441 = vmatprep.subr.bf16.mxu0 %v9440_v40 }
 0x9bf   :  { %v9442_v45 = vpack.c.bf16 %v6473_v42, %v6469_v41 }
 0x9c1   :  { %9375 = vmatpush1.bf16.msra.mxu1 %v9374_v47  ;;  %v6477_v47 = vld [vmem:[%s13884_s9 + $0xb00] sm:$0xff]  ;;  %9443 = vmatpush1.bf16.msra.mxu0 %v9442_v45 }
 0x9c2   :  { %9377 = vmatprep.subr.bf16.mxu1 %v9376_v57  ;;  %v6481_v57 = vld [vmem:[%s13884_s9 + $0xb20] sm:$0xff]  ;;  %9445 = vmatprep.subr.bf16.mxu0 %v9444_v46 }
 0x9c3   :  { %v12742_v50 = vpop.f32.mrb[12].mxu0 }
 0x9c4   :  { %v8190_v51 = vpop.f32.mrb[13].mxu0  ;;  %v9752_v22 = vadd.f32 %v5911_v20, %v12742_v50 }
 0x9c5   :  { %9379 = vmatpush1.bf16.msra.mxu1 %v9378_v62  ;;  %v9446_v62 = vpack.c.bf16 %v6481_v57, %v6477_v47  ;;  %v9448_v51 = vpack.c.bf16 %v6490_v49, %v6486_v48  ;;  %v6429_v48 = vld [vmem:[%s13879_s4 + $0x680] sm:$0xff]  ;;  %v6430_v49 = vld [vmem:[%s13879_s4 + $0x688] sm:$0xff] }
 0x9c6   :  { %9380 = vmatprep.subr.bf16.mxu1 %v9953_v3  ;;  %v4014_v29 = vmax.f32 %v9752_v22, 0.0  ;;  %v9405_v52 = vpack.c.bf16 %v6430_v49, %v6429_v48  ;;  %v6452_v22 = vld [vmem:[%s13884_s9 + $0xa38] sm:$0xff]  ;;  %v6471_v49 = vld [vmem:[%s13884_s9 + $0xad0] sm:$0xff] }
 0x9c7   :  { %9447 = vmatpush1.bf16.msra.mxu0 %v9446_v62 }
 0x9c8   :  { %4220 = vmatmul.mubr.f32.vlgmr.msra.gmra.mrb[26].mxu1 %v3925_v8  ;;  %v6423_v8 = vld [vmem:[%s13879_s4 + $0x2d0] sm:$0xff]  ;;  %9449 = vmatprep.subr.bf16.mxu0 %v9448_v51 }
 0x9c9   :  { %8223 = vmatprep.mubr.msk.f32.mxu1 %vm9954_vm0, %v9955_v6  ;;  %9382 = vmatpush3.bf16.msra.mxu1 %v9381_v54  ;;  %v9396_v10 = vpack.c.bf16 %v6424_v9, %v6423_v8  ;;  %v6494_v54 = vld [vmem:[%s13884_s9 + $0xb88] sm:$0xff] }
 0x9ca   :  { %9383 = vmatprep.subr.bf16.mxu1 %v9953_v3  ;;  %v9452_v59 = vpack.c.bf16 %v6498_v55, %v6494_v54  ;;  %v6431_v54 = vld [vmem:[%s13879_s4 + $0x690] sm:$0xff]  ;;  %v6432_v55 = vld [vmem:[%s13879_s4 + $0x698] sm:$0xff] }
 0x9cb   :  { %9451 = vmatpush1.bf16.msra.mxu0 %v9450_v56  ;;  %v9408_v56 = vpack.c.bf16 %v6432_v55, %v6431_v54  ;;  %v6479_v55 = vld [vmem:[%s13884_s9 + $0xb10] sm:$0xff] }
 0x9cc   :  { %9453 = vmatprep.subr.bf16.mxu0 %v9452_v59  ;;  %v6434_v59 = vld [vmem:[%s13879_s4 + $0x6a8] sm:$0xff] }
 0x9cd   :  { %9385 = vmatpush3.bf16.msra.mxu1 %v9384_v58  ;;  %v5979_v58 = vld [vmem:[%s13882_s7 + $0x10] sm:$0xf] }
 0x9ce   :  { %9386 = vmatprep.subr.bf16.mxu1 %v9953_v3  ;;  %v1908_v63 = vrot.slane %v5979_v58, %v11487_v0  ;;  %v1904_v8 = vrot.slane %v5979_v58, %v11508_v14  ;;  %v1912_v21 = vrot.slane %v5979_v58, %v11513_v30  ;;  %v1916_v24 = vrot.slane %v5979_v58, %v11515_v31  ;;  %v6433_v58 = vld [vmem:[%s13879_s4 + $0x6a0] sm:$0xff] }
 0x9d0   :  { %v1922_v5 = vmul.f32 %v1908_v63, %v1898_v4  ;;  %v1923_v27 = vmul.f32 %v1912_v21, %v1898_v4  ;;  %v1924_v32 = vmul.f32 %v1916_v24, %v1898_v4  ;;  %v6436_v63 = vld [vmem:[%s13879_s4 + $0x6b8] sm:$0xff] }
 0x9d1   :  { %9388 = vmatpush3.bf16.msra.mxu1 %v9387_v61  ;;  %v6497_v61 = vld [vmem:[%s13884_s9 + $0xba0] sm:$0xff]  ;;  %v6448_v21 = vld [vmem:[%s13884_s9 + $0xa18] sm:$0xff] }
 0x9d2   :  { %9389 = vmatprep.subr.bf16.mxu1 %v9953_v3  ;;  %v9454_v1 = vpack.c.bf16 %v6497_v61, %v6493_v60  ;;  %v9411_v60 = vpack.c.bf16 %v6434_v59, %v6433_v58  ;;  %v6435_v61 = vld [vmem:[%s13879_s4 + $0x6b0] sm:$0xff]  ;;  %v9460_v24 = vpack.c.bf16 %v6452_v22, %v6448_v21  ;;  %v6488_v58 = vld [vmem:[%s13884_s9 + $0xb58] sm:$0xff] }
 0x9d3   :  { %v6492_v59 = vld [vmem:[%s13884_s9 + $0xb78] sm:$0xff]  ;;  %v6516_v21 = vld [vmem:[%s13879_s4 + $0x310] sm:$0xff] }
 0x9d4   :  { %9455 = vmatpush1.bf16.msra.mxu0 %v9454_v1  ;;  %v9414_v1 = vpack.c.bf16 %v6436_v63, %v6435_v61  ;;  %v9480_v61 = vpack.c.bf16 %v6492_v59, %v6488_v58  ;;  %v6487_v63 = vld [vmem:[%s13884_s9 + $0xb50] sm:$0xff]  ;;  %v6517_v22 = vld [vmem:[%s13879_s4 + $0x318] sm:$0xff] }
 0x9d5   :  { %9391 = vmatpush3.bf16.msra.mxu1 %v9390_v2  ;;  %v5980_v2 = vld [vmem:[%s13883_s8 + $0x10] sm:$0xf] }
 0x9d6   :  { %9392 = vmatprep.subr.bf16.mxu1 %v9953_v3  ;;  %v1931_v13 = vrot.slane %v5980_v2, %v11508_v14  ;;  %v1939_v28 = vrot.slane %v5980_v2, %v11513_v30  ;;  %v1943_v33 = vrot.slane %v5980_v2, %v11515_v31 }
 0x9d8   :  { %v1950_v37 = vadd.f32 %v1939_v28, %v1923_v27  ;;  %v1951_v39 = vadd.f32 %v1943_v33, %v1924_v32  ;;  %v6447_v27 = vld [vmem:[%s13884_s9 + $0xa10] sm:$0xff]  ;;  %v6456_v32 = vld [vmem:[%s13884_s9 + $0xa58] sm:$0xff] }
 0x9d9   :  { %9394 = vmatpush3.bf16.msra.mxu1 %v9393_v7  ;;  %v1935_v7 = vrot.slane %v5980_v2, %v11487_v0  ;;  %v6437_v2 = vld [vmem:[%s13879_s4 + $0x6c0] sm:$0xff]  ;;  %v6451_v28 = vld [vmem:[%s13884_s9 + $0xa30] sm:$0xff]  ;;  %v6460_v33 = vld [vmem:[%s13884_s9 + $0xa78] sm:$0xff] }
 0x9da   :  { %9395 = vmatprep.subr.bf16.mxu1 %v9953_v3 }
 0x9dd   :  { %9397 = vmatpush3.bf16.msra.mxu1 %v9396_v10  ;;  %v1949_v10 = vadd.f32 %v1935_v7, %v1922_v5  ;;  %v6439_v7 = vld [vmem:[%s13879_s4 + $0x6d0] sm:$0xff] }
 0x9de   :  { %9398 = vmatprep.subr.bf16.mxu1 %v9953_v3 }
 0x9e1   :  { %9400 = vmatpush3.bf16.msra.mxu1 %v9399_v23  ;;  %v1921_v23 = vmul.f32 %v1904_v8, %v1898_v4  ;;  %v6438_v4 = vld [vmem:[%s13879_s4 + $0x6c8] sm:$0xff]  ;;  %v6440_v8 = vld [vmem:[%s13879_s4 + $0x6d8] sm:$0xff] }
 0x9e2   :  { %9401 = vmatprep.subr.bf16.mxu1 %v9953_v3  ;;  %v9417_v5 = vpack.c.bf16 %v6438_v4, %v6437_v2  ;;  %v6496_v2 = vld [vmem:[%s13884_s9 + $0xb98] sm:$0xff] }
 0x9e3   :  { %v6500_v4 = vld [vmem:[%s13884_s9 + $0xbb8] sm:$0xff] }
 0x9e5   :  { %9403 = vmatpush3.bf16.msra.mxu1 %v9402_v26  ;;  %v1948_v26 = vadd.f32 %v1931_v13, %v1921_v23  ;;  %v6443_v23 = vld [vmem:[%s13879_s4 + $0x6f0] sm:$0xff]  ;;  %v6444_v13 = vld [vmem:[%s13879_s4 + $0x6f8] sm:$0xff] }
 0x9e6   :  { %9404 = vmatprep.subr.bf16.mxu1 %v9953_v3 }
 0xa7b   :  { %v4150_v9 = vpop.f32.mrb[24].mxu1 }
 0xa7c   :  { %v4152_v11 = vpop.f32.mrb[25].mxu1  ;;  %v4226_v16 = vadd.f32 %v4150_v9, %v1948_v26  ;;  %v9420_v9 = vpack.c.bf16 %v6440_v8, %v6439_v7  ;;  %v6502_v26 = vld [vmem:[%s13884_s9 + $0xbc8] sm:$0xff]  ;;  %v9484_v7 = vpack.c.bf16 %v6500_v4, %v6496_v2  ;;  %v6495_v8 = vld [vmem:[%s13884_s9 + $0xb90] sm:$0xff] }
 0xa7d   :  { %v4227_v12 = vadd.f32 %v4152_v11, %v1949_v10  ;;  %v6441_v10 = vld [vmem:[%s13879_s4 + $0x6e0] sm:$0xff]  ;;  %v6442_v11 = vld [vmem:[%s13879_s4 + $0x6e8] sm:$0xff] }
 0xa7e   :  { %v6408_v17 = vmul.f32 -1.442695, %v4226_v16  ;;  %v6506_v16 = vld [vmem:[%s13884_s9 + $0xbe8] sm:$0xff] }
 0xa7f   :  { %v6409_v15 = vmul.f32 -1.442695, %v4227_v12  ;;  %v9423_v12 = vpack.c.bf16 %v6442_v11, %v6441_v10  ;;  %v6504_v10 = vld [vmem:[%s13884_s9 + $0xbd8] sm:$0xff] }
 0xa80   :  { %v6508_v11 = vld [vmem:[%s13884_s9 + $0xbf8] sm:$0xff] }
 0xa81   :  { %9859 = vpow2.f32 %v6409_v15  ;;  %v9426_v15 = vpack.c.bf16 %v6444_v13, %v6443_v23  ;;  %v9488_v23 = vpack.c.bf16 %v6508_v11, %v6504_v10  ;;  %v6503_v13 = vld [vmem:[%s13884_s9 + $0xbd0] sm:$0xff] }
 0xa82   :  { %9861 = vpow2.f32 %v6408_v17  ;;  %v9456_v17 = vpack.c.bf16 %v6506_v16, %v6502_v26 }
 0xa84   :  { %9457 = vmatprep.subr.bf16.mxu0 %v9456_v17 }
 0xa8b   :  { %v9860_v18 = vpop.eup %9859 }
 0xa8c   :  { %v4239_v19 = vadd.f32 1.0, %v9860_v18  ;;  %v9862_v25 = vpop.eup %9861  ;;  %v6501_v18 = vld [vmem:[%s13884_s9 + $0xbc0] sm:$0xff] }
 0xa8d   :  { %v4233_v35 = vadd.f32 1.0, %v9862_v25  ;;  %v5778_v25 = vld [vmem:[%s13881_s6 + $0x5] ss:$0 sm:$0xff] }
 0xa8e   :  { %9863 = vrcp.f32 %v4239_v19  ;;  %v6505_v19 = vld [vmem:[%s13884_s9 + $0xbe0] sm:$0xff] }
 0xa8f   :  { %9865 = vrcp.f32 %v4233_v35  ;;  %v9458_v20 = vpack.c.bf16 %v6505_v19, %v6501_v18  ;;  %v6514_v18 = vld [vmem:[%s13879_s4 + $0x300] sm:$0xff]  ;;  %v6515_v19 = vld [vmem:[%s13879_s4 + $0x308] sm:$0xff] }
 0xa91   :  { %9459 = vmatpush1.bf16.msra.mxu0 %v9458_v20  ;;  %v9493_v20 = vpack.c.bf16 %v6515_v19, %v6514_v18  ;;  %v6586_v18 = vld [vmem:[%s13884_s9 + $0xd40] sm:$0xff] }
 0xa92   :  { %9461 = vmatprep.subr.bf16.mxu0 %v9460_v24  ;;  %v9496_v24 = vpack.c.bf16 %v6517_v22, %v6516_v21  ;;  %v6590_v19 = vld [vmem:[%s13884_s9 + $0xd60] sm:$0xff]  ;;  %v6599_v21 = vld [vmem:[%s13884_s9 + $0xda8] sm:$0xff] }
 0xa93   :  { %v9562_v22 = vpack.c.bf16 %v6590_v19, %v6586_v18 }
 0xa98   :  { %v9864_v34 = vpop.eup %9863 }
 0xa99   :  { %v4249_v36 = vmul.f32 %v9864_v34, %v4014_v29  ;;  %v9866_v43 = vpop.eup %9865 }
 0xa9b   :  { %v4221_v38 = vpop.f32.mrb[26].mxu1 }
 0xa9c   :  { %v4228_v40 = vadd.f32 %v4221_v38, %v1950_v37  ;;  %v4223_v41 = vpop.f32.mrb[27].mxu1  ;;  %v9464_v38 = vpack.c.bf16 %v6460_v33, %v6456_v32  ;;  %v6521_v32 = vld [vmem:[%s13879_s4 + $0x338] sm:$0xff] }
 0xa9d   :  { %v4229_v50 = vadd.f32 %v4223_v41, %v1951_v39  ;;  %v6455_v39 = vld [vmem:[%s13884_s9 + $0xa50] sm:$0xff]  ;;  %v6464_v41 = vld [vmem:[%s13884_s9 + $0xa98] sm:$0xff] }
 0xa9e   :  { %9867 = vtanh.f32 %v4228_v40  ;;  %v6459_v40 = vld [vmem:[%s13884_s9 + $0xa70] sm:$0xff] }
 0xa9f   :  { %v6410_v42 = vmul.f32 -1.442695, %v4229_v50  ;;  %v6468_v50 = vld [vmem:[%s13884_s9 + $0xab8] sm:$0xff] }
 0xaa1   :  { %9869 = vpow2.f32 %v6410_v42  ;;  %v9466_v42 = vpack.c.bf16 %v6459_v40, %v6455_v39  ;;  %v6526_v40 = vld [vmem:[%s13879_s4 + $0x360] sm:$0xff] }
 0xaa8   :  { %v9868_v44 = vpop.eup %9867 }
 0xaa9   :  { %v4250_v45 = vmul.f32 %v9868_v44, %v9866_v43  ;;  %v9468_v43 = vpack.c.bf16 %v6468_v50, %v6464_v41  ;;  %v6463_v44 = vld [vmem:[%s13884_s9 + $0xa90] sm:$0xff]  ;;  %v6527_v41 = vld [vmem:[%s13879_s4 + $0x368] sm:$0xff] }
 0xaaa   :  { %v9511_v50 = vpack.c.bf16 %v6527_v41, %v6526_v40 }
 0xaab   :  { %v9870_v46 = vpop.eup %9869  ;;  %v4251_v47 = vadd.f32 %v4250_v45, %v4249_v36  ;;  %v9462_v36 = vpack.c.bf16 %v6451_v28, %v6447_v27  ;;  %v6467_v45 = vld [vmem:[%s13884_s9 + $0xab0] sm:$0xff]  ;;  %v6519_v27 = vld [vmem:[%s13879_s4 + $0x328] sm:$0xff] }
 0xaac   :  { %v4246_v57 = vadd.f32 1.0, %v9870_v46  ;;  %v6472_v46 = vld [vmem:[%s13884_s9 + $0xad8] sm:$0xff] }
 0xaad   :  { %6412 = vst [vmem:[%s13890_s15 + $0x20] sm:$0xff] %v4251_v47  ;;  %9871 = vtanh.f32 %v4251_v47 }
 0xaae   :  { %9873 = vrcp.f32 %v4246_v57  ;;  %v9470_v57 = vpack.c.bf16 %v6467_v45, %v6463_v44  ;;  %v6547_v45 = vld [vmem:[%s13884_s9 + $0xc08] sm:$0xff] }
 0xab7   :  { %v9872_v62 = vpop.eup %9871 }
 0xab8   :  { %v9874_v51 = vpop.eup %9873 }
 0xab9   :  { %v4253_v53 = vmul.f32 %v9874_v51, %v9872_v62  ;;  %v6475_v62 = vld [vmem:[%s13884_s9 + $0xaf0] sm:$0xff]  ;;  %v6480_v51 = vld [vmem:[%s13884_s9 + $0xb18] sm:$0xff] }
 0xabb   :  { %6411 = vst [vmem:[%s13889_s14 + $0x20] sm:$0xff] %v4253_v53  ;;  %8224 = vmatmul.mubr.f32.vlgmr.msra.gmra.mrb[4].mxu1 %v4253_v53  ;;  %v9474_v53 = vpack.c.bf16 %v6475_v62, %v6471_v49  ;;  %v6555_v49 = vld [vmem:[%s13884_s9 + $0xc48] sm:$0xff] }
 0xabc   :  { %9406 = vmatpush3.bf16.msra.mxu1 %v9405_v52  ;;  %8258 = vmatprep.mubr.msk.f32.mxu1 %vm9954_vm0, %v9955_v6  ;;  %v6484_v52 = vld [vmem:[%s13884_s9 + $0xb38] sm:$0xff]  ;;  %v6559_v62 = vld [vmem:[%s13884_s9 + $0xc68] sm:$0xff] }
 0xabd   :  { %9407 = vmatprep.subr.bf16.mxu1 %v9953_v3  ;;  %v9476_v54 = vpack.c.bf16 %v6484_v52, %v6480_v51  ;;  %v9544_v52 = vpack.c.bf16 %v6559_v62, %v6555_v49 }
 0xac0   :  { %9409 = vmatpush3.bf16.msra.mxu1 %v9408_v56  ;;  %v6483_v56 = vld [vmem:[%s13884_s9 + $0xb30] sm:$0xff] }
 0xac1   :  { %9410 = vmatprep.subr.bf16.mxu1 %v9953_v3 }
 0xac4   :  { %9412 = vmatpush3.bf16.msra.mxu1 %v9411_v60  ;;  %v9478_v60 = vpack.c.bf16 %v6483_v56, %v6479_v55  ;;  %v6563_v55 = vld [vmem:[%s13884_s9 + $0xc88] sm:$0xff] }
 0xac5   :  { %9413 = vmatprep.subr.bf16.mxu1 %v9953_v3  ;;  %v6567_v56 = vld [vmem:[%s13884_s9 + $0xca8] sm:$0xff] }
 0xac6   :  { %v9548_v59 = vpack.c.bf16 %v6567_v56, %v6563_v55 }
 0xac8   :  { %9415 = vmatpush3.bf16.msra.mxu1 %v9414_v1  ;;  %v6491_v1 = vld [vmem:[%s13884_s9 + $0xb70] sm:$0xff] }
 0xac9   :  { %9416 = vmatprep.subr.bf16.mxu1 %v9953_v3 }
 0xacc   :  { %9418 = vmatpush3.bf16.msra.mxu1 %v9417_v5  ;;  %v9482_v5 = vpack.c.bf16 %v6491_v1, %v6487_v63  ;;  %v6571_v63 = vld [vmem:[%s13884_s9 + $0xcc8] sm:$0xff] }
 0xacd   :  { %9419 = vmatprep.subr.bf16.mxu1 %v9953_v3  ;;  %v6575_v1 = vld [vmem:[%s13884_s9 + $0xce8] sm:$0xff] }
 0xace   :  { %v9552_v4 = vpack.c.bf16 %v6575_v1, %v6571_v63 }
 0xad0   :  { %9421 = vmatpush3.bf16.msra.mxu1 %v9420_v9  ;;  %v6499_v9 = vld [vmem:[%s13884_s9 + $0xbb0] sm:$0xff] }
 0xad1   :  { %9422 = vmatprep.subr.bf16.mxu1 %v9953_v3 }
 0xad4   :  { %9424 = vmatpush3.bf16.msra.mxu1 %v9423_v12  ;;  %v9486_v12 = vpack.c.bf16 %v6499_v9, %v6495_v8  ;;  %v6579_v8 = vld [vmem:[%s13884_s9 + $0xd08] sm:$0xff] }
 0xad5   :  { %9425 = vmatprep.subr.bf16.mxu1 %v9953_v3  ;;  %v6583_v9 = vld [vmem:[%s13884_s9 + $0xd28] sm:$0xff] }
 0xad6   :  { %v9556_v11 = vpack.c.bf16 %v6583_v9, %v6579_v8 }
 0xad8   :  { %9427 = vmatpush3.bf16.msra.mxu1 %v9426_v15  ;;  %v6507_v15 = vld [vmem:[%s13884_s9 + $0xbf0] sm:$0xff] }
 0xad9   :  { %v9490_v26 = vpack.c.bf16 %v6507_v15, %v6503_v13  ;;  %v6587_v13 = vld [vmem:[%s13884_s9 + $0xd48] sm:$0xff] }
 0xada   :  { %v6591_v15 = vld [vmem:[%s13884_s9 + $0xd68] sm:$0xff] }
 0xadb   :  { %8259 = vmatmul.mubr.f32.vlgmr.msra.gmra.mrb[12].mxu1 %v4251_v47  ;;  %v6476_v47 = vld [vmem:[%s13884_s9 + $0xaf8] sm:$0xff] }
 0xadc   :  { %4990 = vmatprep.mubr.f32.mxu1 %v9955_v6  ;;  %v9472_v48 = vpack.c.bf16 %v6476_v47, %v6472_v46  ;;  %v6551_v46 = vld [vmem:[%s13884_s9 + $0xc28] sm:$0xff]  ;;  %v6546_v47 = vld [vmem:[%s13884_s9 + $0xc00] sm:$0xff] }
 0xb8e   :  { %v4342_v29 = vpop.f32.mrb[4].mxu1 }
 0xb8f   :  { %v13002_v34 = vadd.f32 %v5778_v25, %v4342_v29  ;;  %v8225_v35 = vpop.f32.mrb[5].mxu1  ;;  %v6518_v25 = vld [vmem:[%s13879_s4 + $0x320] sm:$0xff]  ;;  %v6520_v29 = vld [vmem:[%s13879_s4 + $0x330] sm:$0xff] }
 0xb90   :  { %v9499_v28 = vpack.c.bf16 %v6519_v27, %v6518_v25  ;;  %v9502_v33 = vpack.c.bf16 %v6521_v32, %v6520_v29  ;;  %v6523_v35 = vld [vmem:[%s13879_s4 + $0x348] sm:$0xff]  ;;  %v6594_v27 = vld [vmem:[%s13884_s9 + $0xd80] sm:$0xff] }
 0xb91   :  { %v4346_v37 = vmax.f32 %v13002_v34, 0.0  ;;  %v6522_v34 = vld [vmem:[%s13879_s4 + $0x340] sm:$0xff] }
 0xb93   :  { %4570 = vmatmul.mubr.f32.vlgmr.msra.gmra.mrb[24].mxu0 %v4346_v37 }
 0xb94   :  { %9463 = vmatpush1.bf16.msra.mxu0 %v9462_v36  ;;  %4640 = vmatprep.mubr.f32.mxu0 %v9955_v6  ;;  %v9505_v36 = vpack.c.bf16 %v6523_v35, %v6522_v34  ;;  %v1964_v34 = vpop.permute.xlu1 %1963 }
 0xb95   :  { %9465 = vmatprep.subr.bf16.mxu0 %v9464_v38  ;;  %v6525_v38 = vld [vmem:[%s13879_s4 + $0x358] sm:$0xff] }
 0xb98   :  { %9467 = vmatpush1.bf16.msra.mxu0 %v9466_v42  ;;  %v6528_v42 = vld [vmem:[%s13879_s4 + $0x370] sm:$0xff] }
 0xb99   :  { %9469 = vmatprep.subr.bf16.mxu0 %v9468_v43  ;;  %v6529_v43 = vld [vmem:[%s13879_s4 + $0x378] sm:$0xff] }
 0xb9a   :  { %v9514_v44 = vpack.c.bf16 %v6529_v43, %v6528_v42 }
 0xb9c   :  { %9471 = vmatpush1.bf16.msra.mxu0 %v9470_v57  ;;  %v9540_v57 = vpack.c.bf16 %v6551_v46, %v6547_v45 }
 0xb9d   :  { %9473 = vmatprep.subr.bf16.mxu0 %v9472_v48  ;;  %v6550_v48 = vld [vmem:[%s13884_s9 + $0xc20] sm:$0xff] }
 0xb9e   :  { %v9542_v51 = vpack.c.bf16 %v6550_v48, %v6546_v47  ;;  %9541 = vmatprep.subr.bf16.mxu1 %v9540_v57  ;;  %v5930_v48 = vld [vmem:[%s13881_s6 + $0xd] ss:$0 sm:$0xff] }
 0xba0   :  { %9475 = vmatpush1.bf16.msra.mxu0 %v9474_v53  ;;  %v6554_v53 = vld [vmem:[%s13884_s9 + $0xc40] sm:$0xff]  ;;  %9543 = vmatpush1.bf16.msra.mxu1 %v9542_v51 }
 0xba1   :  { %9477 = vmatprep.subr.bf16.mxu0 %v9476_v54  ;;  %v6558_v54 = vld [vmem:[%s13884_s9 + $0xc60] sm:$0xff]  ;;  %9545 = vmatprep.subr.bf16.mxu1 %v9544_v52 }
 0xba2   :  { %v9546_v58 = vpack.c.bf16 %v6558_v54, %v6554_v53 }
 0xba4   :  { %9479 = vmatpush1.bf16.msra.mxu0 %v9478_v60  ;;  %v6562_v60 = vld [vmem:[%s13884_s9 + $0xc80] sm:$0xff]  ;;  %9547 = vmatpush1.bf16.msra.mxu1 %v9546_v58 }
 0xba5   :  { %9481 = vmatprep.subr.bf16.mxu0 %v9480_v61  ;;  %v6566_v61 = vld [vmem:[%s13884_s9 + $0xca0] sm:$0xff]  ;;  %9549 = vmatprep.subr.bf16.mxu1 %v9548_v59 }
 0xba6   :  { %v9550_v2 = vpack.c.bf16 %v6566_v61, %v6562_v60 }
 0xba8   :  { %9483 = vmatpush1.bf16.msra.mxu0 %v9482_v5  ;;  %v6570_v5 = vld [vmem:[%s13884_s9 + $0xcc0] sm:$0xff]  ;;  %9551 = vmatpush1.bf16.msra.mxu1 %v9550_v2 }
 0xba9   :  { %9485 = vmatprep.subr.bf16.mxu0 %v9484_v7  ;;  %v6574_v7 = vld [vmem:[%s13884_s9 + $0xce0] sm:$0xff]  ;;  %9553 = vmatprep.subr.bf16.mxu1 %v9552_v4 }
 0xbaa   :  { %v9554_v10 = vpack.c.bf16 %v6574_v7, %v6570_v5 }
 0xbac   :  { %9487 = vmatpush1.bf16.msra.mxu0 %v9486_v12  ;;  %v6578_v12 = vld [vmem:[%s13884_s9 + $0xd00] sm:$0xff]  ;;  %9555 = vmatpush1.bf16.msra.mxu1 %v9554_v10 }
 0xbad   :  { %9489 = vmatprep.subr.bf16.mxu0 %v9488_v23  ;;  %v6582_v23 = vld [vmem:[%s13884_s9 + $0xd20] sm:$0xff]  ;;  %9557 = vmatprep.subr.bf16.mxu1 %v9556_v11 }
 0xbae   :  { %v13084_v16 = vpop.f32.mrb[12].mxu1 }
 0xbaf   :  { %v8260_v17 = vpop.f32.mrb[13].mxu1  ;;  %v9753_v62 = vadd.f32 %v5930_v48, %v13084_v16 }
 0xbb0   :  { %9491 = vmatpush1.bf16.msra.mxu0 %v9490_v26  ;;  %v9558_v26 = vpack.c.bf16 %v6582_v23, %v6578_v12  ;;  %v9560_v17 = vpack.c.bf16 %v6591_v15, %v6587_v13  ;;  %v6530_v13 = vld [vmem:[%s13879_s4 + $0x700] sm:$0xff]  ;;  %v6531_v15 = vld [vmem:[%s13879_s4 + $0x708] sm:$0xff] }
 0xbb1   :  { %9492 = vmatprep.subr.bf16.mxu0 %v9953_v3  ;;  %v4435_v55 = vmax.f32 %v9753_v62, 0.0  ;;  %v9517_v18 = vpack.c.bf16 %v6531_v15, %v6530_v13  ;;  %v6553_v62 = vld [vmem:[%s13884_s9 + $0xc38] sm:$0xff]  ;;  %v6572_v15 = vld [vmem:[%s13884_s9 + $0xcd0] sm:$0xff] }
 0xbb2   :  { %9559 = vmatpush1.bf16.msra.mxu1 %v9558_v26 }
 0xbb3   :  { %4641 = vmatmul.mubr.f32.vlgmr.msra.gmra.mrb[26].mxu0 %v4346_v37  ;;  %v6524_v37 = vld [vmem:[%s13879_s4 + $0x350] sm:$0xff]  ;;  %9561 = vmatprep.subr.bf16.mxu1 %v9560_v17 }
 0xbb4   :  { %8293 = vmatprep.mubr.msk.f32.mxu0 %vm9954_vm0, %v9955_v6  ;;  %9494 = vmatpush3.bf16.msra.mxu0 %v9493_v20  ;;  %v9508_v39 = vpack.c.bf16 %v6525_v38, %v6524_v37  ;;  %v6595_v20 = vld [vmem:[%s13884_s9 + $0xd88] sm:$0xff] }
 0xbb5   :  { %9495 = vmatprep.subr.bf16.mxu0 %v9953_v3  ;;  %v9564_v25 = vpack.c.bf16 %v6599_v21, %v6595_v20  ;;  %v6532_v20 = vld [vmem:[%s13879_s4 + $0x710] sm:$0xff]  ;;  %v6533_v21 = vld [vmem:[%s13879_s4 + $0x718] sm:$0xff] }
 0xbb6   :  { %9563 = vmatpush1.bf16.msra.mxu1 %v9562_v22  ;;  %v9520_v22 = vpack.c.bf16 %v6533_v21, %v6532_v20  ;;  %v6580_v21 = vld [vmem:[%s13884_s9 + $0xd10] sm:$0xff] }
 0xbb7   :  { %9565 = vmatprep.subr.bf16.mxu1 %v9564_v25  ;;  %v6535_v25 = vld [vmem:[%s13879_s4 + $0x728] sm:$0xff] }
 0xbb8   :  { %9497 = vmatpush3.bf16.msra.mxu0 %v9496_v24  ;;  %v5982_v24 = vld [vmem:[%s13882_s7 + $0x14] sm:$0xf] }
 0xbb9   :  { %9498 = vmatprep.subr.bf16.mxu0 %v9953_v3  ;;  %v1974_v29 = vrot.slane %v5982_v24, %v11487_v0  ;;  %v1970_v37 = vrot.slane %v5982_v24, %v11508_v14  ;;  %v1978_v49 = vrot.slane %v5982_v24, %v11513_v30  ;;  %v1982_v51 = vrot.slane %v5982_v24, %v11515_v31  ;;  %v6534_v24 = vld [vmem:[%s13879_s4 + $0x720] sm:$0xff] }
 0xbbb   :  { %v1988_v35 = vmul.f32 %v1974_v29, %v1964_v34  ;;  %v1989_v53 = vmul.f32 %v1978_v49, %v1964_v34  ;;  %v1990_v56 = vmul.f32 %v1982_v51, %v1964_v34  ;;  %v6537_v29 = vld [vmem:[%s13879_s4 + $0x738] sm:$0xff] }
 0xbbc   :  { %9500 = vmatpush3.bf16.msra.mxu0 %v9499_v28  ;;  %v6598_v28 = vld [vmem:[%s13884_s9 + $0xda0] sm:$0xff]  ;;  %v6549_v49 = vld [vmem:[%s13884_s9 + $0xc18] sm:$0xff] }
 0xbbd   :  { %9501 = vmatprep.subr.bf16.mxu0 %v9953_v3  ;;  %v9566_v32 = vpack.c.bf16 %v6598_v28, %v6594_v27  ;;  %v9523_v27 = vpack.c.bf16 %v6535_v25, %v6534_v24  ;;  %v6536_v28 = vld [vmem:[%s13879_s4 + $0x730] sm:$0xff]  ;;  %v9572_v51 = vpack.c.bf16 %v6553_v62, %v6549_v49  ;;  %v6589_v24 = vld [vmem:[%s13884_s9 + $0xd58] sm:$0xff] }
 0xbbe   :  { %v6593_v25 = vld [vmem:[%s13884_s9 + $0xd78] sm:$0xff]  ;;  %v6617_v49 = vld [vmem:[%s13879_s4 + $0x390] sm:$0xff] }
 0xbbf   :  { %9567 = vmatpush1.bf16.msra.mxu1 %v9566_v32  ;;  %v9526_v32 = vpack.c.bf16 %v6537_v29, %v6536_v28  ;;  %v9592_v28 = vpack.c.bf16 %v6593_v25, %v6589_v24  ;;  %v6588_v29 = vld [vmem:[%s13884_s9 + $0xd50] sm:$0xff]  ;;  %v6618_v62 = vld [vmem:[%s13879_s4 + $0x398] sm:$0xff] }
 0xbc0   :  { %9503 = vmatpush3.bf16.msra.mxu0 %v9502_v33  ;;  %v5983_v33 = vld [vmem:[%s13883_s8 + $0x14] sm:$0xf] }
 0xbc1   :  { %9504 = vmatprep.subr.bf16.mxu0 %v9953_v3  ;;  %v1997_v42 = vrot.slane %v5983_v33, %v11508_v14  ;;  %v2005_v54 = vrot.slane %v5983_v33, %v11513_v30  ;;  %v2009_v58 = vrot.slane %v5983_v33, %v11515_v31 }
 0xbc3   :  { %v2016_v63 = vadd.f32 %v2005_v54, %v1989_v53  ;;  %v2017_v2 = vadd.f32 %v2009_v58, %v1990_v56  ;;  %v6548_v53 = vld [vmem:[%s13884_s9 + $0xc10] sm:$0xff]  ;;  %v6557_v56 = vld [vmem:[%s13884_s9 + $0xc58] sm:$0xff] }
 0xbc4   :  { %9506 = vmatpush3.bf16.msra.mxu0 %v9505_v36  ;;  %v2001_v36 = vrot.slane %v5983_v33, %v11487_v0  ;;  %v6538_v33 = vld [vmem:[%s13879_s4 + $0x740] sm:$0xff]  ;;  %v6552_v54 = vld [vmem:[%s13884_s9 + $0xc30] sm:$0xff]  ;;  %v6561_v58 = vld [vmem:[%s13884_s9 + $0xc78] sm:$0xff] }
 0xbc5   :  { %9507 = vmatprep.subr.bf16.mxu0 %v9953_v3 }
 0xbc8   :  { %9509 = vmatpush3.bf16.msra.mxu0 %v9508_v39  ;;  %v2015_v39 = vadd.f32 %v2001_v36, %v1988_v35  ;;  %v6540_v36 = vld [vmem:[%s13879_s4 + $0x750] sm:$0xff] }
 0xbc9   :  { %9510 = vmatprep.subr.bf16.mxu0 %v9953_v3 }
 0xbcc   :  { %9512 = vmatpush3.bf16.msra.mxu0 %v9511_v50  ;;  %v1987_v50 = vmul.f32 %v1970_v37, %v1964_v34  ;;  %v6539_v34 = vld [vmem:[%s13879_s4 + $0x748] sm:$0xff]  ;;  %v6541_v37 = vld [vmem:[%s13879_s4 + $0x758] sm:$0xff] }
 0xbcd   :  { %9513 = vmatprep.subr.bf16.mxu0 %v9953_v3  ;;  %v9529_v35 = vpack.c.bf16 %v6539_v34, %v6538_v33  ;;  %v6597_v33 = vld [vmem:[%s13884_s9 + $0xd98] sm:$0xff] }
 0xbce   :  { %v6601_v34 = vld [vmem:[%s13884_s9 + $0xdb8] sm:$0xff] }
 0xbd0   :  { %9515 = vmatpush3.bf16.msra.mxu0 %v9514_v44  ;;  %v2014_v44 = vadd.f32 %v1997_v42, %v1987_v50  ;;  %v6544_v50 = vld [vmem:[%s13879_s4 + $0x770] sm:$0xff]  ;;  %v6545_v42 = vld [vmem:[%s13879_s4 + $0x778] sm:$0xff] }
 0xbd1   :  { %9516 = vmatprep.subr.bf16.mxu0 %v9953_v3 }
 0xc66   :  { %v4571_v38 = vpop.f32.mrb[24].mxu0 }
 0xc67   :  { %v4573_v40 = vpop.f32.mrb[25].mxu0  ;;  %v4647_v45 = vadd.f32 %v4571_v38, %v2014_v44  ;;  %v9532_v38 = vpack.c.bf16 %v6541_v37, %v6540_v36  ;;  %v6603_v44 = vld [vmem:[%s13884_s9 + $0xdc8] sm:$0xff]  ;;  %v9596_v36 = vpack.c.bf16 %v6601_v34, %v6597_v33  ;;  %v6596_v37 = vld [vmem:[%s13884_s9 + $0xd90] sm:$0xff] }
 0xc68   :  { %v4648_v41 = vadd.f32 %v4573_v40, %v2015_v39  ;;  %v6542_v39 = vld [vmem:[%s13879_s4 + $0x760] sm:$0xff]  ;;  %v6543_v40 = vld [vmem:[%s13879_s4 + $0x768] sm:$0xff] }
 0xc69   :  { %v6509_v46 = vmul.f32 -1.442695, %v4647_v45  ;;  %v6607_v45 = vld [vmem:[%s13884_s9 + $0xde8] sm:$0xff] }
 0xc6a   :  { %v6510_v43 = vmul.f32 -1.442695, %v4648_v41  ;;  %v9535_v41 = vpack.c.bf16 %v6543_v40, %v6542_v39  ;;  %v6605_v39 = vld [vmem:[%s13884_s9 + $0xdd8] sm:$0xff] }
 0xc6b   :  { %v6609_v40 = vld [vmem:[%s13884_s9 + $0xdf8] sm:$0xff] }
 0xc6c   :  { %9875 = vpow2.f32 %v6510_v43  ;;  %v9538_v43 = vpack.c.bf16 %v6545_v42, %v6544_v50  ;;  %v9600_v50 = vpack.c.bf16 %v6609_v40, %v6605_v39  ;;  %v6604_v42 = vld [vmem:[%s13884_s9 + $0xdd0] sm:$0xff] }
 0xc6d   :  { %9877 = vpow2.f32 %v6509_v46  ;;  %v9568_v46 = vpack.c.bf16 %v6607_v45, %v6603_v44 }
 0xc6f   :  { %9569 = vmatprep.subr.bf16.mxu1 %v9568_v46 }
 0xc76   :  { %v9876_v47 = vpop.eup %9875 }
 0xc77   :  { %v4660_v57 = vadd.f32 1.0, %v9876_v47  ;;  %v9878_v52 = vpop.eup %9877  ;;  %v6602_v47 = vld [vmem:[%s13884_s9 + $0xdc0] sm:$0xff] }
 0xc78   :  { %v4654_v60 = vadd.f32 1.0, %v9878_v52  ;;  %v5797_v52 = vld [vmem:[%s13881_s6 + $0x6] ss:$0 sm:$0xff] }
 0xc79   :  { %9879 = vrcp.f32 %v4660_v57  ;;  %v6606_v57 = vld [vmem:[%s13884_s9 + $0xde0] sm:$0xff] }
 0xc7a   :  { %9881 = vrcp.f32 %v4654_v60  ;;  %v9570_v48 = vpack.c.bf16 %v6606_v57, %v6602_v47  ;;  %v6615_v47 = vld [vmem:[%s13879_s4 + $0x380] sm:$0xff]  ;;  %v6616_v57 = vld [vmem:[%s13879_s4 + $0x388] sm:$0xff] }
 0xc7c   :  { %9571 = vmatpush1.bf16.msra.mxu1 %v9570_v48  ;;  %v9605_v48 = vpack.c.bf16 %v6616_v57, %v6615_v47  ;;  %v6687_v47 = vld [vmem:[%s13884_s9 + $0xf40] sm:$0xff] }
 0xc7d   :  { %9573 = vmatprep.subr.bf16.mxu1 %v9572_v51  ;;  %v9608_v51 = vpack.c.bf16 %v6618_v62, %v6617_v49  ;;  %v6691_v57 = vld [vmem:[%s13884_s9 + $0xf60] sm:$0xff]  ;;  %v6700_v49 = vld [vmem:[%s13884_s9 + $0xfa8] sm:$0xff] }
 0xc7e   :  { %v9674_v62 = vpack.c.bf16 %v6691_v57, %v6687_v47 }
 0xc83   :  { %v9880_v59 = vpop.eup %9879 }
 0xc84   :  { %v4670_v61 = vmul.f32 %v9880_v59, %v4435_v55  ;;  %v9882_v8 = vpop.eup %9881 }
 0xc86   :  { %v4642_v1 = vpop.f32.mrb[26].mxu0 }
 0xc87   :  { %v4649_v4 = vadd.f32 %v4642_v1, %v2016_v63  ;;  %v4644_v5 = vpop.f32.mrb[27].mxu0  ;;  %v9576_v1 = vpack.c.bf16 %v6561_v58, %v6557_v56  ;;  %v6622_v56 = vld [vmem:[%s13879_s4 + $0x3b8] sm:$0xff] }
 0xc88   :  { %v4650_v16 = vadd.f32 %v4644_v5, %v2017_v2  ;;  %v6556_v2 = vld [vmem:[%s13884_s9 + $0xc50] sm:$0xff]  ;;  %v6565_v5 = vld [vmem:[%s13884_s9 + $0xc98] sm:$0xff] }
 0xc89   :  { %9883 = vtanh.f32 %v4649_v4  ;;  %v6560_v4 = vld [vmem:[%s13884_s9 + $0xc70] sm:$0xff] }
 0xc8a   :  { %v6511_v7 = vmul.f32 -1.442695, %v4650_v16  ;;  %v6569_v16 = vld [vmem:[%s13884_s9 + $0xcb8] sm:$0xff] }
 0xc8c   :  { %9885 = vpow2.f32 %v6511_v7  ;;  %v9578_v7 = vpack.c.bf16 %v6560_v4, %v6556_v2  ;;  %v6627_v4 = vld [vmem:[%s13879_s4 + $0x3e0] sm:$0xff] }
 0xc93   :  { %v9884_v9 = vpop.eup %9883 }
 0xc94   :  { %v4671_v10 = vmul.f32 %v9884_v9, %v9882_v8  ;;  %v9580_v8 = vpack.c.bf16 %v6569_v16, %v6565_v5  ;;  %v6564_v9 = vld [vmem:[%s13884_s9 + $0xc90] sm:$0xff]  ;;  %v6628_v5 = vld [vmem:[%s13879_s4 + $0x3e8] sm:$0xff] }
 0xc95   :  { %v9623_v16 = vpack.c.bf16 %v6628_v5, %v6627_v4 }
 0xc96   :  { %v9886_v11 = vpop.eup %9885  ;;  %v4672_v12 = vadd.f32 %v4671_v10, %v4670_v61  ;;  %v9574_v61 = vpack.c.bf16 %v6552_v54, %v6548_v53  ;;  %v6568_v10 = vld [vmem:[%s13884_s9 + $0xcb0] sm:$0xff]  ;;  %v6620_v53 = vld [vmem:[%s13879_s4 + $0x3a8] sm:$0xff] }
 0xc97   :  { %v4667_v23 = vadd.f32 1.0, %v9886_v11  ;;  %v6573_v11 = vld [vmem:[%s13884_s9 + $0xcd8] sm:$0xff] }
 0xc98   :  { %6513 = vst [vmem:[%s13890_s15 + $0x28] sm:$0xff] %v4672_v12  ;;  %9887 = vtanh.f32 %v4672_v12 }
 0xc99   :  { %9889 = vrcp.f32 %v4667_v23  ;;  %v9582_v23 = vpack.c.bf16 %v6568_v10, %v6564_v9  ;;  %v6648_v10 = vld [vmem:[%s13884_s9 + $0xe08] sm:$0xff] }
 0xca2   :  { %v9888_v26 = vpop.eup %9887 }
 0xca3   :  { %v9890_v17 = vpop.eup %9889 }
 0xca4   :  { %v4674_v19 = vmul.f32 %v9890_v17, %v9888_v26  ;;  %v6576_v26 = vld [vmem:[%s13884_s9 + $0xcf0] sm:$0xff]  ;;  %v6581_v17 = vld [vmem:[%s13884_s9 + $0xd18] sm:$0xff] }
 0xca6   :  { %6512 = vst [vmem:[%s13889_s14 + $0x28] sm:$0xff] %v4674_v19  ;;  %8294 = vmatmul.mubr.f32.vlgmr.msra.gmra.mrb[6].mxu0 %v4674_v19  ;;  %v9586_v19 = vpack.c.bf16 %v6576_v26, %v6572_v15  ;;  %v6656_v15 = vld [vmem:[%s13884_s9 + $0xe48] sm:$0xff] }
 0xca7   :  { %9518 = vmatpush3.bf16.msra.mxu0 %v9517_v18  ;;  %8328 = vmatprep.mubr.msk.f32.mxu0 %vm9954_vm0, %v9955_v6  ;;  %v6585_v18 = vld [vmem:[%s13884_s9 + $0xd38] sm:$0xff]  ;;  %v6660_v26 = vld [vmem:[%s13884_s9 + $0xe68] sm:$0xff] }
 0xca8   :  { %9519 = vmatprep.subr.bf16.mxu0 %v9953_v3  ;;  %v9588_v20 = vpack.c.bf16 %v6585_v18, %v6581_v17  ;;  %v9656_v18 = vpack.c.bf16 %v6660_v26, %v6656_v15 }
 0xcab   :  { %9521 = vmatpush3.bf16.msra.mxu0 %v9520_v22  ;;  %v6584_v22 = vld [vmem:[%s13884_s9 + $0xd30] sm:$0xff] }
 0xcac   :  { %9522 = vmatprep.subr.bf16.mxu0 %v9953_v3 }
 0xcaf   :  { %9524 = vmatpush3.bf16.msra.mxu0 %v9523_v27  ;;  %v9590_v27 = vpack.c.bf16 %v6584_v22, %v6580_v21  ;;  %v6664_v21 = vld [vmem:[%s13884_s9 + $0xe88] sm:$0xff] }
 0xcb0   :  { %9525 = vmatprep.subr.bf16.mxu0 %v9953_v3  ;;  %v6668_v22 = vld [vmem:[%s13884_s9 + $0xea8] sm:$0xff] }
 0xcb1   :  { %v9660_v25 = vpack.c.bf16 %v6668_v22, %v6664_v21 }
 0xcb3   :  { %9527 = vmatpush3.bf16.msra.mxu0 %v9526_v32  ;;  %v6592_v32 = vld [vmem:[%s13884_s9 + $0xd70] sm:$0xff] }
 0xcb4   :  { %9528 = vmatprep.subr.bf16.mxu0 %v9953_v3 }
 0xcb7   :  { %9530 = vmatpush3.bf16.msra.mxu0 %v9529_v35  ;;  %v9594_v35 = vpack.c.bf16 %v6592_v32, %v6588_v29  ;;  %v6672_v29 = vld [vmem:[%s13884_s9 + $0xec8] sm:$0xff] }
 0xcb8   :  { %9531 = vmatprep.subr.bf16.mxu0 %v9953_v3  ;;  %v6676_v32 = vld [vmem:[%s13884_s9 + $0xee8] sm:$0xff] }
 0xcb9   :  { %v9664_v34 = vpack.c.bf16 %v6676_v32, %v6672_v29 }
 0xcbb   :  { %9533 = vmatpush3.bf16.msra.mxu0 %v9532_v38  ;;  %v6600_v38 = vld [vmem:[%s13884_s9 + $0xdb0] sm:$0xff] }
 0xcbc   :  { %9534 = vmatprep.subr.bf16.mxu0 %v9953_v3 }
 0xcbf   :  { %9536 = vmatpush3.bf16.msra.mxu0 %v9535_v41  ;;  %v9598_v41 = vpack.c.bf16 %v6600_v38, %v6596_v37  ;;  %v6680_v37 = vld [vmem:[%s13884_s9 + $0xf08] sm:$0xff] }
 0xcc0   :  { %9537 = vmatprep.subr.bf16.mxu0 %v9953_v3  ;;  %v6684_v38 = vld [vmem:[%s13884_s9 + $0xf28] sm:$0xff] }
 0xcc1   :  { %v9668_v40 = vpack.c.bf16 %v6684_v38, %v6680_v37 }
 0xcc3   :  { %9539 = vmatpush3.bf16.msra.mxu0 %v9538_v43  ;;  %v6608_v43 = vld [vmem:[%s13884_s9 + $0xdf0] sm:$0xff] }
 0xcc4   :  { %v9602_v44 = vpack.c.bf16 %v6608_v43, %v6604_v42  ;;  %v6688_v42 = vld [vmem:[%s13884_s9 + $0xf48] sm:$0xff] }
 0xcc5   :  { %v6692_v43 = vld [vmem:[%s13884_s9 + $0xf68] sm:$0xff] }
 0xcc6   :  { %8329 = vmatmul.mubr.f32.vlgmr.msra.gmra.mrb[14].mxu0 %v4672_v12  ;;  %v6577_v12 = vld [vmem:[%s13884_s9 + $0xcf8] sm:$0xff] }
 0xcc7   :  { %5411 = vmatprep.mubr.f32.mxu0 %v9955_v6  ;;  %v9584_v13 = vpack.c.bf16 %v6577_v12, %v6573_v11  ;;  %v6652_v11 = vld [vmem:[%s13884_s9 + $0xe28] sm:$0xff]  ;;  %v6647_v12 = vld [vmem:[%s13884_s9 + $0xe00] sm:$0xff] }
 0xd79   :  { %v4763_v55 = vpop.f32.mrb[6].mxu0 }
 0xd7a   :  { %v13344_v59 = vadd.f32 %v5797_v52, %v4763_v55  ;;  %v8295_v60 = vpop.f32.mrb[7].mxu0  ;;  %v6619_v52 = vld [vmem:[%s13879_s4 + $0x3a0] sm:$0xff]  ;;  %v6621_v55 = vld [vmem:[%s13879_s4 + $0x3b0] sm:$0xff] }
 0xd7b   :  { %v9611_v54 = vpack.c.bf16 %v6620_v53, %v6619_v52  ;;  %v9614_v58 = vpack.c.bf16 %v6622_v56, %v6621_v55  ;;  %v6624_v60 = vld [vmem:[%s13879_s4 + $0x3c8] sm:$0xff]  ;;  %v6695_v53 = vld [vmem:[%s13884_s9 + $0xf80] sm:$0xff] }
 0xd7c   :  { %v4767_v63 = vmax.f32 %v13344_v59, 0.0  ;;  %v6623_v59 = vld [vmem:[%s13879_s4 + $0x3c0] sm:$0xff] }
 0xd7e   :  { %4991 = vmatmul.mubr.f32.vlgmr.msra.gmra.mrb[28].mxu1 %v4767_v63 }
 0xd7f   :  { %9575 = vmatpush1.bf16.msra.mxu1 %v9574_v61  ;;  %5061 = vmatprep.mubr.f32.mxu1 %v9955_v6  ;;  %v9617_v61 = vpack.c.bf16 %v6624_v60, %v6623_v59  ;;  %v5986_v59 = vld [vmem:[%s13883_s8 + $0x18] sm:$0xf] }
 0xd80   :  { %9577 = vmatprep.subr.bf16.mxu1 %v9576_v1  ;;  %v6626_v1 = vld [vmem:[%s13879_s4 + $0x3d8] sm:$0xff] }
 0xd83   :  { %9579 = vmatpush1.bf16.msra.mxu1 %v9578_v7  ;;  %v6629_v7 = vld [vmem:[%s13879_s4 + $0x3f0] sm:$0xff] }
 0xd84   :  { %9581 = vmatprep.subr.bf16.mxu1 %v9580_v8  ;;  %v6630_v8 = vld [vmem:[%s13879_s4 + $0x3f8] sm:$0xff] }
 0xd85   :  { %v9626_v9 = vpack.c.bf16 %v6630_v8, %v6629_v7  ;;  %v2063_v7 = vrot.slane %v5986_v59, %v11508_v14 }
 0xd87   :  { %9583 = vmatpush1.bf16.msra.mxu1 %v9582_v23  ;;  %v9652_v23 = vpack.c.bf16 %v6652_v11, %v6648_v10 }
 0xd88   :  { %9585 = vmatprep.subr.bf16.mxu1 %v9584_v13  ;;  %v6651_v13 = vld [vmem:[%s13884_s9 + $0xe20] sm:$0xff] }
 0xd89   :  { %v9654_v17 = vpack.c.bf16 %v6651_v13, %v6647_v12  ;;  %9653 = vmatprep.subr.bf16.mxu0 %v9652_v23  ;;  %v5949_v13 = vld [vmem:[%s13881_s6 + $0xe] ss:$0 sm:$0xff] }
 0xd8b   :  { %9587 = vmatpush1.bf16.msra.mxu1 %v9586_v19  ;;  %v6655_v19 = vld [vmem:[%s13884_s9 + $0xe40] sm:$0xff]  ;;  %9655 = vmatpush1.bf16.msra.mxu0 %v9654_v17 }
 0xd8c   :  { %9589 = vmatprep.subr.bf16.mxu1 %v9588_v20  ;;  %v6659_v20 = vld [vmem:[%s13884_s9 + $0xe60] sm:$0xff]  ;;  %9657 = vmatprep.subr.bf16.mxu0 %v9656_v18 }
 0xd8d   :  { %v9658_v24 = vpack.c.bf16 %v6659_v20, %v6655_v19  ;;  %v2071_v20 = vrot.slane %v5986_v59, %v11513_v30 }
 0xd8f   :  { %9591 = vmatpush1.bf16.msra.mxu1 %v9590_v27  ;;  %v6663_v27 = vld [vmem:[%s13884_s9 + $0xe80] sm:$0xff]  ;;  %9659 = vmatpush1.bf16.msra.mxu0 %v9658_v24  ;;  %v2075_v24 = vrot.slane %v5986_v59, %v11515_v31 }
 0xd90   :  { %9593 = vmatprep.subr.bf16.mxu1 %v9592_v28  ;;  %v6667_v28 = vld [vmem:[%s13884_s9 + $0xea0] sm:$0xff]  ;;  %9661 = vmatprep.subr.bf16.mxu0 %v9660_v25 }
 0xd91   :  { %v9662_v33 = vpack.c.bf16 %v6667_v28, %v6663_v27 }
 0xd93   :  { %9595 = vmatpush1.bf16.msra.mxu1 %v9594_v35  ;;  %v6671_v35 = vld [vmem:[%s13884_s9 + $0xec0] sm:$0xff]  ;;  %9663 = vmatpush1.bf16.msra.mxu0 %v9662_v33 }
 0xd94   :  { %9597 = vmatprep.subr.bf16.mxu1 %v9596_v36  ;;  %v6675_v36 = vld [vmem:[%s13884_s9 + $0xee0] sm:$0xff]  ;;  %9665 = vmatprep.subr.bf16.mxu0 %v9664_v34 }
 0xd95   :  { %v9666_v39 = vpack.c.bf16 %v6675_v36, %v6671_v35 }
 0xd97   :  { %9599 = vmatpush1.bf16.msra.mxu1 %v9598_v41  ;;  %v6679_v41 = vld [vmem:[%s13884_s9 + $0xf00] sm:$0xff]  ;;  %9667 = vmatpush1.bf16.msra.mxu0 %v9666_v39 }
 0xd98   :  { %9601 = vmatprep.subr.bf16.mxu1 %v9600_v50  ;;  %v6683_v50 = vld [vmem:[%s13884_s9 + $0xf20] sm:$0xff]  ;;  %9669 = vmatprep.subr.bf16.mxu0 %v9668_v40 }
 0xd99   :  { %v13426_v45 = vpop.f32.mrb[14].mxu0 }
 0xd9a   :  { %v8330_v46 = vpop.f32.mrb[15].mxu0  ;;  %v9754_v17 = vadd.f32 %v5949_v13, %v13426_v45 }
 0xd9b   :  { %9603 = vmatpush1.bf16.msra.mxu1 %v9602_v44  ;;  %v9670_v44 = vpack.c.bf16 %v6683_v50, %v6679_v41  ;;  %v9672_v46 = vpack.c.bf16 %v6692_v43, %v6688_v42  ;;  %v6631_v42 = vld [vmem:[%s13879_s4 + $0x780] sm:$0xff]  ;;  %v6632_v43 = vld [vmem:[%s13879_s4 + $0x788] sm:$0xff] }
 0xd9c   :  { %9604 = vmatprep.subr.bf16.mxu1 %v9953_v3  ;;  %v4856_v22 = vmax.f32 %v9754_v17, 0.0  ;;  %v9629_v47 = vpack.c.bf16 %v6632_v43, %v6631_v42  ;;  %v6673_v43 = vld [vmem:[%s13884_s9 + $0xed0] sm:$0xff] }
 0xd9d   :  { %9671 = vmatpush1.bf16.msra.mxu0 %v9670_v44 }
 0xd9e   :  { %5062 = vmatmul.mubr.f32.vlgmr.msra.gmra.mrb[30].mxu1 %v4767_v63  ;;  %v6625_v63 = vld [vmem:[%s13879_s4 + $0x3d0] sm:$0xff]  ;;  %9673 = vmatprep.subr.bf16.mxu0 %v9672_v46 }
 0xd9f   :  { %8363 = vmatprep.mubr.msk.f32.mxu1 %vm9954_vm0, %v9955_v6  ;;  %9606 = vmatpush3.bf16.msra.mxu1 %v9605_v48  ;;  %v9620_v2 = vpack.c.bf16 %v6626_v1, %v6625_v63  ;;  %v6696_v48 = vld [vmem:[%s13884_s9 + $0xf88] sm:$0xff] }
 0xda0   :  { %9607 = vmatprep.subr.bf16.mxu1 %v9953_v3  ;;  %v9676_v52 = vpack.c.bf16 %v6700_v49, %v6696_v48  ;;  %v6633_v48 = vld [vmem:[%s13879_s4 + $0x790] sm:$0xff]  ;;  %v6634_v49 = vld [vmem:[%s13879_s4 + $0x798] sm:$0xff] }
 0xda1   :  { %9675 = vmatpush1.bf16.msra.mxu0 %v9674_v62  ;;  %v9632_v62 = vpack.c.bf16 %v6634_v49, %v6633_v48  ;;  %v6681_v49 = vld [vmem:[%s13884_s9 + $0xf10] sm:$0xff] }
 0xda2   :  { %9677 = vmatprep.subr.bf16.mxu0 %v9676_v52  ;;  %v6636_v52 = vld [vmem:[%s13879_s4 + $0x7a8] sm:$0xff] }
 0xda3   :  { %9609 = vmatpush3.bf16.msra.mxu1 %v9608_v51  ;;  %v5985_v51 = vld [vmem:[%s13882_s7 + $0x18] sm:$0xf] }
 0xda4   :  { %9610 = vmatprep.subr.bf16.mxu1 %v9953_v3  ;;  %v2040_v55 = vrot.slane %v5985_v51, %v11487_v0  ;;  %v2036_v63 = vrot.slane %v5985_v51, %v11508_v14  ;;  %v2044_v15 = vrot.slane %v5985_v51, %v11513_v30  ;;  %v2048_v26 = vrot.slane %v5985_v51, %v11515_v31  ;;  %v6635_v51 = vld [vmem:[%s13879_s4 + $0x7a0] sm:$0xff] }
 0xda7   :  { %9612 = vmatpush3.bf16.msra.mxu1 %v9611_v54  ;;  %v6699_v54 = vld [vmem:[%s13884_s9 + $0xfa0] sm:$0xff] }
 0xda8   :  { %9613 = vmatprep.subr.bf16.mxu1 %v9953_v3  ;;  %v9678_v56 = vpack.c.bf16 %v6699_v54, %v6695_v53  ;;  %v9635_v53 = vpack.c.bf16 %v6636_v52, %v6635_v51  ;;  %v6637_v54 = vld [vmem:[%s13879_s4 + $0x7b0] sm:$0xff]  ;;  %v6690_v51 = vld [vmem:[%s13884_s9 + $0xf58] sm:$0xff] }
 0xda9   :  { %v6694_v52 = vld [vmem:[%s13884_s9 + $0xf78] sm:$0xff] }
 0xdaa   :  { %9679 = vmatpush1.bf16.msra.mxu0 %v9678_v56 }
 0xdab   :  { %9615 = vmatpush3.bf16.msra.mxu1 %v9614_v58  ;;  %v2030_v58 = vpop.permute.xlu0 %2029 }
 0xdac   :  { %9616 = vmatprep.subr.bf16.mxu1 %v9953_v3  ;;  %v2054_v60 = vmul.f32 %v2040_v55, %v2030_v58  ;;  %v2055_v19 = vmul.f32 %v2044_v15, %v2030_v58  ;;  %v2056_v21 = vmul.f32 %v2048_v26, %v2030_v58  ;;  %v6638_v55 = vld [vmem:[%s13879_s4 + $0x7b8] sm:$0xff] }
 0xdad   :  { %v9638_v56 = vpack.c.bf16 %v6638_v55, %v6637_v54  ;;  %v6650_v15 = vld [vmem:[%s13884_s9 + $0xe18] sm:$0xff]  ;;  %v9704_v54 = vpack.c.bf16 %v6694_v52, %v6690_v51  ;;  %v6689_v55 = vld [vmem:[%s13884_s9 + $0xf50] sm:$0xff] }
 0xdae   :  { %v2082_v29 = vadd.f32 %v2071_v20, %v2055_v19  ;;  %v2083_v33 = vadd.f32 %v2075_v24, %v2056_v21  ;;  %v6654_v26 = vld [vmem:[%s13884_s9 + $0xe38] sm:$0xff]  ;;  %v6649_v19 = vld [vmem:[%s13884_s9 + $0xe10] sm:$0xff] }
 0xdaf   :  { %9618 = vmatpush3.bf16.msra.mxu1 %v9617_v61  ;;  %v2067_v61 = vrot.slane %v5986_v59, %v11487_v0  ;;  %v6640_v59 = vld [vmem:[%s13879_s4 + $0x7c8] sm:$0xff]  ;;  %v9684_v17 = vpack.c.bf16 %v6654_v26, %v6650_v15  ;;  %v6653_v20 = vld [vmem:[%s13884_s9 + $0xe30] sm:$0xff]  ;;  %v6662_v24 = vld [vmem:[%s13884_s9 + $0xe78] sm:$0xff] }
 0xdb0   :  { %9619 = vmatprep.subr.bf16.mxu1 %v9953_v3  ;;  %v5523_v15 = vld [vmem:[%s13885_s10 + $0x10] sm:$0xff] }
 0xdb3   :  { %9621 = vmatpush3.bf16.msra.mxu1 %v9620_v2  ;;  %v2081_v2 = vadd.f32 %v2067_v61, %v2054_v60  ;;  %v6641_v61 = vld [vmem:[%s13879_s4 + $0x7d0] sm:$0xff] }
 0xdb4   :  { %9622 = vmatprep.subr.bf16.mxu1 %v9953_v3 }
 0xdb7   :  { %9624 = vmatpush3.bf16.msra.mxu1 %v9623_v16  ;;  %v2053_v16 = vmul.f32 %v2036_v63, %v2030_v58  ;;  %v6639_v58 = vld [vmem:[%s13879_s4 + $0x7c0] sm:$0xff]  ;;  %v6642_v63 = vld [vmem:[%s13879_s4 + $0x7d8] sm:$0xff] }
 0xdb8   :  { %9625 = vmatprep.subr.bf16.mxu1 %v9953_v3  ;;  %v9641_v60 = vpack.c.bf16 %v6640_v59, %v6639_v58  ;;  %v6698_v58 = vld [vmem:[%s13884_s9 + $0xf98] sm:$0xff] }
 0xdb9   :  { %v6702_v59 = vld [vmem:[%s13884_s9 + $0xfb8] sm:$0xff] }
 0xdbb   :  { %9627 = vmatpush3.bf16.msra.mxu1 %v9626_v9  ;;  %v2080_v9 = vadd.f32 %v2063_v7, %v2053_v16  ;;  %v6645_v16 = vld [vmem:[%s13879_s4 + $0x7f0] sm:$0xff]  ;;  %v6646_v7 = vld [vmem:[%s13879_s4 + $0x7f8] sm:$0xff] }
 0xdbc   :  { %9628 = vmatprep.subr.bf16.mxu1 %v9953_v3 }
 0xe51   :  { %v4992_v1 = vpop.f32.mrb[28].mxu1 }
 0xe52   :  { %v4994_v4 = vpop.f32.mrb[29].mxu1  ;;  %v5068_v10 = vadd.f32 %v4992_v1, %v2080_v9  ;;  %v9644_v1 = vpack.c.bf16 %v6642_v63, %v6641_v61  ;;  %v6704_v9 = vld [vmem:[%s13884_s9 + $0xfc8] sm:$0xff]  ;;  %v9708_v61 = vpack.c.bf16 %v6702_v59, %v6698_v58  ;;  %v6697_v63 = vld [vmem:[%s13884_s9 + $0xf90] sm:$0xff] }
 0xe53   :  { %v5069_v5 = vadd.f32 %v4994_v4, %v2081_v2  ;;  %v6643_v2 = vld [vmem:[%s13879_s4 + $0x7e0] sm:$0xff]  ;;  %v6644_v4 = vld [vmem:[%s13879_s4 + $0x7e8] sm:$0xff] }
 0xe54   :  { %v6610_v11 = vmul.f32 -1.442695, %v5068_v10  ;;  %v6708_v10 = vld [vmem:[%s13884_s9 + $0xfe8] sm:$0xff] }
 0xe55   :  { %v6611_v8 = vmul.f32 -1.442695, %v5069_v5  ;;  %v9647_v5 = vpack.c.bf16 %v6644_v4, %v6643_v2  ;;  %v6706_v2 = vld [vmem:[%s13884_s9 + $0xfd8] sm:$0xff] }
 0xe56   :  { %v6710_v4 = vld [vmem:[%s13884_s9 + $0xff8] sm:$0xff] }
 0xe57   :  { %9891 = vpow2.f32 %v6611_v8  ;;  %v9650_v8 = vpack.c.bf16 %v6646_v7, %v6645_v16  ;;  %v9712_v16 = vpack.c.bf16 %v6710_v4, %v6706_v2  ;;  %v6705_v7 = vld [vmem:[%s13884_s9 + $0xfd0] sm:$0xff] }
 0xe58   :  { %9893 = vpow2.f32 %v6610_v11  ;;  %v9680_v11 = vpack.c.bf16 %v6708_v10, %v6704_v9 }
 0xe5a   :  { %9681 = vmatprep.subr.bf16.mxu0 %v9680_v11 }
 0xe61   :  { %v9892_v12 = vpop.eup %9891 }
 0xe62   :  { %v5081_v23 = vadd.f32 1.0, %v9892_v12  ;;  %v9894_v18 = vpop.eup %9893  ;;  %v6703_v12 = vld [vmem:[%s13884_s9 + $0xfc0] sm:$0xff] }
 0xe63   :  { %v5075_v27 = vadd.f32 1.0, %v9894_v18  ;;  %v5816_v18 = vld [vmem:[%s13881_s6 + $0x7] ss:$0 sm:$0xff] }
 0xe64   :  { %9895 = vrcp.f32 %v5081_v23  ;;  %v6707_v23 = vld [vmem:[%s13884_s9 + $0xfe0] sm:$0xff] }
 0xe65   :  { %9897 = vrcp.f32 %v5075_v27  ;;  %v9682_v13 = vpack.c.bf16 %v6707_v23, %v6703_v12  ;;  %v5521_v12 = vld [vmem:[%s13885_s10] sm:$0xff]  ;;  %v5522_v23 = vld [vmem:[%s13885_s10 + $0x8] sm:$0xff] }
 0xe67   :  { %9683 = vmatpush1.bf16.msra.mxu0 %v9682_v13  ;;  %v9717_v13 = vpack.c.bf16 %v5522_v23, %v5521_v12 }
 0xe68   :  { %9685 = vmatprep.subr.bf16.mxu0 %v9684_v17  ;;  %v5525_v17 = vld [vmem:[%s13885_s10 + $0x20] sm:$0xff] }
 0xe6e   :  { %v9896_v25 = vpop.eup %9895 }
 0xe6f   :  { %v5091_v28 = vmul.f32 %v9896_v25, %v4856_v22  ;;  %v9898_v37 = vpop.eup %9897  ;;  %v6658_v22 = vld [vmem:[%s13884_s9 + $0xe58] sm:$0xff] }
 0xe71   :  { %v5063_v32 = vpop.f32.mrb[30].mxu1 }
 0xe72   :  { %v5070_v34 = vadd.f32 %v5063_v32, %v2082_v29  ;;  %v5065_v35 = vpop.f32.mrb[31].mxu1  ;;  %v9688_v32 = vpack.c.bf16 %v6662_v24, %v6658_v22  ;;  %v5529_v24 = vld [vmem:[%s13885_s10 + $0x40] sm:$0xff] }
 0xe73   :  { %v5071_v36 = vadd.f32 %v5065_v35, %v2083_v33  ;;  %v6657_v33 = vld [vmem:[%s13884_s9 + $0xe50] sm:$0xff]  ;;  %v6666_v35 = vld [vmem:[%s13884_s9 + $0xe98] sm:$0xff] }
 0xe74   :  { %9899 = vtanh.f32 %v5070_v34  ;;  %v6661_v34 = vld [vmem:[%s13884_s9 + $0xe70] sm:$0xff] }
 0xe75   :  { %v6612_v45 = vmul.f32 -1.442695, %v5071_v36  ;;  %v6670_v36 = vld [vmem:[%s13884_s9 + $0xeb8] sm:$0xff] }
 0xe77   :  { %9901 = vpow2.f32 %v6612_v45  ;;  %v9690_v45 = vpack.c.bf16 %v6661_v34, %v6657_v33  ;;  %v5533_v33 = vld [vmem:[%s13885_s10 + $0x60] sm:$0xff]  ;;  %v5534_v34 = vld [vmem:[%s13885_s10 + $0x68] sm:$0xff] }
 0xe7e   :  { %v9900_v38 = vpop.eup %9899 }
 0xe7f   :  { %v5092_v39 = vmul.f32 %v9900_v38, %v9898_v37  ;;  %v9692_v37 = vpack.c.bf16 %v6670_v36, %v6666_v35  ;;  %v6665_v38 = vld [vmem:[%s13884_s9 + $0xe90] sm:$0xff]  ;;  %v9735_v35 = vpack.c.bf16 %v5534_v34, %v5533_v33 }
 0xe80   :  { %v5535_v36 = vld [vmem:[%s13885_s10 + $0x70] sm:$0xff] }
 0xe81   :  { %v9902_v40 = vpop.eup %9901  ;;  %v5093_v41 = vadd.f32 %v5092_v39, %v5091_v28  ;;  %v9686_v28 = vpack.c.bf16 %v6653_v20, %v6649_v19  ;;  %v6669_v39 = vld [vmem:[%s13884_s9 + $0xeb0] sm:$0xff] }
 0xe82   :  { %v5088_v50 = vadd.f32 1.0, %v9902_v40  ;;  %v6674_v40 = vld [vmem:[%s13884_s9 + $0xed8] sm:$0xff]  ;;  %v5527_v20 = vld [vmem:[%s13885_s10 + $0x30] sm:$0xff] }
 0xe83   :  { %6614 = vst [vmem:[%s13890_s15 + $0x30] sm:$0xff] %v5093_v41  ;;  %9903 = vtanh.f32 %v5093_v41 }
 0xe84   :  { %9905 = vrcp.f32 %v5088_v50  ;;  %v9694_v50 = vpack.c.bf16 %v6669_v39, %v6665_v38  ;;  %v5988_v38 = vld [vmem:[%s13882_s7 + $0x1c] sm:$0xf] }
 0xe85   :  { %v2106_v39 = vrot.slane %v5988_v38, %v11487_v0 }
 0xe8d   :  { %v9904_v44 = vpop.eup %9903 }
 0xe8e   :  { %v9906_v46 = vpop.eup %9905 }
 0xe8f   :  { %v5095_v57 = vmul.f32 %v9906_v46, %v9904_v44  ;;  %v6677_v44 = vld [vmem:[%s13884_s9 + $0xef0] sm:$0xff]  ;;  %v6682_v46 = vld [vmem:[%s13884_s9 + $0xf18] sm:$0xff] }
 0xe91   :  { %6613 = vst [vmem:[%s13889_s14 + $0x30] sm:$0xff] %v5095_v57  ;;  %8364 = vmatmul.mubr.f32.vlgmr.msra.gmra.mrb[6].mxu1 %v5095_v57  ;;  %v9698_v57 = vpack.c.bf16 %v6677_v44, %v6673_v43  ;;  %v2102_v43 = vrot.slane %v5988_v38, %v11508_v14 }
 0xe92   :  { %9630 = vmatpush3.bf16.msra.mxu1 %v9629_v47  ;;  %8398 = vmatprep.mubr.msk.f32.mxu1 %vm9954_vm0, %v9955_v6  ;;  %v6686_v47 = vld [vmem:[%s13884_s9 + $0xf38] sm:$0xff] }
 0xe93   :  { %9631 = vmatprep.subr.bf16.mxu1 %v9953_v3  ;;  %v9700_v48 = vpack.c.bf16 %v6686_v47, %v6682_v46 }
 0xe96   :  { %9633 = vmatpush3.bf16.msra.mxu1 %v9632_v62  ;;  %v6685_v62 = vld [vmem:[%s13884_s9 + $0xf30] sm:$0xff] }
 0xe97   :  { %9634 = vmatprep.subr.bf16.mxu1 %v9953_v3 }
 0xe9a   :  { %9636 = vmatpush3.bf16.msra.mxu1 %v9635_v53  ;;  %v9702_v53 = vpack.c.bf16 %v6685_v62, %v6681_v49 }
 0xe9b   :  { %9637 = vmatprep.subr.bf16.mxu1 %v9953_v3 }
 0xe9e   :  { %9639 = vmatpush3.bf16.msra.mxu1 %v9638_v56  ;;  %v6693_v56 = vld [vmem:[%s13884_s9 + $0xf70] sm:$0xff] }
 0xe9f   :  { %9640 = vmatprep.subr.bf16.mxu1 %v9953_v3 }
 0xea2   :  { %9642 = vmatpush3.bf16.msra.mxu1 %v9641_v60  ;;  %v9706_v60 = vpack.c.bf16 %v6693_v56, %v6689_v55  ;;  %v2110_v55 = vrot.slane %v5988_v38, %v11513_v30  ;;  %v2114_v56 = vrot.slane %v5988_v38, %v11515_v31 }
 0xea3   :  { %9643 = vmatprep.subr.bf16.mxu1 %v9953_v3 }
 0xea6   :  { %9645 = vmatpush3.bf16.msra.mxu1 %v9644_v1  ;;  %v6701_v1 = vld [vmem:[%s13884_s9 + $0xfb0] sm:$0xff] }
 0xea7   :  { %9646 = vmatprep.subr.bf16.mxu1 %v9953_v3 }
 0xeaa   :  { %9648 = vmatpush3.bf16.msra.mxu1 %v9647_v5  ;;  %v9710_v5 = vpack.c.bf16 %v6701_v1, %v6697_v63 }
 0xeab   :  { %9649 = vmatprep.subr.bf16.mxu1 %v9953_v3 }
 0xeae   :  { %9651 = vmatpush3.bf16.msra.mxu1 %v9650_v8  ;;  %v6709_v8 = vld [vmem:[%s13884_s9 + $0xff0] sm:$0xff] }
 0xeaf   :  { %v9714_v9 = vpack.c.bf16 %v6709_v8, %v6705_v7 }
 0xeb1   :  { %8399 = vmatmul.mubr.f32.vlgmr.msra.gmra.mrb[14].mxu1 %v5093_v41  ;;  %v6678_v41 = vld [vmem:[%s13884_s9 + $0xef8] sm:$0xff] }
 0xeb2   :  { %v9696_v42 = vpack.c.bf16 %v6678_v41, %v6674_v40  ;;  %v2096_v40 = vpop.permute.xlu1 %2095  ;;  %v5989_v41 = vld [vmem:[%s13883_s8 + $0x1c] sm:$0xf] }
 0xeb3   :  { %v2121_v59 = vmul.f32 %v2110_v55, %v2096_v40  ;;  %v2141_v1 = vrot.slane %v5989_v41, %v11515_v31 }
 0xf64   :  { %v5184_v21 = vpop.f32.mrb[6].mxu1 }
 0xf65   :  { %v13685_v25 = vadd.f32 %v5816_v18, %v5184_v21  ;;  %v8365_v27 = vpop.f32.mrb[7].mxu1  ;;  %v5526_v18 = vld [vmem:[%s13885_s10 + $0x28] sm:$0xff]  ;;  %v5528_v21 = vld [vmem:[%s13885_s10 + $0x38] sm:$0xff] }
 0xf66   :  { %v9723_v19 = vpack.c.bf16 %v5526_v18, %v5525_v17  ;;  %v9726_v22 = vpack.c.bf16 %v5528_v21, %v5527_v20 }
 0xf67   :  { %v5188_v29 = vmax.f32 %v13685_v25, 0.0  ;;  %v5530_v25 = vld [vmem:[%s13885_s10 + $0x48] sm:$0xff] }
 0xf68   :  { %v9729_v27 = vpack.c.bf16 %v5530_v25, %v5529_v24 }
 0xf69   :  { %5412 = vmatmul.mubr.f32.vlgmr.msra.gmra.mrb[28].mxu0 %v5188_v29 }
 0xf6a   :  { %9687 = vmatpush1.bf16.msra.mxu0 %v9686_v28  ;;  %5482 = vmatprep.mubr.f32.mxu0 %v9955_v6  ;;  %v5531_v28 = vld [vmem:[%s13885_s10 + $0x50] sm:$0xff] }
 0xf6b   :  { %9689 = vmatprep.subr.bf16.mxu0 %v9688_v32 }
 0xf6e   :  { %9691 = vmatpush1.bf16.msra.mxu0 %v9690_v45  ;;  %v5536_v45 = vld [vmem:[%s13885_s10 + $0x78] sm:$0xff] }
 0xf6f   :  { %9693 = vmatprep.subr.bf16.mxu0 %v9692_v37  ;;  %v9738_v37 = vpack.c.bf16 %v5536_v45, %v5535_v36 }
 0xf72   :  { %9695 = vmatpush1.bf16.msra.mxu0 %v9694_v50  ;;  %v2120_v50 = vmul.f32 %v2106_v39, %v2096_v40 }
 0xf73   :  { %9697 = vmatprep.subr.bf16.mxu0 %v9696_v42  ;;  %v2133_v42 = vrot.slane %v5989_v41, %v11487_v0  ;;  %v5968_v0 = vld [vmem:[%s13881_s6 + $0xf] ss:$0 sm:$0xff] }
 0xf75   :  { %v2147_v46 = vadd.f32 %v2133_v42, %v2120_v50 }
 0xf76   :  { %9699 = vmatpush1.bf16.msra.mxu0 %v9698_v57  ;;  %v2119_v57 = vmul.f32 %v2102_v43, %v2096_v40 }
 0xf77   :  { %9701 = vmatprep.subr.bf16.mxu0 %v9700_v48  ;;  %v2129_v48 = vrot.slane %v5989_v41, %v11508_v14 }
 0xf79   :  { %v2146_v62 = vadd.f32 %v2129_v48, %v2119_v57  ;;  %v6718_v57 = vld [vmem:[%s13888_s13] ss:$0 sm:$0xff] }
 0xf7a   :  { %9703 = vmatpush1.bf16.msra.mxu0 %v9702_v53 }
 0xf7b   :  { %9705 = vmatprep.subr.bf16.mxu0 %v9704_v54 }
 0xf7e   :  { %9707 = vmatpush1.bf16.msra.mxu0 %v9706_v60  ;;  %v2137_v60 = vrot.slane %v5989_v41, %v11513_v30 }
 0xf7f   :  { %9709 = vmatprep.subr.bf16.mxu0 %v9708_v61  ;;  %v2122_v61 = vmul.f32 %v2114_v56, %v2096_v40 }
 0xf81   :  { %v2149_v8 = vadd.f32 %v2141_v1, %v2122_v61 }
 0xf82   :  { %9711 = vmatpush1.bf16.msra.mxu0 %v9710_v5 }
 0xf83   :  { %9713 = vmatprep.subr.bf16.mxu0 %v9712_v16  ;;  %v2148_v16 = vadd.f32 %v2137_v60, %v2121_v59 }
 0xf84   :  { %v13767_v10 = vpop.f32.mrb[14].mxu1 }
 0xf85   :  { %v8400_v11 = vpop.f32.mrb[15].mxu1  ;;  %v9755_v58 = vadd.f32 %v5968_v0, %v13767_v10 }
 0xf86   :  { %9715 = vmatpush1.bf16.msra.mxu0 %v9714_v9 }
 0xf87   :  { %9716 = vmatprep.subr.bf16.mxu0 %v9953_v3  ;;  %v5277_v63 = vmax.f32 %v9755_v58, 0.0 }
 0xf89   :  { %5483 = vmatmul.mubr.f32.vlgmr.msra.gmra.mrb[30].mxu0 %v5188_v29  ;;  %v5532_v29 = vld [vmem:[%s13885_s10 + $0x58] sm:$0xff] }
 0xf8a   :  { %8433 = vmatprep.mubr.msk.f32.mxu0 %vm9954_vm0, %v9955_v6  ;;  %9718 = vmatpush3.bf16.msra.mxu0 %v9717_v13  ;;  %v5524_v6 = vld [vmem:[%s13885_s10 + $0x18] sm:$0xff]  ;;  %v9732_v32 = vpack.c.bf16 %v5532_v29, %v5531_v28 }
 0xf8b   :  { %9719 = vmatprep.subr.bf16.mxu0 %v9953_v3  ;;  %v9720_v26 = vpack.c.bf16 %v5524_v6, %v5523_v15 }
 0xf8e   :  { %9721 = vmatpush3.bf16.msra.mxu0 %v9720_v26 }
 0xf8f   :  { %9722 = vmatprep.subr.bf16.mxu0 %v9953_v3 }
 0xf92   :  { %9724 = vmatpush3.bf16.msra.mxu0 %v9723_v19  ;;  %v6716_v19 = vld [vmem:[%s13886_s11] ss:$0 sm:$0xff] }
 0xf93   :  { %9725 = vmatprep.subr.bf16.mxu0 %v9953_v3 }
 0xf96   :  { %9727 = vmatpush3.bf16.msra.mxu0 %v9726_v22 }
 0xf97   :  { %9728 = vmatprep.subr.bf16.mxu0 %v9953_v3 }
 0xf9a   :  { %9730 = vmatpush3.bf16.msra.mxu0 %v9729_v27 }
 0xf9b   :  { %9731 = vmatprep.subr.bf16.mxu0 %v9953_v3 }
 0xf9e   :  { %9733 = vmatpush3.bf16.msra.mxu0 %v9732_v32 }
 0xf9f   :  { %9734 = vmatprep.subr.bf16.mxu0 %v9953_v3 }
 0xfa2   :  { %9736 = vmatpush3.bf16.msra.mxu0 %v9735_v35 }
 0xfa3   :  { %9737 = vmatprep.subr.bf16.mxu0 %v9953_v3 }
 0xfa6   :  { %9739 = vmatpush3.bf16.msra.mxu0 %v9738_v37 }
0x103c   :  { %v5413_v44 = vpop.f32.mrb[28].mxu0 }
0x103d   :  { %v5415_v3 = vpop.f32.mrb[29].mxu0  ;;  %v5489_v51 = vadd.f32 %v5413_v44, %v2146_v62 }
0x103e   :  { %v5490_v47 = vadd.f32 %v5415_v3, %v2147_v46  ;;  %v6717_v3 = vld [vmem:[%s13887_s12] ss:$0 sm:$0xff] }
0x103f   :  { %v6711_v52 = vmul.f32 -1.442695, %v5489_v51 }
0x1040   :  { %v6712_v49 = vmul.f32 -1.442695, %v5490_v47 }
0x1042   :  { %9907 = vpow2.f32 %v6712_v49 }
0x1043   :  { %9909 = vpow2.f32 %v6711_v52 }
0x104c   :  { %v9908_v53 = vpop.eup %9907 }
0x104d   :  { %v5502_v54 = vadd.f32 1.0, %v9908_v53  ;;  %v9910_v14 = vpop.eup %9909 }
0x104e   :  { %v5496_v4 = vadd.f32 1.0, %v9910_v14 }
0x104f   :  { %9911 = vrcp.f32 %v5502_v54 }
0x1050   :  { %9913 = vrcp.f32 %v5496_v4 }
0x1059   :  { %v9912_v2 = vpop.eup %9911 }
0x105a   :  { %v5512_v5 = vmul.f32 %v9912_v2, %v5277_v63  ;;  %v9914_v23 = vpop.eup %9913 }
0x105c   :  { %v5484_v7 = vpop.f32.mrb[30].mxu0 }
0x105d   :  { %v5491_v9 = vadd.f32 %v5484_v7, %v2148_v16  ;;  %v5486_v11 = vpop.f32.mrb[31].mxu0 }
0x105e   :  { %v5492_v12 = vadd.f32 %v5486_v11, %v2149_v8 }
0x105f   :  { %9915 = vtanh.f32 %v5491_v9 }
0x1060   :  { %v6713_v10 = vmul.f32 -1.442695, %v5492_v12 }
0x1062   :  { %9917 = vpow2.f32 %v6713_v10 }
0x1069   :  { %v9916_v13 = vpop.eup %9915 }
0x106a   :  { %v5513_v30 = vmul.f32 %v9916_v13, %v9914_v23 }
0x106c   :  { %v9918_v15 = vpop.eup %9917  ;;  %v5514_v6 = vadd.f32 %v5513_v30, %v5512_v5 }
0x106d   :  { %v5509_v26 = vadd.f32 1.0, %v9918_v15 }
0x106e   :  { %9919 = vtanh.f32 %v5514_v6  ;;  %6715 = vst [vmem:[%s13890_s15 + $0x38] sm:$0xff] %v5514_v6 }
0x106f   :  { %9921 = vrcp.f32 %v5509_v26 }
0x1078   :  { %v9920_v31 = vpop.eup %9919 }
0x1079   :  { %v9922_v17 = vpop.eup %9921 }
0x107a   :  { %v5516_v18 = vmul.f32 %v9922_v17, %v9920_v31 }
0x107c   :  { %6714 = vst [vmem:[%s13889_s14 + $0x38] sm:$0xff] %v5516_v18  ;;  %8434 = vmatmul.mubr.f32.vlgmr.msra.gmra.mrb[32].mxu0 %v5516_v18 }
0x114f   :  { %v5610_v20 = vpop.f32.mrb[32].mxu0 }
0x1150   :  { %v5611_v21 = vadd.f32 %v6716_v19, %v5610_v20  ;;  %v8435_v22 = vpop.f32.mrb[33].mxu0 }
0x1152   :  { %v5614_v24 = vmax.f32 %v5611_v21, 0.0 }
0x1154   :  { %v5616_v25 = vsel %vm5615_vm1, %v5614_v24, 0.0 }
0x1155   :  { %v5617_v27 = vrot.slane %v5616_v25, 4 }
0x1157   :  { %v5618_v28 = vadd.f32 %v5617_v27, %v5616_v25 }
0x1159   :  { %v5619_v29 = vrot.slane %v5618_v28, 2 }
0x115b   :  { %v5620_v32 = vadd.f32 %v5619_v29, %v5618_v28 }
0x115d   :  { %v5621_v33 = vrot.slane %v5620_v32, 1 }
0x115f   :  { %v5622_v34 = vadd.f32 %v5621_v33, %v5620_v32 }
0x1161   :  { %v5624_v35 = vmul.f32 0.125, %v5622_v34 }
0x1163   :  { %v5625_v36 = vsub.f32 %v5614_v24, %v5624_v35 }
0x1165   :  { %v5626_v45 = vmul.f32 %v5625_v36, %v5625_v36 }
0x1167   :  { %v5627_v37 = vsel %vm5615_vm1, %v5626_v45, 0.0 }
0x1168   :  { %v5628_v38 = vrot.slane %v5627_v37, 4 }
0x116a   :  { %v5629_v39 = vadd.f32 %v5628_v38, %v5627_v37 }
0x116c   :  { %v5630_v40 = vrot.slane %v5629_v39, 2 }
0x116e   :  { %v5631_v41 = vadd.f32 %v5630_v40, %v5629_v39 }
0x1170   :  { %v5632_v50 = vrot.slane %v5631_v41, 1 }
0x1172   :  { %v5633_v42 = vadd.f32 %v5632_v50, %v5631_v41 }
0x1174   :  { %v5634_v43 = vmul.f32 0.125, %v5633_v42 }
0x1176   :  { %v5635_v44 = vadd.f32 1e-05, %v5634_v43 }
0x1178   :  { %9923 = vrsqrt.f32 %v5635_v44 }
0x1182   :  { %v9924_v46 = vpop.eup %9923 }
0x1183   :  { %v5637_v47 = vmul.f32 %v9924_v46, %v5625_v36 }
0x1185   :  { %v5645_v48 = vmul.f32 %v6717_v3, %v5637_v47 }
0x1187   :  { %v5653_v49 = vadd.f32 %v6718_v57, %v5645_v48 }
0x1189   :  { %v6719_v62 = vmul.f32 -1.442695, %v5653_v49 }
0x118b   :  { %9925 = vpow2.f32 %v6719_v62 }
0x1195   :  { %v9926_v51 = vpop.eup %9925 }
0x1196   :  { %v5657_v52 = vadd.f32 1.0, %v9926_v51 }
0x1198   :  { %9927 = vrcp.f32 %v5657_v52 }
0x11a2   :  { %v9928_v53 = vpop.eup %9927 }
0x11a3   :  { %5660 = vst.msk [vmem:[#allocation4] sm:$0xff] %vm5615_vm1, %v9928_v53 }
0x11a4   :  { %9940 = shalt.err (!%p9937_p4)
}
0x11a5   :  { %s9941_s2 = scalar_lea.hbm %s13891_s16, 128 }
0x11a6   :  { %p9942_p5 = scmp.ne.s32.totalorder %s13891_s16, %s9941_s2  ;;  %p9945_p6 = scmp.lt.u32.totalorder %s9941_s2, %s13891_s16 }
0x11a8   :  { %p9947_p7 = pnand %p9945_p6, %p9942_p5 }
0x11aa   :  { %9950 = shalt.err (!%p9947_p7)
}
0x11ab   :  { %5674 = dma.vmem_to_hbm [thread:$0]  %s5672_s26, 128, %s13891_s16, [#allocation5]  }
0x11ac   :  { %9951 = dma.done.wait [#allocation5], 128  }
0x11ad   :  { %9952 = vsyncadd [#allocation5], 4294967168 }
0x11ae   :  { %5682 = vsyncpa [#allocation5], 1 }

</bundles_post_ra>
